<compile_context>
chip_gen: v6e
topology: v6e:2x2x1
jax: 0.10.0
libtpu: 0.0.40
codegen_flags: <defaults>
</compile_context>

<pallas_src>
import functools

import numpy as np
import jax
import jax.numpy as jnp
from jax.experimental import pallas as pl
from jax.experimental.pallas import tpu as pltpu


def encoder_kernel(x_ref,
                   wqkv_ref, bqkv_ref,
                   wo_ref, bo_ref,
                   bn1_scale_ref, bn1_shift_ref,
                   w1_ref, b1_ref, w2_ref, b2_ref,
                   bn2_scale_ref, bn2_shift_ref,
                   o_ref, *, h, q, v):
    TB, Kseq, D = x_ref.shape
    QH = h * q
    VH = h * v
    bf16 = jnp.bfloat16
    f32 = jnp.float32

    x = x_ref[...]                               # (TB, K, D), f32
    xf = x.reshape(TB * Kseq, D)                 # flatten rows for tall matmuls

    # --- Fused Q|K|V projection: one MXU pass, bf16 inputs, f32 accumulate ---
    qkv = jnp.dot(xf.astype(bf16), wqkv_ref[...],
                  preferred_element_type=f32) + bqkv_ref[...]

    # original repo scales scores by sqrt(seq_len) (not sqrt(d_k)); fold into Q.
    # Static Python constant so the kernel and the pure-JAX reference round
    # identically.
    inv_sqrt_k = 1.0 / float(np.sqrt(Kseq))
    Q = qkv[:, :QH] * inv_sqrt_k
    Km = qkv[:, QH:2 * QH]
    V = qkv[:, 2 * QH:]

    Q3 = Q.reshape(TB, Kseq, QH).astype(bf16)
    K3 = Km.reshape(TB, Kseq, QH).astype(bf16)
    V3 = V.reshape(TB, Kseq, VH).astype(bf16)

    # --- Multi-head attention: static head loop, batched over the batch tile -
    heads = []
    for hd in range(h):
        qh = Q3[:, :, hd * q:(hd + 1) * q]       # (TB, K, q)
        kh = K3[:, :, hd * q:(hd + 1) * q]
        vh = V3[:, :, hd * v:(hd + 1) * v]
        # contract on last dims -> no explicit transpose of kh
        s = jnp.einsum("bkq,blq->bkl", qh, kh, preferred_element_type=f32)
        s = s - jnp.max(s, axis=-1, keepdims=True)
        p = jnp.exp(s)
        # exact softmax normalization (denominator is (TB, K, 1): negligible
        # cost, and keeps the kernel numerically identical to the reference).
        p = p / jnp.sum(p, axis=-1, keepdims=True)
        heads.append(jnp.einsum("bkl,blv->bkv", p.astype(bf16), vh,
                                preferred_element_type=f32))
    attn = jnp.concatenate(heads, axis=-1).reshape(TB * Kseq, VH)

    mha = jnp.dot(attn.astype(bf16), wo_ref[...],
                  preferred_element_type=f32) + bo_ref[...]

    # dropout: identity (eval mode)
    # --- Residual + BatchNorm1d (eval: per-channel affine), f32 element-wise --
    x1 = (mha + xf) * bn1_scale_ref[...] + bn1_shift_ref[...]

    # --- Position-wise Feed Forward -------------------------------------------
    hid = jnp.dot(x1.astype(bf16), w1_ref[...],
                  preferred_element_type=f32) + b1_ref[...]
    hid = jnp.maximum(hid, 0.0)
    ff = jnp.dot(hid.astype(bf16), w2_ref[...],
                 preferred_element_type=f32) + b2_ref[...]

    # --- Residual + BatchNorm1d (eval) ----------------------------------------
    x2 = (ff + x1) * bn2_scale_ref[...] + bn2_shift_ref[...]
    o_ref[...] = x2.reshape(TB, Kseq, D)


def _pick_batch_tile(B, K, target_rows=256):
    """Largest divisor of B with tile_rows = TB*K not exceeding ~target_rows."""
    want = max(1, target_rows // max(K, 1))
    best = 1
    for tb in range(1, B + 1):
        if B % tb == 0 and tb <= want:
            best = tb
    return best


def encoder_pallas(x, params, *, h, q, v, batch_tile=None):
    B, K, D = x.shape
    QH, VH = h * q, h * v
    d_ff = params["w1"].shape[1]

    TB = batch_tile if batch_tile is not None else _pick_batch_tile(B, K)
    assert B % TB == 0, "batch_tile must divide the batch size"

    bf16 = jnp.bfloat16
    # Fuse Q|K|V weights/biases outside the kernel; cast matmul weights to bf16
    # (halves weight DMA bytes / VMEM; accumulation stays f32 in-kernel).
    wqkv = jnp.concatenate([params["wq"], params["wk"], params["wv"]],
                           axis=1).astype(bf16)
    bqkv = jnp.concatenate([params["bq"], params["bk"], params["bv"]],
                           axis=1).astype(jnp.float32)
    wo = params["wo"].astype(bf16)
    w1 = params["w1"].astype(bf16)
    w2 = params["w2"].astype(bf16)

    def const_spec(arr):
        shape = arr.shape
        return pl.BlockSpec(shape, lambda b: tuple(0 for _ in shape))

    in_specs = [
        pl.BlockSpec((TB, K, D), lambda b: (b, 0, 0)),     # x
        const_spec(wqkv), const_spec(bqkv),                # fused QKV
        const_spec(wo), const_spec(params["bo"]),          # Wo, bo
        const_spec(params["bn1_scale"]), const_spec(params["bn1_shift"]),
        const_spec(w1), const_spec(params["b1"]),          # W1, b1
        const_spec(w2), const_spec(params["b2"]),          # W2, b2
        const_spec(params["bn2_scale"]), const_spec(params["bn2_shift"]),
    ]

    # Advisory cost estimate for XLA scheduling around the custom call.
    flops = (2 * B * K * D * (2 * QH + VH)      # fused QKV projection
             + 2 * B * h * K * K * (q + v)      # attention scores + P@V
             + 2 * B * K * VH * D               # output projection
             + 4 * B * K * D * d_ff)            # feed-forward
    transcendentals = B * h * K * K             # softmax exp
    bytes_accessed = 2 * B * K * D * 4          # x in + out (f32)
    for a in (wqkv, wo, w1, w2):
        bytes_accessed += a.size * 2            # bf16 weights
    bytes_accessed += bqkv.size * 4
    for name in ("bo", "b1", "b2", "bn1_scale", "bn1_shift",
                 "bn2_scale", "bn2_shift"):
        bytes_accessed += params[name].size * 4

    kernel = functools.partial(encoder_kernel, h=h, q=q, v=v)
    return pl.pallas_call(
        kernel,
        out_shape=jax.ShapeDtypeStruct((B, K, D), jnp.float32),
        grid=(B // TB,),
        in_specs=in_specs,
        out_specs=pl.BlockSpec((TB, K, D), lambda b: (b, 0, 0)),
        compiler_params=pltpu.CompilerParams(
            dimension_semantics=("parallel",),
            vmem_limit_bytes=32 * 1024 * 1024),
        cost_estimate=pl.CostEstimate(flops=int(flops),
                                      transcendentals=int(transcendentals),
                                      bytes_accessed=int(bytes_accessed)),
    )(x.astype(jnp.float32), wqkv, bqkv, wo, params["bo"],
      params["bn1_scale"], params["bn1_shift"],
      w1, params["b1"], w2, params["b2"],
      params["bn2_scale"], params["bn2_shift"])


def encoder_reference(x, params, *, h, q, v):
    """Pure-JAX reference mirroring the PyTorch forward (eval mode), using the
    same bf16 MXU-input / f32-accumulate convention as the kernel (op-for-op
    identical math so the comparison isolates kernel bugs, not dtype policy)."""
    B, K, D = x.shape
    QH, VH = h * q, h * v
    f32 = jnp.float32
    bf16 = jnp.bfloat16

    def mm(a, b):
        return jnp.dot(a.astype(bf16), b.astype(bf16), preferred_element_type=f32)

    wqkv = jnp.concatenate([params["wq"], params["wk"], params["wv"]], axis=1)
    bqkv = jnp.concatenate([params["bq"], params["bk"], params["bv"]], axis=1)

    xf = x.reshape(B * K, D)
    qkv = mm(xf, wqkv) + bqkv
    inv_sqrt_k = 1.0 / float(np.sqrt(K))        # repo scales by sqrt(seq_len)
    Q = qkv[:, :QH] * inv_sqrt_k
    Km = qkv[:, QH:2 * QH]
    V = qkv[:, 2 * QH:]
    Q3 = Q.reshape(B, K, QH).astype(bf16)
    K3 = Km.reshape(B, K, QH).astype(bf16)
    V3 = V.reshape(B, K, VH).astype(bf16)

    heads = []
    for hd in range(h):
        qh = Q3[..., hd * q:(hd + 1) * q]
        kh = K3[..., hd * q:(hd + 1) * q]
        vh = V3[..., hd * v:(hd + 1) * v]
        s = jnp.einsum("bkq,blq->bkl", qh, kh, preferred_element_type=f32)
        s = s - jnp.max(s, axis=-1, keepdims=True)
        p = jnp.exp(s)
        p = p / jnp.sum(p, axis=-1, keepdims=True)
        heads.append(jnp.einsum("bkl,blv->bkv", p.astype(bf16), vh,
                                preferred_element_type=f32))
    attn = jnp.concatenate(heads, axis=-1).reshape(B * K, VH)

    mha = mm(attn, params["wo"]) + params["bo"]
    x1 = (mha + xf) * params["bn1_scale"] + params["bn1_shift"]
    hid = jnp.maximum(mm(x1, params["w1"]) + params["b1"], 0.0)
    ff = mm(hid, params["w2"]) + params["b2"]
    out = (ff + x1) * params["bn2_scale"] + params["bn2_shift"]
    return out.reshape(B, K, D)


def make_params(key, d_model, q, v, h, d_ff):
    """Deterministic synthetic parameters (PyTorch Linear weights pre-transposed)."""
    ks = jax.random.split(key, 16)
    QH, VH = q * h, v * h
    eps = 1e-5

    def lin(kw, kb, d_in, d_out):
        w = 0.1 * jax.random.normal(kw, (d_in, d_out), jnp.float32)
        b = 0.1 * jax.random.normal(kb, (1, d_out), jnp.float32)
        return w, b

    wq, bq = lin(ks[0], ks[1], d_model, QH)
    wk, bk = lin(ks[2], ks[3], d_model, QH)
    wv, bv = lin(ks[4], ks[5], d_model, VH)
    wo, bo = lin(ks[6], ks[7], VH, d_model)
    w1, b1 = lin(ks[8], ks[9], d_model, d_ff)
    w2, b2 = lin(ks[10], ks[11], d_ff, d_model)

    def bn(kg, kb):
        gamma = 1.0 + 0.1 * jax.random.normal(kg, (1, d_model), jnp.float32)
        beta = 0.1 * jax.random.normal(kb, (1, d_model), jnp.float32)
        mean = 0.05 * jax.random.normal(kg, (1, d_model), jnp.float32)
        var = 0.5 + jnp.abs(0.5 * jax.random.normal(kb, (1, d_model), jnp.float32))
        scale = gamma / jnp.sqrt(var + eps)
        shift = beta - mean * scale
        return scale, shift

    bn1_scale, bn1_shift = bn(ks[12], ks[13])
    bn2_scale, bn2_shift = bn(ks[14], ks[15])

    return dict(wq=wq, bq=bq, wk=wk, bk=bk, wv=wv, bv=bv, wo=wo, bo=bo,
                w1=w1, b1=b1, w2=w2, b2=b2,
                bn1_scale=bn1_scale, bn1_shift=bn1_shift,
                bn2_scale=bn2_scale, bn2_shift=bn2_shift)


if __name__ == "__main__":
    # Lane-dense small config: d_model = h*q = h*v = 128, d_ff = 256.
    B, K, d_model = 16, 32, 128
    q = v = 16
    h = 8
    d_ff = 256   # PFF default is 2048 in the original repo; shrunk for the test

    key = jax.random.PRNGKey(0)
    kx, kp = jax.random.split(key)
    x = jax.random.normal(kx, (B, K, d_model), jnp.float32)
    params = make_params(kp, d_model, q, v, h, d_ff)

    # batch_tile=4 -> 4 grid steps of 128 rows each (pipelining + megacore demo)
    out = encoder_pallas(x, params, h=h, q=q, v=v, batch_tile=4)
    out = jax.block_until_ready(out)

    ref = encoder_reference(x, params, h=h, q=q, v=v)
    np.testing.assert_allclose(np.asarray(out), np.asarray(ref),
                               rtol=2e-2, atol=2e-2)

    print("KERNEL_OK")
</pallas_src>

<mosaic_0001>
module attributes {stable_mosaic.version = 11 : i64} {
  func.func @encoder_kernel(%arg0: i32, %arg1: memref<4x32x128xf32, #tpu.memory_space<vmem>>, %arg2: memref<128x384xbf16, #tpu.memory_space<vmem>>, %arg3: memref<1x384xf32, #tpu.memory_space<vmem>>, %arg4: memref<128x128xbf16, #tpu.memory_space<vmem>>, %arg5: memref<1x128xf32, #tpu.memory_space<vmem>>, %arg6: memref<1x128xf32, #tpu.memory_space<vmem>>, %arg7: memref<1x128xf32, #tpu.memory_space<vmem>>, %arg8: memref<128x256xbf16, #tpu.memory_space<vmem>>, %arg9: memref<1x256xf32, #tpu.memory_space<vmem>>, %arg10: memref<256x128xbf16, #tpu.memory_space<vmem>>, %arg11: memref<1x128xf32, #tpu.memory_space<vmem>>, %arg12: memref<1x128xf32, #tpu.memory_space<vmem>>, %arg13: memref<1x128xf32, #tpu.memory_space<vmem>>, %arg14: memref<4x32x128xf32, #tpu.memory_space<vmem>>) attributes {dimension_semantics = [#tpu.dimension_semantics<parallel>], iteration_bounds = array<i64: 4>, scalar_prefetch = 0 : i64, scratch_operands = 0 : i64, tpu.core_type = #tpu.core_type<tc>, window_params = [{transform_indices = @transform_0, window_bounds = array<i64: 4, 32, 128>}, {pipeline_mode = #tpu.pipeline_mode<synchronous>, transform_indices = @transform_1, window_bounds = array<i64: 128, 384>}, {pipeline_mode = #tpu.pipeline_mode<synchronous>, transform_indices = @transform_2, window_bounds = array<i64: 1, 384>}, {pipeline_mode = #tpu.pipeline_mode<synchronous>, transform_indices = @transform_3, window_bounds = array<i64: 128, 128>}, {pipeline_mode = #tpu.pipeline_mode<synchronous>, transform_indices = @transform_4, window_bounds = array<i64: 1, 128>}, {pipeline_mode = #tpu.pipeline_mode<synchronous>, transform_indices = @transform_5, window_bounds = array<i64: 1, 128>}, {pipeline_mode = #tpu.pipeline_mode<synchronous>, transform_indices = @transform_6, window_bounds = array<i64: 1, 128>}, {pipeline_mode = #tpu.pipeline_mode<synchronous>, transform_indices = @transform_7, window_bounds = array<i64: 128, 256>}, {pipeline_mode = #tpu.pipeline_mode<synchronous>, transform_indices = @transform_8, window_bounds = array<i64: 1, 256>}, {pipeline_mode = #tpu.pipeline_mode<synchronous>, transform_indices = @transform_9, window_bounds = array<i64: 256, 128>}, {pipeline_mode = #tpu.pipeline_mode<synchronous>, transform_indices = @transform_10, window_bounds = array<i64: 1, 128>}, {pipeline_mode = #tpu.pipeline_mode<synchronous>, transform_indices = @transform_11, window_bounds = array<i64: 1, 128>}, {pipeline_mode = #tpu.pipeline_mode<synchronous>, transform_indices = @transform_12, window_bounds = array<i64: 1, 128>}, {transform_indices = @transform_13, window_bounds = array<i64: 4, 32, 128>}]} {
    %c0 = arith.constant 0 : index
    %c0_0 = arith.constant 0 : index
    %c0_1 = arith.constant 0 : index
    %0 = vector.load %arg1[%c0, %c0_0, %c0_1] : memref<4x32x128xf32, #tpu.memory_space<vmem>>, vector<4x32x128xf32>
    %1 = vector.shape_cast %0 : vector<4x32x128xf32> to vector<128x128xf32>
    %2 = arith.truncf %1 : vector<128x128xf32> to vector<128x128xbf16>
    %c0_2 = arith.constant 0 : index
    %c0_3 = arith.constant 0 : index
    %3 = vector.load %arg2[%c0_2, %c0_3] : memref<128x384xbf16, #tpu.memory_space<vmem>>, vector<128x384xbf16>
    %cst = arith.constant dense<0.000000e+00> : vector<128x384xf32>
    %4 = tpu.matmul %2, %3, %cst {dimension_numbers = #tpu.dot_dimension_numbers<[1], [0], [0], [1], [0, 0, 1, 1], [], []>} : vector<128x128xbf16>, vector<128x384xbf16>, vector<128x384xf32> -> vector<128x384xf32>
    %c0_4 = arith.constant 0 : index
    %c0_5 = arith.constant 0 : index
    %5 = vector.load %arg3[%c0_4, %c0_5] : memref<1x384xf32, #tpu.memory_space<vmem>>, vector<1x384xf32>
    %6 = vector.broadcast %5 : vector<1x384xf32> to vector<128x384xf32>
    %7 = arith.addf %4, %6 : vector<128x384xf32>
    %8 = vector.extract_strided_slice %7 {offsets = [0, 0], sizes = [128, 128], strides = [1, 1]} : vector<128x384xf32> to vector<128x128xf32>
    %cst_6 = arith.constant 0.176776692 : f32
    %9 = vector.broadcast %cst_6 : f32 to vector<128x128xf32>
    %10 = arith.mulf %8, %9 : vector<128x128xf32>
    %11 = vector.extract_strided_slice %7 {offsets = [0, 128], sizes = [128, 128], strides = [1, 1]} : vector<128x384xf32> to vector<128x128xf32>
    %12 = vector.extract_strided_slice %7 {offsets = [0, 256], sizes = [128, 128], strides = [1, 1]} : vector<128x384xf32> to vector<128x128xf32>
    %13 = vector.shape_cast %10 : vector<128x128xf32> to vector<4x32x128xf32>
    %14 = arith.truncf %13 : vector<4x32x128xf32> to vector<4x32x128xbf16>
    %15 = vector.shape_cast %11 : vector<128x128xf32> to vector<4x32x128xf32>
    %16 = arith.truncf %15 : vector<4x32x128xf32> to vector<4x32x128xbf16>
    %17 = vector.shape_cast %12 : vector<128x128xf32> to vector<4x32x128xf32>
    %18 = arith.truncf %17 : vector<4x32x128xf32> to vector<4x32x128xbf16>
    %19 = vector.extract_strided_slice %14 {offsets = [0, 0, 0], sizes = [4, 32, 16], strides = [1, 1, 1]} : vector<4x32x128xbf16> to vector<4x32x16xbf16>
    %20 = vector.extract_strided_slice %16 {offsets = [0, 0, 0], sizes = [4, 32, 16], strides = [1, 1, 1]} : vector<4x32x128xbf16> to vector<4x32x16xbf16>
    %21 = vector.extract_strided_slice %18 {offsets = [0, 0, 0], sizes = [4, 32, 16], strides = [1, 1, 1]} : vector<4x32x128xbf16> to vector<4x32x16xbf16>
    "tpu.trace_start"() <{level = 10 : i32, message = "bkq,blq->bkl"}> : () -> ()
    %cst_7 = arith.constant dense<0.000000e+00> : vector<4x32x32xf32>
    %22 = tpu.matmul %19, %20, %cst_7 {dimension_numbers = #tpu.dot_dimension_numbers<[2], [2], [1], [1], [0, 0, 0, 1, 1, 1], [0], [0]>} : vector<4x32x16xbf16>, vector<4x32x16xbf16>, vector<4x32x32xf32> -> vector<4x32x32xf32>
    "tpu.trace_stop"() : () -> ()
    %cst_8 = arith.constant dense<0xFF800000> : vector<4x32xf32>
    %23 = vector.multi_reduction <maximumf>, %22, %cst_8 [2] : vector<4x32x32xf32> to vector<4x32xf32>
    %24 = vector.shape_cast %23 : vector<4x32xf32> to vector<4x32x1xf32>
    %25 = vector.broadcast %24 : vector<4x32x1xf32> to vector<4x32x32xf32>
    %26 = arith.subf %22, %25 : vector<4x32x32xf32>
    %27 = math.exp %26 : vector<4x32x32xf32>
    %cst_9 = arith.constant dense<0.000000e+00> : vector<4x32xf32>
    %28 = vector.multi_reduction <add>, %27, %cst_9 [2] : vector<4x32x32xf32> to vector<4x32xf32>
    %29 = vector.shape_cast %28 : vector<4x32xf32> to vector<4x32x1xf32>
    %30 = vector.broadcast %29 : vector<4x32x1xf32> to vector<4x32x32xf32>
    %31 = arith.divf %27, %30 : vector<4x32x32xf32>
    %32 = arith.truncf %31 : vector<4x32x32xf32> to vector<4x32x32xbf16>
    "tpu.trace_start"() <{level = 10 : i32, message = "bkl,blv->bkv"}> : () -> ()
    %cst_10 = arith.constant dense<0.000000e+00> : vector<4x32x16xf32>
    %33 = tpu.matmul %32, %21, %cst_10 {dimension_numbers = #tpu.dot_dimension_numbers<[2], [1], [1], [2], [0, 0, 0, 1, 1, 2], [0], [0]>} : vector<4x32x32xbf16>, vector<4x32x16xbf16>, vector<4x32x16xf32> -> vector<4x32x16xf32>
    "tpu.trace_stop"() : () -> ()
    %34 = vector.extract_strided_slice %14 {offsets = [0, 0, 16], sizes = [4, 32, 16], strides = [1, 1, 1]} : vector<4x32x128xbf16> to vector<4x32x16xbf16>
    %35 = vector.extract_strided_slice %16 {offsets = [0, 0, 16], sizes = [4, 32, 16], strides = [1, 1, 1]} : vector<4x32x128xbf16> to vector<4x32x16xbf16>
    %36 = vector.extract_strided_slice %18 {offsets = [0, 0, 16], sizes = [4, 32, 16], strides = [1, 1, 1]} : vector<4x32x128xbf16> to vector<4x32x16xbf16>
    "tpu.trace_start"() <{level = 10 : i32, message = "bkq,blq->bkl"}> : () -> ()
    %cst_11 = arith.constant dense<0.000000e+00> : vector<4x32x32xf32>
    %37 = tpu.matmul %34, %35, %cst_11 {dimension_numbers = #tpu.dot_dimension_numbers<[2], [2], [1], [1], [0, 0, 0, 1, 1, 1], [0], [0]>} : vector<4x32x16xbf16>, vector<4x32x16xbf16>, vector<4x32x32xf32> -> vector<4x32x32xf32>
    "tpu.trace_stop"() : () -> ()
    %cst_12 = arith.constant dense<0xFF800000> : vector<4x32xf32>
    %38 = vector.multi_reduction <maximumf>, %37, %cst_12 [2] : vector<4x32x32xf32> to vector<4x32xf32>
    %39 = vector.shape_cast %38 : vector<4x32xf32> to vector<4x32x1xf32>
    %40 = vector.broadcast %39 : vector<4x32x1xf32> to vector<4x32x32xf32>
    %41 = arith.subf %37, %40 : vector<4x32x32xf32>
    %42 = math.exp %41 : vector<4x32x32xf32>
    %cst_13 = arith.constant dense<0.000000e+00> : vector<4x32xf32>
    %43 = vector.multi_reduction <add>, %42, %cst_13 [2] : vector<4x32x32xf32> to vector<4x32xf32>
    %44 = vector.shape_cast %43 : vector<4x32xf32> to vector<4x32x1xf32>
    %45 = vector.broadcast %44 : vector<4x32x1xf32> to vector<4x32x32xf32>
    %46 = arith.divf %42, %45 : vector<4x32x32xf32>
    %47 = arith.truncf %46 : vector<4x32x32xf32> to vector<4x32x32xbf16>
    "tpu.trace_start"() <{level = 10 : i32, message = "bkl,blv->bkv"}> : () -> ()
    %cst_14 = arith.constant dense<0.000000e+00> : vector<4x32x16xf32>
    %48 = tpu.matmul %47, %36, %cst_14 {dimension_numbers = #tpu.dot_dimension_numbers<[2], [1], [1], [2], [0, 0, 0, 1, 1, 2], [0], [0]>} : vector<4x32x32xbf16>, vector<4x32x16xbf16>, vector<4x32x16xf32> -> vector<4x32x16xf32>
    "tpu.trace_stop"() : () -> ()
    %49 = vector.extract_strided_slice %14 {offsets = [0, 0, 32], sizes = [4, 32, 16], strides = [1, 1, 1]} : vector<4x32x128xbf16> to vector<4x32x16xbf16>
    %50 = vector.extract_strided_slice %16 {offsets = [0, 0, 32], sizes = [4, 32, 16], strides = [1, 1, 1]} : vector<4x32x128xbf16> to vector<4x32x16xbf16>
    %51 = vector.extract_strided_slice %18 {offsets = [0, 0, 32], sizes = [4, 32, 16], strides = [1, 1, 1]} : vector<4x32x128xbf16> to vector<4x32x16xbf16>
    "tpu.trace_start"() <{level = 10 : i32, message = "bkq,blq->bkl"}> : () -> ()
    %cst_15 = arith.constant dense<0.000000e+00> : vector<4x32x32xf32>
    %52 = tpu.matmul %49, %50, %cst_15 {dimension_numbers = #tpu.dot_dimension_numbers<[2], [2], [1], [1], [0, 0, 0, 1, 1, 1], [0], [0]>} : vector<4x32x16xbf16>, vector<4x32x16xbf16>, vector<4x32x32xf32> -> vector<4x32x32xf32>
    "tpu.trace_stop"() : () -> ()
    %cst_16 = arith.constant dense<0xFF800000> : vector<4x32xf32>
    %53 = vector.multi_reduction <maximumf>, %52, %cst_16 [2] : vector<4x32x32xf32> to vector<4x32xf32>
    %54 = vector.shape_cast %53 : vector<4x32xf32> to vector<4x32x1xf32>
    %55 = vector.broadcast %54 : vector<4x32x1xf32> to vector<4x32x32xf32>
    %56 = arith.subf %52, %55 : vector<4x32x32xf32>
    %57 = math.exp %56 : vector<4x32x32xf32>
    %cst_17 = arith.constant dense<0.000000e+00> : vector<4x32xf32>
    %58 = vector.multi_reduction <add>, %57, %cst_17 [2] : vector<4x32x32xf32> to vector<4x32xf32>
    %59 = vector.shape_cast %58 : vector<4x32xf32> to vector<4x32x1xf32>
    %60 = vector.broadcast %59 : vector<4x32x1xf32> to vector<4x32x32xf32>
    %61 = arith.divf %57, %60 : vector<4x32x32xf32>
    %62 = arith.truncf %61 : vector<4x32x32xf32> to vector<4x32x32xbf16>
    "tpu.trace_start"() <{level = 10 : i32, message = "bkl,blv->bkv"}> : () -> ()
    %cst_18 = arith.constant dense<0.000000e+00> : vector<4x32x16xf32>
    %63 = tpu.matmul %62, %51, %cst_18 {dimension_numbers = #tpu.dot_dimension_numbers<[2], [1], [1], [2], [0, 0, 0, 1, 1, 2], [0], [0]>} : vector<4x32x32xbf16>, vector<4x32x16xbf16>, vector<4x32x16xf32> -> vector<4x32x16xf32>
    "tpu.trace_stop"() : () -> ()
    %64 = vector.extract_strided_slice %14 {offsets = [0, 0, 48], sizes = [4, 32, 16], strides = [1, 1, 1]} : vector<4x32x128xbf16> to vector<4x32x16xbf16>
    %65 = vector.extract_strided_slice %16 {offsets = [0, 0, 48], sizes = [4, 32, 16], strides = [1, 1, 1]} : vector<4x32x128xbf16> to vector<4x32x16xbf16>
    %66 = vector.extract_strided_slice %18 {offsets = [0, 0, 48], sizes = [4, 32, 16], strides = [1, 1, 1]} : vector<4x32x128xbf16> to vector<4x32x16xbf16>
    "tpu.trace_start"() <{level = 10 : i32, message = "bkq,blq->bkl"}> : () -> ()
    %cst_19 = arith.constant dense<0.000000e+00> : vector<4x32x32xf32>
    %67 = tpu.matmul %64, %65, %cst_19 {dimension_numbers = #tpu.dot_dimension_numbers<[2], [2], [1], [1], [0, 0, 0, 1, 1, 1], [0], [0]>} : vector<4x32x16xbf16>, vector<4x32x16xbf16>, vector<4x32x32xf32> -> vector<4x32x32xf32>
    "tpu.trace_stop"() : () -> ()
    %cst_20 = arith.constant dense<0xFF800000> : vector<4x32xf32>
    %68 = vector.multi_reduction <maximumf>, %67, %cst_20 [2] : vector<4x32x32xf32> to vector<4x32xf32>
    %69 = vector.shape_cast %68 : vector<4x32xf32> to vector<4x32x1xf32>
    %70 = vector.broadcast %69 : vector<4x32x1xf32> to vector<4x32x32xf32>
    %71 = arith.subf %67, %70 : vector<4x32x32xf32>
    %72 = math.exp %71 : vector<4x32x32xf32>
    %cst_21 = arith.constant dense<0.000000e+00> : vector<4x32xf32>
    %73 = vector.multi_reduction <add>, %72, %cst_21 [2] : vector<4x32x32xf32> to vector<4x32xf32>
    %74 = vector.shape_cast %73 : vector<4x32xf32> to vector<4x32x1xf32>
    %75 = vector.broadcast %74 : vector<4x32x1xf32> to vector<4x32x32xf32>
    %76 = arith.divf %72, %75 : vector<4x32x32xf32>
    %77 = arith.truncf %76 : vector<4x32x32xf32> to vector<4x32x32xbf16>
    "tpu.trace_start"() <{level = 10 : i32, message = "bkl,blv->bkv"}> : () -> ()
    %cst_22 = arith.constant dense<0.000000e+00> : vector<4x32x16xf32>
    %78 = tpu.matmul %77, %66, %cst_22 {dimension_numbers = #tpu.dot_dimension_numbers<[2], [1], [1], [2], [0, 0, 0, 1, 1, 2], [0], [0]>} : vector<4x32x32xbf16>, vector<4x32x16xbf16>, vector<4x32x16xf32> -> vector<4x32x16xf32>
    "tpu.trace_stop"() : () -> ()
    %79 = vector.extract_strided_slice %14 {offsets = [0, 0, 64], sizes = [4, 32, 16], strides = [1, 1, 1]} : vector<4x32x128xbf16> to vector<4x32x16xbf16>
    %80 = vector.extract_strided_slice %16 {offsets = [0, 0, 64], sizes = [4, 32, 16], strides = [1, 1, 1]} : vector<4x32x128xbf16> to vector<4x32x16xbf16>
    %81 = vector.extract_strided_slice %18 {offsets = [0, 0, 64], sizes = [4, 32, 16], strides = [1, 1, 1]} : vector<4x32x128xbf16> to vector<4x32x16xbf16>
    "tpu.trace_start"() <{level = 10 : i32, message = "bkq,blq->bkl"}> : () -> ()
    %cst_23 = arith.constant dense<0.000000e+00> : vector<4x32x32xf32>
    %82 = tpu.matmul %79, %80, %cst_23 {dimension_numbers = #tpu.dot_dimension_numbers<[2], [2], [1], [1], [0, 0, 0, 1, 1, 1], [0], [0]>} : vector<4x32x16xbf16>, vector<4x32x16xbf16>, vector<4x32x32xf32> -> vector<4x32x32xf32>
    "tpu.trace_stop"() : () -> ()
    %cst_24 = arith.constant dense<0xFF800000> : vector<4x32xf32>
    %83 = vector.multi_reduction <maximumf>, %82, %cst_24 [2] : vector<4x32x32xf32> to vector<4x32xf32>
    %84 = vector.shape_cast %83 : vector<4x32xf32> to vector<4x32x1xf32>
    %85 = vector.broadcast %84 : vector<4x32x1xf32> to vector<4x32x32xf32>
    %86 = arith.subf %82, %85 : vector<4x32x32xf32>
    %87 = math.exp %86 : vector<4x32x32xf32>
    %cst_25 = arith.constant dense<0.000000e+00> : vector<4x32xf32>
    %88 = vector.multi_reduction <add>, %87, %cst_25 [2] : vector<4x32x32xf32> to vector<4x32xf32>
    %89 = vector.shape_cast %88 : vector<4x32xf32> to vector<4x32x1xf32>
    %90 = vector.broadcast %89 : vector<4x32x1xf32> to vector<4x32x32xf32>
    %91 = arith.divf %87, %90 : vector<4x32x32xf32>
    %92 = arith.truncf %91 : vector<4x32x32xf32> to vector<4x32x32xbf16>
    "tpu.trace_start"() <{level = 10 : i32, message = "bkl,blv->bkv"}> : () -> ()
    %cst_26 = arith.constant dense<0.000000e+00> : vector<4x32x16xf32>
    %93 = tpu.matmul %92, %81, %cst_26 {dimension_numbers = #tpu.dot_dimension_numbers<[2], [1], [1], [2], [0, 0, 0, 1, 1, 2], [0], [0]>} : vector<4x32x32xbf16>, vector<4x32x16xbf16>, vector<4x32x16xf32> -> vector<4x32x16xf32>
    "tpu.trace_stop"() : () -> ()
    %94 = vector.extract_strided_slice %14 {offsets = [0, 0, 80], sizes = [4, 32, 16], strides = [1, 1, 1]} : vector<4x32x128xbf16> to vector<4x32x16xbf16>
    %95 = vector.extract_strided_slice %16 {offsets = [0, 0, 80], sizes = [4, 32, 16], strides = [1, 1, 1]} : vector<4x32x128xbf16> to vector<4x32x16xbf16>
    %96 = vector.extract_strided_slice %18 {offsets = [0, 0, 80], sizes = [4, 32, 16], strides = [1, 1, 1]} : vector<4x32x128xbf16> to vector<4x32x16xbf16>
    "tpu.trace_start"() <{level = 10 : i32, message = "bkq,blq->bkl"}> : () -> ()
    %cst_27 = arith.constant dense<0.000000e+00> : vector<4x32x32xf32>
    %97 = tpu.matmul %94, %95, %cst_27 {dimension_numbers = #tpu.dot_dimension_numbers<[2], [2], [1], [1], [0, 0, 0, 1, 1, 1], [0], [0]>} : vector<4x32x16xbf16>, vector<4x32x16xbf16>, vector<4x32x32xf32> -> vector<4x32x32xf32>
    "tpu.trace_stop"() : () -> ()
    %cst_28 = arith.constant dense<0xFF800000> : vector<4x32xf32>
    %98 = vector.multi_reduction <maximumf>, %97, %cst_28 [2] : vector<4x32x32xf32> to vector<4x32xf32>
    %99 = vector.shape_cast %98 : vector<4x32xf32> to vector<4x32x1xf32>
    %100 = vector.broadcast %99 : vector<4x32x1xf32> to vector<4x32x32xf32>
    %101 = arith.subf %97, %100 : vector<4x32x32xf32>
    %102 = math.exp %101 : vector<4x32x32xf32>
    %cst_29 = arith.constant dense<0.000000e+00> : vector<4x32xf32>
    %103 = vector.multi_reduction <add>, %102, %cst_29 [2] : vector<4x32x32xf32> to vector<4x32xf32>
    %104 = vector.shape_cast %103 : vector<4x32xf32> to vector<4x32x1xf32>
    %105 = vector.broadcast %104 : vector<4x32x1xf32> to vector<4x32x32xf32>
    %106 = arith.divf %102, %105 : vector<4x32x32xf32>
    %107 = arith.truncf %106 : vector<4x32x32xf32> to vector<4x32x32xbf16>
    "tpu.trace_start"() <{level = 10 : i32, message = "bkl,blv->bkv"}> : () -> ()
    %cst_30 = arith.constant dense<0.000000e+00> : vector<4x32x16xf32>
    %108 = tpu.matmul %107, %96, %cst_30 {dimension_numbers = #tpu.dot_dimension_numbers<[2], [1], [1], [2], [0, 0, 0, 1, 1, 2], [0], [0]>} : vector<4x32x32xbf16>, vector<4x32x16xbf16>, vector<4x32x16xf32> -> vector<4x32x16xf32>
    "tpu.trace_stop"() : () -> ()
    %109 = vector.extract_strided_slice %14 {offsets = [0, 0, 96], sizes = [4, 32, 16], strides = [1, 1, 1]} : vector<4x32x128xbf16> to vector<4x32x16xbf16>
    %110 = vector.extract_strided_slice %16 {offsets = [0, 0, 96], sizes = [4, 32, 16], strides = [1, 1, 1]} : vector<4x32x128xbf16> to vector<4x32x16xbf16>
    %111 = vector.extract_strided_slice %18 {offsets = [0, 0, 96], sizes = [4, 32, 16], strides = [1, 1, 1]} : vector<4x32x128xbf16> to vector<4x32x16xbf16>
    "tpu.trace_start"() <{level = 10 : i32, message = "bkq,blq->bkl"}> : () -> ()
    %cst_31 = arith.constant dense<0.000000e+00> : vector<4x32x32xf32>
    %112 = tpu.matmul %109, %110, %cst_31 {dimension_numbers = #tpu.dot_dimension_numbers<[2], [2], [1], [1], [0, 0, 0, 1, 1, 1], [0], [0]>} : vector<4x32x16xbf16>, vector<4x32x16xbf16>, vector<4x32x32xf32> -> vector<4x32x32xf32>
    "tpu.trace_stop"() : () -> ()
    %cst_32 = arith.constant dense<0xFF800000> : vector<4x32xf32>
    %113 = vector.multi_reduction <maximumf>, %112, %cst_32 [2] : vector<4x32x32xf32> to vector<4x32xf32>
    %114 = vector.shape_cast %113 : vector<4x32xf32> to vector<4x32x1xf32>
    %115 = vector.broadcast %114 : vector<4x32x1xf32> to vector<4x32x32xf32>
    %116 = arith.subf %112, %115 : vector<4x32x32xf32>
    %117 = math.exp %116 : vector<4x32x32xf32>
    %cst_33 = arith.constant dense<0.000000e+00> : vector<4x32xf32>
    %118 = vector.multi_reduction <add>, %117, %cst_33 [2] : vector<4x32x32xf32> to vector<4x32xf32>
    %119 = vector.shape_cast %118 : vector<4x32xf32> to vector<4x32x1xf32>
    %120 = vector.broadcast %119 : vector<4x32x1xf32> to vector<4x32x32xf32>
    %121 = arith.divf %117, %120 : vector<4x32x32xf32>
    %122 = arith.truncf %121 : vector<4x32x32xf32> to vector<4x32x32xbf16>
    "tpu.trace_start"() <{level = 10 : i32, message = "bkl,blv->bkv"}> : () -> ()
    %cst_34 = arith.constant dense<0.000000e+00> : vector<4x32x16xf32>
    %123 = tpu.matmul %122, %111, %cst_34 {dimension_numbers = #tpu.dot_dimension_numbers<[2], [1], [1], [2], [0, 0, 0, 1, 1, 2], [0], [0]>} : vector<4x32x32xbf16>, vector<4x32x16xbf16>, vector<4x32x16xf32> -> vector<4x32x16xf32>
    "tpu.trace_stop"() : () -> ()
    %124 = vector.extract_strided_slice %14 {offsets = [0, 0, 112], sizes = [4, 32, 16], strides = [1, 1, 1]} : vector<4x32x128xbf16> to vector<4x32x16xbf16>
    %125 = vector.extract_strided_slice %16 {offsets = [0, 0, 112], sizes = [4, 32, 16], strides = [1, 1, 1]} : vector<4x32x128xbf16> to vector<4x32x16xbf16>
    %126 = vector.extract_strided_slice %18 {offsets = [0, 0, 112], sizes = [4, 32, 16], strides = [1, 1, 1]} : vector<4x32x128xbf16> to vector<4x32x16xbf16>
    "tpu.trace_start"() <{level = 10 : i32, message = "bkq,blq->bkl"}> : () -> ()
    %cst_35 = arith.constant dense<0.000000e+00> : vector<4x32x32xf32>
    %127 = tpu.matmul %124, %125, %cst_35 {dimension_numbers = #tpu.dot_dimension_numbers<[2], [2], [1], [1], [0, 0, 0, 1, 1, 1], [0], [0]>} : vector<4x32x16xbf16>, vector<4x32x16xbf16>, vector<4x32x32xf32> -> vector<4x32x32xf32>
    "tpu.trace_stop"() : () -> ()
    %cst_36 = arith.constant dense<0xFF800000> : vector<4x32xf32>
    %128 = vector.multi_reduction <maximumf>, %127, %cst_36 [2] : vector<4x32x32xf32> to vector<4x32xf32>
    %129 = vector.shape_cast %128 : vector<4x32xf32> to vector<4x32x1xf32>
    %130 = vector.broadcast %129 : vector<4x32x1xf32> to vector<4x32x32xf32>
    %131 = arith.subf %127, %130 : vector<4x32x32xf32>
    %132 = math.exp %131 : vector<4x32x32xf32>
    %cst_37 = arith.constant dense<0.000000e+00> : vector<4x32xf32>
    %133 = vector.multi_reduction <add>, %132, %cst_37 [2] : vector<4x32x32xf32> to vector<4x32xf32>
    %134 = vector.shape_cast %133 : vector<4x32xf32> to vector<4x32x1xf32>
    %135 = vector.broadcast %134 : vector<4x32x1xf32> to vector<4x32x32xf32>
    %136 = arith.divf %132, %135 : vector<4x32x32xf32>
    %137 = arith.truncf %136 : vector<4x32x32xf32> to vector<4x32x32xbf16>
    "tpu.trace_start"() <{level = 10 : i32, message = "bkl,blv->bkv"}> : () -> ()
    %cst_38 = arith.constant dense<0.000000e+00> : vector<4x32x16xf32>
    %138 = tpu.matmul %137, %126, %cst_38 {dimension_numbers = #tpu.dot_dimension_numbers<[2], [1], [1], [2], [0, 0, 0, 1, 1, 2], [0], [0]>} : vector<4x32x32xbf16>, vector<4x32x16xbf16>, vector<4x32x16xf32> -> vector<4x32x16xf32>
    "tpu.trace_stop"() : () -> ()
    %139 = tpu.concatenate %33, %48, %63, %78, %93, %108, %123, %138 in 2 : vector<4x32x16xf32>, vector<4x32x16xf32>, vector<4x32x16xf32>, vector<4x32x16xf32>, vector<4x32x16xf32>, vector<4x32x16xf32>, vector<4x32x16xf32>, vector<4x32x16xf32> -> vector<4x32x128xf32>
    %140 = vector.shape_cast %139 : vector<4x32x128xf32> to vector<128x128xf32>
    %141 = arith.truncf %140 : vector<128x128xf32> to vector<128x128xbf16>
    %c0_39 = arith.constant 0 : index
    %c0_40 = arith.constant 0 : index
    %142 = vector.load %arg4[%c0_39, %c0_40] : memref<128x128xbf16, #tpu.memory_space<vmem>>, vector<128x128xbf16>
    %cst_41 = arith.constant dense<0.000000e+00> : vector<128x128xf32>
    %143 = tpu.matmul %141, %142, %cst_41 {dimension_numbers = #tpu.dot_dimension_numbers<[1], [0], [0], [1], [0, 0, 1, 1], [], []>} : vector<128x128xbf16>, vector<128x128xbf16>, vector<128x128xf32> -> vector<128x128xf32>
    %c0_42 = arith.constant 0 : index
    %c0_43 = arith.constant 0 : index
    %144 = vector.load %arg5[%c0_42, %c0_43] : memref<1x128xf32, #tpu.memory_space<vmem>>, vector<1x128xf32>
    %145 = vector.broadcast %144 : vector<1x128xf32> to vector<128x128xf32>
    %146 = arith.addf %143, %145 : vector<128x128xf32>
    %147 = arith.addf %146, %1 : vector<128x128xf32>
    %c0_44 = arith.constant 0 : index
    %c0_45 = arith.constant 0 : index
    %148 = vector.load %arg6[%c0_44, %c0_45] : memref<1x128xf32, #tpu.memory_space<vmem>>, vector<1x128xf32>
    %149 = vector.broadcast %148 : vector<1x128xf32> to vector<128x128xf32>
    %150 = arith.mulf %147, %149 : vector<128x128xf32>
    %c0_46 = arith.constant 0 : index
    %c0_47 = arith.constant 0 : index
    %151 = vector.load %arg7[%c0_46, %c0_47] : memref<1x128xf32, #tpu.memory_space<vmem>>, vector<1x128xf32>
    %152 = vector.broadcast %151 : vector<1x128xf32> to vector<128x128xf32>
    %153 = arith.addf %150, %152 : vector<128x128xf32>
    %154 = arith.truncf %153 : vector<128x128xf32> to vector<128x128xbf16>
    %c0_48 = arith.constant 0 : index
    %c0_49 = arith.constant 0 : index
    %155 = vector.load %arg8[%c0_48, %c0_49] : memref<128x256xbf16, #tpu.memory_space<vmem>>, vector<128x256xbf16>
    %cst_50 = arith.constant dense<0.000000e+00> : vector<128x256xf32>
    %156 = tpu.matmul %154, %155, %cst_50 {dimension_numbers = #tpu.dot_dimension_numbers<[1], [0], [0], [1], [0, 0, 1, 1], [], []>} : vector<128x128xbf16>, vector<128x256xbf16>, vector<128x256xf32> -> vector<128x256xf32>
    %c0_51 = arith.constant 0 : index
    %c0_52 = arith.constant 0 : index
    %157 = vector.load %arg9[%c0_51, %c0_52] : memref<1x256xf32, #tpu.memory_space<vmem>>, vector<1x256xf32>
    %158 = vector.broadcast %157 : vector<1x256xf32> to vector<128x256xf32>
    %159 = arith.addf %156, %158 : vector<128x256xf32>
    %cst_53 = arith.constant 0.000000e+00 : f32
    %160 = vector.broadcast %cst_53 : f32 to vector<128x256xf32>
    %161 = arith.maximumf %159, %160 : vector<128x256xf32>
    %162 = arith.truncf %161 : vector<128x256xf32> to vector<128x256xbf16>
    %c0_54 = arith.constant 0 : index
    %c0_55 = arith.constant 0 : index
    %163 = vector.load %arg10[%c0_54, %c0_55] : memref<256x128xbf16, #tpu.memory_space<vmem>>, vector<256x128xbf16>
    %cst_56 = arith.constant dense<0.000000e+00> : vector<128x128xf32>
    %164 = tpu.matmul %162, %163, %cst_56 {dimension_numbers = #tpu.dot_dimension_numbers<[1], [0], [0], [1], [0, 0, 1, 1], [], []>} : vector<128x256xbf16>, vector<256x128xbf16>, vector<128x128xf32> -> vector<128x128xf32>
    %c0_57 = arith.constant 0 : index
    %c0_58 = arith.constant 0 : index
    %165 = vector.load %arg11[%c0_57, %c0_58] : memref<1x128xf32, #tpu.memory_space<vmem>>, vector<1x128xf32>
    %166 = vector.broadcast %165 : vector<1x128xf32> to vector<128x128xf32>
    %167 = arith.addf %164, %166 : vector<128x128xf32>
    %168 = arith.addf %167, %153 : vector<128x128xf32>
    %c0_59 = arith.constant 0 : index
    %c0_60 = arith.constant 0 : index
    %169 = vector.load %arg12[%c0_59, %c0_60] : memref<1x128xf32, #tpu.memory_space<vmem>>, vector<1x128xf32>
    %170 = vector.broadcast %169 : vector<1x128xf32> to vector<128x128xf32>
    %171 = arith.mulf %168, %170 : vector<128x128xf32>
    %c0_61 = arith.constant 0 : index
    %c0_62 = arith.constant 0 : index
    %172 = vector.load %arg13[%c0_61, %c0_62] : memref<1x128xf32, #tpu.memory_space<vmem>>, vector<1x128xf32>
    %173 = vector.broadcast %172 : vector<1x128xf32> to vector<128x128xf32>
    %174 = arith.addf %171, %173 : vector<128x128xf32>
    %175 = vector.shape_cast %174 : vector<128x128xf32> to vector<4x32x128xf32>
    %c0_63 = arith.constant 0 : index
    %c0_64 = arith.constant 0 : index
    %c0_65 = arith.constant 0 : index
    %176 = vector.load %arg14[%c0_63, %c0_64, %c0_65] : memref<4x32x128xf32, #tpu.memory_space<vmem>>, vector<4x32x128xf32>
    tpu.vector_store %arg14[%c0_63, %c0_64, %c0_65], %175 {strides = array<i32>} : memref<4x32x128xf32, #tpu.memory_space<vmem>>, vector<4x32x128xf32>,
    return
  }
  func.func @transform_0(%arg0: i32) -> (i32, i32, i32) {
    %c0_i32 = arith.constant 0 : i32
    %c0_i32_0 = arith.constant 0 : i32
    %c0_i32_1 = arith.constant 0 : i32
    return %arg0, %c0_i32, %c0_i32_0 : i32, i32, i32
  }
  func.func @transform_1(%arg0: i32) -> (i32, i32) {
    %c0_i32 = arith.constant 0 : i32
    %c0_i32_0 = arith.constant 0 : i32
    %c0_i32_1 = arith.constant 0 : i32
    return %c0_i32, %c0_i32_0 : i32, i32
  }
  func.func @transform_2(%arg0: i32) -> (i32, i32) {
    %c0_i32 = arith.constant 0 : i32
    %c0_i32_0 = arith.constant 0 : i32
    %c0_i32_1 = arith.constant 0 : i32
    return %c0_i32, %c0_i32_0 : i32, i32
  }
  func.func @transform_3(%arg0: i32) -> (i32, i32) {
    %c0_i32 = arith.constant 0 : i32
    %c0_i32_0 = arith.constant 0 : i32
    %c0_i32_1 = arith.constant 0 : i32
    return %c0_i32, %c0_i32_0 : i32, i32
  }
  func.func @transform_4(%arg0: i32) -> (i32, i32) {
    %c0_i32 = arith.constant 0 : i32
    %c0_i32_0 = arith.constant 0 : i32
    %c0_i32_1 = arith.constant 0 : i32
    return %c0_i32, %c0_i32_0 : i32, i32
  }
  func.func @transform_5(%arg0: i32) -> (i32, i32) {
    %c0_i32 = arith.constant 0 : i32
    %c0_i32_0 = arith.constant 0 : i32
    %c0_i32_1 = arith.constant 0 : i32
    return %c0_i32, %c0_i32_0 : i32, i32
  }
  func.func @transform_6(%arg0: i32) -> (i32, i32) {
    %c0_i32 = arith.constant 0 : i32
    %c0_i32_0 = arith.constant 0 : i32
    %c0_i32_1 = arith.constant 0 : i32
    return %c0_i32, %c0_i32_0 : i32, i32
  }
  func.func @transform_7(%arg0: i32) -> (i32, i32) {
    %c0_i32 = arith.constant 0 : i32
    %c0_i32_0 = arith.constant 0 : i32
    %c0_i32_1 = arith.constant 0 : i32
    return %c0_i32, %c0_i32_0 : i32, i32
  }
  func.func @transform_8(%arg0: i32) -> (i32, i32) {
    %c0_i32 = arith.constant 0 : i32
    %c0_i32_0 = arith.constant 0 : i32
    %c0_i32_1 = arith.constant 0 : i32
    return %c0_i32, %c0_i32_0 : i32, i32
  }
  func.func @transform_9(%arg0: i32) -> (i32, i32) {
    %c0_i32 = arith.constant 0 : i32
    %c0_i32_0 = arith.constant 0 : i32
    %c0_i32_1 = arith.constant 0 : i32
    return %c0_i32, %c0_i32_0 : i32, i32
  }
  func.func @transform_10(%arg0: i32) -> (i32, i32) {
    %c0_i32 = arith.constant 0 : i32
    %c0_i32_0 = arith.constant 0 : i32
    %c0_i32_1 = arith.constant 0 : i32
    return %c0_i32, %c0_i32_0 : i32, i32
  }
  func.func @transform_11(%arg0: i32) -> (i32, i32) {
    %c0_i32 = arith.constant 0 : i32
    %c0_i32_0 = arith.constant 0 : i32
    %c0_i32_1 = arith.constant 0 : i32
    return %c0_i32, %c0_i32_0 : i32, i32
  }
  func.func @transform_12(%arg0: i32) -> (i32, i32) {
    %c0_i32 = arith.constant 0 : i32
    %c0_i32_0 = arith.constant 0 : i32
    %c0_i32_1 = arith.constant 0 : i32
    return %c0_i32, %c0_i32_0 : i32, i32
  }
  func.func @transform_13(%arg0: i32) -> (i32, i32, i32) {
    %c0_i32 = arith.constant 0 : i32
    %c0_i32_0 = arith.constant 0 : i32
    %c0_i32_1 = arith.constant 0 : i32
    return %arg0, %c0_i32, %c0_i32_0 : i32, i32, i32
  }
}

</mosaic_0001>

<bundles_post_ra>
// kernel: tpu_custom_call.1
= control target key start
LH: loop header
LB: loop body
LE: loop exit
PB: predicated region body
PF: predicated region fallthrough
CT: control target
= control target key end

     0   :  { %s14038_s0 = inlined_call_operand.hbm [shape: f32[16,32,128], index: 0, kind: input, shape index: {}]   ;;  %s14039_s1 = inlined_call_operand.hbm [shape: bf16[128,384], index: 1, kind: input, shape index: {}]   ;;  %s14040_s2 = inlined_call_operand.vmem [shape: f32[1,384], index: 2, kind: input, shape index: {}]   ;;  %s14041_s3 = inlined_call_operand.hbm [shape: bf16[128,128], index: 3, kind: input, shape index: {}]   ;;  %s14042_s4 = inlined_call_operand.vmem [shape: f32[1,128], index: 4, kind: input, shape index: {}]   ;;  %s14043_s5 = inlined_call_operand.vmem [shape: f32[1,128], index: 5, kind: input, shape index: {}]   ;;  %s14044_s6 = inlined_call_operand.vmem [shape: f32[1,128], index: 6, kind: input, shape index: {}]   ;;  %s14045_s7 = inlined_call_operand.hbm [shape: bf16[128,256], index: 7, kind: input, shape index: {}]   ;;  %s14046_s8 = inlined_call_operand.vmem [shape: f32[1,256], index: 8, kind: input, shape index: {}]   ;;  %s14047_s9 = inlined_call_operand.hbm [shape: bf16[256,128], index: 9, kind: input, shape index: {}]   ;;  %s14048_s10 = inlined_call_operand.vmem [shape: f32[1,128], index: 10, kind: input, shape index: {}]   ;;  %s14049_s11 = inlined_call_operand.vmem [shape: f32[1,128], index: 11, kind: input, shape index: {}]   ;;  %s14050_s12 = inlined_call_operand.vmem [shape: f32[1,128], index: 12, kind: input, shape index: {}]   ;;  %s14051_s13 = inlined_call_operand.hbm [shape: f32[16,32,128], index: 13, kind: output, shape index: {}]  }
   0x1   :  { %14120 = sst [smem:[#allocation106_spill]] %s14039_s1 }
   0x2   :  { %14121 = sst [smem:[#allocation107_spill]] %s14041_s3 }
   0x3   :  { %14122 = sst [smem:[#allocation108_spill]] %s14045_s7 }
   0x4   :  { %14123 = sst [smem:[#allocation109_spill]] %s14047_s9 }
   0x5   :  { %18 = vsyncpa [#allocation3], 0 }
   0x6   :  { %20 = vsyncpa [#allocation3 + $0x1], 0 }
   0x7   :  { %21 = vsyncpa [#allocation6], 0 }
   0x8   :  { %22 = vsyncpa [#allocation9], 0 }
   0x9   :  { %23 = vsyncpa [#allocation4], 0 }
   0xa   :  { %25 = vsyncpa [#allocation4 + $0x1], 0  ;;  %s10597_s25 = smov 0   ;;  %s10599_s26 = smov 0  }
   0xb   :  { %s10601_s27 = smov 0   ;;  %s10603_s28 = smov 0  }
   0xc LB: > { %14124 = sst [smem:[#allocation16_spill]] %s10499_s27  ;;  %s10618_s29 = sadd.s32 4294967295, %s10503_s28   ;;  %s10503_s28 = sphi %s10603_s28, %s14363_s28   ;;  %s10499_s27 = sphi %s10601_s27, %s14360_s27   ;;  %s10495_s26 = sphi %s10599_s26, %s14362_s26   ;;  %s10491_s25 = sphi %s10597_s25, %s14361_s25  }
   0xd   : > { %s8090_s30 = sadd.s32 4294967294, %s10503_s28   ;;  %p51_p0 = scmp.ne.s32.totalorder %s10495_s26, %s10491_s25 }
   0xe   : > { %p14052_p1 = scmp.eq.s32.totalorder %s10618_s29, 0  ;;  %p333_p3 = scmp.eq.s32.totalorder %s8090_s30, 3 }
   0xf   : > { %p8091_p5 = scmp.ge.s32.totalorder %s10503_s28, 1  ;;  %p340_p7 = scmp.lt.s32.totalorder %s10503_s28, 5 }
  0x10   : > { %p10627_p4 = por %p14052_p1, %p51_p0  ;;  %p10632_p6 = por %p333_p3, %p51_p0 }
  0x11   : > { %p10637_p8 = pnand %p8091_p5, %p340_p7  ;;  %s10505_s17 = smov [#allocation5]  }
  0x12   : > { %s14125_s14 = scalar_select %p10627_p4, 1, 0 }
  0x13   : > { %s14126_s15 = scalar_select %p10632_p6, 1, 0 }
  0x14   : > { %s14128_s16 = scalar_select %p10637_p8, 1, 0 }
  0x15   : > { %14127 = sst [smem:[#allocation17_spill]] %s14126_s15  ;;  %s352_s18 = sshll.u32 %s10505_s17, 4  ;;  %s353_s18 = int_to_ptr.vmem [resolvable:$true] %s352_s18 }
  0x16   : > { %p9328_p9 = pneg %p10637_p8  ;;  %s10506_s20 = smov [#allocation8]  }
  0x17   : > { %s390_s21 = sshll.u32 %s10506_s20, 4  ;;  %s10310_s22 = scalar_lea.vmem %s353_s18, 3072  ;;  %s391_s21 = int_to_ptr.vmem [resolvable:$true] %s390_s21 }
  0x18   : > { %p10645_p10 = pnand %p9328_p9, %p14052_p1  ;;  %p10311_p12 = scmp.ne.s32.totalorder %s353_s18, %s10310_s22 }
  0x19   : > { %p10318_p3 = scmp.lt.s32.totalorder %s353_s18, %s353_s18  ;;  %p10319_p5 = scmp.lt.s32.totalorder %s10310_s22, %s10310_s22 }
  0x1a   : > { %p10301_p11 = pneg %p10645_p10 }
  0x1b   : > { %p10320_p7 = por %p10319_p5, %p10318_p3 }
  0x1c   : > { %p10313_p13 = pnand %p10311_p12, %p10301_p11 }
  0x1e   : > { %p10314_p0 = pneg %p10313_p13 }
  0x20   : > { %p10321_p9 = pnand %p10320_p7, %p10314_p0 }
  0x22   : > { %10324 = shalt.err (!%p10321_p9)
}
  0x23   : > { %s10507_s23 = smov 192   ;;  %s10508_s24 = smov 12  }
  0x24   : > { %s14130_s1 = sld [smem:[#allocation106_spill]]  ;;  %s10336_s20 = scalar_lea.vmem %s391_s21, 2048 }
  0x25   : > { %p10337_p1 = scmp.ne.s32.totalorder %s391_s21, %s10336_s20  ;;  %p10344_p2 = scmp.lt.s32.totalorder %s391_s21, %s391_s21 }
  0x26   : > { %p10345_p6 = scmp.lt.s32.totalorder %s10336_s20, %s10336_s20 }
  0x27   : > { %p10339_p12 = pnand %p10337_p1, %p10301_p11 }
  0x28   : > { %p10346_p3 = por %p10345_p6, %p10344_p2 }
  0x29   : > { %p10340_p13 = pneg %p10339_p12 }
  0x2a   : > { %9331 = dma.hbm_to_vmem [thread:$0]  (!%p10645_p10), %s14130_s1, 3072, %s353_s18, [#allocation6], %s10507_s23, %s10507_s23, %s10508_s24  }
  0x2b   : > { %p10347_p0 = pnand %p10346_p3, %p10340_p13 }
  0x2d   : > { %10350 = shalt.err (!%p10347_p0)
}
  0x2e   : > { %s14054_s22 = smov 128   ;;  %s14055_s15 = smov 8  }
  0x2f   : > { %s14131_s7 = sld [smem:[#allocation108_spill]]  ;;  %s10511_s24 = smov [#allocation7]  }
  0x30   : > { %s368_s30 = sshll.u32 %s10511_s24, 4  ;;  %s369_s30 = int_to_ptr.vmem [resolvable:$true] %s368_s30 }
  0x31   : > { %s10362_s17 = scalar_lea.vmem %s369_s30, 1024  ;;  %p10370_p5 = scmp.lt.s32.totalorder %s369_s30, %s369_s30 }
  0x32   : > { %p10363_p1 = scmp.ne.s32.totalorder %s369_s30, %s10362_s17  ;;  %p10371_p7 = scmp.lt.s32.totalorder %s10362_s17, %s10362_s17 }
  0x34   : > { %p10365_p2 = pnand %p10363_p1, %p10301_p11  ;;  %p10372_p9 = por %p10371_p7, %p10370_p5 }
  0x35   : > { %9337 = dma.hbm_to_vmem [thread:$0]  (!%p10645_p10), %s14131_s7, 2048, %s391_s21, [#allocation9], %s14054_s22, %s14054_s22, %s14055_s15  }
  0x36   : > { %p10366_p6 = pneg %p10365_p2 }
  0x38   : > { %p10373_p12 = pnand %p10372_p9, %p10366_p6 }
  0x3a   : > { %10376 = shalt.err (!%p10373_p12)
}
  0x3b   : > { %s10512_s20 = smov 64   ;;  %s10513_s1 = smov 4  }
  0x3c   : > { %s14132_s3 = sld [smem:[#allocation107_spill]]  ;;  %s10514_s23 = smov [#allocation10]  }
  0x3d   : > { %s406_s24 = sshll.u32 %s10514_s23, 4  ;;  %s407_s24 = int_to_ptr.vmem [resolvable:$true] %s406_s24 }
  0x3e   : > { %s10388_s22 = scalar_lea.vmem %s407_s24, 2048  ;;  %p10396_p1 = scmp.lt.s32.totalorder %s407_s24, %s407_s24 }
  0x3f   : > { %p10389_p13 = scmp.ne.s32.totalorder %s407_s24, %s10388_s22  ;;  %p10397_p2 = scmp.lt.s32.totalorder %s10388_s22, %s10388_s22 }
  0x41   : > { %p10391_p3 = pnand %p10389_p13, %p10301_p11  ;;  %p10398_p6 = por %p10397_p2, %p10396_p1 }
  0x42   : > { %9334 = dma.hbm_to_vmem [thread:$0]  (!%p10645_p10), %s14132_s3, 1024, %s369_s30, [#allocation6], %s10512_s20, %s10512_s20, %s10513_s1  }
  0x43   : > { %p10392_p0 = pneg %p10391_p3 }
  0x45   : > { %p10399_p5 = pnand %p10398_p6, %p10392_p0 }
  0x47   : > { %10402 = shalt.err (!%p10399_p5)
}
  0x48   : > { %s14133_s9 = sld [smem:[#allocation109_spill]]  ;;  %s10687_s22 = sadd.s32 1, %s10503_s28  }
  0x49   : > { %s38_s30 = sadd.s32 1, %s10499_s27  ;;  %s35_s19 = ssub.s32 %s10503_s28, %s10687_s22 }
  0x4a   : > { %p45_p11 = scmp.ne.s32.totalorder %s10499_s27, %s10495_s26  ;;  %p36_p7 = scmp.eq.s32.totalorder %s35_s19, 0 }
  0x4b   : > { %p46_p9 = scmp.eq.s32.totalorder %s10503_s28, 0  ;;  %p14134_p12 = scmp.eq.s32.totalorder %s10618_s29, 3 }
  0x4c   : > { %p9353_p3 = scmp.lt.s32.totalorder %s10503_s28, 4  ;;  %s429_s18 = sand.u32 1, %s10499_s27  }
  0x4d   : > { %p10697_p13 = por %p14134_p12, %p45_p11  ;;  %p47_p0 = por %p46_p9, %p45_p11 }
  0x4e   : > { %9340 = dma.hbm_to_vmem [thread:$0]  (!%p10645_p10), %s14133_s9, 2048, %s407_s24, [#allocation9], %s10512_s20, %s10512_s20, %s10513_s1  }
  0x4f   : > { %s14135_s15 = scalar_select %p10697_p13, 1, 0 }
  0x50   : > { %s10703_s21 = scalar_select %p36_p7, %s10499_s27, %s38_s30  }
  0x51   : > { %s8097_s23 = sshll.u32 %s429_s18, 7  ;;  %s8313_s1 = sshll.u32 %s10503_s28, 11 }
  0x52   : > { %14136 = sst [smem:[#allocation18_spill]] %s10703_s21  ;;  %s10710_s17 = scalar_lea.hbm %s14038_s0, %s8313_s1 }
  0x53   : > { %s433_s19 = scalar_lea.vmem [#allocation2], %s8097_s23  ;;  %p10714_p10 = pnand %p9353_p3, %p47_p0 }
  0x54   : > { %s441_s3 = sshll.u32 %s433_s19, 4  ;;  %s10718_s30 = scalar_lea.sflag [#allocation3], %s429_s18  ;;  %s10712_s3 = int_to_ptr.vmem [resolvable:$true] %s441_s3 }
  0x55   : > { %s10403_s9 = scalar_lea.hbm %s10710_s17, 2048  ;;  %p10405_p2 = pneg %p10714_p10 }
  0x56   : > { %p10404_p1 = scmp.ne.s32.totalorder %s10710_s17, %s10403_s9  ;;  %s10408_s23 = scalar_lea.hbm %s14038_s0, 8192 }
  0x57   : > { %p10409_p11 = scmp.lt.s32.totalorder %s10710_s17, %s14038_s0  ;;  %p10410_p7 = scmp.lt.s32.totalorder %s10408_s23, %s10403_s9 }
  0x58   : > { %p10406_p6 = pnand %p10405_p2, %p10404_p1 }
  0x59   : > { %p10411_p9 = por %p10410_p7, %p10409_p11 }
  0x5a   : > { %p10407_p5 = pneg %p10406_p6 }
  0x5c   : > { %p10412_p12 = pnand %p10411_p9, %p10407_p5 }
  0x5e   : > { %10415 = shalt.err (!%p10412_p12)
}
  0x5f   : > { %s10416_s18 = scalar_lea.vmem %s10712_s3, 2048  ;;  %s10515_s21 = smov [#allocation2]  }
  0x60   : > { %p10417_p3 = scmp.ne.s32.totalorder %s10712_s3, %s10416_s18  ;;  %s10421_s27 = sshll.u32 %s10515_s21, 4  ;;  %s10422_s27 = int_to_ptr.vmem [resolvable:$false] %s10421_s27 }
  0x61   : > { %s10423_s1 = scalar_lea.vmem %s10422_s27, 4096  ;;  %p10424_p6 = scmp.lt.s32.totalorder %s10712_s3, %s10422_s27 }
  0x62   : > { %p10419_p0 = pnand %p10417_p3, %p10405_p2  ;;  %p10425_p13 = scmp.lt.s32.totalorder %s10423_s1, %s10416_s18 }
  0x64   : > { %p10420_p1 = pneg %p10419_p0  ;;  %p10426_p4 = por %p10425_p13, %p10424_p6 }
  0x66   : > { %p10427_p8 = pnand %p10426_p4, %p10420_p1 }
  0x68   : > { %10430 = shalt.err (!%p10427_p8)
}
  0x69   : > { %s14138_s9 = smov 8   ;;  %s14139_s20 = smov 128  }
  0x6a   : > { %9344 = dma.hbm_to_vmem [thread:$0]  (!%p10714_p10), %s10710_s17, 2048, %s10712_s3, %s10718_s30, %s14139_s20, %s14139_s20, %s14138_s9  }
  0x6b   : > { %p14140_p2 = scmp.ne.s32.totalorder %s14128_s16, 0 }
  0x6d   : > { %453 = sbr.rel (%p14140_p2) target bundleno = 6198 (0x1836), region = 72 }
  0x72   : > { %s10745_s21 = sand.u32 1, %s10495_s26   ;;  %p14141_p4 = scmp.ne.s32.totalorder %s14125_s14, 0 }
  0x73   : > { %s8102_s27 = sshll.u32 %s10745_s21, 7  ;;  %s456_s23 = scalar_lea.sflag [#allocation3], %s10745_s21 }
  0x74   : > { %s10751_s7 = scalar_lea.vmem [#allocation2], %s8102_s27 }
  0x75   : > { %10474 = dma.done.wait (%p14141_p4), %s456_s23, 2048  }
  0x76   : > { %10476 = vsyncadd (%p14141_p4), %s456_s23, 4294965248  ;;  %p14142_p8 = scmp.eq.s32.totalorder %s10618_s29, 0 }
  0x78   : > { %10478 = dma.done.wait (%p14142_p8), [#allocation6], 4096   ;;  %p14143_p13 = pmov %p14142_p8 }
  0x79   : > { %p14144_p10 = pmov %p14142_p8 }
  0x7a   : > { %10480 = vsyncadd (%p14143_p13), [#allocation6], 4294963200 }
  0x7b   : > { %10482 = dma.done.wait (%p14144_p10), [#allocation9], 4096   ;;  %p14145_p5 = pmov %p14142_p8 }
  0x7c   : > { %v14062_v0 = vmov 0   ;;  %v9691_v1 = vld [vmem:[#allocation5 + $0xac] ss:$12 sps:$4 sm:$0xff]   ;;  %v9693_v2 = vld [vmem:[#allocation5 + $0xa8] ss:$12 sps:$4 sm:$0xff]   ;;  %v521_v8 = vld [vmem:[%s10751_s7] sm:$0xff]  ;;  %v579_v49 = vlaneseq }
  0x7d   : > { %10484 = vsyncadd (%p14145_p5), [#allocation9], 4294963200  ;;  %754 = vmatprep.mubr.bf16.mxu0 %v14062_v0  ;;  %722 = vmatprep.subr.bf16.mxu0 %v9691_v1  ;;  %v9694_v3 = vld [vmem:[#allocation5 + $0x94] ss:$12 sps:$4 sm:$0xff]   ;;  %v9696_v4 = vld [vmem:[#allocation5 + $0x90] ss:$12 sps:$4 sm:$0xff]  }
  0x7e   : > { %723 = vmatpush1.bf16.msra.mxu0 %v9693_v2  ;;  %v9697_v5 = vld [vmem:[#allocation5 + $0x7c] ss:$12 sps:$4 sm:$0xff]   ;;  %v9699_v6 = vld [vmem:[#allocation5 + $0x78] ss:$12 sps:$4 sm:$0xff]   ;;  %v9702_v9 = vld [vmem:[#allocation5 + $0x60] ss:$12 sps:$4 sm:$0xff]  }
  0x7f   : > { %724 = vmatprep.subr.bf16.mxu0 %v9694_v3  ;;  %v9700_v7 = vld [vmem:[#allocation5 + $0x64] ss:$12 sps:$4 sm:$0xff]   ;;  %v522_v10 = vld [vmem:[%s10751_s7 + $0x8] sm:$0xff]  ;;  %v9706_v14 = vld [vmem:[#allocation5 + $0x34] ss:$12 sps:$4 sm:$0xff]   ;;  %v10789_v50 = vshrl.u32 %v579_v49, 7 }
  0x80   : > { %v9703_v11 = vld [vmem:[#allocation5 + $0x4c] ss:$12 sps:$4 sm:$0xff]   ;;  %v537_v12 = vpack.c.bf16 %v522_v10, %v521_v8  ;;  %v9705_v13 = vld [vmem:[#allocation5 + $0x48] ss:$12 sps:$4 sm:$0xff]   ;;  %v9715_v15 = vld [vmem:[#allocation5 + $0xb0] ss:$12 sps:$4 sm:$0xff]  }
  0x81   : > { %v9716_v16 = vld [vmem:[#allocation5 + $0x98] ss:$12 sps:$4 sm:$0xff]   ;;  %v9708_v17 = vld [vmem:[#allocation5 + $0x30] ss:$12 sps:$4 sm:$0xff]   ;;  %8668 = vmatprep.subr.bf16.mxu1 %v9715_v15  ;;  %v9717_v19 = vld [vmem:[#allocation5 + $0x80] ss:$12 sps:$4 sm:$0xff]  }
  0x82   : > { %725 = vmatpush1.bf16.msra.mxu0 %v9696_v4  ;;  %8684 = vmatprep.mubr.bf16.mxu1 %v537_v12  ;;  %v9709_v18 = vld [vmem:[#allocation5 + $0x1c] ss:$12 sps:$4 sm:$0xff]   ;;  %v9711_v20 = vld [vmem:[#allocation5 + $0x18] ss:$12 sps:$4 sm:$0xff]   ;;  %v9714_v23 = vld [vmem:[#allocation5] ss:$12 sps:$4 sm:$0xff]  }
  0x83   : > { %726 = vmatprep.subr.bf16.mxu0 %v9697_v5  ;;  %8669 = vmatpush3.bf16.msra.mxu1 %v9715_v15  ;;  %v9712_v21 = vld [vmem:[#allocation5 + $0x4] ss:$12 sps:$4 sm:$0xff]   ;;  %v9718_v22 = vld [vmem:[#allocation5 + $0x68] ss:$12 sps:$4 sm:$0xff]   ;;  %v524_v27 = vld [vmem:[%s10751_s7 + $0x18] sm:$0xff]  ;;  %14146 = vst [vmem:[#allocation19_spill] sm:$0xff] %v10789_v50 }
  0x84   : > { %8670 = vmatprep.subr.bf16.mxu1 %v9716_v16  ;;  %v9719_v24 = vld [vmem:[#allocation5 + $0x50] ss:$12 sps:$4 sm:$0xff]   ;;  %v9720_v25 = vld [vmem:[#allocation5 + $0x38] ss:$12 sps:$4 sm:$0xff]   ;;  %v9721_v28 = vld [vmem:[#allocation5 + $0x20] ss:$12 sps:$4 sm:$0xff]  }
  0x85   : > { %v523_v26 = vld [vmem:[%s10751_s7 + $0x10] sm:$0xff]  ;;  %v525_v31 = vld [vmem:[%s10751_s7 + $0x20] sm:$0xff]  ;;  %v526_v32 = vld [vmem:[%s10751_s7 + $0x28] sm:$0xff]  ;;  %v14060_v51 = vsub.s32 0, %v10789_v50  ;;  %vm972_vm0 = vcmask 130048   ;;  %v14061_v63 = vsub.s32 1, %v10789_v50 }
  0x86   : > { %727 = vmatpush1.bf16.msra.mxu0 %v9699_v6  ;;  %v538_v29 = vpack.c.bf16 %v524_v27, %v523_v26  ;;  %v9722_v30 = vld [vmem:[#allocation5 + $0x8] ss:$12 sps:$4 sm:$0xff]   ;;  %v539_v33 = vpack.c.bf16 %v526_v32, %v525_v31  ;;  %v528_v35 = vld [vmem:[%s10751_s7 + $0x38] sm:$0xff]  ;;  %v529_v37 = vld [vmem:[%s10751_s7 + $0x40] sm:$0xff]  ;;  %vm1217_vm1 = vcmask 261120   ;;  %s10517_s16 = smov 112  }
  0x87   : > { %728 = vmatprep.subr.bf16.mxu0 %v9700_v7  ;;  %8671 = vmatpush3.bf16.msra.mxu1 %v9716_v16  ;;  %v527_v34 = vld [vmem:[%s10751_s7 + $0x30] sm:$0xff]  ;;  %v530_v38 = vld [vmem:[%s10751_s7 + $0x48] sm:$0xff]  ;;  %v532_v41 = vld [vmem:[%s10751_s7 + $0x58] sm:$0xff]  ;;  %s10518_s17 = smov 96   ;;  %s10519_s30 = smov 80   ;;  %vm7054_vm2 = vcmask 392192  }
  0x88   : > { %8672 = vmatprep.subr.bf16.mxu1 %v9717_v19  ;;  %v540_v36 = vpack.c.bf16 %v528_v35, %v527_v34  ;;  %v541_v39 = vpack.c.bf16 %v530_v38, %v529_v37  ;;  %v531_v40 = vld [vmem:[%s10751_s7 + $0x50] sm:$0xff]  ;;  %v533_v42 = vld [vmem:[%s10751_s7 + $0x60] sm:$0xff]  ;;  %v534_v43 = vld [vmem:[%s10751_s7 + $0x68] sm:$0xff]  ;;  %s10520_s24 = smov 64   ;;  %s10521_s19 = smov 48   ;;  %vm7071_vm3 = vcmask 523264  }
  0x89   : > { %v542_v44 = vpack.c.bf16 %v532_v41, %v531_v40  ;;  %v543_v45 = vpack.c.bf16 %v534_v43, %v533_v42  ;;  %v535_v46 = vld [vmem:[%s10751_s7 + $0x70] sm:$0xff]  ;;  %v536_v47 = vld [vmem:[%s10751_s7 + $0x78] sm:$0xff]  ;;  %v10795_v52 = vld [vmem:[%s14040_s2] sm:$0x7]  ;;  %s10522_s18 = smov 32   ;;  %s10523_s1 = smov 16  }
  0x8a   : > { %729 = vmatpush1.bf16.msra.mxu0 %v9702_v9  ;;  %v544_v48 = vpack.c.bf16 %v536_v47, %v535_v46  ;;  %v10800_v53 = vrot.slane %v10795_v52, %v14060_v51  ;;  %v10812_v4 = vrot.slane %v10795_v52, %v14061_v63  ;;  %vm7088_vm4 = vcmask 654336   ;;  %s13913_s20 = scalar_lea.vmem [#allocation11], %s8102_s27  ;;  %s8315_s27 = sshll.u32 %s10618_s29, 11 }
  0x8b   : > { %730 = vmatprep.subr.bf16.mxu0 %v9703_v11  ;;  %8673 = vmatpush3.bf16.msra.mxu1 %v9717_v19  ;;  %vm7105_vm5 = vcmask 785408   ;;  %vm7122_vm6 = vcmask 916480   ;;  %s7979_s23 = sshll.u32 %s13913_s20, 4  ;;  %p14356_p7 = scmp.ne.s32.totalorder %s14135_s15, 0  ;;  %s13994_s23 = int_to_ptr.vmem [resolvable:$true] %s7979_s23 }
  0x8c   : > { %8674 = vmatprep.subr.bf16.mxu1 %v9718_v22  ;;  %s10524_s29 = smov [#allocation11]  }
  0x8e   : > { %731 = vmatpush1.bf16.msra.mxu0 %v9705_v13 }
  0x8f   : > { %732 = vmatprep.subr.bf16.mxu0 %v9706_v14  ;;  %8675 = vmatpush3.bf16.msra.mxu1 %v9718_v22 }
  0x90   : > { %8676 = vmatprep.subr.bf16.mxu1 %v9719_v24 }
  0x92   : > { %733 = vmatpush1.bf16.msra.mxu0 %v9708_v17 }
  0x93   : > { %734 = vmatprep.subr.bf16.mxu0 %v9709_v18  ;;  %8677 = vmatpush3.bf16.msra.mxu1 %v9719_v24 }
  0x94   : > { %8678 = vmatprep.subr.bf16.mxu1 %v9720_v25 }
  0x96   : > { %735 = vmatpush1.bf16.msra.mxu0 %v9711_v20 }
  0x97   : > { %736 = vmatprep.subr.bf16.mxu0 %v9712_v21  ;;  %8679 = vmatpush3.bf16.msra.mxu1 %v9720_v25 }
  0x98   : > { %8680 = vmatprep.subr.bf16.mxu1 %v9721_v28 }
  0x9a   : > { %737 = vmatpush1.bf16.msra.mxu0 %v9714_v23 }
  0x9b   : > { %8681 = vmatpush3.bf16.msra.mxu1 %v9721_v28 }
  0x9c   : > { %8682 = vmatprep.subr.bf16.mxu1 %v9722_v30 }
  0x9d   : > { %755 = vmatmul.mubr.bf16.vlgmr.msra.gmra.mxu0 %v537_v12 }
  0x9e   : > { %764 = vmatprep.mubr.bf16.mxu0 %v14062_v0 }
  0x9f   : > { %8683 = vmatpush3.bf16.msra.mxu1 %v9722_v30 }
  0xa2   : > { %8685 = vmatmul.mubr.bf16.vlgmr.msra.gmra.mxu1 %v538_v29 }
  0xa3   : > { %8688 = vmatprep.mubr.bf16.mxu1 %v539_v33 }
  0xa5   : > { %765 = vmatmul.mubr.bf16.gmra.mxu0 %v538_v29 }
  0xa6   : > { %774 = vmatprep.mubr.bf16.mxu0 %v14062_v0 }
  0xaa   : > { %8689 = vmatmul.mubr.bf16.gmra.mxu1 %v540_v36 }
  0xab   : > { %8692 = vmatprep.mubr.bf16.mxu1 %v541_v39 }
  0xad   : > { %775 = vmatmul.mubr.bf16.gmra.mxu0 %v539_v33  ;;  %v589_v33 = vsub.s32 2, %v10789_v50 }
  0xae   : > { %784 = vmatprep.mubr.bf16.mxu0 %v14062_v0 }
  0xaf   : > { %v10862_v47 = vrot.slane %v10795_v52, %v589_v33 }
  0xb2   : > { %8693 = vmatmul.mubr.bf16.gmra.mxu1 %v542_v44 }
  0xb3   : > { %8696 = vmatprep.mubr.bf16.mxu1 %v543_v45 }
  0xb5   : > { %785 = vmatmul.mubr.bf16.gmra.mxu0 %v540_v36 }
  0xb6   : > { %794 = vmatprep.mubr.bf16.mxu0 %v14062_v0 }
  0xba   : > { %8697 = vmatmul.mubr.bf16.gmra.mxu1 %v544_v48 }
  0xbd   : > { %795 = vmatmul.mubr.bf16.gmra.mxu0 %v541_v39 }
  0xbe   : > { %804 = vmatprep.mubr.bf16.mxu0 %v14062_v0 }
  0xc5   : > { %805 = vmatmul.mubr.bf16.gmra.mxu0 %v542_v44 }
  0xc6   : > { %814 = vmatprep.mubr.bf16.mxu0 %v14062_v0 }
  0xcd   : > { %815 = vmatmul.mubr.bf16.gmra.mxu0 %v543_v45 }
  0xce   : > { %824 = vmatprep.mubr.bf16.mxu0 %v14062_v0 }
  0xd5   : > { %825 = vmatmul.mubr.bf16.gmra.mxu0 %v544_v48 }
 0x15d   : > { %v756_v54 = vpop.f32.mrf.mxu0 }
 0x15e   : > { %v757_v56 = vadd.f32 %v756_v54, %v10800_v53 }
 0x15f   : > { %v758_v55 = vpop.f32.mrf.mxu0 }
 0x160   : > { %v932_v60 = vmul.f32 0.17677669, %v757_v56  ;;  %v759_v11 = vadd.f32 %v758_v55, %v10812_v4 }
 0x161   : > { %v760_v57 = vpop.f32.mrf.mxu0 }
 0x162   : > { %v761_v58 = vadd.f32 %v760_v57, %v10800_v53  ;;  %v10817_v10 = vpop.f32.mrf.mxu1 }
 0x163   : > { %v762_v59 = vpop.f32.mrf.mxu0 }
 0x164   : > { %v933_v61 = vmul.f32 0.17677669, %v761_v58  ;;  %v763_v6 = vadd.f32 %v762_v59, %v10812_v4  ;;  %v10822_v14 = vpop.f32.mrf.mxu1 }
 0x165   : > { %v766_v62 = vpop.f32.mrf.mxu0 }
 0x166   : > { %v10805_v1 = vpack.c.bf16 %v933_v61, %v932_v60  ;;  %v10824_v15 = vpack.c.bf16 %v763_v6, %v759_v11  ;;  %v10830_v18 = vpop.f32.mrf.mxu1  ;;  %v767_v27 = vadd.f32 %v766_v62, %v10800_v53 }
 0x167   : > { %v768_v2 = vpop.f32.mrf.mxu0 }
 0x168   : > { %8704 = vmatprep.mubr.msk.bf16.mxu1 %vm972_vm0, %v10805_v1  ;;  %v769_v7 = vadd.f32 %v768_v2, %v10812_v4  ;;  %v10834_v20 = vpop.f32.mrf.mxu1  ;;  %v980_v28 = vsel %vm972_vm0, %v10824_v15, 0  ;;  %v934_v37 = vmul.f32 0.17677669, %v767_v27 }
 0x169   : > { %v770_v3 = vpop.f32.mrf.mxu0 }
 0x16a   : > { %v10836_v22 = vpop.f32.mrf.mxu1  ;;  %v771_v23 = vadd.f32 %v770_v3, %v10800_v53 }
 0x16b   : > { %v772_v5 = vpop.f32.mrf.mxu0 }
 0x16c   : > { %v773_v8 = vadd.f32 %v772_v5, %v10812_v4  ;;  %v10840_v26 = vpop.f32.mrf.mxu1  ;;  %v935_v32 = vmul.f32 0.17677669, %v771_v23 }
 0x16d   : > { %v776_v9 = vpop.f32.mrf.mxu0 }
 0x16e   : > { %v10820_v12 = vpack.c.bf16 %v773_v8, %v769_v7  ;;  %v777_v29 = vadd.f32 %v776_v9, %v10800_v53  ;;  %v10846_v31 = vpop.f32.mrf.mxu1  ;;  %v10856_v44 = vpack.c.bf16 %v935_v32, %v934_v37 }
 0x16f   : > { %v778_v13 = vpop.f32.mrf.mxu0 }
 0x170   : > { %9244 = vmatprep.subr.msk.bf16.mxu1 %vm972_vm0, %v10820_v12  ;;  %v983_v16 = vsel %vm972_vm0, %v10820_v12, 0  ;;  %v10849_v36 = vpop.f32.mrf.mxu1  ;;  %v936_v41 = vmul.f32 0.17677669, %v777_v29  ;;  %v779_v45 = vadd.f32 %v778_v13, %v10812_v4 }
 0x171   : > { %v780_v17 = vpop.f32.mrf.mxu0  ;;  %8701 = vmatpush3.bf16.xpose.msra.mxu1 %v983_v16 }
 0x172   : > { %9245 = vmatprep.subr.msk.bf16.mxu1 %vm972_vm0, %v10824_v15  ;;  %v781_v24 = vadd.f32 %v780_v17, %v10800_v53  ;;  %v10854_v43 = vpop.f32.mrf.mxu1 }
 0x173   : > { %v782_v19 = vpop.f32.mrf.mxu0 }
 0x174   : > { %v937_v34 = vmul.f32 0.17677669, %v781_v24  ;;  %v783_v38 = vadd.f32 %v782_v19, %v10812_v4  ;;  %v901_v54 = vpop.f32.mrf.mxu1 }
 0x175   : > { %v786_v21 = vpop.f32.mrf.mxu0  ;;  %v902_v52 = vadd.f32 %v901_v54, %v10862_v47 }
 0x176   : > { %v10864_v48 = vpack.c.bf16 %v937_v34, %v936_v41  ;;  %v10866_v55 = vpack.c.bf16 %v783_v38, %v779_v45  ;;  %v10878_v59 = vpop.f32.mrf.mxu1  ;;  %v787_v13 = vadd.f32 %v786_v21, %v10800_v53 }
 0x177   : > { %v788_v25 = vpop.f32.mrf.mxu0 }
 0x178   : > { %v789_v39 = vadd.f32 %v788_v25, %v10812_v4  ;;  %v904_v62 = vpop.f32.mrf.mxu1  ;;  %v1041_v19 = vsel %vm972_vm0, %v10866_v55, 0 }
 0x179   : > { %v790_v30 = vpop.f32.mrf.mxu0  ;;  %8703 = vmatpush3.bf16.xpose.msra.mxu1 %v980_v28  ;;  %v905_v5 = vadd.f32 %v904_v62, %v10862_v47  ;;  %v938_v28 = vmul.f32 0.17677669, %v787_v13 }
 0x17a   : > { %v10884_v7 = vpop.f32.mrf.mxu1  ;;  %v791_v8 = vadd.f32 %v790_v30, %v10800_v53 }
 0x17b   : > { %v792_v35 = vpop.f32.mrf.mxu0  ;;  %v10889_v11 = vpack.c.bf16 %v905_v5, %v902_v52  ;;  %v881_v52 = vadd.f32 %v10830_v18, %v10862_v47  ;;  %v870_v18 = vadd.f32 %v10822_v14, %v10862_v47 }
 0x17c   : > { %v793_v40 = vadd.f32 %v792_v35, %v10812_v4  ;;  %v917_v17 = vpop.f32.mrf.mxu1  ;;  %v939_v27 = vmul.f32 0.17677669, %v791_v8 }
 0x17d   : > { %v796_v42 = vpop.f32.mrf.mxu0  ;;  %v918_v23 = vadd.f32 %v917_v17, %v10862_v47  ;;  %v873_v17 = vadd.f32 %v10834_v20, %v10862_v47 }
 0x17e   : > { %v10859_v46 = vpack.c.bf16 %v793_v40, %v789_v39  ;;  %v797_v56 = vadd.f32 %v796_v42, %v10800_v53  ;;  %v10897_v25 = vpop.f32.mrf.mxu1  ;;  %v10903_v37 = vpack.c.bf16 %v939_v27, %v938_v28 }
 0x17f   : > { %v798_v49 = vpop.f32.mrf.mxu0 }
 0x180   : > { %8705 = vmatmul.mubr.msk.bf16.vlgmr.msra.gmra.mxu1 %vm972_vm0, %v10856_v44  ;;  %9246 = vmatprep.subr.msk.bf16.mxu1 %vm972_vm0, %v10859_v46  ;;  %v1044_v57 = vsel %vm972_vm0, %v10859_v46, 0  ;;  %v940_v2 = vmul.f32 0.17677669, %v797_v56  ;;  %v920_v30 = vpop.f32.mrf.mxu1  ;;  %v799_v38 = vadd.f32 %v798_v49, %v10812_v4 }
 0x181   : > { %v800_v58 = vpop.f32.mrf.mxu0  ;;  %8709 = vmatpush3.bf16.xpose.msra.mxu1 %v1044_v57  ;;  %8712 = vmatprep.mubr.msk.bf16.mxu1 %vm972_vm0, %v10864_v48  ;;  %v921_v34 = vadd.f32 %v920_v30, %v10862_v47  ;;  %v878_v57 = vadd.f32 %v10817_v10, %v10862_v47  ;;  %v910_v30 = vadd.f32 %v10854_v43, %v10862_v47 }
 0x182   : > { %v801_v60 = vadd.f32 %v800_v58, %v10800_v53  ;;  %9247 = vmatprep.subr.msk.bf16.mxu1 %vm972_vm0, %v10866_v55 }
 0x183   : > { %v802_v61 = vpop.f32.mrf.mxu0  ;;  %v10908_v40 = vpack.c.bf16 %v921_v34, %v918_v23  ;;  %v10929_v5 = vpack.c.bf16 %v881_v52, %v878_v57  ;;  %v929_v52 = vadd.f32 %v10897_v25, %v10862_v47 }
 0x184   : > { %v941_v3 = vmul.f32 0.17677669, %v801_v60  ;;  %v803_v21 = vadd.f32 %v802_v61, %v10812_v4 }
 0x185   : > { %v806_v6 = vpop.f32.mrf.mxu0 }
 0x186   : > { %v10887_v9 = vpack.c.bf16 %v941_v3, %v940_v2  ;;  %v10910_v42 = vpack.c.bf16 %v803_v21, %v799_v38  ;;  %v807_v13 = vadd.f32 %v806_v6, %v10800_v53 }
 0x187   : > { %v808_v16 = vpop.f32.mrf.mxu0 }
 0x188   : > { %8720 = vmatprep.mubr.msk.bf16.mxu0 %vm972_vm0, %v10887_v9  ;;  %v809_v32 = vadd.f32 %v808_v16, %v10812_v4  ;;  %v1102_v16 = vsel %vm972_vm0, %v10910_v42, 0 }
 0x189   : > { %v810_v24 = vpop.f32.mrf.mxu0  ;;  %8711 = vmatpush3.bf16.xpose.msra.mxu1 %v1041_v19 }
 0x18a   : > { %v811_v2 = vadd.f32 %v810_v24, %v10800_v53  ;;  %v942_v24 = vmul.f32 0.17677669, %v807_v13 }
 0x18b   : > { %v812_v29 = vpop.f32.mrf.mxu0 }
 0x18c   : > { %v813_v33 = vadd.f32 %v812_v29, %v10812_v4  ;;  %v943_v19 = vmul.f32 0.17677669, %v811_v2  ;;  %v10944_v29 = vpack.c.bf16 %v873_v17, %v870_v18 }
 0x18d   : > { %v816_v35 = vpop.f32.mrf.mxu0 }
 0x18e   : > { %v10906_v39 = vpack.c.bf16 %v813_v33, %v809_v32  ;;  %v817_v45 = vadd.f32 %v816_v35, %v10800_v53  ;;  %v10948_v14 = vpack.c.bf16 %v943_v19, %v942_v24  ;;  %v913_v32 = vadd.f32 %v10878_v59, %v10862_v47 }
 0x18f   : > { %v818_v41 = vpop.f32.mrf.mxu0  ;;  %v897_v59 = vadd.f32 %v10846_v31, %v10862_v47  ;;  %v886_v31 = vadd.f32 %v10840_v26, %v10862_v47 }
 0x190   : > { %8713 = vmatmul.mubr.msk.bf16.vlgmr.msra.gmra.mxu1 %vm972_vm0, %v10903_v37  ;;  %9248 = vmatprep.subr.msk.bf16.mxu0 %vm972_vm0, %v10906_v39  ;;  %v1105_v54 = vsel %vm972_vm0, %v10906_v39, 0  ;;  %v944_v60 = vmul.f32 0.17677669, %v817_v45  ;;  %v819_v20 = vadd.f32 %v818_v41, %v10812_v4  ;;  %v10970_v34 = vpack.c.bf16 %v913_v32, %v910_v30 }
 0x191   : > { %v820_v56 = vpop.f32.mrf.mxu0  ;;  %8717 = vmatpush3.bf16.xpose.msra.mxu0 %v1105_v54  ;;  %v889_v54 = vadd.f32 %v10849_v36, %v10862_v47 }
 0x192   : > { %v821_v49 = vadd.f32 %v820_v56, %v10800_v53  ;;  %9249 = vmatprep.subr.msk.bf16.mxu0 %vm972_vm0, %v10910_v42 }
 0x193   : > { %v822_v58 = vpop.f32.mrf.mxu0  ;;  %v10988_v57 = vpack.c.bf16 %v889_v54, %v886_v31 }
 0x194   : > { %v945_v61 = vmul.f32 0.17677669, %v821_v49  ;;  %v823_v6 = vadd.f32 %v822_v58, %v10812_v4 }
 0x195   : > { %v826_v62 = vpop.f32.mrf.mxu0 }
 0x196   : > { %v10927_v3 = vpack.c.bf16 %v945_v61, %v944_v60  ;;  %v10955_v33 = vpack.c.bf16 %v823_v6, %v819_v20  ;;  %v827_v41 = vadd.f32 %v826_v62, %v10800_v53 }
 0x197   : > { %v828_v8 = vpop.f32.mrf.mxu0 }
 0x198   : > { %8728 = vmatprep.mubr.msk.bf16.mxu1 %vm972_vm0, %v10927_v3  ;;  %v829_v27 = vadd.f32 %v828_v8, %v10812_v4  ;;  %v946_v56 = vmul.f32 0.17677669, %v827_v41 }
 0x199   : > { %v830_v10 = vpop.f32.mrf.mxu0  ;;  %8719 = vmatpush3.bf16.xpose.msra.mxu0 %v1102_v16 }
 0x19a   : > { %8732 = vmatprep.subr.bf16.mxu0 %v10929_v5  ;;  %v831_v35 = vadd.f32 %v830_v10, %v10800_v53  ;;  %v926_v53 = vadd.f32 %v10884_v7, %v10862_v47 }
 0x19b   : > { %v832_v23 = vpop.f32.mrf.mxu0 }
 0x19c   : > { %v833_v28 = vadd.f32 %v832_v23, %v10812_v4  ;;  %v894_v4 = vadd.f32 %v10836_v22, %v10862_v47  ;;  %v1163_v22 = vsel %vm972_vm0, %v10955_v33, 0  ;;  %v947_v45 = vmul.f32 0.17677669, %v831_v35 }
 0x19d   : > { %v10997_v26 = vpack.c.bf16 %v929_v52, %v926_v53 }
 0x19e   : > { %v10951_v21 = vpack.c.bf16 %v833_v28, %v829_v27  ;;  %v10975_v38 = vpack.c.bf16 %v897_v59, %v894_v4  ;;  %v10986_v49 = vpack.c.bf16 %v947_v45, %v946_v56 }
 0x1a0   : > { %8721 = vmatmul.mubr.msk.bf16.vlgmr.msra.gmra.mxu0 %vm972_vm0, %v10948_v14  ;;  %9250 = vmatprep.subr.msk.bf16.mxu1 %vm972_vm0, %v10951_v21  ;;  %v1166_v43 = vsel %vm972_vm0, %v10951_v21, 0 }
 0x1a1   : > { %8725 = vmatpush3.bf16.xpose.msra.mxu1 %v1166_v43  ;;  %8733 = vmatpush3.bf16.msra.mxu0 %v10929_v5 }
 0x1a2   : > { %9251 = vmatprep.subr.msk.bf16.mxu1 %vm972_vm0, %v10955_v33  ;;  %8734 = vmatprep.subr.bf16.mxu0 %v10944_v29 }
 0x1a5   : > { %8735 = vmatpush3.bf16.msra.mxu0 %v10944_v29 }
 0x1a6   : > { %8748 = vmatprep.subr.bf16.mxu0 %v10970_v34 }
 0x1a9   : > { %8727 = vmatpush3.bf16.xpose.msra.mxu1 %v1163_v22 }
 0x1aa   : > { %8740 = vmatprep.subr.bf16.mxu1 %v10975_v38 }
 0x1b0   : > { %8729 = vmatmul.mubr.msk.bf16.vlgmr.msra.gmra.mxu1 %vm972_vm0, %v10986_v49 }
 0x1b1   : > { %8741 = vmatpush3.bf16.msra.mxu1 %v10975_v38 }
 0x1b2   : > { %8742 = vmatprep.subr.bf16.mxu1 %v10988_v57 }
 0x1b5   : > { %8743 = vmatpush3.bf16.msra.mxu1 %v10988_v57 }
 0x1b6   : > { %8756 = vmatprep.subr.bf16.mxu1 %v10997_v26 }
 0x240   : > { %v11002_v36 = vpop.f32.mrf.mxu1 }
 0x241   : > { %v1224_v32 = vsel %vm1217_vm1, %v11002_v36, -inf }
 0x242   : > { %v1019_v58 = vpop.f32.mrf.mxu1 }
 0x243   : > { %v1218_v28 = vsel %vm1217_vm1, %v1019_v58, -inf }
 0x244   : > { %v11004_v7 = vpop.f32.mrf.mxu1 }
 0x245   : > { %v1227_v35 = vsel %vm1217_vm1, %v11004_v7, -inf }
 0x246   : > { %v11006_v60 = vpop.f32.mrf.mxu1 }
 0x247   : > { %v1221_v43 = vsel %vm1217_vm1, %v11006_v60, -inf }
 0x250   : > { %v11008_v47 = vpop.f32.mrf.mxu1 }
 0x251   : > { %v1236_v25 = vsel %vm1217_vm1, %v11008_v47, -inf }
 0x252   : > { %1237 = vmax.xlane.f32.xlu1 %v1236_v25  ;;  %v11012_v61 = vpop.f32.mrf.mxu1 }
 0x253   : > { %v1230_v62 = vsel %vm1217_vm1, %v11012_v61, -inf }
 0x254   : > { %1231 = vmax.xlane.f32.xlu0 %v1230_v62  ;;  %v11016_v2 = vpop.f32.mrf.mxu1 }
 0x255   : > { %v1239_v8 = vsel %vm1217_vm1, %v11016_v2, -inf }
 0x256   : > { %1240 = vmax.xlane.f32.xlu1 %v1239_v8  ;;  %v11020_v13 = vpop.f32.mrf.mxu1 }
 0x257   : > { %v1233_v16 = vsel %vm1217_vm1, %v11020_v13, -inf }
 0x258   : > { %1234 = vmax.xlane.f32.xlu0 %v1233_v16 }
 0x260   : > { %v11038_v27 = vpop.f32.mrf.mxu0 }
 0x261   : > { %v1248_v22 = vsel %vm1217_vm1, %v11038_v27, -inf }
 0x262   : > { %v11043_v20 = vpop.f32.mrf.mxu0 }
 0x263   : > { %v1242_v59 = vsel %vm1217_vm1, %v11043_v20, -inf }
 0x264   : > { %v11049_v4 = vpop.f32.mrf.mxu0 }
 0x265   : > { %v1251_v31 = vsel %vm1217_vm1, %v11049_v4, -inf }
 0x266   : > { %v11055_v41 = vpop.f32.mrf.mxu0 }
 0x267   : > { %v1245_v45 = vsel %vm1217_vm1, %v11055_v41, -inf }
 0x270   : > { %v11024_v10 = vpop.f32.mrf.mxu1 }
 0x271   : > { %v1260_v24 = vsel %vm1217_vm1, %v11024_v10, -inf }
 0x272   : > { %v11026_v18 = vpop.f32.mrf.mxu1 }
 0x273   : > { %v1254_v17 = vsel %vm1217_vm1, %v11026_v18, -inf }
 0x274   : > { %1255 = vmax.xlane.f32.xlu0 %v1254_v17  ;;  %v11030_v19 = vpop.f32.mrf.mxu1 }
 0x275   : > { %v1263_v30 = vsel %vm1217_vm1, %v11030_v19, -inf }
 0x276   : > { %v11032_v23 = vpop.f32.mrf.mxu1 }
 0x277   : > { %v1257_v6 = vsel %vm1217_vm1, %v11032_v23, -inf }
 0x278   : > { %1261 = vmax.xlane.f32.xlu0 %v1260_v24  ;;  %1258 = vmax.xlane.f32.xlu1 %v1257_v6 }
 0x27c   : > { %1219 = vmax.xlane.f32.xlu0 %v1218_v28  ;;  %1264 = vmax.xlane.f32.xlu1 %v1263_v30 }
 0x280   : > { %1225 = vmax.xlane.f32.xlu0 %v1224_v32  ;;  %1222 = vmax.xlane.f32.xlu1 %v1221_v43 }
 0x284   : > { %1243 = vmax.xlane.f32.xlu0 %v1242_v59  ;;  %1228 = vmax.xlane.f32.xlu1 %v1227_v35 }
 0x288   : > { %1249 = vmax.xlane.f32.xlu0 %v1248_v22  ;;  %1246 = vmax.xlane.f32.xlu1 %v1245_v45 }
 0x28c   : > { %1252 = vmax.xlane.f32.xlu1 %v1251_v31 }
 0x2db   : > { %v1238_v56 = vpop.xlane.xlu1 %1237 }
 0x2dc   : > { %v1272_v32 = vsub.f32 %v11008_v47, %v1238_v56 }
 0x2dd   : > { %v1232_v54 = vpop.xlane.xlu0 %1231 }
 0x2de   : > { %v1294_v51 = vmul.f32 1.442695, %v1272_v32  ;;  %v1270_v63 = vsub.f32 %v11012_v61, %v1232_v54 }
 0x2df   : > { %v1241_v52 = vpop.xlane.xlu1 %1240 }
 0x2e0   : > { %v1290_v47 = vmul.f32 1.442695, %v1270_v63 }
 0x2e1   : > { %v1235_v53 = vpop.xlane.xlu0 %1234 }
 0x2fd   : > { %v1256_v25 = vpop.xlane.xlu0 %1255 }
 0x301   : > { %v1262_v62 = vpop.xlane.xlu0 %1261  ;;  %v11063_v8 = vpop.xlane.xlu1 %1258 }
 0x305   : > { %v1220_v16 = vpop.xlane.xlu0 %1219  ;;  %v11065_v17 = vpop.xlane.xlu1 %1264 }
 0x306   : > { %v1266_v24 = vsub.f32 %v1019_v58, %v1220_v16  ;;  %v1273_v16 = vsub.f32 %v11016_v2, %v1241_v52  ;;  %v1281_v32 = vsub.f32 %v11030_v19, %v11065_v17 }
 0x308   : > { %v1282_v43 = vmul.f32 1.442695, %v1266_v24  ;;  %v1296_v56 = vmul.f32 1.442695, %v1273_v16  ;;  %v1271_v24 = vsub.f32 %v11020_v13, %v1235_v53  ;;  %v1312_v19 = vmul.f32 1.442695, %v1281_v32 }
 0x309   : > { %v1226_v6 = vpop.xlane.xlu0 %1225  ;;  %v1223_v28 = vpop.xlane.xlu1 %1222 }
 0x30a   : > { %v1268_v30 = vsub.f32 %v11002_v36, %v1226_v6  ;;  %v1267_v35 = vsub.f32 %v11006_v60, %v1223_v28  ;;  %v1292_v28 = vmul.f32 1.442695, %v1271_v24 }
 0x30c   : > { %v1286_v59 = vmul.f32 1.442695, %v1268_v30  ;;  %v1284_v0 = vmul.f32 1.442695, %v1267_v35 }
 0x30d   : > { %v1244_v22 = vpop.xlane.xlu0 %1243  ;;  %v1229_v45 = vpop.xlane.xlu1 %1228 }
 0x30e   : > { %9771 = vpow2.f32 %v1286_v59  ;;  %v1269_v31 = vsub.f32 %v11004_v7, %v1229_v45  ;;  %v1274_v61 = vsub.f32 %v11043_v20, %v1244_v22  ;;  %v1279_v22 = vsub.f32 %v11032_v23, %v11063_v8 }
 0x30f   : > { %9773 = vpow2.f32 %v1282_v43 }
 0x310   : > { %v1288_v58 = vmul.f32 1.442695, %v1269_v31  ;;  %v1298_v63 = vmul.f32 1.442695, %v1274_v61  ;;  %v1308_v16 = vmul.f32 1.442695, %v1279_v22 }
 0x311   : > { %v1250_v36 = vpop.xlane.xlu0 %1249  ;;  %v1247_v6 = vpop.xlane.xlu1 %1246 }
 0x312   : > { %9775 = vpow2.f32 %v1288_v58  ;;  %v1276_v60 = vsub.f32 %v11038_v27, %v1250_v36 }
 0x313   : > { %9777 = vpow2.f32 %v1294_v51  ;;  %v1280_v51 = vsub.f32 %v11024_v10, %v1262_v62 }
 0x314   : > { %9779 = vpow2.f32 %v1284_v0  ;;  %v1302_v54 = vmul.f32 1.442695, %v1276_v60  ;;  %v1275_v0 = vsub.f32 %v11055_v41, %v1247_v6 }
 0x315   : > { %v1253_v7 = vpop.xlane.xlu1 %1252  ;;  %9781 = vpow2.f32 %v1290_v47  ;;  %v1310_v30 = vmul.f32 1.442695, %v1280_v51 }
 0x316   : > { %9783 = vpow2.f32 %v1296_v56  ;;  %v1277_v2 = vsub.f32 %v11049_v4, %v1253_v7  ;;  %v1278_v4 = vsub.f32 %v11026_v18, %v1256_v25  ;;  %v1300_v43 = vmul.f32 1.442695, %v1275_v0 }
 0x317   : > { %9785 = vpow2.f32 %v1302_v54 }
 0x318   : > { %9787 = vpow2.f32 %v1292_v28  ;;  %v1304_v20 = vmul.f32 1.442695, %v1277_v2  ;;  %v1306_v18 = vmul.f32 1.442695, %v1278_v4 }
 0x319   : > { %9789 = vpow2.f32 %v1298_v63 }
 0x31a   : > { %9791 = vpow2.f32 %v1304_v20 }
 0x31b   : > { %v11077_v52 = vpop.eup %9771  ;;  %9793 = vpow2.f32 %v1310_v30 }
 0x31c   : > { %v1320_v27 = vsel %vm1217_vm1, %v11077_v52, 0.0  ;;  %v11082_v13 = vpop.eup %9773  ;;  %9795 = vpow2.f32 %v1300_v43 }
 0x31d   : > { %1321 = vadd.xlane.f32.xlu0 %v1320_v27  ;;  %v1314_v10 = vsel %vm1217_vm1, %v11082_v13, 0.0  ;;  %9797 = vpow2.f32 %v1306_v18 }
 0x31e   : > { %9799 = vpow2.f32 %v1312_v19 }
 0x31f   : > { %v11085_v53 = vpop.eup %9775  ;;  %9801 = vpow2.f32 %v1308_v16 }
 0x320   : > { %v11090_v62 = vpop.eup %9777  ;;  %v1323_v41 = vsel %vm1217_vm1, %v11085_v53, 0.0 }
 0x321   : > { %1315 = vadd.xlane.f32.xlu0 %v1314_v10  ;;  %v11096_v59 = vpop.eup %9779  ;;  %1324 = vadd.xlane.f32.xlu1 %v1323_v41  ;;  %v1332_v25 = vsel %vm1217_vm1, %v11090_v62, 0.0 }
 0x322   : > { %v11100_v35 = vpop.eup %9781  ;;  %v1317_v17 = vsel %vm1217_vm1, %v11096_v59, 0.0 }
 0x323   : > { %v11106_v45 = vpop.eup %9783  ;;  %v1326_v31 = vsel %vm1217_vm1, %v11100_v35, 0.0 }
 0x324   : > { %v11110_v58 = vpop.eup %9785  ;;  %v1335_v23 = vsel %vm1217_vm1, %v11106_v45, 0.0 }
 0x325   : > { %1333 = vadd.xlane.f32.xlu0 %v1332_v25  ;;  %1318 = vadd.xlane.f32.xlu1 %v1317_v17  ;;  %v11114_v8 = vpop.eup %9787  ;;  %v1344_v36 = vsel %vm1217_vm1, %v11110_v58, 0.0 }
 0x326   : > { %v11118_v6 = vpop.eup %9789  ;;  %v1329_v47 = vsel %vm1217_vm1, %v11114_v8, 0.0 }
 0x327   : > { %v11122_v60 = vpop.eup %9791  ;;  %v1338_v56 = vsel %vm1217_vm1, %v11118_v6, 0.0 }
 0x328   : > { %v11126_v24 = vpop.eup %9793  ;;  %v1347_v7 = vsel %vm1217_vm1, %v11122_v60, 0.0 }
 0x329   : > { %1327 = vadd.xlane.f32.xlu0 %v1326_v31  ;;  %1336 = vadd.xlane.f32.xlu1 %v1335_v23  ;;  %v11130_v61 = vpop.eup %9795  ;;  %v1356_v54 = vsel %vm1217_vm1, %v11126_v24, 0.0 }
 0x32a   : > { %v11134_v28 = vpop.eup %9797  ;;  %v1341_v2 = vsel %vm1217_vm1, %v11130_v61, 0.0 }
 0x32b   : > { %v11138_v51 = vpop.eup %9799  ;;  %v1350_v63 = vsel %vm1217_vm1, %v11134_v28, 0.0 }
 0x32c   : > { %v1359_v27 = vsel %vm1217_vm1, %v11138_v51, 0.0  ;;  %v11144_v0 = vpop.eup %9801 }
 0x32d   : > { %1345 = vadd.xlane.f32.xlu0 %v1344_v36  ;;  %1330 = vadd.xlane.f32.xlu1 %v1329_v47  ;;  %v1353_v20 = vsel %vm1217_vm1, %v11144_v0, 0.0 }
 0x331   : > { %1339 = vadd.xlane.f32.xlu0 %v1338_v56  ;;  %1348 = vadd.xlane.f32.xlu1 %v1347_v7 }
 0x335   : > { %1357 = vadd.xlane.f32.xlu0 %v1356_v54  ;;  %1342 = vadd.xlane.f32.xlu1 %v1341_v2 }
 0x339   : > { %1351 = vadd.xlane.f32.xlu0 %v1350_v63  ;;  %1360 = vadd.xlane.f32.xlu1 %v1359_v27 }
 0x33d   : > { %1354 = vadd.xlane.f32.xlu1 %v1353_v20 }
 0x34e   : > { %1630 = vrot.lane.b32.xlu1 %v10824_v15, %s10517_s16 }
 0x34f   : > { %1632 = vrot.lane.b32.xlu0 %v10820_v12, %s10517_s16 }
 0x352   : > { %1624 = vrot.lane.b32.xlu1 %v10805_v1, %s10517_s16 }
 0x353   : > { %1778 = vrot.lane.b32.xlu0 %v10906_v39, %s10517_s16 }
 0x356   : > { %1705 = vrot.lane.b32.xlu1 %v10859_v46, %s10517_s16 }
 0x357   : > { %1703 = vrot.lane.b32.xlu0 %v10866_v55, %s10517_s16 }
 0x35a   : > { %1626 = vrot.lane.b32.xlu1 %v10856_v44, %s10517_s16 }
 0x35b   : > { %1770 = vrot.lane.b32.xlu0 %v10887_v9, %s10517_s16 }
 0x35e   : > { %1776 = vrot.lane.b32.xlu1 %v10910_v42, %s10517_s16 }
 0x35f   : > { %1772 = vrot.lane.b32.xlu0 %v10948_v14, %s10517_s16 }
 0x362   : > { %1697 = vrot.lane.b32.xlu1 %v10864_v48, %s10517_s16 }
 0x363   : > { %1699 = vrot.lane.b32.xlu0 %v10903_v37, %s10517_s16 }
 0x366   : > { %1851 = vrot.lane.b32.xlu1 %v10951_v21, %s10517_s16 }
 0x367   : > { %1843 = vrot.lane.b32.xlu0 %v10927_v3, %s10517_s16 }
 0x36a   : > { %1849 = vrot.lane.b32.xlu1 %v10955_v33, %s10517_s16 }
 0x36b   : > { %2102 = vrot.lane.b32.xlu0 %v10929_v5, %s10517_s16 }
 0x36e   : > { %1845 = vrot.lane.b32.xlu1 %v10986_v49, %s10517_s16 }
 0x36f   : > { %2228 = vrot.lane.b32.xlu0 %v10970_v34, %s10517_s16 }
 0x372   : > { %2100 = vrot.lane.b32.xlu1 %v10944_v29, %s10517_s16 }
 0x373   : > { %2226 = vrot.lane.b32.xlu0 %v10889_v11, %s10517_s16 }
 0x3a6   : > { %v1322_v4 = vpop.xlane.xlu0 %1321 }
 0x3aa   : > { %v1316_v30 = vpop.xlane.xlu0 %1315  ;;  %v1325_v10 = vpop.xlane.xlu1 %1324 }
 0x3ab   : > { %9803 = vrcp.f32 %v1325_v10 }
 0x3ac   : > { %9805 = vrcp.f32 %v1316_v30 }
 0x3ad   : > { %9807 = vrcp.f32 %v1322_v4 }
 0x3ae   : > { %v1334_v32 = vpop.xlane.xlu0 %1333  ;;  %v1319_v43 = vpop.xlane.xlu1 %1318 }
 0x3af   : > { %9809 = vrcp.f32 %v1319_v43 }
 0x3b2   : > { %v1328_v41 = vpop.xlane.xlu0 %1327  ;;  %v1337_v18 = vpop.xlane.xlu1 %1336 }
 0x3b3   : > { %9811 = vrcp.f32 %v1337_v18 }
 0x3b4   : > { %9813 = vrcp.f32 %v1328_v41 }
 0x3b5   : > { %9815 = vrcp.f32 %v1334_v32 }
 0x3b6   : > { %v1346_v25 = vpop.xlane.xlu0 %1345  ;;  %v1331_v22 = vpop.xlane.xlu1 %1330 }
 0x3b7   : > { %9817 = vrcp.f32 %v1331_v22 }
 0x3b8   : > { %v9804_v19 = vpop.eup %9803 }
 0x3b9   : > { %v9806_v31 = vpop.eup %9805  ;;  %v1369_v47 = vmul.f32 %v9804_v19, %v11085_v53 }
 0x3ba   : > { %v1340_v17 = vpop.xlane.xlu0 %1339  ;;  %v1349_v16 = vpop.xlane.xlu1 %1348  ;;  %v1363_v7 = vmul.f32 %v9806_v31, %v11082_v13 }
 0x3bb   : > { %v9808_v23 = vpop.eup %9807  ;;  %9819 = vrcp.f32 %v1349_v16 }
 0x3bc   : > { %v9810_v36 = vpop.eup %9809  ;;  %9821 = vrcp.f32 %v1340_v17  ;;  %v1367_v63 = vmul.f32 %v9808_v23, %v11077_v52 }
 0x3bd   : > { %v1365_v54 = vmul.f32 %v9810_v36, %v11096_v59  ;;  %9823 = vrcp.f32 %v1346_v25 }
 0x3be   : > { %v1358_v56 = vpop.xlane.xlu0 %1357  ;;  %v1343_v2 = vpop.xlane.xlu1 %1342  ;;  %v1395_v20 = vpack.c.bf16 %v1369_v47, %v1367_v63 }
 0x3bf   : > { %9825 = vrcp.f32 %v1343_v2  ;;  %v1394_v27 = vpack.c.bf16 %v1365_v54, %v1363_v7 }
 0x3c0   : > { %v9812_v4 = vpop.eup %9811 }
 0x3c1   : > { %8736 = vmatprep.mubr.msk.bf16.mxu0 %vm1217_vm1, %v1394_v27  ;;  %v9814_v10 = vpop.eup %9813  ;;  %v1377_v52 = vmul.f32 %v9812_v4, %v11106_v45 }
 0x3c2   : > { %v1352_v30 = vpop.xlane.xlu0 %1351  ;;  %8737 = vmatmul.mubr.msk.bf16.vlgmr.msra.gmra.mxu0 %vm1217_vm1, %v1395_v20  ;;  %v1361_v53 = vpop.xlane.xlu1 %1360  ;;  %v1371_v43 = vmul.f32 %v9814_v10, %v11100_v35 }
 0x3c3   : > { %v9816_v32 = vpop.eup %9815  ;;  %8749 = vmatpush3.bf16.msra.mxu0 %v10970_v34  ;;  %9827 = vrcp.f32 %v1361_v53 }
 0x3c4   : > { %v9818_v13 = vpop.eup %9817  ;;  %8750 = vmatprep.subr.bf16.mxu0 %v10889_v11  ;;  %9829 = vrcp.f32 %v1352_v30  ;;  %v1375_v25 = vmul.f32 %v9816_v32, %v11090_v62 }
 0x3c5   : > { %v1373_v41 = vmul.f32 %v9818_v13, %v11114_v8  ;;  %9831 = vrcp.f32 %v1358_v56 }
 0x3c6   : > { %v1633_v59 = vpop.permute.xlu0 %1632  ;;  %v1355_v18 = vpop.xlane.xlu1 %1354  ;;  %v1397_v19 = vpack.c.bf16 %v1377_v52, %v1375_v25 }
 0x3c7   : > { %8751 = vmatpush3.bf16.msra.mxu0 %v10889_v11  ;;  %9833 = vrcp.f32 %v1355_v18  ;;  %v1396_v22 = vpack.c.bf16 %v1373_v41, %v1371_v43  ;;  %v1644_v18 = vsel %vm972_vm0, %v1633_v59, 0 }
 0x3c8   : > { %v9820_v17 = vpop.eup %9819 }
 0x3c9   : > { %8744 = vmatprep.mubr.msk.bf16.mxu1 %vm1217_vm1, %v1396_v22  ;;  %v9822_v45 = vpop.eup %9821  ;;  %v1385_v62 = vmul.f32 %v9820_v17, %v11122_v60 }
 0x3ca   : > { %v1779_v31 = vpop.permute.xlu0 %1778  ;;  %8745 = vmatmul.mubr.msk.bf16.vlgmr.msra.gmra.mxu1 %vm1217_vm1, %v1397_v19  ;;  %v1631_v16 = vpop.permute.xlu1 %1630  ;;  %v1379_v36 = vmul.f32 %v9822_v45, %v11118_v6 }
 0x3cb   : > { %9256 = vmatprep.subr.msk.bf16.mxu0 %vm972_vm0, %v1779_v31  ;;  %v9824_v35 = vpop.eup %9823  ;;  %8757 = vmatpush3.bf16.msra.mxu1 %v10997_v26  ;;  %v1790_v6 = vsel %vm972_vm0, %v1779_v31, 0  ;;  %v1641_v22 = vsel %vm972_vm0, %v1631_v16, 0 }
 0x3cc   : > { %v9826_v8 = vpop.eup %9825  ;;  %8758 = vmatprep.subr.bf16.mxu1 %v10908_v40  ;;  %v1383_v7 = vmul.f32 %v9824_v35, %v11110_v58 }
 0x3cd   : > { %v1381_v47 = vmul.f32 %v9826_v8, %v11130_v61 }
 0x3ce   : > { %v1704_v23 = vpop.permute.xlu0 %1703  ;;  %v1625_v56 = vpop.permute.xlu1 %1624  ;;  %v1399_v2 = vpack.c.bf16 %v1385_v62, %v1383_v7 }
 0x3cf   : > { %8759 = vmatpush3.bf16.msra.mxu1 %v10908_v40  ;;  %v1398_v54 = vpack.c.bf16 %v1381_v47, %v1379_v36  ;;  %v1714_v35 = vsel %vm972_vm0, %v1704_v23, 0 }
 0x3d0   : > { %9252 = vmatprep.subr.msk.bf16.mxu1 %vm972_vm0, %v1633_v59  ;;  %v9828_v63 = vpop.eup %9827 }
 0x3d1   : > { %8752 = vmatprep.mubr.msk.bf16.mxu0 %vm1217_vm1, %v1398_v54  ;;  %v9830_v20 = vpop.eup %9829  ;;  %v1393_v4 = vmul.f32 %v9828_v63, %v11138_v51 }
 0x3d2   : > { %v1771_v27 = vpop.permute.xlu0 %1770  ;;  %8753 = vmatmul.mubr.msk.bf16.vlgmr.msra.gmra.mxu0 %vm1217_vm1, %v1399_v2  ;;  %v1706_v60 = vpop.permute.xlu1 %1705  ;;  %v1387_v10 = vmul.f32 %v9830_v20, %v11134_v28 }
 0x3d3   : > { %v9832_v61 = vpop.eup %9831  ;;  %8781 = vmatpush3.bf16.xpose.msra.mxu0 %v1790_v6  ;;  %8784 = vmatprep.mubr.msk.bf16.mxu0 %vm972_vm0, %v1771_v27  ;;  %v1717_v17 = vsel %vm972_vm0, %v1706_v60, 0 }
 0x3d4   : > { %v9834_v58 = vpop.eup %9833  ;;  %v1391_v13 = vmul.f32 %v9832_v61, %v11126_v24 }
 0x3d5   : > { %v1389_v53 = vmul.f32 %v9834_v58, %v11144_v0 }
 0x3d6   : > { %v1773_v30 = vpop.permute.xlu0 %1772  ;;  %v1627_v32 = vpop.permute.xlu1 %1626  ;;  %v1401_v43 = vpack.c.bf16 %v1393_v4, %v1391_v13 }
 0x3d7   : > { %v1400_v52 = vpack.c.bf16 %v1389_v53, %v1387_v10 }
 0x3d9   : > { %8760 = vmatprep.mubr.msk.bf16.mxu1 %vm1217_vm1, %v1400_v52 }
 0x3da   : > { %v1700_v41 = vpop.permute.xlu0 %1699  ;;  %8761 = vmatmul.mubr.msk.bf16.vlgmr.msra.gmra.mxu1 %vm1217_vm1, %v1401_v43  ;;  %v1777_v25 = vpop.permute.xlu1 %1776 }
 0x3db   : > { %8765 = vmatpush3.bf16.xpose.msra.mxu1 %v1644_v18  ;;  %8768 = vmatprep.mubr.msk.bf16.mxu1 %vm972_vm0, %v1625_v56  ;;  %v1787_v28 = vsel %vm972_vm0, %v1777_v25, 0 }
 0x3dc   : > { %9253 = vmatprep.subr.msk.bf16.mxu1 %vm972_vm0, %v1631_v16  ;;  %9257 = vmatprep.subr.msk.bf16.mxu0 %vm972_vm0, %v1777_v25 }
 0x3dd   : > { %8783 = vmatpush3.bf16.xpose.msra.mxu0 %v1787_v28 }
 0x3de   : > { %v1844_v24 = vpop.permute.xlu0 %1843  ;;  %v1698_v51 = vpop.permute.xlu1 %1697 }
 0x3e2   : > { %v2103_v0 = vpop.permute.xlu0 %2102  ;;  %v1852_v19 = vpop.permute.xlu1 %1851 }
 0x3e3   : > { %8796 = vmatprep.subr.bf16.mxu0 %v2103_v0  ;;  %8767 = vmatpush3.bf16.xpose.msra.mxu1 %v1641_v22  ;;  %v1863_v8 = vsel %vm972_vm0, %v1852_v19, 0 }
 0x3e4   : > { %9254 = vmatprep.subr.msk.bf16.mxu1 %vm972_vm0, %v1706_v60  ;;  %8785 = vmatmul.mubr.msk.bf16.vlgmr.msra.gmra.mxu0 %vm972_vm0, %v1773_v30 }
 0x3e5   : > { %8797 = vmatpush3.bf16.msra.mxu0 %v2103_v0 }
 0x3e6   : > { %v1850_v59 = vpop.permute.xlu1 %1849  ;;  %v11234_v16 = vpop.permute.xlu0 %2228 }
 0x3e7   : > { %v1860_v62 = vsel %vm972_vm0, %v1850_v59, 0 }
 0x3ea   : > { %8769 = vmatmul.mubr.msk.bf16.vlgmr.msra.gmra.mxu1 %vm972_vm0, %v1627_v32  ;;  %v1846_v31 = vpop.permute.xlu1 %1845 }
 0x3eb   : > { %8773 = vmatpush3.bf16.xpose.msra.mxu1 %v1717_v17  ;;  %8776 = vmatprep.mubr.msk.bf16.mxu1 %vm972_vm0, %v1698_v51 }
 0x3ec   : > { %9255 = vmatprep.subr.msk.bf16.mxu1 %vm972_vm0, %v1704_v23 }
 0x3ee   : > { %v2101_v45 = vpop.permute.xlu1 %2100 }
 0x3ef   : > { %8798 = vmatprep.subr.bf16.mxu0 %v2101_v45 }
 0x3f0   : > { %8799 = vmatpush3.bf16.msra.mxu0 %v2101_v45 }
 0x3f1   : > { %8812 = vmatprep.subr.bf16.mxu0 %v11234_v16 }
 0x3f3   : > { %8775 = vmatpush3.bf16.xpose.msra.mxu1 %v1714_v35 }
 0x3f4   : > { %9258 = vmatprep.subr.msk.bf16.mxu1 %vm972_vm0, %v1852_v19 }
 0x3fa   : > { %8777 = vmatmul.mubr.msk.bf16.vlgmr.msra.gmra.mxu1 %vm972_vm0, %v1700_v41 }
 0x3fb   : > { %8789 = vmatpush3.bf16.xpose.msra.mxu1 %v1863_v8  ;;  %8792 = vmatprep.mubr.msk.bf16.mxu1 %vm972_vm0, %v1844_v24 }
 0x3fc   : > { %9259 = vmatprep.subr.msk.bf16.mxu1 %vm972_vm0, %v1850_v59 }
 0x403   : > { %8791 = vmatpush3.bf16.xpose.msra.mxu1 %v1860_v62 }
 0x40a   : > { %8793 = vmatmul.mubr.msk.bf16.vlgmr.msra.gmra.mxu1 %vm972_vm0, %v1846_v31 }
 0x482   : > { %v11245_v36 = vpop.f32.mrf.mxu0 }
 0x483   : > { %14147 = vst [vmem:[#allocation20_spill] sm:$0xff] %v11245_v36 }
 0x484   : > { %v11247_v23 = vpop.f32.mrf.mxu0 }
 0x485   : > { %14148 = vst [vmem:[#allocation21_spill] sm:$0xff] %v11247_v23 }
 0x486   : > { %v11251_v56 = vpop.f32.mrf.mxu0 }
 0x487   : > { %14150 = vst [vmem:[#allocation23_spill] sm:$0xff] %v11251_v56 }
 0x488   : > { %v11255_v54 = vpop.f32.mrf.mxu0 }
 0x489   : > { %14152 = vst [vmem:[#allocation25_spill] sm:$0xff] %v11255_v54 }
 0x48a   : > { %v11249_v47 = vpop.f32.mrf.mxu1 }
 0x48b   : > { %14149 = vst [vmem:[#allocation22_spill] sm:$0xff] %v11249_v47 }
 0x48c   : > { %v11253_v7 = vpop.f32.mrf.mxu1 }
 0x48d   : > { %14151 = vst [vmem:[#allocation24_spill] sm:$0xff] %v11253_v7 }
 0x48e   : > { %v11257_v2 = vpop.f32.mrf.mxu1 }
 0x48f   : > { %14153 = vst [vmem:[#allocation26_spill] sm:$0xff] %v11257_v2 }
 0x490   : > { %v11261_v27 = vpop.f32.mrf.mxu1 }
 0x491   : > { %14155 = vst [vmem:[#allocation28_spill] sm:$0xff] %v11261_v27 }
 0x492   : > { %v11259_v63 = vpop.f32.mrf.mxu0 }
 0x493   : > { %14154 = vst [vmem:[#allocation27_spill] sm:$0xff] %v11259_v63 }
 0x494   : > { %v11263_v20 = vpop.f32.mrf.mxu0 }
 0x495   : > { %14156 = vst [vmem:[#allocation29_spill] sm:$0xff] %v11263_v20 }
 0x496   : > { %v11267_v60 = vpop.f32.mrf.mxu0 }
 0x497   : > { %14158 = vst [vmem:[#allocation31_spill] sm:$0xff] %v11267_v60 }
 0x498   : > { %v11271_v58 = vpop.f32.mrf.mxu0 }
 0x499   : > { %14160 = vst [vmem:[#allocation33_spill] sm:$0xff] %v11271_v58 }
 0x49a   : > { %v11265_v6 = vpop.f32.mrf.mxu1 }
 0x49b   : > { %14157 = vst [vmem:[#allocation30_spill] sm:$0xff] %v11265_v6 }
 0x49c   : > { %v11269_v61 = vpop.f32.mrf.mxu1 }
 0x49d   : > { %14159 = vst [vmem:[#allocation32_spill] sm:$0xff] %v11269_v61 }
 0x49e   : > { %v11273_v4 = vpop.f32.mrf.mxu1 }
 0x49f   : > { %14161 = vst [vmem:[#allocation34_spill] sm:$0xff] %v11273_v4 }
 0x4a0   : > { %v11276_v32 = vpop.f32.mrf.mxu1 }
 0x4a1   : > { %14162 = vst [vmem:[#allocation35_spill] sm:$0xff] %v11276_v32 }
 0x4a4   : > { %v8786_v30 = vpop.f32.mrf.mxu0 }
 0x4a5   : > { %v1944_v10 = vsel %vm1217_vm1, %v8786_v30, -inf }
 0x4a6   : > { %1945 = vmax.xlane.f32.xlu0 %v1944_v10  ;;  %v1826_v53 = vpop.f32.mrf.mxu0 }
 0x4a7   : > { %v1938_v52 = vsel %vm1217_vm1, %v1826_v53, -inf }
 0x4a8   : > { %v8787_v13 = vpop.f32.mrf.mxu0 }
 0x4a9   : > { %v1947_v43 = vsel %vm1217_vm1, %v8787_v13, -inf }
 0x4aa   : > { %v8770_v41 = vpop.f32.mrf.mxu1  ;;  %1939 = vmax.xlane.f32.xlu0 %v1938_v52  ;;  %1948 = vmax.xlane.f32.xlu1 %v1947_v43  ;;  %v1829_v18 = vpop.f32.mrf.mxu0 }
 0x4ab   : > { %v1920_v28 = vsel %vm1217_vm1, %v8770_v41, -inf  ;;  %v1941_v24 = vsel %vm1217_vm1, %v1829_v18, -inf }
 0x4ac   : > { %v11280_v25 = vpop.f32.mrf.mxu1 }
 0x4ad   : > { %v1914_v22 = vsel %vm1217_vm1, %v11280_v25, -inf }
 0x4ae   : > { %v11284_v51 = vpop.f32.mrf.mxu1  ;;  %1921 = vmax.xlane.f32.xlu0 %v1920_v28  ;;  %1942 = vmax.xlane.f32.xlu1 %v1941_v24 }
 0x4af   : > { %v1923_v59 = vsel %vm1217_vm1, %v11284_v51, -inf }
 0x4b0   : > { %v11286_v0 = vpop.f32.mrf.mxu1 }
 0x4b1   : > { %v1917_v19 = vsel %vm1217_vm1, %v11286_v0, -inf }
 0x4b2   : > { %1915 = vmax.xlane.f32.xlu0 %v1914_v22  ;;  %1918 = vmax.xlane.f32.xlu1 %v1917_v19 }
 0x4b6   : > { %1924 = vmax.xlane.f32.xlu0 %v1923_v59 }
 0x4ba   : > { %v11294_v17 = vpop.f32.mrf.mxu1 }
 0x4bb   : > { %v1932_v31 = vsel %vm1217_vm1, %v11294_v17, -inf }
 0x4bc   : > { %1933 = vmax.xlane.f32.xlu0 %v1932_v31  ;;  %v11298_v45 = vpop.f32.mrf.mxu1 }
 0x4bd   : > { %v1926_v8 = vsel %vm1217_vm1, %v11298_v45, -inf }
 0x4be   : > { %v11300_v35 = vpop.f32.mrf.mxu1 }
 0x4bf   : > { %v1935_v62 = vsel %vm1217_vm1, %v11300_v35, -inf }
 0x4c0   : > { %1927 = vmax.xlane.f32.xlu0 %v1926_v8  ;;  %1936 = vmax.xlane.f32.xlu1 %v1935_v62  ;;  %v11306_v10 = vpop.f32.mrf.mxu1  ;;  %v11330_v62 = vpop.permute.xlu0 %2226 }
 0x4c1   : > { %v1929_v52 = vsel %vm1217_vm1, %v11306_v10, -inf }
 0x4c4   : > { %1930 = vmax.xlane.f32.xlu1 %v1929_v52 }
 0x4ca   : > { %v11310_v43 = vpop.f32.mrf.mxu1 }
 0x4cb   : > { %v1956_v28 = vsel %vm1217_vm1, %v11310_v43, -inf }
 0x4cc   : > { %1957 = vmax.xlane.f32.xlu0 %v1956_v28  ;;  %v11314_v24 = vpop.f32.mrf.mxu1 }
 0x4cd   : > { %v1950_v22 = vsel %vm1217_vm1, %v11314_v24, -inf }
 0x4ce   : > { %v11322_v19 = vpop.f32.mrf.mxu1 }
 0x4cf   : > { %v1959_v59 = vsel %vm1217_vm1, %v11322_v19, -inf }
 0x4d0   : > { %1951 = vmax.xlane.f32.xlu0 %v1950_v22  ;;  %v11326_v31 = vpop.f32.mrf.mxu1 }
 0x4d1   : > { %v1953_v8 = vsel %vm1217_vm1, %v11326_v31, -inf }
 0x4d5   : > { %2356 = vrot.lane.b32.xlu1 %v10820_v12, %s10518_s17 }
 0x4e6   : > { %2165 = vrot.lane.b32.xlu0 %v10975_v38, %s10517_s16 }
 0x4f9   : > { %1960 = vmax.xlane.f32.xlu1 %v1959_v59 }
 0x4fd   : > { %1954 = vmax.xlane.f32.xlu1 %v1953_v8 }
 0x52f   : > { %v1946_v52 = vpop.xlane.xlu0 %1945 }
 0x530   : > { %v1972_v28 = vsub.f32 %v8786_v30, %v1946_v52 }
 0x532   : > { %v1998_v22 = vmul.f32 1.442695, %v1972_v28 }
 0x533   : > { %v1940_v50 = vpop.xlane.xlu0 %1939  ;;  %v1949_v61 = vpop.xlane.xlu1 %1948 }
 0x534   : > { %9835 = vpow2.f32 %v1998_v22  ;;  %v1970_v32 = vsub.f32 %v1826_v53, %v1940_v50  ;;  %v1973_v6 = vsub.f32 %v8787_v13, %v1949_v61 }
 0x536   : > { %v1994_v4 = vmul.f32 1.442695, %v1970_v32  ;;  %v2000_v47 = vmul.f32 1.442695, %v1973_v6 }
 0x537   : > { %v1922_v2 = vpop.xlane.xlu0 %1921  ;;  %v1943_v7 = vpop.xlane.xlu1 %1942 }
 0x538   : > { %9837 = vpow2.f32 %v1994_v4  ;;  %v1964_v59 = vsub.f32 %v8770_v41, %v1922_v2  ;;  %v1971_v27 = vsub.f32 %v1829_v18, %v1943_v7 }
 0x539   : > { %9839 = vpow2.f32 %v2000_v47 }
 0x53a   : > { %v1982_v36 = vmul.f32 1.442695, %v1964_v59  ;;  %v1996_v8 = vmul.f32 1.442695, %v1971_v27 }
 0x53b   : > { %v1916_v56 = vpop.xlane.xlu0 %1915 }
 0x53c   : > { %9841 = vpow2.f32 %v1982_v36  ;;  %v1962_v30 = vsub.f32 %v11280_v25, %v1916_v56 }
 0x53d   : > { %9843 = vpow2.f32 %v1996_v8  ;;  %v1919_v8 = vpop.xlane.xlu1 %1918 }
 0x53e   : > { %v1978_v52 = vmul.f32 1.442695, %v1962_v30 }
 0x53f   : > { %v1925_v7 = vpop.xlane.xlu0 %1924 }
 0x540   : > { %9845 = vpow2.f32 %v1978_v52  ;;  %v1965_v59 = vsub.f32 %v11284_v51, %v1925_v7  ;;  %v1963_v52 = vsub.f32 %v11286_v0, %v1919_v8 }
 0x541   : > { %v11333_v28 = vpop.eup %9835 }
 0x542   : > { %v2040_v50 = vsel %vm1217_vm1, %v11333_v28, 0.0 }
 0x543   : > { %2041 = vadd.xlane.f32.xlu0 %v2040_v50  ;;  %v1984_v50 = vmul.f32 1.442695, %v1965_v59 }
 0x545   : > { %v11337_v6 = vpop.eup %9837  ;;  %v1934_v4 = vpop.xlane.xlu0 %1933  ;;  %9847 = vpow2.f32 %v1984_v50 }
 0x546   : > { %v11339_v2 = vpop.eup %9839  ;;  %v2034_v47 = vsel %vm1217_vm1, %v11337_v6, 0.0  ;;  %v1968_v30 = vsub.f32 %v11294_v17, %v1934_v4 }
 0x547   : > { %2035 = vadd.xlane.f32.xlu0 %v2034_v47  ;;  %v2043_v36 = vsel %vm1217_vm1, %v11339_v2, 0.0 }
 0x548   : > { %2044 = vadd.xlane.f32.xlu1 %v2043_v36  ;;  %v1990_v47 = vmul.f32 1.442695, %v1968_v30 }
 0x549   : > { %v11345_v56 = vpop.eup %9841  ;;  %v1928_v41 = vpop.xlane.xlu0 %1927 }
 0x54a   : > { %v11347_v27 = vpop.eup %9843  ;;  %v2016_v61 = vsel %vm1217_vm1, %v11345_v56, 0.0  ;;  %v1966_v36 = vsub.f32 %v11298_v45, %v1928_v41  ;;  %9849 = vpow2.f32 %v1990_v47  ;;  %v1937_v41 = vpop.xlane.xlu1 %1936 }
 0x54b   : > { %2017 = vadd.xlane.f32.xlu0 %v2016_v61  ;;  %v2037_v53 = vsel %vm1217_vm1, %v11347_v27, 0.0  ;;  %v1980_v61 = vmul.f32 1.442695, %v1963_v52  ;;  %v1969_v59 = vsub.f32 %v11300_v35, %v1937_v41 }
 0x54c   : > { %2038 = vadd.xlane.f32.xlu1 %v2037_v53  ;;  %v1986_v53 = vmul.f32 1.442695, %v1966_v36 }
 0x54d   : > { %v11353_v32 = vpop.eup %9845  ;;  %9851 = vpow2.f32 %v1980_v61  ;;  %v1992_v30 = vmul.f32 1.442695, %v1969_v59 }
 0x54e   : > { %v2010_v13 = vsel %vm1217_vm1, %v11353_v32, 0.0  ;;  %9853 = vpow2.f32 %v1986_v53  ;;  %v1931_v8 = vpop.xlane.xlu1 %1930 }
 0x54f   : > { %2011 = vadd.xlane.f32.xlu0 %v2010_v13  ;;  %v1967_v52 = vsub.f32 %v11306_v10, %v1931_v8  ;;  %9855 = vpow2.f32 %v1992_v30 }
 0x551   : > { %v1988_v47 = vmul.f32 1.442695, %v1967_v52 }
 0x552   : > { %v11365_v13 = vpop.eup %9847  ;;  %v11395_v50 = vpop.permute.xlu1 %2356 }
 0x553   : > { %v2019_v51 = vsel %vm1217_vm1, %v11365_v13, 0.0  ;;  %9857 = vpow2.f32 %v1988_v47 }
 0x555   : > { %v1958_v18 = vpop.xlane.xlu0 %1957 }
 0x556   : > { %v1976_v36 = vsub.f32 %v11310_v43, %v1958_v18 }
 0x558   : > { %v2006_v61 = vmul.f32 1.442695, %v1976_v36 }
 0x559   : > { %v1952_v25 = vpop.xlane.xlu0 %1951 }
 0x55a   : > { %v1974_v53 = vsub.f32 %v11314_v24, %v1952_v25  ;;  %9859 = vpow2.f32 %v2006_v61 }
 0x55c   : > { %v2002_v10 = vmul.f32 1.442695, %v1974_v53 }
 0x55d   : > { %2291 = vrot.lane.b32.xlu1 %v10997_v26, %s10517_s16  ;;  %v2166_v22 = vpop.permute.xlu0 %2165 }
 0x55e   : > { %8804 = vmatprep.subr.bf16.mxu1 %v2166_v22  ;;  %9861 = vpow2.f32 %v2002_v10 }
 0x55f   : > { %8805 = vmatpush3.bf16.msra.mxu1 %v2166_v22  ;;  %v11367_v22 = vpop.eup %9849 }
 0x560   : > { %v11371_v17 = vpop.eup %9851  ;;  %v2028_v0 = vsel %vm1217_vm1, %v11367_v22, 0.0 }
 0x561   : > { %v11375_v45 = vpop.eup %9853  ;;  %v2013_v7 = vsel %vm1217_vm1, %v11371_v17, 0.0 }
 0x562   : > { %v2022_v4 = vsel %vm1217_vm1, %v11375_v45, 0.0 }
 0x565   : > { %2163 = vrot.lane.b32.xlu0 %v10988_v57, %s10517_s16 }
 0x581   : > { %2020 = vadd.xlane.f32.xlu1 %v2019_v51 }
 0x582   : > { %v1961_v35 = vpop.xlane.xlu1 %1960 }
 0x583   : > { %v1977_v51 = vsub.f32 %v11322_v19, %v1961_v35 }
 0x584   : > { %2029 = vadd.xlane.f32.xlu0 %v2028_v0 }
 0x585   : > { %2014 = vadd.xlane.f32.xlu1 %v2013_v7  ;;  %v2008_v43 = vmul.f32 1.442695, %v1977_v51  ;;  %v11407_v7 = vpop.eup %9855 }
 0x586   : > { %v1955_v0 = vpop.xlane.xlu1 %1954  ;;  %v2031_v25 = vsel %vm1217_vm1, %v11407_v7, 0.0 }
 0x587   : > { %v1975_v18 = vsub.f32 %v11326_v31, %v1955_v0  ;;  %9863 = vpow2.f32 %v2008_v43 }
 0x588   : > { %2023 = vadd.xlane.f32.xlu0 %v2022_v4  ;;  %v11413_v4 = vpop.eup %9857 }
 0x589   : > { %v2004_v24 = vmul.f32 1.442695, %v1975_v18  ;;  %v2025_v19 = vsel %vm1217_vm1, %v11413_v4, 0.0  ;;  %v11419_v31 = vpop.eup %9859 }
 0x58a   : > { %v2052_v41 = vsel %vm1217_vm1, %v11419_v31, 0.0  ;;  %v11425_v59 = vpop.eup %9861 }
 0x58b   : > { %9865 = vpow2.f32 %v2004_v24  ;;  %v2046_v8 = vsel %vm1217_vm1, %v11425_v59, 0.0 }
 0x594   : > { %v11429_v30 = vpop.eup %9863 }
 0x595   : > { %v2055_v47 = vsel %vm1217_vm1, %v11429_v30, 0.0 }
 0x596   : > { %2289 = vrot.lane.b32.xlu1 %v10908_v40, %s10517_s16 }
 0x598   : > { %v11433_v36 = vpop.eup %9865 }
 0x599   : > { %v2049_v61 = vsel %vm1217_vm1, %v11433_v36, 0.0 }
 0x59a   : > { %2425 = vrot.lane.b32.xlu1 %v10859_v46, %s10518_s17 }
 0x59e   : > { %2354 = vrot.lane.b32.xlu0 %v10824_v15, %s10518_s17 }
 0x5a2   : > { %2350 = vrot.lane.b32.xlu0 %v10805_v1, %s10518_s17 }
 0x5a6   : > { %2494 = vrot.lane.b32.xlu0 %v10906_v39, %s10518_s17 }
 0x5aa   : > { %2423 = vrot.lane.b32.xlu0 %v10866_v55, %s10518_s17 }
 0x5ae   : > { %2488 = vrot.lane.b32.xlu0 %v10887_v9, %s10518_s17 }
 0x5b2   : > { %2490 = vrot.lane.b32.xlu0 %v10948_v14, %s10518_s17 }
 0x5b6   : > { %2421 = vrot.lane.b32.xlu0 %v10903_v37, %s10518_s17 }
 0x5ba   : > { %2557 = vrot.lane.b32.xlu0 %v10927_v3, %s10518_s17 }
 0x5be   : > { %2032 = vadd.xlane.f32.xlu1 %v2031_v25  ;;  %2812 = vrot.lane.b32.xlu0 %v10929_v5, %s10518_s17 }
 0x5c2   : > { %2026 = vadd.xlane.f32.xlu1 %v2025_v19  ;;  %2934 = vrot.lane.b32.xlu0 %v10970_v34, %s10518_s17 }
 0x5c6   : > { %2053 = vadd.xlane.f32.xlu1 %v2052_v41 }
 0x5ca   : > { %2047 = vadd.xlane.f32.xlu1 %v2046_v8 }
 0x5cc   : > { %v2042_v52 = vpop.xlane.xlu0 %2041 }
 0x5ce   : > { %2056 = vadd.xlane.f32.xlu1 %v2055_v47 }
 0x5d0   : > { %v2036_v35 = vpop.xlane.xlu0 %2035 }
 0x5d1   : > { %v2045_v53 = vpop.xlane.xlu1 %2044  ;;  %9867 = vrcp.f32 %v2036_v35 }
 0x5d2   : > { %2050 = vadd.xlane.f32.xlu1 %v2049_v61 }
 0x5d4   : > { %v2018_v10 = vpop.xlane.xlu0 %2017 }
 0x5d5   : > { %v2039_v51 = vpop.xlane.xlu1 %2038 }
 0x5d6   : > { %9869 = vrcp.f32 %v2039_v51 }
 0x5d8   : > { %v2012_v0 = vpop.xlane.xlu0 %2011 }
 0x5d9   : > { %v11437_v18 = vpop.permute.xlu1 %2291 }
 0x5dc   : > { %v2164_v43 = vpop.permute.xlu0 %2163 }
 0x5dd   : > { %8806 = vmatprep.subr.bf16.mxu1 %v2164_v43 }
 0x5de   : > { %8807 = vmatpush3.bf16.msra.mxu1 %v2164_v43  ;;  %v9868_v19 = vpop.eup %9867 }
 0x5df   : > { %8820 = vmatprep.subr.bf16.mxu1 %v11437_v18 }
 0x5e3   : > { %2352 = vrot.lane.b32.xlu1 %v10856_v44, %s10518_s17  ;;  %v9870_v41 = vpop.eup %9869 }
 0x5e7   : > { %2492 = vrot.lane.b32.xlu1 %v10910_v42, %s10518_s17 }
 0x5eb   : > { %2419 = vrot.lane.b32.xlu1 %v10864_v48, %s10518_s17 }
 0x5ef   : > { %2563 = vrot.lane.b32.xlu1 %v10951_v21, %s10518_s17 }
 0x5f3   : > { %2561 = vrot.lane.b32.xlu1 %v10955_v33, %s10518_s17 }
 0x5f7   : > { %2559 = vrot.lane.b32.xlu1 %v10986_v49, %s10518_s17 }
 0x5fb   : > { %2810 = vrot.lane.b32.xlu1 %v10944_v29, %s10518_s17 }
 0x60a   : > { %v2021_v24 = vpop.xlane.xlu1 %2020 }
 0x60b   : > { %9871 = vrcp.f32 %v2021_v24 }
 0x60c   : > { %9873 = vrcp.f32 %v2012_v0  ;;  %v2077_v0 = vmul.f32 %v9870_v41, %v11347_v27 }
 0x60d   : > { %9875 = vrcp.f32 %v2018_v10  ;;  %v2030_v8 = vpop.xlane.xlu0 %2029 }
 0x60e   : > { %v2015_v25 = vpop.xlane.xlu1 %2014 }
 0x60f   : > { %9877 = vrcp.f32 %v2015_v25 }
 0x610   : > { %9879 = vrcp.f32 %v2045_v53 }
 0x611   : > { %9881 = vrcp.f32 %v2042_v52  ;;  %v2024_v10 = vpop.xlane.xlu0 %2023  ;;  %v2075_v52 = vmul.f32 %v9868_v19, %v11337_v6 }
 0x613   : > { %v2094_v60 = vpack.c.bf16 %v2077_v0, %v2075_v52 }
 0x618   : > { %v9872_v47 = vpop.eup %9871 }
 0x619   : > { %v9874_v61 = vpop.eup %9873  ;;  %v2065_v54 = vmul.f32 %v9872_v47, %v11365_v13 }
 0x61a   : > { %v9876_v43 = vpop.eup %9875  ;;  %v2059_v35 = vmul.f32 %v9874_v61, %v11353_v32 }
 0x61b   : > { %v2063_v24 = vmul.f32 %v9876_v43, %v11345_v56 }
 0x61c   : > { %v9878_v23 = vpop.eup %9877 }
 0x61d   : > { %v2061_v51 = vmul.f32 %v9878_v23, %v11371_v17  ;;  %v2091_v25 = vpack.c.bf16 %v2065_v54, %v2063_v24  ;;  %v9880_v63 = vpop.eup %9879  ;;  %v2355_v23 = vpop.permute.xlu0 %2354 }
 0x61e   : > { %v9882_v13 = vpop.eup %9881  ;;  %v2081_v56 = vmul.f32 %v9880_v63, %v11339_v2  ;;  %v2365_v63 = vsel %vm972_vm0, %v2355_v23, 0 }
 0x61f   : > { %v2090_v53 = vpack.c.bf16 %v2061_v51, %v2059_v35  ;;  %v2079_v27 = vmul.f32 %v9882_v13, %v11333_v28 }
 0x621   : > { %8800 = vmatprep.mubr.msk.bf16.mxu0 %vm1217_vm1, %v2090_v53  ;;  %v2095_v54 = vpack.c.bf16 %v2081_v56, %v2079_v27  ;;  %v2351_v6 = vpop.permute.xlu0 %2350 }
 0x622   : > { %8801 = vmatmul.mubr.msk.bf16.vlgmr.msra.gmra.mxu0 %vm1217_vm1, %v2091_v25 }
 0x623   : > { %8813 = vmatpush3.bf16.msra.mxu0 %v11234_v16  ;;  %8816 = vmatprep.mubr.msk.bf16.mxu0 %vm1217_vm1, %v2094_v60  ;;  %v2368_v16 = vsel %vm972_vm0, %v11395_v50, 0 }
 0x624   : > { %8814 = vmatprep.subr.bf16.mxu0 %v11330_v62 }
 0x625   : > { %v2495_v60 = vpop.permute.xlu0 %2494 }
 0x627   : > { %8815 = vmatpush3.bf16.msra.mxu0 %v11330_v62  ;;  %v2290_v62 = vpop.permute.xlu1 %2289 }
 0x628   : > { %9260 = vmatprep.subr.msk.bf16.mxu0 %vm972_vm0, %v11395_v50 }
 0x629   : > { %v11477_v32 = vpop.permute.xlu0 %2423 }
 0x62a   : > { %8817 = vmatmul.mubr.msk.bf16.vlgmr.msra.gmra.mxu0 %vm1217_vm1, %v2095_v54 }
 0x62b   : > { %8829 = vmatpush3.bf16.xpose.msra.mxu0 %v2368_v16  ;;  %8832 = vmatprep.mubr.msk.bf16.mxu0 %vm972_vm0, %v2351_v6  ;;  %v2426_v28 = vpop.permute.xlu1 %2425 }
 0x62c   : > { %9261 = vmatprep.subr.msk.bf16.mxu0 %vm972_vm0, %v2355_v23 }
 0x62d   : > { %v2489_v19 = vpop.permute.xlu0 %2488 }
 0x631   : > { %v2491_v43 = vpop.permute.xlu0 %2490 }
 0x633   : > { %8831 = vmatpush3.bf16.xpose.msra.mxu0 %v2365_v63 }
 0x634   : > { %9264 = vmatprep.subr.msk.bf16.mxu0 %vm972_vm0, %v2495_v60 }
 0x635   : > { %v2422_v13 = vpop.permute.xlu0 %2421 }
 0x647   : > { %v2033_v2 = vpop.xlane.xlu1 %2032 }
 0x648   : > { %9883 = vrcp.f32 %v2033_v2 }
 0x649   : > { %9885 = vrcp.f32 %v2024_v10 }
 0x64a   : > { %9887 = vrcp.f32 %v2030_v8 }
 0x64b   : > { %v2027_v17 = vpop.xlane.xlu1 %2026 }
 0x64c   : > { %9889 = vrcp.f32 %v2027_v17 }
 0x64f   : > { %v2054_v50 = vpop.xlane.xlu1 %2053 }
 0x653   : > { %v2048_v41 = vpop.xlane.xlu1 %2047 }
 0x655   : > { %v9884_v47 = vpop.eup %9883 }
 0x656   : > { %v9886_v61 = vpop.eup %9885  ;;  %v2073_v24 = vmul.f32 %v9884_v47, %v11407_v7  ;;  %v2437_v47 = vsel %vm972_vm0, %v2426_v28, 0 }
 0x657   : > { %v2057_v35 = vpop.xlane.xlu1 %2056  ;;  %v9888_v51 = vpop.eup %9887  ;;  %v2067_v10 = vmul.f32 %v9886_v61, %v11375_v45  ;;  %v2506_v45 = vsel %vm972_vm0, %v2495_v60, 0 }
 0x658   : > { %9891 = vrcp.f32 %v2057_v35  ;;  %v2071_v52 = vmul.f32 %v9888_v51, %v11367_v22  ;;  %v2558_v22 = vpop.permute.xlu0 %2557 }
 0x659   : > { %v9890_v0 = vpop.eup %9889  ;;  %9893 = vrcp.f32 %v2048_v41 }
 0x65a   : > { %v2069_v8 = vmul.f32 %v9890_v0, %v11413_v4  ;;  %9895 = vrcp.f32 %v2054_v50  ;;  %v2093_v23 = vpack.c.bf16 %v2073_v24, %v2071_v52 }
 0x65b   : > { %v2051_v53 = vpop.xlane.xlu1 %2050 }
 0x65c   : > { %9897 = vrcp.f32 %v2051_v53  ;;  %v2092_v25 = vpack.c.bf16 %v2069_v8, %v2067_v10  ;;  %v2813_v63 = vpop.permute.xlu0 %2812 }
 0x65e   : > { %8808 = vmatprep.mubr.msk.bf16.mxu1 %vm1217_vm1, %v2092_v25 }
 0x65f   : > { %8809 = vmatmul.mubr.msk.bf16.vlgmr.msra.gmra.mxu1 %vm1217_vm1, %v2093_v23  ;;  %v2353_v56 = vpop.permute.xlu1 %2352 }
 0x660   : > { %8821 = vmatpush3.bf16.msra.mxu1 %v11437_v18  ;;  %8833 = vmatmul.mubr.msk.bf16.vlgmr.msra.gmra.mxu0 %vm972_vm0, %v2353_v56 }
 0x661   : > { %8822 = vmatprep.subr.bf16.mxu1 %v2290_v62  ;;  %8845 = vmatpush3.bf16.xpose.msra.mxu0 %v2506_v45 }
 0x662   : > { %8848 = vmatprep.mubr.msk.bf16.mxu0 %vm972_vm0, %v2489_v19 }
 0x663   : > { %v2493_v7 = vpop.permute.xlu1 %2492 }
 0x664   : > { %8823 = vmatpush3.bf16.msra.mxu1 %v2290_v62  ;;  %9265 = vmatprep.subr.msk.bf16.mxu0 %vm972_vm0, %v2493_v7  ;;  %v2503_v18 = vsel %vm972_vm0, %v2493_v7, 0 }
 0x665   : > { %9262 = vmatprep.subr.msk.bf16.mxu1 %vm972_vm0, %v2426_v28  ;;  %v9892_v4 = vpop.eup %9891 }
 0x666   : > { %v9894_v27 = vpop.eup %9893  ;;  %v2089_v60 = vmul.f32 %v9892_v4, %v11429_v30 }
 0x667   : > { %v2420_v54 = vpop.permute.xlu1 %2419  ;;  %v9896_v6 = vpop.eup %9895  ;;  %v2083_v2 = vmul.f32 %v9894_v27, %v11425_v59 }
 0x668   : > { %v2087_v50 = vmul.f32 %v9896_v6, %v11419_v31  ;;  %v2434_v31 = vsel %vm972_vm0, %v11477_v32, 0 }
 0x669   : > { %v9898_v16 = vpop.eup %9897  ;;  %8847 = vmatpush3.bf16.xpose.msra.mxu0 %v2503_v18 }
 0x66a   : > { %8860 = vmatprep.subr.bf16.mxu0 %v2813_v63  ;;  %v2085_v62 = vmul.f32 %v9898_v16, %v11433_v36  ;;  %v2097_v41 = vpack.c.bf16 %v2089_v60, %v2087_v50  ;;  %v11505_v36 = vpop.permute.xlu0 %2934 }
 0x66b   : > { %v2564_v17 = vpop.permute.xlu1 %2563 }
 0x66c   : > { %v2096_v19 = vpack.c.bf16 %v2085_v62, %v2083_v2  ;;  %v2575_v28 = vsel %vm972_vm0, %v2564_v17, 0 }
 0x66e   : > { %8824 = vmatprep.mubr.msk.bf16.mxu1 %vm1217_vm1, %v2096_v19 }
 0x66f   : > { %8825 = vmatmul.mubr.msk.bf16.vlgmr.msra.gmra.mxu1 %vm1217_vm1, %v2097_v41  ;;  %v2562_v61 = vpop.permute.xlu1 %2561 }
 0x670   : > { %8837 = vmatpush3.bf16.xpose.msra.mxu1 %v2437_v47  ;;  %8849 = vmatmul.mubr.msk.bf16.vlgmr.msra.gmra.mxu0 %vm972_vm0, %v2491_v43 }
 0x671   : > { %9263 = vmatprep.subr.msk.bf16.mxu1 %vm972_vm0, %v11477_v32  ;;  %8840 = vmatprep.mubr.msk.bf16.mxu1 %vm972_vm0, %v2420_v54  ;;  %v2572_v32 = vsel %vm972_vm0, %v2562_v61, 0 }
 0x672   : > { %8861 = vmatpush3.bf16.msra.mxu0 %v2813_v63 }
 0x673   : > { %v2560_v59 = vpop.permute.xlu1 %2559 }
 0x677   : > { %v2811_v30 = vpop.permute.xlu1 %2810 }
 0x678   : > { %8839 = vmatpush3.bf16.xpose.msra.mxu1 %v2434_v31  ;;  %8862 = vmatprep.subr.bf16.mxu0 %v2811_v30 }
 0x679   : > { %9266 = vmatprep.subr.msk.bf16.mxu1 %vm972_vm0, %v2564_v17  ;;  %8863 = vmatpush3.bf16.msra.mxu0 %v2811_v30 }
 0x67a   : > { %8876 = vmatprep.subr.bf16.mxu0 %v11505_v36 }
 0x67f   : > { %8841 = vmatmul.mubr.msk.bf16.vlgmr.msra.gmra.mxu1 %vm972_vm0, %v2422_v13 }
 0x680   : > { %8853 = vmatpush3.bf16.xpose.msra.mxu1 %v2575_v28  ;;  %8856 = vmatprep.mubr.msk.bf16.mxu1 %vm972_vm0, %v2558_v22 }
 0x681   : > { %9267 = vmatprep.subr.msk.bf16.mxu1 %vm972_vm0, %v2562_v61 }
 0x688   : > { %8855 = vmatpush3.bf16.xpose.msra.mxu1 %v2572_v32 }
 0x68f   : > { %8857 = vmatmul.mubr.msk.bf16.vlgmr.msra.gmra.mxu1 %vm972_vm0, %v2560_v59 }
 0x6e2   : > { %v11515_v43 = vpop.f32.mrf.mxu0 }
 0x6e3   : > { %14163 = vst [vmem:[#allocation36_spill] sm:$0xff] %v11515_v43 }
 0x6e4   : > { %v11517_v35 = vpop.f32.mrf.mxu0 }
 0x6e6   : > { %v11519_v51 = vpop.f32.mrf.mxu0 }
 0x6e8   : > { %v11523_v24 = vpop.f32.mrf.mxu0 }
 0x6ea   : > { %v11525_v10 = vpop.f32.mrf.mxu0 }
 0x6eb   : > { %14164 = vst [vmem:[#allocation37_spill] sm:$0xff] %v11525_v10 }
 0x6ec   : > { %v11527_v8 = vpop.f32.mrf.mxu0 }
 0x6ed   : > { %14165 = vst [vmem:[#allocation38_spill] sm:$0xff] %v11527_v8 }
 0x6ee   : > { %v11529_v53 = vpop.f32.mrf.mxu0 }
 0x6ef   : > { %14166 = vst [vmem:[#allocation39_spill] sm:$0xff] %v11529_v53 }
 0x6f0   : > { %v11533_v25 = vpop.f32.mrf.mxu0 }
 0x6f1   : > { %14167 = vst [vmem:[#allocation40_spill] sm:$0xff] %v11533_v25 }
 0x71f   : > { %v11535_v13 = vpop.f32.mrf.mxu1 }
 0x720   : > { %14168 = vst [vmem:[#allocation41_spill] sm:$0xff] %v11535_v13  ;;  %v11537_v23 = vpop.f32.mrf.mxu0 }
 0x721   : > { %v11539_v56 = vpop.f32.mrf.mxu1  ;;  %v2632_v45 = vsel %vm1217_vm1, %v11537_v23, -inf }
 0x722   : > { %14169 = vst [vmem:[#allocation42_spill] sm:$0xff] %v11539_v56  ;;  %2633 = vmax.xlane.f32.xlu0 %v2632_v45  ;;  %v11543_v22 = vpop.f32.mrf.mxu0 }
 0x723   : > { %v11545_v7 = vpop.f32.mrf.mxu1  ;;  %v2626_v54 = vsel %vm1217_vm1, %v11543_v22, -inf }
 0x724   : > { %14170 = vst [vmem:[#allocation43_spill] sm:$0xff] %v11545_v7  ;;  %v11549_v27 = vpop.f32.mrf.mxu0 }
 0x725   : > { %v2635_v16 = vsel %vm1217_vm1, %v11549_v27, -inf  ;;  %v11559_v63 = vpop.f32.mrf.mxu1 }
 0x726   : > { %2627 = vmax.xlane.f32.xlu0 %v2626_v54  ;;  %v11553_v6 = vpop.f32.mrf.mxu0  ;;  %14171 = vst [vmem:[#allocation44_spill] sm:$0xff] %v11559_v63 }
 0x727   : > { %v2629_v18 = vsel %vm1217_vm1, %v11553_v6, -inf }
 0x728   : > { %2630 = vmax.xlane.f32.xlu1 %v2629_v18 }
 0x72a   : > { %2636 = vmax.xlane.f32.xlu0 %v2635_v16 }
 0x72f   : > { %v11561_v60 = vpop.f32.mrf.mxu1 }
 0x730   : > { %14172 = vst [vmem:[#allocation45_spill] sm:$0xff] %v11561_v60  ;;  %v11563_v2 = vpop.f32.mrf.mxu0 }
 0x731   : > { %v11565_v62 = vpop.f32.mrf.mxu1  ;;  %v2656_v17 = vsel %vm1217_vm1, %v11563_v2, -inf }
 0x732   : > { %14173 = vst [vmem:[#allocation46_spill] sm:$0xff] %v11565_v62  ;;  %2657 = vmax.xlane.f32.xlu0 %v2656_v17  ;;  %v11569_v50 = vpop.f32.mrf.mxu0 }
 0x733   : > { %v11571_v19 = vpop.f32.mrf.mxu1  ;;  %v2650_v61 = vsel %vm1217_vm1, %v11569_v50, -inf }
 0x734   : > { %14174 = vst [vmem:[#allocation47_spill] sm:$0xff] %v11571_v19  ;;  %v11575_v47 = vpop.f32.mrf.mxu0 }
 0x735   : > { %v2659_v59 = vsel %vm1217_vm1, %v11575_v47, -inf  ;;  %v11585_v28 = vpop.f32.mrf.mxu1 }
 0x736   : > { %2651 = vmax.xlane.f32.xlu0 %v2650_v61  ;;  %2660 = vmax.xlane.f32.xlu1 %v2659_v59  ;;  %v11581_v31 = vpop.f32.mrf.mxu0  ;;  %14175 = vst [vmem:[#allocation48_spill] sm:$0xff] %v11585_v28 }
 0x737   : > { %v2653_v30 = vsel %vm1217_vm1, %v11581_v31, -inf }
 0x73a   : > { %2654 = vmax.xlane.f32.xlu1 %v2653_v30 }
 0x73f   : > { %v11587_v32 = vpop.f32.mrf.mxu1 }
 0x740   : > { %v2644_v45 = vsel %vm1217_vm1, %v11587_v32, -inf }
 0x741   : > { %2645 = vmax.xlane.f32.xlu0 %v2644_v45  ;;  %v11591_v54 = vpop.f32.mrf.mxu1 }
 0x742   : > { %v2638_v16 = vsel %vm1217_vm1, %v11591_v54, -inf }
 0x743   : > { %v11593_v18 = vpop.f32.mrf.mxu1 }
 0x744   : > { %v2647_v17 = vsel %vm1217_vm1, %v11593_v18, -inf }
 0x745   : > { %2639 = vmax.xlane.f32.xlu0 %v2638_v16  ;;  %2648 = vmax.xlane.f32.xlu1 %v2647_v17  ;;  %v11599_v61 = vpop.f32.mrf.mxu1 }
 0x746   : > { %v2641_v59 = vsel %vm1217_vm1, %v11599_v61, -inf }
 0x749   : > { %2642 = vmax.xlane.f32.xlu1 %v2641_v59 }
 0x74f   : > { %v11603_v30 = vpop.f32.mrf.mxu1 }
 0x750   : > { %v2668_v45 = vsel %vm1217_vm1, %v11603_v30, -inf }
 0x751   : > { %2669 = vmax.xlane.f32.xlu0 %v2668_v45  ;;  %v11607_v41 = vpop.f32.mrf.mxu1 }
 0x752   : > { %v2662_v52 = vsel %vm1217_vm1, %v11607_v41, -inf }
 0x753   : > { %v11621_v16 = vpop.f32.mrf.mxu1 }
 0x755   : > { %2663 = vmax.xlane.f32.xlu0 %v2662_v52  ;;  %v2671_v52 = vsel %vm1217_vm1, %v11621_v16, -inf  ;;  %v11625_v17 = vpop.f32.mrf.mxu1 }
 0x756   : > { %v2665_v59 = vsel %vm1217_vm1, %v11625_v17, -inf }
 0x75a   : > { %3060 = vrot.lane.b32.xlu1 %v10820_v12, %s10519_s30 }
 0x75e   : > { %2995 = vrot.lane.b32.xlu1 %v10997_v26, %s10518_s17 }
 0x76b   : > { %2932 = vrot.lane.b32.xlu0 %v10889_v11, %s10518_s17 }
 0x76f   : > { %2873 = vrot.lane.b32.xlu0 %v10975_v38, %s10518_s17 }
 0x773   : > { %2871 = vrot.lane.b32.xlu0 %v10988_v57, %s10518_s17 }
 0x782   : > { %2672 = vmax.xlane.f32.xlu1 %v2671_v52 }
 0x786   : > { %2666 = vmax.xlane.f32.xlu1 %v2665_v59 }
 0x7ab   : > { %v2634_v45 = vpop.xlane.xlu0 %2633 }
 0x7ac   : > { %v2676_v4 = vsub.f32 %v11537_v23, %v2634_v45 }
 0x7ae   : > { %v2694_v0 = vmul.f32 1.442695, %v2676_v4 }
 0x7af   : > { %v2628_v60 = vpop.xlane.xlu0 %2627 }
 0x7b0   : > { %9899 = vpow2.f32 %v2694_v0  ;;  %v2674_v19 = vsub.f32 %v11543_v22, %v2628_v60 }
 0x7b1   : > { %v2631_v28 = vpop.xlane.xlu1 %2630 }
 0x7b2   : > { %v2690_v62 = vmul.f32 1.442695, %v2674_v19  ;;  %v2675_v20 = vsub.f32 %v11553_v6, %v2631_v28 }
 0x7b3   : > { %v2637_v58 = vpop.xlane.xlu0 %2636 }
 0x7b4   : > { %9901 = vpow2.f32 %v2690_v62  ;;  %v2677_v52 = vsub.f32 %v11549_v27, %v2637_v58  ;;  %v2692_v10 = vmul.f32 1.442695, %v2675_v20 }
 0x7b6   : > { %v2696_v53 = vmul.f32 1.442695, %v2677_v52 }
 0x7b8   : > { %9903 = vpow2.f32 %v2696_v53 }
 0x7b9   : > { %9905 = vpow2.f32 %v2692_v10 }
 0x7bb   : > { %v2658_v59 = vpop.xlane.xlu0 %2657 }
 0x7bc   : > { %v2684_v23 = vsub.f32 %v11563_v2, %v2658_v59 }
 0x7bd   : > { %v11634_v4 = vpop.eup %9899 }
 0x7be   : > { %v2710_v0 = vmul.f32 1.442695, %v2684_v23  ;;  %v2728_v22 = vsel %vm1217_vm1, %v11634_v4, 0.0 }
 0x7bf   : > { %v2652_v60 = vpop.xlane.xlu0 %2651  ;;  %v2661_v19 = vpop.xlane.xlu1 %2660  ;;  %2729 = vadd.xlane.f32.xlu0 %v2728_v22 }
 0x7c0   : > { %9907 = vpow2.f32 %v2710_v0  ;;  %v2682_v6 = vsub.f32 %v11569_v50, %v2652_v60  ;;  %v2685_v20 = vsub.f32 %v11575_v47, %v2661_v19 }
 0x7c1   : > { %v11640_v58 = vpop.eup %9901 }
 0x7c2   : > { %v2706_v10 = vmul.f32 1.442695, %v2682_v6  ;;  %v2712_v53 = vmul.f32 1.442695, %v2685_v20  ;;  %v2722_v27 = vsel %vm1217_vm1, %v11640_v58, 0.0 }
 0x7c3   : > { %v2655_v2 = vpop.xlane.xlu1 %2654  ;;  %2723 = vadd.xlane.f32.xlu0 %v2722_v27 }
 0x7c4   : > { %9909 = vpow2.f32 %v2706_v10  ;;  %v2683_v62 = vsub.f32 %v11581_v31, %v2655_v2 }
 0x7c5   : > { %v11645_v28 = vpop.eup %9903  ;;  %9911 = vpow2.f32 %v2712_v53 }
 0x7c6   : > { %v2708_v45 = vmul.f32 1.442695, %v2683_v62  ;;  %v2731_v50 = vsel %vm1217_vm1, %v11645_v28, 0.0  ;;  %v11649_v47 = vpop.eup %9905 }
 0x7c7   : > { %2732 = vadd.xlane.f32.xlu1 %v2731_v50  ;;  %v2725_v59 = vsel %vm1217_vm1, %v11649_v47, 0.0 }
 0x7c8   : > { %9913 = vpow2.f32 %v2708_v45 }
 0x7ca   : > { %v2646_v52 = vpop.xlane.xlu0 %2645 }
 0x7cb   : > { %v2680_v23 = vsub.f32 %v11587_v32, %v2646_v52  ;;  %2726 = vadd.xlane.f32.xlu1 %v2725_v59 }
 0x7cd   : > { %v11654_v0 = vpop.eup %9907  ;;  %v2702_v31 = vmul.f32 1.442695, %v2680_v23 }
 0x7ce   : > { %v2640_v22 = vpop.xlane.xlu0 %2639  ;;  %v2752_v60 = vsel %vm1217_vm1, %v11654_v0, 0.0  ;;  %v2649_v2 = vpop.xlane.xlu1 %2648 }
 0x7cf   : > { %9915 = vpow2.f32 %v2702_v31  ;;  %v2678_v19 = vsub.f32 %v11591_v54, %v2640_v22  ;;  %2753 = vadd.xlane.f32.xlu0 %v2752_v60 }
 0x7d1   : > { %v11659_v6 = vpop.eup %9909  ;;  %v2698_v20 = vmul.f32 1.442695, %v2678_v19 }
 0x7d2   : > { %v11661_v10 = vpop.eup %9911  ;;  %v2746_v32 = vsel %vm1217_vm1, %v11659_v6, 0.0  ;;  %v2643_v23 = vpop.xlane.xlu1 %2642 }
 0x7d3   : > { %9917 = vpow2.f32 %v2698_v20  ;;  %2747 = vadd.xlane.f32.xlu0 %v2746_v32  ;;  %v2755_v53 = vsel %vm1217_vm1, %v11661_v10, 0.0 }
 0x7d4   : > { %2756 = vadd.xlane.f32.xlu1 %v2755_v53  ;;  %v2681_v53 = vsub.f32 %v11593_v18, %v2649_v2 }
 0x7d5   : > { %v11667_v27 = vpop.eup %9913 }
 0x7d6   : > { %v2749_v54 = vsel %vm1217_vm1, %v11667_v27, 0.0  ;;  %v11681_v60 = vpop.permute.xlu1 %3060 }
 0x7d8   : > { %2750 = vadd.xlane.f32.xlu1 %v2749_v54  ;;  %v2704_v54 = vmul.f32 1.442695, %v2681_v53 }
 0x7da   : > { %v2670_v62 = vpop.xlane.xlu0 %2669  ;;  %v11685_v32 = vpop.permute.xlu1 %2995  ;;  %9919 = vpow2.f32 %v2704_v54 }
 0x7dc   : > { %v11671_v45 = vpop.eup %9915 }
 0x7dd   : > { %v2740_v50 = vsel %vm1217_vm1, %v11671_v45, 0.0 }
 0x7de   : > { %2741 = vadd.xlane.f32.xlu0 %v2740_v50  ;;  %v2664_v52 = vpop.xlane.xlu0 %2663  ;;  %v2679_v50 = vsub.f32 %v11599_v61, %v2643_v23 }
 0x7df   : > { %v2686_v18 = vsub.f32 %v11607_v41, %v2664_v52 }
 0x7e0   : > { %v11675_v59 = vpop.eup %9917 }
 0x7e1   : > { %v2734_v31 = vsel %vm1217_vm1, %v11675_v59, 0.0  ;;  %v2714_v2 = vmul.f32 1.442695, %v2686_v18 }
 0x7e2   : > { %2735 = vadd.xlane.f32.xlu0 %v2734_v31  ;;  %v11679_v22 = vpop.permute.xlu0 %2932  ;;  %v2700_v31 = vmul.f32 1.442695, %v2679_v50 }
 0x7e4   : > { %9921 = vpow2.f32 %v2700_v31 }
 0x7e6   : > { %v2874_v19 = vpop.permute.xlu0 %2873 }
 0x7e7   : > { %8868 = vmatprep.subr.bf16.mxu1 %v2874_v19 }
 0x7e8   : > { %8869 = vmatpush3.bf16.msra.mxu1 %v2874_v19  ;;  %v2688_v19 = vsub.f32 %v11603_v30, %v2670_v62  ;;  %v11707_v30 = vpop.eup %9919 }
 0x7e9   : > { %2993 = vrot.lane.b32.xlu1 %v10908_v40, %s10518_s17  ;;  %v2743_v52 = vsel %vm1217_vm1, %v11707_v30, 0.0 }
 0x7ea   : > { %v2872_v20 = vpop.permute.xlu0 %2871 }
 0x7eb   : > { %8870 = vmatprep.subr.bf16.mxu1 %v2872_v20 }
 0x7ec   : > { %8871 = vmatpush3.bf16.msra.mxu1 %v2872_v20  ;;  %v2718_v20 = vmul.f32 1.442695, %v2688_v19 }
 0x7ed   : > { %3129 = vrot.lane.b32.xlu1 %v10859_v46, %s10519_s30  ;;  %8884 = vmatprep.subr.bf16.mxu1 %v11685_v32 }
 0x7ee   : > { %9923 = vpow2.f32 %v2718_v20 }
 0x7ef   : > { %9925 = vpow2.f32 %v2714_v2 }
 0x7f1   : > { %v11714_v54 = vpop.eup %9921 }
 0x7f2   : > { %v2737_v50 = vsel %vm1217_vm1, %v11714_v54, 0.0 }
 0x7f8   : > { %3058 = vrot.lane.b32.xlu0 %v10824_v15, %s10519_s30 }
 0x7fb   : > { %v11720_v31 = vpop.eup %9923 }
 0x7fc   : > { %3054 = vrot.lane.b32.xlu0 %v10805_v1, %s10519_s30  ;;  %v11726_v19 = vpop.eup %9925 }
 0x7fd   : > { %v2758_v20 = vsel %vm1217_vm1, %v11726_v19, 0.0 }
 0x800   : > { %3198 = vrot.lane.b32.xlu0 %v10906_v39, %s10519_s30 }
 0x804   : > { %3127 = vrot.lane.b32.xlu0 %v10866_v55, %s10519_s30 }
 0x808   : > { %3192 = vrot.lane.b32.xlu0 %v10887_v9, %s10519_s30 }
 0x80b   : > { %v2673_v61 = vpop.xlane.xlu1 %2672 }
 0x80c   : > { %v2689_v23 = vsub.f32 %v11621_v16, %v2673_v61  ;;  %3194 = vrot.lane.b32.xlu0 %v10948_v14, %s10519_s30 }
 0x80e   : > { %v2720_v62 = vmul.f32 1.442695, %v2689_v23 }
 0x80f   : > { %v2667_v53 = vpop.xlane.xlu1 %2666 }
 0x810   : > { %9927 = vpow2.f32 %v2720_v62  ;;  %v2687_v41 = vsub.f32 %v11625_v17, %v2667_v53  ;;  %3125 = vrot.lane.b32.xlu0 %v10903_v37, %s10519_s30  ;;  %v2764_v17 = vsel %vm1217_vm1, %v11720_v31, 0.0 }
 0x811   : > { %2744 = vadd.xlane.f32.xlu1 %v2743_v52 }
 0x812   : > { %v2716_v16 = vmul.f32 1.442695, %v2687_v41 }
 0x814   : > { %9929 = vpow2.f32 %v2716_v16  ;;  %3261 = vrot.lane.b32.xlu0 %v10927_v3, %s10519_s30 }
 0x815   : > { %2738 = vadd.xlane.f32.xlu1 %v2737_v50 }
 0x818   : > { %3516 = vrot.lane.b32.xlu0 %v10929_v5, %s10519_s30 }
 0x819   : > { %2765 = vadd.xlane.f32.xlu1 %v2764_v17 }
 0x81c   : > { %3638 = vrot.lane.b32.xlu0 %v10970_v34, %s10519_s30 }
 0x81d   : > { %v11732_v18 = vpop.eup %9927  ;;  %2759 = vadd.xlane.f32.xlu1 %v2758_v20 }
 0x81e   : > { %v2767_v2 = vsel %vm1217_vm1, %v11732_v18, 0.0 }
 0x821   : > { %v11736_v61 = vpop.eup %9929  ;;  %2768 = vadd.xlane.f32.xlu1 %v2767_v2 }
 0x822   : > { %v2761_v23 = vsel %vm1217_vm1, %v11736_v61, 0.0 }
 0x825   : > { %2762 = vadd.xlane.f32.xlu1 %v2761_v23 }
 0x836   : > { %3056 = vrot.lane.b32.xlu1 %v10856_v44, %s10519_s30 }
 0x83a   : > { %3196 = vrot.lane.b32.xlu1 %v10910_v42, %s10519_s30 }
 0x83e   : > { %3123 = vrot.lane.b32.xlu1 %v10864_v48, %s10519_s30 }
 0x842   : > { %3267 = vrot.lane.b32.xlu1 %v10951_v21, %s10519_s30 }
 0x846   : > { %3265 = vrot.lane.b32.xlu1 %v10955_v33, %s10519_s30 }
 0x848   : > { %v2730_v62 = vpop.xlane.xlu0 %2729 }
 0x84a   : > { %3263 = vrot.lane.b32.xlu1 %v10986_v49, %s10519_s30 }
 0x84c   : > { %v2724_v53 = vpop.xlane.xlu0 %2723 }
 0x84e   : > { %3514 = vrot.lane.b32.xlu1 %v10944_v29, %s10519_s30 }
 0x850   : > { %v2733_v41 = vpop.xlane.xlu1 %2732 }
 0x851   : > { %9931 = vrcp.f32 %v2733_v41 }
 0x852   : > { %9933 = vrcp.f32 %v2724_v53 }
 0x853   : > { %9935 = vrcp.f32 %v2730_v62 }
 0x854   : > { %v2727_v52 = vpop.xlane.xlu1 %2726 }
 0x855   : > { %9937 = vrcp.f32 %v2727_v52 }
 0x858   : > { %v2754_v16 = vpop.xlane.xlu0 %2753 }
 0x85c   : > { %v2748_v50 = vpop.xlane.xlu0 %2747 }
 0x85d   : > { %v2757_v17 = vpop.xlane.xlu1 %2756 }
 0x85e   : > { %v9932_v20 = vpop.eup %9931  ;;  %9939 = vrcp.f32 %v2757_v17 }
 0x85f   : > { %v9934_v2 = vpop.eup %9933  ;;  %9941 = vrcp.f32 %v2748_v50  ;;  %v2777_v13 = vmul.f32 %v9932_v20, %v11645_v28 }
 0x860   : > { %v9936_v23 = vpop.eup %9935  ;;  %9943 = vrcp.f32 %v2754_v16  ;;  %v2771_v41 = vmul.f32 %v9934_v2, %v11640_v58 }
 0x861   : > { %v2751_v25 = vpop.xlane.xlu1 %2750  ;;  %v2775_v53 = vmul.f32 %v9936_v23, %v11634_v4 }
 0x862   : > { %v9938_v8 = vpop.eup %9937  ;;  %9945 = vrcp.f32 %v2751_v25 }
 0x863   : > { %v2773_v62 = vmul.f32 %v9938_v8, %v11649_v47  ;;  %v2803_v7 = vpack.c.bf16 %v2777_v13, %v2775_v53 }
 0x865   : > { %v2802_v52 = vpack.c.bf16 %v2773_v62, %v2771_v41 }
 0x867   : > { %v2742_v63 = vpop.xlane.xlu0 %2741  ;;  %8864 = vmatprep.mubr.msk.bf16.mxu0 %vm1217_vm1, %v2802_v52 }
 0x868   : > { %8865 = vmatmul.mubr.msk.bf16.vlgmr.msra.gmra.mxu0 %vm1217_vm1, %v2803_v7 }
 0x869   : > { %8877 = vmatpush3.bf16.msra.mxu0 %v11505_v36 }
 0x86a   : > { %8878 = vmatprep.subr.bf16.mxu0 %v11679_v22 }
 0x86b   : > { %v2736_v25 = vpop.xlane.xlu0 %2735  ;;  %v9940_v16 = vpop.eup %9939 }
 0x86c   : > { %v9942_v28 = vpop.eup %9941  ;;  %v2793_v4 = vmul.f32 %v9940_v16, %v11661_v10 }
 0x86d   : > { %8879 = vmatpush3.bf16.msra.mxu0 %v11679_v22  ;;  %v9944_v58 = vpop.eup %9943  ;;  %v2787_v47 = vmul.f32 %v9942_v28, %v11659_v6  ;;  %v3072_v22 = vsel %vm972_vm0, %v11681_v60, 0 }
 0x86e   : > { %9268 = vmatprep.subr.msk.bf16.mxu0 %vm972_vm0, %v11681_v60  ;;  %v2791_v36 = vmul.f32 %v9944_v58, %v11654_v0  ;;  %v2994_v0 = vpop.permute.xlu1 %2993 }
 0x86f   : > { %v9946_v8 = vpop.eup %9945  ;;  %v3059_v13 = vpop.permute.xlu0 %3058 }
 0x870   : > { %v2789_v7 = vmul.f32 %v9946_v8, %v11667_v27  ;;  %v2807_v20 = vpack.c.bf16 %v2793_v4, %v2791_v36  ;;  %v3069_v6 = vsel %vm972_vm0, %v3059_v13, 0 }
 0x872   : > { %v2806_v50 = vpack.c.bf16 %v2789_v7, %v2787_v47  ;;  %v3130_v27 = vpop.permute.xlu1 %3129 }
 0x873   : > { %v3055_v17 = vpop.permute.xlu0 %3054 }
 0x874   : > { %8880 = vmatprep.mubr.msk.bf16.mxu0 %vm1217_vm1, %v2806_v50 }
 0x875   : > { %8881 = vmatmul.mubr.msk.bf16.vlgmr.msra.gmra.mxu0 %vm1217_vm1, %v2807_v20 }
 0x876   : > { %8893 = vmatpush3.bf16.xpose.msra.mxu0 %v3072_v22  ;;  %8896 = vmatprep.mubr.msk.bf16.mxu0 %vm972_vm0, %v3055_v17 }
 0x877   : > { %9269 = vmatprep.subr.msk.bf16.mxu0 %vm972_vm0, %v3059_v13  ;;  %v3199_v10 = vpop.permute.xlu0 %3198 }
 0x87b   : > { %v11777_v23 = vpop.permute.xlu0 %3127 }
 0x87e   : > { %8895 = vmatpush3.bf16.xpose.msra.mxu0 %v3069_v6 }
 0x87f   : > { %9272 = vmatprep.subr.msk.bf16.mxu0 %vm972_vm0, %v3199_v10  ;;  %v3193_v62 = vpop.permute.xlu0 %3192 }
 0x883   : > { %v3195_v28 = vpop.permute.xlu0 %3194 }
 0x887   : > { %v3126_v50 = vpop.permute.xlu0 %3125 }
 0x89a   : > { %v2745_v2 = vpop.xlane.xlu1 %2744 }
 0x89b   : > { %9947 = vrcp.f32 %v2745_v2 }
 0x89c   : > { %9949 = vrcp.f32 %v2736_v25 }
 0x89d   : > { %9951 = vrcp.f32 %v2742_v63 }
 0x89e   : > { %v2739_v60 = vpop.xlane.xlu1 %2738 }
 0x89f   : > { %9953 = vrcp.f32 %v2739_v60 }
 0x8a2   : > { %v2766_v41 = vpop.xlane.xlu1 %2765 }
 0x8a6   : > { %v2760_v53 = vpop.xlane.xlu1 %2759 }
 0x8a8   : > { %v9948_v52 = vpop.eup %9947 }
 0x8a9   : > { %v9950_v16 = vpop.eup %9949  ;;  %v2785_v4 = vmul.f32 %v9948_v52, %v11707_v30 }
 0x8aa   : > { %v2769_v58 = vpop.xlane.xlu1 %2768  ;;  %v9952_v8 = vpop.eup %9951  ;;  %v2779_v25 = vmul.f32 %v9950_v16, %v11675_v59  ;;  %v3210_v59 = vsel %vm972_vm0, %v3199_v10, 0 }
 0x8ab   : > { %9955 = vrcp.f32 %v2769_v58  ;;  %v2783_v7 = vmul.f32 %v9952_v8, %v11671_v45  ;;  %v3262_v45 = vpop.permute.xlu0 %3261  ;;  %v3141_v8 = vsel %vm972_vm0, %v3130_v27, 0 }
 0x8ac   : > { %v9954_v13 = vpop.eup %9953  ;;  %9957 = vrcp.f32 %v2760_v53 }
 0x8ad   : > { %v2781_v63 = vmul.f32 %v9954_v13, %v11714_v54  ;;  %9959 = vrcp.f32 %v2766_v41  ;;  %v2805_v17 = vpack.c.bf16 %v2785_v4, %v2783_v7 }
 0x8ae   : > { %v2763_v47 = vpop.xlane.xlu1 %2762 }
 0x8af   : > { %9961 = vrcp.f32 %v2763_v47  ;;  %v2804_v36 = vpack.c.bf16 %v2781_v63, %v2779_v25  ;;  %v3517_v41 = vpop.permute.xlu0 %3516 }
 0x8b1   : > { %8872 = vmatprep.mubr.msk.bf16.mxu1 %vm1217_vm1, %v2804_v36 }
 0x8b2   : > { %8873 = vmatmul.mubr.msk.bf16.vlgmr.msra.gmra.mxu1 %vm1217_vm1, %v2805_v17  ;;  %v3057_v20 = vpop.permute.xlu1 %3056 }
 0x8b3   : > { %8885 = vmatpush3.bf16.msra.mxu1 %v11685_v32  ;;  %8897 = vmatmul.mubr.msk.bf16.vlgmr.msra.gmra.mxu0 %vm972_vm0, %v3057_v20 }
 0x8b4   : > { %8886 = vmatprep.subr.bf16.mxu1 %v2994_v0  ;;  %8909 = vmatpush3.bf16.xpose.msra.mxu0 %v3210_v59 }
 0x8b5   : > { %8912 = vmatprep.mubr.msk.bf16.mxu0 %vm972_vm0, %v3193_v62 }
 0x8b6   : > { %v3197_v30 = vpop.permute.xlu1 %3196 }
 0x8b7   : > { %8887 = vmatpush3.bf16.msra.mxu1 %v2994_v0  ;;  %9273 = vmatprep.subr.msk.bf16.mxu0 %vm972_vm0, %v3197_v30  ;;  %v3207_v32 = vsel %vm972_vm0, %v3197_v30, 0 }
 0x8b8   : > { %9270 = vmatprep.subr.msk.bf16.mxu1 %vm972_vm0, %v3130_v27  ;;  %v9956_v54 = vpop.eup %9955 }
 0x8b9   : > { %v9958_v22 = vpop.eup %9957  ;;  %v2801_v10 = vmul.f32 %v9956_v54, %v11732_v18 }
 0x8ba   : > { %v3124_v6 = vpop.permute.xlu1 %3123  ;;  %v9960_v2 = vpop.eup %9959  ;;  %v2795_v62 = vmul.f32 %v9958_v22, %v11726_v19 }
 0x8bb   : > { %v2799_v52 = vmul.f32 %v9960_v2, %v11720_v31  ;;  %v3138_v31 = vsel %vm972_vm0, %v11777_v23, 0 }
 0x8bc   : > { %v9962_v60 = vpop.eup %9961  ;;  %8911 = vmatpush3.bf16.xpose.msra.mxu0 %v3207_v32 }
 0x8bd   : > { %8924 = vmatprep.subr.bf16.mxu0 %v3517_v41  ;;  %v2797_v0 = vmul.f32 %v9962_v60, %v11736_v61  ;;  %v2809_v58 = vpack.c.bf16 %v2801_v10, %v2799_v52  ;;  %v11805_v61 = vpop.permute.xlu0 %3638 }
 0x8be   : > { %v3268_v53 = vpop.permute.xlu1 %3267 }
 0x8bf   : > { %v2808_v16 = vpack.c.bf16 %v2797_v0, %v2795_v62  ;;  %v3279_v27 = vsel %vm972_vm0, %v3268_v53, 0 }
 0x8c1   : > { %8888 = vmatprep.mubr.msk.bf16.mxu1 %vm1217_vm1, %v2808_v16 }
 0x8c2   : > { %8889 = vmatmul.mubr.msk.bf16.vlgmr.msra.gmra.mxu1 %vm1217_vm1, %v2809_v58  ;;  %v3266_v13 = vpop.permute.xlu1 %3265 }
 0x8c3   : > { %8901 = vmatpush3.bf16.xpose.msra.mxu1 %v3141_v8  ;;  %8913 = vmatmul.mubr.msk.bf16.vlgmr.msra.gmra.mxu0 %vm972_vm0, %v3195_v28 }
 0x8c4   : > { %9271 = vmatprep.subr.msk.bf16.mxu1 %vm972_vm0, %v11777_v23  ;;  %8904 = vmatprep.mubr.msk.bf16.mxu1 %vm972_vm0, %v3124_v6  ;;  %v3276_v23 = vsel %vm972_vm0, %v3266_v13, 0 }
 0x8c5   : > { %8925 = vmatpush3.bf16.msra.mxu0 %v3517_v41 }
 0x8c6   : > { %v3264_v19 = vpop.permute.xlu1 %3263 }
 0x8ca   : > { %v3515_v18 = vpop.permute.xlu1 %3514 }
 0x8cb   : > { %8903 = vmatpush3.bf16.xpose.msra.mxu1 %v3138_v31  ;;  %8926 = vmatprep.subr.bf16.mxu0 %v3515_v18 }
 0x8cc   : > { %9274 = vmatprep.subr.msk.bf16.mxu1 %vm972_vm0, %v3268_v53  ;;  %8927 = vmatpush3.bf16.msra.mxu0 %v3515_v18 }
 0x8cd   : > { %8940 = vmatprep.subr.bf16.mxu0 %v11805_v61 }
 0x8d2   : > { %8905 = vmatmul.mubr.msk.bf16.vlgmr.msra.gmra.mxu1 %vm972_vm0, %v3126_v50 }
 0x8d3   : > { %8917 = vmatpush3.bf16.xpose.msra.mxu1 %v3279_v27  ;;  %8920 = vmatprep.mubr.msk.bf16.mxu1 %vm972_vm0, %v3262_v45 }
 0x8d4   : > { %9275 = vmatprep.subr.msk.bf16.mxu1 %vm972_vm0, %v3266_v13 }
 0x8db   : > { %8919 = vmatpush3.bf16.xpose.msra.mxu1 %v3276_v23 }
 0x8e2   : > { %8921 = vmatmul.mubr.msk.bf16.vlgmr.msra.gmra.mxu1 %vm972_vm0, %v3264_v19 }
 0x928   : > { %v11815_v28 = vpop.f32.mrf.mxu0 }
 0x929   : > { %14176 = vst [vmem:[#allocation49_spill] sm:$0xff] %v11815_v28 }
 0x92a   : > { %v11817_v4 = vpop.f32.mrf.mxu0 }
 0x92c   : > { %v11819_v25 = vpop.f32.mrf.mxu0 }
 0x92d   : > { %14177 = vst [vmem:[#allocation50_spill] sm:$0xff] %v11819_v25 }
 0x92e   : > { %v11823_v47 = vpop.f32.mrf.mxu0 }
 0x935   : > { %v11825_v7 = vpop.f32.mrf.mxu0 }
 0x936   : > { %14178 = vst [vmem:[#allocation51_spill] sm:$0xff] %v11825_v7 }
 0x937   : > { %v11827_v36 = vpop.f32.mrf.mxu0 }
 0x938   : > { %14179 = vst [vmem:[#allocation52_spill] sm:$0xff] %v11827_v36 }
 0x939   : > { %v11829_v50 = vpop.f32.mrf.mxu0 }
 0x93a   : > { %14180 = vst [vmem:[#allocation53_spill] sm:$0xff] %v11829_v50 }
 0x93b   : > { %v11833_v20 = vpop.f32.mrf.mxu0 }
 0x93c   : > { %14181 = vst [vmem:[#allocation54_spill] sm:$0xff] %v11833_v20 }
 0x972   : > { %v11835_v59 = vpop.f32.mrf.mxu1 }
 0x973   : > { %14182 = vst [vmem:[#allocation55_spill] sm:$0xff] %v11835_v59  ;;  %v11837_v45 = vpop.f32.mrf.mxu0 }
 0x974   : > { %v11839_v30 = vpop.f32.mrf.mxu1  ;;  %v3336_v54 = vsel %vm1217_vm1, %v11837_v45, -inf }
 0x975   : > { %14183 = vst [vmem:[#allocation56_spill] sm:$0xff] %v11839_v30  ;;  %3337 = vmax.xlane.f32.xlu0 %v3336_v54  ;;  %v11843_v22 = vpop.f32.mrf.mxu0 }
 0x976   : > { %v11845_v6 = vpop.f32.mrf.mxu1  ;;  %v3330_v60 = vsel %vm1217_vm1, %v11843_v22, -inf }
 0x977   : > { %14184 = vst [vmem:[#allocation57_spill] sm:$0xff] %v11845_v6  ;;  %v11849_v32 = vpop.f32.mrf.mxu0 }
 0x978   : > { %v3339_v62 = vsel %vm1217_vm1, %v11849_v32, -inf  ;;  %v11859_v0 = vpop.f32.mrf.mxu1 }
 0x979   : > { %3331 = vmax.xlane.f32.xlu0 %v3330_v60  ;;  %v11853_v41 = vpop.f32.mrf.mxu0  ;;  %14185 = vst [vmem:[#allocation58_spill] sm:$0xff] %v11859_v0 }
 0x97a   : > { %v3333_v10 = vsel %vm1217_vm1, %v11853_v41, -inf }
 0x97b   : > { %3334 = vmax.xlane.f32.xlu1 %v3333_v10 }
 0x97d   : > { %3340 = vmax.xlane.f32.xlu0 %v3339_v62 }
 0x982   : > { %v11861_v53 = vpop.f32.mrf.mxu1 }
 0x983   : > { %14186 = vst [vmem:[#allocation59_spill] sm:$0xff] %v11861_v53  ;;  %v11863_v52 = vpop.f32.mrf.mxu0 }
 0x984   : > { %v11865_v16 = vpop.f32.mrf.mxu1  ;;  %v3360_v58 = vsel %vm1217_vm1, %v11863_v52, -inf }
 0x985   : > { %14187 = vst [vmem:[#allocation60_spill] sm:$0xff] %v11865_v16  ;;  %3361 = vmax.xlane.f32.xlu0 %v3360_v58  ;;  %v11869_v8 = vpop.f32.mrf.mxu0 }
 0x986   : > { %v11871_v13 = vpop.f32.mrf.mxu1  ;;  %v3354_v18 = vsel %vm1217_vm1, %v11869_v8, -inf }
 0x987   : > { %14188 = vst [vmem:[#allocation61_spill] sm:$0xff] %v11871_v13  ;;  %v11875_v31 = vpop.f32.mrf.mxu0 }
 0x988   : > { %v3363_v27 = vsel %vm1217_vm1, %v11875_v31, -inf  ;;  %v11885_v60 = vpop.f32.mrf.mxu1 }
 0x989   : > { %3355 = vmax.xlane.f32.xlu0 %v3354_v18  ;;  %3364 = vmax.xlane.f32.xlu1 %v3363_v27  ;;  %v11881_v23 = vpop.f32.mrf.mxu0  ;;  %14189 = vst [vmem:[#allocation62_spill] sm:$0xff] %v11885_v60 }
 0x98a   : > { %v3357_v54 = vsel %vm1217_vm1, %v11881_v23, -inf }
 0x98d   : > { %3358 = vmax.xlane.f32.xlu1 %v3357_v54 }
 0x992   : > { %v11887_v10 = vpop.f32.mrf.mxu1 }
 0x993   : > { %v3348_v62 = vsel %vm1217_vm1, %v11887_v10, -inf }
 0x994   : > { %3349 = vmax.xlane.f32.xlu0 %v3348_v62  ;;  %v11891_v58 = vpop.f32.mrf.mxu1 }
 0x995   : > { %v3342_v18 = vsel %vm1217_vm1, %v11891_v58, -inf }
 0x996   : > { %v11893_v19 = vpop.f32.mrf.mxu1 }
 0x997   : > { %v3351_v27 = vsel %vm1217_vm1, %v11893_v19, -inf }
 0x998   : > { %3343 = vmax.xlane.f32.xlu0 %v3342_v18  ;;  %3352 = vmax.xlane.f32.xlu1 %v3351_v27  ;;  %v11899_v54 = vpop.f32.mrf.mxu1 }
 0x999   : > { %v3345_v17 = vsel %vm1217_vm1, %v11899_v54, -inf }
 0x99c   : > { %3346 = vmax.xlane.f32.xlu1 %v3345_v17 }
 0x9a2   : > { %v11903_v2 = vpop.f32.mrf.mxu1 }
 0x9a3   : > { %v3372_v62 = vsel %vm1217_vm1, %v11903_v2, -inf }
 0x9a4   : > { %3373 = vmax.xlane.f32.xlu0 %v3372_v62  ;;  %v11907_v63 = vpop.f32.mrf.mxu1 }
 0x9a5   : > { %v3366_v53 = vsel %vm1217_vm1, %v11907_v63, -inf }
 0x9a6   : > { %v11921_v17 = vpop.f32.mrf.mxu1 }
 0x9a8   : > { %3367 = vmax.xlane.f32.xlu0 %v3366_v53  ;;  %v3375_v53 = vsel %vm1217_vm1, %v11921_v17, -inf  ;;  %v11925_v18 = vpop.f32.mrf.mxu1 }
 0x9a9   : > { %v3369_v27 = vsel %vm1217_vm1, %v11925_v18, -inf }
 0x9ad   : > { %3764 = vrot.lane.b32.xlu1 %v10820_v12, %s10520_s24 }
 0x9b1   : > { %3699 = vrot.lane.b32.xlu1 %v10997_v26, %s10519_s30 }
 0x9be   : > { %3636 = vrot.lane.b32.xlu0 %v10889_v11, %s10519_s30 }
 0x9c2   : > { %3577 = vrot.lane.b32.xlu0 %v10975_v38, %s10519_s30 }
 0x9c6   : > { %3575 = vrot.lane.b32.xlu0 %v10988_v57, %s10519_s30 }
 0x9d5   : > { %3376 = vmax.xlane.f32.xlu1 %v3375_v53 }
 0x9d9   : > { %3370 = vmax.xlane.f32.xlu1 %v3369_v27 }
 0x9fe   : > { %v3338_v62 = vpop.xlane.xlu0 %3337 }
 0x9ff   : > { %v3380_v13 = vsub.f32 %v11837_v45, %v3338_v62 }
 0xa01   : > { %v3398_v60 = vmul.f32 1.442695, %v3380_v13 }
 0xa02   : > { %v3332_v16 = vpop.xlane.xlu0 %3331 }
 0xa03   : > { %9963 = vpow2.f32 %v3398_v60  ;;  %v3378_v7 = vsub.f32 %v11843_v22, %v3332_v16 }
 0xa04   : > { %v3335_v50 = vpop.xlane.xlu1 %3334 }
 0xa05   : > { %v3394_v20 = vmul.f32 1.442695, %v3378_v7  ;;  %v3379_v36 = vsub.f32 %v11853_v41, %v3335_v50 }
 0xa06   : > { %v3341_v59 = vpop.xlane.xlu0 %3340 }
 0xa07   : > { %9965 = vpow2.f32 %v3394_v20  ;;  %v3381_v53 = vsub.f32 %v11849_v32, %v3341_v59  ;;  %v3396_v6 = vmul.f32 1.442695, %v3379_v36 }
 0xa09   : > { %v3400_v0 = vmul.f32 1.442695, %v3381_v53 }
 0xa0b   : > { %9967 = vpow2.f32 %v3400_v0 }
 0xa0c   : > { %9969 = vpow2.f32 %v3396_v6 }
 0xa0e   : > { %v3362_v27 = vpop.xlane.xlu0 %3361 }
 0xa0f   : > { %v3388_v45 = vsub.f32 %v11863_v52, %v3362_v27 }
 0xa10   : > { %v11934_v13 = vpop.eup %9963 }
 0xa11   : > { %v3414_v60 = vmul.f32 1.442695, %v3388_v45  ;;  %v3432_v22 = vsel %vm1217_vm1, %v11934_v13, 0.0 }
 0xa12   : > { %v3356_v7 = vpop.xlane.xlu0 %3355  ;;  %v3365_v16 = vpop.xlane.xlu1 %3364  ;;  %3433 = vadd.xlane.f32.xlu0 %v3432_v22 }
 0xa13   : > { %9971 = vpow2.f32 %v3414_v60  ;;  %v3386_v50 = vsub.f32 %v11869_v8, %v3356_v7  ;;  %v3389_v36 = vsub.f32 %v11875_v31, %v3365_v16 }
 0xa14   : > { %v11940_v20 = vpop.eup %9965 }
 0xa15   : > { %v3410_v59 = vmul.f32 1.442695, %v3386_v50  ;;  %v3416_v6 = vmul.f32 1.442695, %v3389_v36  ;;  %v3426_v32 = vsel %vm1217_vm1, %v11940_v20, 0.0 }
 0xa16   : > { %v3359_v41 = vpop.xlane.xlu1 %3358  ;;  %3427 = vadd.xlane.f32.xlu0 %v3426_v32 }
 0xa17   : > { %9973 = vpow2.f32 %v3410_v59  ;;  %v3387_v0 = vsub.f32 %v11881_v23, %v3359_v41 }
 0xa18   : > { %v11945_v52 = vpop.eup %9967  ;;  %9975 = vpow2.f32 %v3416_v6 }
 0xa19   : > { %v3412_v62 = vmul.f32 1.442695, %v3387_v0  ;;  %v3435_v8 = vsel %vm1217_vm1, %v11945_v52, 0.0  ;;  %v11949_v31 = vpop.eup %9969 }
 0xa1a   : > { %3436 = vadd.xlane.f32.xlu1 %v3435_v8  ;;  %v3429_v27 = vsel %vm1217_vm1, %v11949_v31, 0.0 }
 0xa1b   : > { %9977 = vpow2.f32 %v3412_v62 }
 0xa1d   : > { %v3350_v53 = vpop.xlane.xlu0 %3349 }
 0xa1e   : > { %v3384_v45 = vsub.f32 %v11887_v10, %v3350_v53  ;;  %3430 = vadd.xlane.f32.xlu1 %v3429_v27 }
 0xa20   : > { %v11954_v60 = vpop.eup %9971  ;;  %v3406_v23 = vmul.f32 1.442695, %v3384_v45 }
 0xa21   : > { %v3344_v22 = vpop.xlane.xlu0 %3343  ;;  %v3456_v7 = vsel %vm1217_vm1, %v11954_v60, 0.0  ;;  %v3353_v41 = vpop.xlane.xlu1 %3352 }
 0xa22   : > { %9979 = vpow2.f32 %v3406_v23  ;;  %v3382_v16 = vsub.f32 %v11891_v58, %v3344_v22  ;;  %3457 = vadd.xlane.f32.xlu0 %v3456_v7 }
 0xa24   : > { %v11959_v50 = vpop.eup %9973  ;;  %v3402_v36 = vmul.f32 1.442695, %v3382_v16 }
 0xa25   : > { %v11961_v59 = vpop.eup %9975  ;;  %v3450_v10 = vsel %vm1217_vm1, %v11959_v50, 0.0  ;;  %v3347_v45 = vpop.xlane.xlu1 %3346 }
 0xa26   : > { %9981 = vpow2.f32 %v3402_v36  ;;  %3451 = vadd.xlane.f32.xlu0 %v3450_v10  ;;  %v3459_v6 = vsel %vm1217_vm1, %v11961_v59, 0.0 }
 0xa27   : > { %3460 = vadd.xlane.f32.xlu1 %v3459_v6  ;;  %v3385_v6 = vsub.f32 %v11893_v19, %v3353_v41 }
 0xa28   : > { %v11967_v32 = vpop.eup %9977 }
 0xa29   : > { %v3453_v58 = vsel %vm1217_vm1, %v11967_v32, 0.0  ;;  %v11981_v7 = vpop.permute.xlu1 %3764 }
 0xa2b   : > { %3454 = vadd.xlane.f32.xlu1 %v3453_v58  ;;  %v3408_v58 = vmul.f32 1.442695, %v3385_v6 }
 0xa2d   : > { %v3374_v0 = vpop.xlane.xlu0 %3373  ;;  %v11985_v10 = vpop.permute.xlu1 %3699  ;;  %9983 = vpow2.f32 %v3408_v58 }
 0xa2f   : > { %v11971_v62 = vpop.eup %9979 }
 0xa30   : > { %v3444_v8 = vsel %vm1217_vm1, %v11971_v62, 0.0 }
 0xa31   : > { %3445 = vadd.xlane.f32.xlu0 %v3444_v8  ;;  %v3368_v53 = vpop.xlane.xlu0 %3367  ;;  %v3383_v8 = vsub.f32 %v11899_v54, %v3347_v45 }
 0xa32   : > { %v3390_v19 = vsub.f32 %v11907_v63, %v3368_v53 }
 0xa33   : > { %v11975_v27 = vpop.eup %9981 }
 0xa34   : > { %v3438_v23 = vsel %vm1217_vm1, %v11975_v27, 0.0  ;;  %v3418_v41 = vmul.f32 1.442695, %v3390_v19 }
 0xa35   : > { %3439 = vadd.xlane.f32.xlu0 %v3438_v23  ;;  %v11979_v22 = vpop.permute.xlu0 %3636  ;;  %v3404_v23 = vmul.f32 1.442695, %v3383_v8 }
 0xa37   : > { %9985 = vpow2.f32 %v3404_v23 }
 0xa39   : > { %v3578_v16 = vpop.permute.xlu0 %3577 }
 0xa3a   : > { %8932 = vmatprep.subr.bf16.mxu1 %v3578_v16 }
 0xa3b   : > { %8933 = vmatpush3.bf16.msra.mxu1 %v3578_v16  ;;  %v3392_v16 = vsub.f32 %v11903_v2, %v3374_v0  ;;  %v12007_v2 = vpop.eup %9983 }
 0xa3c   : > { %3697 = vrot.lane.b32.xlu1 %v10908_v40, %s10519_s30  ;;  %v3447_v53 = vsel %vm1217_vm1, %v12007_v2, 0.0 }
 0xa3d   : > { %v3576_v36 = vpop.permute.xlu0 %3575 }
 0xa3e   : > { %8934 = vmatprep.subr.bf16.mxu1 %v3576_v36 }
 0xa3f   : > { %8935 = vmatpush3.bf16.msra.mxu1 %v3576_v36  ;;  %v3422_v36 = vmul.f32 1.442695, %v3392_v16 }
 0xa40   : > { %3833 = vrot.lane.b32.xlu1 %v10859_v46, %s10520_s24  ;;  %8948 = vmatprep.subr.bf16.mxu1 %v11985_v10 }
 0xa41   : > { %9987 = vpow2.f32 %v3422_v36 }
 0xa42   : > { %9989 = vpow2.f32 %v3418_v41 }
 0xa44   : > { %v12014_v58 = vpop.eup %9985 }
 0xa45   : > { %v3441_v8 = vsel %vm1217_vm1, %v12014_v58, 0.0 }
 0xa4b   : > { %3762 = vrot.lane.b32.xlu0 %v10824_v15, %s10520_s24 }
 0xa4e   : > { %v12020_v23 = vpop.eup %9987 }
 0xa4f   : > { %3758 = vrot.lane.b32.xlu0 %v10805_v1, %s10520_s24  ;;  %v12026_v16 = vpop.eup %9989 }
 0xa50   : > { %v3462_v36 = vsel %vm1217_vm1, %v12026_v16, 0.0 }
 0xa53   : > { %3902 = vrot.lane.b32.xlu0 %v10906_v39, %s10520_s24 }
 0xa57   : > { %3831 = vrot.lane.b32.xlu0 %v10866_v55, %s10520_s24 }
 0xa5b   : > { %3896 = vrot.lane.b32.xlu0 %v10887_v9, %s10520_s24 }
 0xa5e   : > { %v3377_v54 = vpop.xlane.xlu1 %3376 }
 0xa5f   : > { %v3393_v45 = vsub.f32 %v11921_v17, %v3377_v54  ;;  %3898 = vrot.lane.b32.xlu0 %v10948_v14, %s10520_s24 }
 0xa61   : > { %v3424_v0 = vmul.f32 1.442695, %v3393_v45 }
 0xa62   : > { %v3371_v6 = vpop.xlane.xlu1 %3370 }
 0xa63   : > { %9991 = vpow2.f32 %v3424_v0  ;;  %v3391_v63 = vsub.f32 %v11925_v18, %v3371_v6  ;;  %3829 = vrot.lane.b32.xlu0 %v10903_v37, %s10520_s24  ;;  %v3468_v18 = vsel %vm1217_vm1, %v12020_v23, 0.0 }
 0xa64   : > { %3448 = vadd.xlane.f32.xlu1 %v3447_v53 }
 0xa65   : > { %v3420_v17 = vmul.f32 1.442695, %v3391_v63 }
 0xa67   : > { %9993 = vpow2.f32 %v3420_v17  ;;  %3965 = vrot.lane.b32.xlu0 %v10927_v3, %s10520_s24 }
 0xa68   : > { %3442 = vadd.xlane.f32.xlu1 %v3441_v8 }
 0xa6b   : > { %4220 = vrot.lane.b32.xlu0 %v10929_v5, %s10520_s24 }
 0xa6c   : > { %3469 = vadd.xlane.f32.xlu1 %v3468_v18 }
 0xa6f   : > { %4342 = vrot.lane.b32.xlu0 %v10970_v34, %s10520_s24 }
 0xa70   : > { %v12032_v19 = vpop.eup %9991  ;;  %3463 = vadd.xlane.f32.xlu1 %v3462_v36 }
 0xa71   : > { %v3471_v41 = vsel %vm1217_vm1, %v12032_v19, 0.0 }
 0xa74   : > { %v12036_v54 = vpop.eup %9993  ;;  %3472 = vadd.xlane.f32.xlu1 %v3471_v41 }
 0xa75   : > { %v3465_v45 = vsel %vm1217_vm1, %v12036_v54, 0.0 }
 0xa78   : > { %3466 = vadd.xlane.f32.xlu1 %v3465_v45 }
 0xa89   : > { %3760 = vrot.lane.b32.xlu1 %v10856_v44, %s10520_s24 }
 0xa8d   : > { %3900 = vrot.lane.b32.xlu1 %v10910_v42, %s10520_s24 }
 0xa91   : > { %3827 = vrot.lane.b32.xlu1 %v10864_v48, %s10520_s24 }
 0xa95   : > { %3971 = vrot.lane.b32.xlu1 %v10951_v21, %s10520_s24 }
 0xa99   : > { %3969 = vrot.lane.b32.xlu1 %v10955_v33, %s10520_s24 }
 0xa9b   : > { %v3434_v0 = vpop.xlane.xlu0 %3433 }
 0xa9d   : > { %3967 = vrot.lane.b32.xlu1 %v10986_v49, %s10520_s24 }
 0xa9f   : > { %v3428_v6 = vpop.xlane.xlu0 %3427 }
 0xaa1   : > { %4218 = vrot.lane.b32.xlu1 %v10944_v29, %s10520_s24 }
 0xaa3   : > { %v3437_v63 = vpop.xlane.xlu1 %3436 }
 0xaa4   : > { %9995 = vrcp.f32 %v3437_v63 }
 0xaa5   : > { %9997 = vrcp.f32 %v3428_v6 }
 0xaa6   : > { %9999 = vrcp.f32 %v3434_v0 }
 0xaa7   : > { %v3431_v53 = vpop.xlane.xlu1 %3430 }
 0xaa8   : > { %10001 = vrcp.f32 %v3431_v53 }
 0xaab   : > { %v3458_v17 = vpop.xlane.xlu0 %3457 }
 0xaaf   : > { %v3452_v8 = vpop.xlane.xlu0 %3451 }
 0xab0   : > { %v3461_v18 = vpop.xlane.xlu1 %3460 }
 0xab1   : > { %v9996_v36 = vpop.eup %9995  ;;  %10003 = vrcp.f32 %v3461_v18 }
 0xab2   : > { %v9998_v41 = vpop.eup %9997  ;;  %10005 = vrcp.f32 %v3452_v8  ;;  %v3481_v28 = vmul.f32 %v9996_v36, %v11945_v52 }
 0xab3   : > { %v10000_v45 = vpop.eup %9999  ;;  %10007 = vrcp.f32 %v3458_v17  ;;  %v3475_v63 = vmul.f32 %v9998_v41, %v11940_v20 }
 0xab4   : > { %v3455_v30 = vpop.xlane.xlu1 %3454  ;;  %v3479_v6 = vmul.f32 %v10000_v45, %v11934_v13 }
 0xab5   : > { %v10002_v56 = vpop.eup %10001  ;;  %10009 = vrcp.f32 %v3455_v30 }
 0xab6   : > { %v3477_v0 = vmul.f32 %v10002_v56, %v11949_v31  ;;  %v3507_v25 = vpack.c.bf16 %v3481_v28, %v3479_v6 }
 0xab8   : > { %v3506_v53 = vpack.c.bf16 %v3477_v0, %v3475_v63 }
 0xaba   : > { %v3446_v43 = vpop.xlane.xlu0 %3445  ;;  %8928 = vmatprep.mubr.msk.bf16.mxu0 %vm1217_vm1, %v3506_v53 }
 0xabb   : > { %8929 = vmatmul.mubr.msk.bf16.vlgmr.msra.gmra.mxu0 %vm1217_vm1, %v3507_v25 }
 0xabc   : > { %8941 = vmatpush3.bf16.msra.mxu0 %v11805_v61 }
 0xabd   : > { %8942 = vmatprep.subr.bf16.mxu0 %v11979_v22 }
 0xabe   : > { %v3440_v30 = vpop.xlane.xlu0 %3439  ;;  %v10004_v17 = vpop.eup %10003 }
 0xabf   : > { %v10006_v52 = vpop.eup %10005  ;;  %v3497_v13 = vmul.f32 %v10004_v17, %v11961_v59 }
 0xac0   : > { %8943 = vmatpush3.bf16.msra.mxu0 %v11979_v22  ;;  %v10008_v20 = vpop.eup %10007  ;;  %v3491_v31 = vmul.f32 %v10006_v52, %v11959_v50  ;;  %v3776_v22 = vsel %vm972_vm0, %v11981_v7, 0 }
 0xac1   : > { %9276 = vmatprep.subr.msk.bf16.mxu0 %vm972_vm0, %v11981_v7  ;;  %v3495_v61 = vmul.f32 %v10008_v20, %v11954_v60  ;;  %v3698_v60 = vpop.permute.xlu1 %3697 }
 0xac2   : > { %v10010_v56 = vpop.eup %10009  ;;  %v3763_v28 = vpop.permute.xlu0 %3762 }
 0xac3   : > { %v3493_v25 = vmul.f32 %v10010_v56, %v11967_v32  ;;  %v3511_v36 = vpack.c.bf16 %v3497_v13, %v3495_v61  ;;  %v3773_v50 = vsel %vm972_vm0, %v3763_v28, 0 }
 0xac5   : > { %v3510_v8 = vpack.c.bf16 %v3493_v25, %v3491_v31  ;;  %v3834_v32 = vpop.permute.xlu1 %3833 }
 0xac6   : > { %v3759_v18 = vpop.permute.xlu0 %3758 }
 0xac7   : > { %8944 = vmatprep.mubr.msk.bf16.mxu0 %vm1217_vm1, %v3510_v8 }
 0xac8   : > { %8945 = vmatmul.mubr.msk.bf16.vlgmr.msra.gmra.mxu0 %vm1217_vm1, %v3511_v36 }
 0xac9   : > { %8957 = vmatpush3.bf16.xpose.msra.mxu0 %v3776_v22  ;;  %8960 = vmatprep.mubr.msk.bf16.mxu0 %vm972_vm0, %v3759_v18 }
 0xaca   : > { %9277 = vmatprep.subr.msk.bf16.mxu0 %vm972_vm0, %v3763_v28  ;;  %v3903_v59 = vpop.permute.xlu0 %3902 }
 0xace   : > { %v12077_v45 = vpop.permute.xlu0 %3831 }
 0xad1   : > { %8959 = vmatpush3.bf16.xpose.msra.mxu0 %v3773_v50 }
 0xad2   : > { %9280 = vmatprep.subr.msk.bf16.mxu0 %vm972_vm0, %v3903_v59  ;;  %v3897_v0 = vpop.permute.xlu0 %3896 }
 0xad6   : > { %v3899_v52 = vpop.permute.xlu0 %3898 }
 0xada   : > { %v3830_v8 = vpop.permute.xlu0 %3829 }
 0xaed   : > { %v3449_v41 = vpop.xlane.xlu1 %3448 }
 0xaee   : > { %10011 = vrcp.f32 %v3449_v41 }
 0xaef   : > { %10013 = vrcp.f32 %v3440_v30 }
 0xaf0   : > { %10015 = vrcp.f32 %v3446_v43 }
 0xaf1   : > { %v3443_v7 = vpop.xlane.xlu1 %3442 }
 0xaf2   : > { %10017 = vrcp.f32 %v3443_v7 }
 0xaf5   : > { %v3470_v63 = vpop.xlane.xlu1 %3469 }
 0xaf9   : > { %v3464_v6 = vpop.xlane.xlu1 %3463 }
 0xafb   : > { %v10012_v53 = vpop.eup %10011 }
 0xafc   : > { %v10014_v17 = vpop.eup %10013  ;;  %v3489_v13 = vmul.f32 %v10012_v53, %v12007_v2 }
 0xafd   : > { %v3473_v20 = vpop.xlane.xlu1 %3472  ;;  %v10016_v56 = vpop.eup %10015  ;;  %v3483_v30 = vmul.f32 %v10014_v17, %v11975_v27  ;;  %v3914_v27 = vsel %vm972_vm0, %v3903_v59, 0 }
 0xafe   : > { %10019 = vrcp.f32 %v3473_v20  ;;  %v3487_v25 = vmul.f32 %v10016_v56, %v11971_v62  ;;  %v3966_v62 = vpop.permute.xlu0 %3965  ;;  %v3845_v56 = vsel %vm972_vm0, %v3834_v32, 0 }
 0xaff   : > { %v10018_v28 = vpop.eup %10017  ;;  %10021 = vrcp.f32 %v3464_v6 }
 0xb00   : > { %v3485_v43 = vmul.f32 %v10018_v28, %v12014_v58  ;;  %10023 = vrcp.f32 %v3470_v63  ;;  %v3509_v18 = vpack.c.bf16 %v3489_v13, %v3487_v25 }
 0xb01   : > { %v3467_v31 = vpop.xlane.xlu1 %3466 }
 0xb02   : > { %10025 = vrcp.f32 %v3467_v31  ;;  %v3508_v61 = vpack.c.bf16 %v3485_v43, %v3483_v30  ;;  %v4221_v63 = vpop.permute.xlu0 %4220 }
 0xb04   : > { %8936 = vmatprep.mubr.msk.bf16.mxu1 %vm1217_vm1, %v3508_v61 }
 0xb05   : > { %8937 = vmatmul.mubr.msk.bf16.vlgmr.msra.gmra.mxu1 %vm1217_vm1, %v3509_v18  ;;  %v3761_v36 = vpop.permute.xlu1 %3760 }
 0xb06   : > { %8949 = vmatpush3.bf16.msra.mxu1 %v11985_v10  ;;  %8961 = vmatmul.mubr.msk.bf16.vlgmr.msra.gmra.mxu0 %vm972_vm0, %v3761_v36 }
 0xb07   : > { %8950 = vmatprep.subr.bf16.mxu1 %v3698_v60  ;;  %8973 = vmatpush3.bf16.xpose.msra.mxu0 %v3914_v27 }
 0xb08   : > { %8976 = vmatprep.mubr.msk.bf16.mxu0 %vm972_vm0, %v3897_v0 }
 0xb09   : > { %v3901_v2 = vpop.permute.xlu1 %3900 }
 0xb0a   : > { %8951 = vmatpush3.bf16.msra.mxu1 %v3698_v60  ;;  %9281 = vmatprep.subr.msk.bf16.mxu0 %vm972_vm0, %v3901_v2  ;;  %v3911_v10 = vsel %vm972_vm0, %v3901_v2, 0 }
 0xb0b   : > { %9278 = vmatprep.subr.msk.bf16.mxu1 %vm972_vm0, %v3834_v32  ;;  %v10020_v58 = vpop.eup %10019 }
 0xb0c   : > { %v10022_v22 = vpop.eup %10021  ;;  %v3505_v59 = vmul.f32 %v10020_v58, %v12032_v19 }
 0xb0d   : > { %v3828_v50 = vpop.permute.xlu1 %3827  ;;  %v10024_v41 = vpop.eup %10023  ;;  %v3499_v0 = vmul.f32 %v10022_v22, %v12026_v16 }
 0xb0e   : > { %v3503_v53 = vmul.f32 %v10024_v41, %v12020_v23  ;;  %v3842_v23 = vsel %vm972_vm0, %v12077_v45, 0 }
 0xb0f   : > { %v10026_v7 = vpop.eup %10025  ;;  %8975 = vmatpush3.bf16.xpose.msra.mxu0 %v3911_v10 }
 0xb10   : > { %8988 = vmatprep.subr.bf16.mxu0 %v4221_v63  ;;  %v3501_v60 = vmul.f32 %v10026_v7, %v12036_v54  ;;  %v3513_v20 = vpack.c.bf16 %v3505_v59, %v3503_v53  ;;  %v12105_v54 = vpop.permute.xlu0 %4342 }
 0xb11   : > { %v3972_v6 = vpop.permute.xlu1 %3971 }
 0xb12   : > { %v3512_v17 = vpack.c.bf16 %v3501_v60, %v3499_v0  ;;  %v3983_v32 = vsel %vm972_vm0, %v3972_v6, 0 }
 0xb14   : > { %8952 = vmatprep.mubr.msk.bf16.mxu1 %vm1217_vm1, %v3512_v17 }
 0xb15   : > { %8953 = vmatmul.mubr.msk.bf16.vlgmr.msra.gmra.mxu1 %vm1217_vm1, %v3513_v20  ;;  %v3970_v28 = vpop.permute.xlu1 %3969 }
 0xb16   : > { %8965 = vmatpush3.bf16.xpose.msra.mxu1 %v3845_v56  ;;  %8977 = vmatmul.mubr.msk.bf16.vlgmr.msra.gmra.mxu0 %vm972_vm0, %v3899_v52 }
 0xb17   : > { %9279 = vmatprep.subr.msk.bf16.mxu1 %vm972_vm0, %v12077_v45  ;;  %8968 = vmatprep.mubr.msk.bf16.mxu1 %vm972_vm0, %v3828_v50  ;;  %v3980_v45 = vsel %vm972_vm0, %v3970_v28, 0 }
 0xb18   : > { %8989 = vmatpush3.bf16.msra.mxu0 %v4221_v63 }
 0xb19   : > { %v3968_v16 = vpop.permute.xlu1 %3967 }
 0xb1d   : > { %v4219_v19 = vpop.permute.xlu1 %4218 }
 0xb1e   : > { %8967 = vmatpush3.bf16.xpose.msra.mxu1 %v3842_v23  ;;  %8990 = vmatprep.subr.bf16.mxu0 %v4219_v19 }
 0xb1f   : > { %9282 = vmatprep.subr.msk.bf16.mxu1 %vm972_vm0, %v3972_v6  ;;  %8991 = vmatpush3.bf16.msra.mxu0 %v4219_v19 }
 0xb20   : > { %9004 = vmatprep.subr.bf16.mxu0 %v12105_v54 }
 0xb25   : > { %8969 = vmatmul.mubr.msk.bf16.vlgmr.msra.gmra.mxu1 %vm972_vm0, %v3830_v8 }
 0xb26   : > { %8981 = vmatpush3.bf16.xpose.msra.mxu1 %v3983_v32  ;;  %8984 = vmatprep.mubr.msk.bf16.mxu1 %vm972_vm0, %v3966_v62 }
 0xb27   : > { %9283 = vmatprep.subr.msk.bf16.mxu1 %vm972_vm0, %v3970_v28 }
 0xb2e   : > { %8983 = vmatpush3.bf16.xpose.msra.mxu1 %v3980_v45 }
 0xb35   : > { %8985 = vmatmul.mubr.msk.bf16.vlgmr.msra.gmra.mxu1 %vm972_vm0, %v3968_v16 }
 0xb7b   : > { %v12115_v52 = vpop.f32.mrf.mxu0 }
 0xb7c   : > { %14190 = vst [vmem:[#allocation63_spill] sm:$0xff] %v12115_v52 }
 0xb7d   : > { %v12117_v13 = vpop.f32.mrf.mxu0 }
 0xb7e   : > { %14191 = vst [vmem:[#allocation64_spill] sm:$0xff] %v12117_v13 }
 0xb7f   : > { %v12119_v30 = vpop.f32.mrf.mxu0 }
 0xb80   : > { %14192 = vst [vmem:[#allocation65_spill] sm:$0xff] %v12119_v30 }
 0xb81   : > { %v12123_v31 = vpop.f32.mrf.mxu0 }
 0xb82   : > { %14193 = vst [vmem:[#allocation66_spill] sm:$0xff] %v12123_v31 }
 0xb88   : > { %v12125_v25 = vpop.f32.mrf.mxu0 }
 0xb89   : > { %14194 = vst [vmem:[#allocation67_spill] sm:$0xff] %v12125_v25 }
 0xb8a   : > { %v12127_v61 = vpop.f32.mrf.mxu0 }
 0xb8b   : > { %14195 = vst [vmem:[#allocation68_spill] sm:$0xff] %v12127_v61 }
 0xb8c   : > { %v12129_v8 = vpop.f32.mrf.mxu0 }
 0xb8d   : > { %14196 = vst [vmem:[#allocation69_spill] sm:$0xff] %v12129_v8 }
 0xb8e   : > { %v12133_v36 = vpop.f32.mrf.mxu0 }
 0xb8f   : > { %14197 = vst [vmem:[#allocation70_spill] sm:$0xff] %v12133_v36 }
 0xbc5   : > { %v12135_v27 = vpop.f32.mrf.mxu1 }
 0xbc6   : > { %14198 = vst [vmem:[#allocation71_spill] sm:$0xff] %v12135_v27  ;;  %v12137_v62 = vpop.f32.mrf.mxu0 }
 0xbc7   : > { %v12139_v2 = vpop.f32.mrf.mxu1  ;;  %v4040_v58 = vsel %vm1217_vm1, %v12137_v62, -inf }
 0xbc8   : > { %14199 = vst [vmem:[#allocation72_spill] sm:$0xff] %v12139_v2  ;;  %4041 = vmax.xlane.f32.xlu0 %v4040_v58  ;;  %v12143_v22 = vpop.f32.mrf.mxu0 }
 0xbc9   : > { %v12145_v50 = vpop.f32.mrf.mxu1  ;;  %v4034_v63 = vsel %vm1217_vm1, %v12143_v22, -inf }
 0xbca   : > { %14200 = vst [vmem:[#allocation73_spill] sm:$0xff] %v12145_v50  ;;  %v12149_v10 = vpop.f32.mrf.mxu0 }
 0xbcb   : > { %v12151_v7 = vpop.f32.mrf.mxu1  ;;  %v4043_v6 = vsel %vm1217_vm1, %v12149_v10, -inf }
 0xbcc   : > { %14201 = vst [vmem:[#allocation74_spill] sm:$0xff] %v12151_v7  ;;  %4035 = vmax.xlane.f32.xlu0 %v4034_v63  ;;  %v12157_v0 = vpop.f32.mrf.mxu0 }
 0xbcd   : > { %v4037_v60 = vsel %vm1217_vm1, %v12157_v0, -inf }
 0xbce   : > { %4038 = vmax.xlane.f32.xlu1 %v4037_v60 }
 0xbd0   : > { %4044 = vmax.xlane.f32.xlu0 %v4043_v6 }
 0xbd5   : > { %v12163_v53 = vpop.f32.mrf.mxu1 }
 0xbd6   : > { %14202 = vst [vmem:[#allocation75_spill] sm:$0xff] %v12163_v53  ;;  %v12165_v17 = vpop.f32.mrf.mxu0 }
 0xbd7   : > { %v12167_v20 = vpop.f32.mrf.mxu1  ;;  %v4064_v56 = vsel %vm1217_vm1, %v12165_v17, -inf }
 0xbd8   : > { %14203 = vst [vmem:[#allocation76_spill] sm:$0xff] %v12167_v20  ;;  %4065 = vmax.xlane.f32.xlu0 %v4064_v56  ;;  %v12171_v28 = vpop.f32.mrf.mxu0 }
 0xbd9   : > { %v12173_v16 = vpop.f32.mrf.mxu1  ;;  %v4058_v45 = vsel %vm1217_vm1, %v12171_v28, -inf }
 0xbda   : > { %14204 = vst [vmem:[#allocation77_spill] sm:$0xff] %v12173_v16  ;;  %v12177_v19 = vpop.f32.mrf.mxu0 }
 0xbdb   : > { %v12179_v32 = vpop.f32.mrf.mxu1  ;;  %v4067_v58 = vsel %vm1217_vm1, %v12177_v19, -inf }
 0xbdc   : > { %14205 = vst [vmem:[#allocation78_spill] sm:$0xff] %v12179_v32  ;;  %4059 = vmax.xlane.f32.xlu0 %v4058_v45  ;;  %4068 = vmax.xlane.f32.xlu1 %v4067_v58  ;;  %v12187_v60 = vpop.f32.mrf.mxu0 }
 0xbdd   : > { %v4061_v6 = vsel %vm1217_vm1, %v12187_v60, -inf }
 0xbe0   : > { %4062 = vmax.xlane.f32.xlu1 %v4061_v6 }
 0xbe5   : > { %v12191_v56 = vpop.f32.mrf.mxu1 }
 0xbe6   : > { %v4052_v23 = vsel %vm1217_vm1, %v12191_v56, -inf }
 0xbe7   : > { %4053 = vmax.xlane.f32.xlu0 %v4052_v23  ;;  %v12195_v18 = vpop.f32.mrf.mxu1 }
 0xbe8   : > { %v4046_v45 = vsel %vm1217_vm1, %v12195_v18, -inf }
 0xbe9   : > { %v12197_v41 = vpop.f32.mrf.mxu1 }
 0xbea   : > { %v4055_v58 = vsel %vm1217_vm1, %v12197_v41, -inf }
 0xbeb   : > { %4047 = vmax.xlane.f32.xlu0 %v4046_v45  ;;  %4056 = vmax.xlane.f32.xlu1 %v4055_v58  ;;  %v12203_v63 = vpop.f32.mrf.mxu1 }
 0xbec   : > { %v4049_v6 = vsel %vm1217_vm1, %v12203_v63, -inf }
 0xbef   : > { %4050 = vmax.xlane.f32.xlu1 %v4049_v6 }
 0xbf5   : > { %v12207_v59 = vpop.f32.mrf.mxu1 }
 0xbf6   : > { %v4076_v23 = vsel %vm1217_vm1, %v12207_v59, -inf }
 0xbf7   : > { %4077 = vmax.xlane.f32.xlu0 %v4076_v23  ;;  %v12211_v43 = vpop.f32.mrf.mxu1 }
 0xbf8   : > { %v4070_v20 = vsel %vm1217_vm1, %v12211_v43, -inf }
 0xbf9   : > { %v12225_v45 = vpop.f32.mrf.mxu1 }
 0xbfb   : > { %4071 = vmax.xlane.f32.xlu0 %v4070_v20  ;;  %v4079_v20 = vsel %vm1217_vm1, %v12225_v45, -inf  ;;  %v12229_v58 = vpop.f32.mrf.mxu1 }
 0xbfc   : > { %v4073_v6 = vsel %vm1217_vm1, %v12229_v58, -inf }
 0xc00   : > { %4468 = vrot.lane.b32.xlu1 %v10820_v12, %s10521_s19 }
 0xc04   : > { %4403 = vrot.lane.b32.xlu1 %v10997_v26, %s10520_s24 }
 0xc11   : > { %4340 = vrot.lane.b32.xlu0 %v10889_v11, %s10520_s24 }
 0xc15   : > { %4281 = vrot.lane.b32.xlu0 %v10975_v38, %s10520_s24 }
 0xc19   : > { %4279 = vrot.lane.b32.xlu0 %v10988_v57, %s10520_s24 }
 0xc28   : > { %4080 = vmax.xlane.f32.xlu1 %v4079_v20 }
 0xc2c   : > { %4074 = vmax.xlane.f32.xlu1 %v4073_v6 }
 0xc51   : > { %v4042_v23 = vpop.xlane.xlu0 %4041 }
 0xc52   : > { %v4084_v32 = vsub.f32 %v12137_v62, %v4042_v23 }
 0xc54   : > { %v4102_v53 = vmul.f32 1.442695, %v4084_v32 }
 0xc55   : > { %v4036_v16 = vpop.xlane.xlu0 %4035 }
 0xc56   : > { %10027 = vpow2.f32 %v4102_v53  ;;  %v4082_v25 = vsub.f32 %v12143_v22, %v4036_v16 }
 0xc57   : > { %v4039_v8 = vpop.xlane.xlu1 %4038 }
 0xc58   : > { %v4098_v36 = vmul.f32 1.442695, %v4082_v25  ;;  %v4083_v61 = vsub.f32 %v12157_v0, %v4039_v8 }
 0xc59   : > { %v4045_v27 = vpop.xlane.xlu0 %4044 }
 0xc5a   : > { %10029 = vpow2.f32 %v4098_v36  ;;  %v4085_v20 = vsub.f32 %v12149_v10, %v4045_v27  ;;  %v4100_v50 = vmul.f32 1.442695, %v4083_v61 }
 0xc5c   : > { %v4104_v2 = vmul.f32 1.442695, %v4085_v20 }
 0xc5e   : > { %10031 = vpow2.f32 %v4104_v2 }
 0xc5f   : > { %10033 = vpow2.f32 %v4100_v50 }
 0xc61   : > { %v4066_v6 = vpop.xlane.xlu0 %4065 }
 0xc62   : > { %v4092_v62 = vsub.f32 %v12165_v17, %v4066_v6 }
 0xc63   : > { %v12238_v32 = vpop.eup %10027 }
 0xc64   : > { %v4118_v53 = vmul.f32 1.442695, %v4092_v62  ;;  %v4136_v22 = vsel %vm1217_vm1, %v12238_v32, 0.0 }
 0xc65   : > { %v4060_v25 = vpop.xlane.xlu0 %4059  ;;  %v4069_v16 = vpop.xlane.xlu1 %4068  ;;  %4137 = vadd.xlane.f32.xlu0 %v4136_v22 }
 0xc66   : > { %10035 = vpow2.f32 %v4118_v53  ;;  %v4090_v8 = vsub.f32 %v12171_v28, %v4060_v25  ;;  %v4093_v61 = vsub.f32 %v12177_v19, %v4069_v16 }
 0xc67   : > { %v12244_v36 = vpop.eup %10029 }
 0xc68   : > { %v4114_v27 = vmul.f32 1.442695, %v4090_v8  ;;  %v4120_v2 = vmul.f32 1.442695, %v4093_v61  ;;  %v4130_v50 = vsel %vm1217_vm1, %v12244_v36, 0.0 }
 0xc69   : > { %v4063_v10 = vpop.xlane.xlu1 %4062  ;;  %4131 = vadd.xlane.f32.xlu0 %v4130_v50 }
 0xc6a   : > { %10037 = vpow2.f32 %v4114_v27  ;;  %v4091_v0 = vsub.f32 %v12187_v60, %v4063_v10 }
 0xc6b   : > { %v12249_v17 = vpop.eup %10031  ;;  %10039 = vpow2.f32 %v4120_v2 }
 0xc6c   : > { %v4116_v23 = vmul.f32 1.442695, %v4091_v0  ;;  %v4139_v28 = vsel %vm1217_vm1, %v12249_v17, 0.0  ;;  %v12253_v19 = vpop.eup %10033 }
 0xc6d   : > { %4140 = vadd.xlane.f32.xlu1 %v4139_v28  ;;  %v4133_v6 = vsel %vm1217_vm1, %v12253_v19, 0.0 }
 0xc6e   : > { %10041 = vpow2.f32 %v4116_v23 }
 0xc70   : > { %v4054_v20 = vpop.xlane.xlu0 %4053 }
 0xc71   : > { %v4088_v62 = vsub.f32 %v12191_v56, %v4054_v20  ;;  %4134 = vadd.xlane.f32.xlu1 %v4133_v6 }
 0xc73   : > { %v12258_v53 = vpop.eup %10035  ;;  %v4110_v60 = vmul.f32 1.442695, %v4088_v62 }
 0xc74   : > { %v4048_v22 = vpop.xlane.xlu0 %4047  ;;  %v4160_v25 = vsel %vm1217_vm1, %v12258_v53, 0.0  ;;  %v4057_v10 = vpop.xlane.xlu1 %4056 }
 0xc75   : > { %10043 = vpow2.f32 %v4110_v60  ;;  %v4086_v16 = vsub.f32 %v12195_v18, %v4048_v22  ;;  %4161 = vadd.xlane.f32.xlu0 %v4160_v25 }
 0xc77   : > { %v12263_v8 = vpop.eup %10037  ;;  %v4106_v61 = vmul.f32 1.442695, %v4086_v16 }
 0xc78   : > { %v12265_v27 = vpop.eup %10039  ;;  %v4154_v56 = vsel %vm1217_vm1, %v12263_v8, 0.0  ;;  %v4051_v62 = vpop.xlane.xlu1 %4050 }
 0xc79   : > { %10045 = vpow2.f32 %v4106_v61  ;;  %4155 = vadd.xlane.f32.xlu0 %v4154_v56  ;;  %v4163_v2 = vsel %vm1217_vm1, %v12265_v27, 0.0 }
 0xc7a   : > { %4164 = vadd.xlane.f32.xlu1 %v4163_v2  ;;  %v4089_v2 = vsub.f32 %v12197_v41, %v4057_v10 }
 0xc7b   : > { %v12271_v50 = vpop.eup %10041 }
 0xc7c   : > { %v4157_v18 = vsel %vm1217_vm1, %v12271_v50, 0.0  ;;  %v12285_v25 = vpop.permute.xlu1 %4468 }
 0xc7e   : > { %4158 = vadd.xlane.f32.xlu1 %v4157_v18  ;;  %v4112_v18 = vmul.f32 1.442695, %v4089_v2 }
 0xc80   : > { %v4078_v0 = vpop.xlane.xlu0 %4077  ;;  %v12289_v56 = vpop.permute.xlu1 %4403  ;;  %10047 = vpow2.f32 %v4112_v18 }
 0xc82   : > { %v12275_v23 = vpop.eup %10043 }
 0xc83   : > { %v4148_v28 = vsel %vm1217_vm1, %v12275_v23, 0.0 }
 0xc84   : > { %4149 = vadd.xlane.f32.xlu0 %v4148_v28  ;;  %v4072_v20 = vpop.xlane.xlu0 %4071  ;;  %v4087_v28 = vsub.f32 %v12203_v63, %v4051_v62 }
 0xc85   : > { %v4094_v41 = vsub.f32 %v12211_v43, %v4072_v20 }
 0xc86   : > { %v12279_v6 = vpop.eup %10045 }
 0xc87   : > { %v4142_v60 = vsel %vm1217_vm1, %v12279_v6, 0.0  ;;  %v4122_v10 = vmul.f32 1.442695, %v4094_v41 }
 0xc88   : > { %4143 = vadd.xlane.f32.xlu0 %v4142_v60  ;;  %v12283_v22 = vpop.permute.xlu0 %4340  ;;  %v4108_v60 = vmul.f32 1.442695, %v4087_v28 }
 0xc8a   : > { %10049 = vpow2.f32 %v4108_v60 }
 0xc8c   : > { %v4282_v16 = vpop.permute.xlu0 %4281 }
 0xc8d   : > { %8996 = vmatprep.subr.bf16.mxu1 %v4282_v16 }
 0xc8e   : > { %8997 = vmatpush3.bf16.msra.mxu1 %v4282_v16  ;;  %v4096_v16 = vsub.f32 %v12207_v59, %v4078_v0  ;;  %v12311_v59 = vpop.eup %10047 }
 0xc8f   : > { %4401 = vrot.lane.b32.xlu1 %v10908_v40, %s10520_s24  ;;  %v4151_v20 = vsel %vm1217_vm1, %v12311_v59, 0.0 }
 0xc90   : > { %v4280_v61 = vpop.permute.xlu0 %4279 }
 0xc91   : > { %8998 = vmatprep.subr.bf16.mxu1 %v4280_v61 }
 0xc92   : > { %8999 = vmatpush3.bf16.msra.mxu1 %v4280_v61  ;;  %v4126_v61 = vmul.f32 1.442695, %v4096_v16 }
 0xc93   : > { %4537 = vrot.lane.b32.xlu1 %v10859_v46, %s10521_s19  ;;  %9012 = vmatprep.subr.bf16.mxu1 %v12289_v56 }
 0xc94   : > { %10051 = vpow2.f32 %v4126_v61 }
 0xc95   : > { %10053 = vpow2.f32 %v4122_v10 }
 0xc97   : > { %v12318_v18 = vpop.eup %10049 }
 0xc98   : > { %v4145_v28 = vsel %vm1217_vm1, %v12318_v18, 0.0 }
 0xc9e   : > { %4466 = vrot.lane.b32.xlu0 %v10824_v15, %s10521_s19 }
 0xca1   : > { %v12324_v60 = vpop.eup %10051 }
 0xca2   : > { %4462 = vrot.lane.b32.xlu0 %v10805_v1, %s10521_s19  ;;  %v12330_v16 = vpop.eup %10053 }
 0xca3   : > { %v4166_v61 = vsel %vm1217_vm1, %v12330_v16, 0.0 }
 0xca6   : > { %4606 = vrot.lane.b32.xlu0 %v10906_v39, %s10521_s19 }
 0xcaa   : > { %4535 = vrot.lane.b32.xlu0 %v10866_v55, %s10521_s19 }
 0xcae   : > { %4600 = vrot.lane.b32.xlu0 %v10887_v9, %s10521_s19 }
 0xcb1   : > { %v4081_v63 = vpop.xlane.xlu1 %4080 }
 0xcb2   : > { %v4097_v62 = vsub.f32 %v12225_v45, %v4081_v63  ;;  %4602 = vrot.lane.b32.xlu0 %v10948_v14, %s10521_s19 }
 0xcb4   : > { %v4128_v0 = vmul.f32 1.442695, %v4097_v62 }
 0xcb5   : > { %v4075_v2 = vpop.xlane.xlu1 %4074 }
 0xcb6   : > { %10055 = vpow2.f32 %v4128_v0  ;;  %v4095_v43 = vsub.f32 %v12229_v58, %v4075_v2  ;;  %4533 = vrot.lane.b32.xlu0 %v10903_v37, %s10521_s19  ;;  %v4172_v58 = vsel %vm1217_vm1, %v12324_v60, 0.0 }
 0xcb7   : > { %4152 = vadd.xlane.f32.xlu1 %v4151_v20 }
 0xcb8   : > { %v4124_v45 = vmul.f32 1.442695, %v4095_v43 }
 0xcba   : > { %10057 = vpow2.f32 %v4124_v45  ;;  %4669 = vrot.lane.b32.xlu0 %v10927_v3, %s10521_s19 }
 0xcbb   : > { %4146 = vadd.xlane.f32.xlu1 %v4145_v28 }
 0xcbe   : > { %4924 = vrot.lane.b32.xlu0 %v10929_v5, %s10521_s19 }
 0xcbf   : > { %4173 = vadd.xlane.f32.xlu1 %v4172_v58 }
 0xcc2   : > { %5046 = vrot.lane.b32.xlu0 %v10970_v34, %s10521_s19 }
 0xcc3   : > { %v12336_v41 = vpop.eup %10055  ;;  %4167 = vadd.xlane.f32.xlu1 %v4166_v61 }
 0xcc4   : > { %v4175_v10 = vsel %vm1217_vm1, %v12336_v41, 0.0 }
 0xcc7   : > { %v12340_v63 = vpop.eup %10057  ;;  %4176 = vadd.xlane.f32.xlu1 %v4175_v10 }
 0xcc8   : > { %v4169_v62 = vsel %vm1217_vm1, %v12340_v63, 0.0 }
 0xccb   : > { %4170 = vadd.xlane.f32.xlu1 %v4169_v62 }
 0xcdc   : > { %4464 = vrot.lane.b32.xlu1 %v10856_v44, %s10521_s19 }
 0xce0   : > { %4604 = vrot.lane.b32.xlu1 %v10910_v42, %s10521_s19 }
 0xce4   : > { %4531 = vrot.lane.b32.xlu1 %v10864_v48, %s10521_s19 }
 0xce8   : > { %4675 = vrot.lane.b32.xlu1 %v10951_v21, %s10521_s19 }
 0xcec   : > { %4673 = vrot.lane.b32.xlu1 %v10955_v33, %s10521_s19 }
 0xcee   : > { %v4138_v0 = vpop.xlane.xlu0 %4137 }
 0xcf0   : > { %4671 = vrot.lane.b32.xlu1 %v10986_v49, %s10521_s19 }
 0xcf2   : > { %v4132_v2 = vpop.xlane.xlu0 %4131 }
 0xcf4   : > { %4922 = vrot.lane.b32.xlu1 %v10944_v29, %s10521_s19 }
 0xcf6   : > { %v4141_v43 = vpop.xlane.xlu1 %4140 }
 0xcf7   : > { %10059 = vrcp.f32 %v4141_v43 }
 0xcf8   : > { %10061 = vrcp.f32 %v4132_v2 }
 0xcf9   : > { %10063 = vrcp.f32 %v4138_v0 }
 0xcfa   : > { %v4135_v20 = vpop.xlane.xlu1 %4134 }
 0xcfb   : > { %10065 = vrcp.f32 %v4135_v20 }
 0xcfe   : > { %v4162_v45 = vpop.xlane.xlu0 %4161 }
 0xd02   : > { %v4156_v28 = vpop.xlane.xlu0 %4155 }
 0xd03   : > { %v4165_v58 = vpop.xlane.xlu1 %4164 }
 0xd04   : > { %v10060_v61 = vpop.eup %10059  ;;  %10067 = vrcp.f32 %v4165_v58 }
 0xd05   : > { %v10062_v10 = vpop.eup %10061  ;;  %10069 = vrcp.f32 %v4156_v28  ;;  %v4185_v30 = vmul.f32 %v10060_v61, %v12249_v17 }
 0xd06   : > { %v10064_v62 = vpop.eup %10063  ;;  %10071 = vrcp.f32 %v4162_v45  ;;  %v4179_v43 = vmul.f32 %v10062_v10, %v12244_v36 }
 0xd07   : > { %v4159_v7 = vpop.xlane.xlu1 %4158  ;;  %v4183_v2 = vmul.f32 %v10064_v62, %v12238_v32 }
 0xd08   : > { %v10066_v52 = vpop.eup %10065  ;;  %10073 = vrcp.f32 %v4159_v7 }
 0xd09   : > { %v4181_v0 = vmul.f32 %v10066_v52, %v12253_v19  ;;  %v4211_v31 = vpack.c.bf16 %v4185_v30, %v4183_v2 }
 0xd0b   : > { %v4210_v20 = vpack.c.bf16 %v4181_v0, %v4179_v43 }
 0xd0d   : > { %v4150_v13 = vpop.xlane.xlu0 %4149  ;;  %8992 = vmatprep.mubr.msk.bf16.mxu0 %vm1217_vm1, %v4210_v20 }
 0xd0e   : > { %8993 = vmatmul.mubr.msk.bf16.vlgmr.msra.gmra.mxu0 %vm1217_vm1, %v4211_v31 }
 0xd0f   : > { %9005 = vmatpush3.bf16.msra.mxu0 %v12105_v54 }
 0xd10   : > { %9006 = vmatprep.subr.bf16.mxu0 %v12283_v22 }
 0xd11   : > { %v4144_v7 = vpop.xlane.xlu0 %4143  ;;  %v10068_v45 = vpop.eup %10067 }
 0xd12   : > { %v10070_v17 = vpop.eup %10069  ;;  %v4201_v32 = vmul.f32 %v10068_v45, %v12265_v27 }
 0xd13   : > { %9007 = vmatpush3.bf16.msra.mxu0 %v12283_v22  ;;  %v10072_v36 = vpop.eup %10071  ;;  %v4195_v19 = vmul.f32 %v10070_v17, %v12263_v8  ;;  %v4480_v22 = vsel %vm972_vm0, %v12285_v25, 0 }
 0xd14   : > { %9284 = vmatprep.subr.msk.bf16.mxu0 %vm972_vm0, %v12285_v25  ;;  %v4199_v54 = vmul.f32 %v10072_v36, %v12258_v53  ;;  %v4402_v53 = vpop.permute.xlu1 %4401 }
 0xd15   : > { %v10074_v52 = vpop.eup %10073  ;;  %v4467_v30 = vpop.permute.xlu0 %4466 }
 0xd16   : > { %v4197_v31 = vmul.f32 %v10074_v52, %v12271_v50  ;;  %v4215_v61 = vpack.c.bf16 %v4201_v32, %v4199_v54  ;;  %v4477_v8 = vsel %vm972_vm0, %v4467_v30, 0 }
 0xd18   : > { %v4214_v28 = vpack.c.bf16 %v4197_v31, %v4195_v19  ;;  %v4538_v50 = vpop.permute.xlu1 %4537 }
 0xd19   : > { %v4463_v58 = vpop.permute.xlu0 %4462 }
 0xd1a   : > { %9008 = vmatprep.mubr.msk.bf16.mxu0 %vm1217_vm1, %v4214_v28 }
 0xd1b   : > { %9009 = vmatmul.mubr.msk.bf16.vlgmr.msra.gmra.mxu0 %vm1217_vm1, %v4215_v61 }
 0xd1c   : > { %9021 = vmatpush3.bf16.xpose.msra.mxu0 %v4480_v22  ;;  %9024 = vmatprep.mubr.msk.bf16.mxu0 %vm972_vm0, %v4463_v58 }
 0xd1d   : > { %9285 = vmatprep.subr.msk.bf16.mxu0 %vm972_vm0, %v4467_v30  ;;  %v4607_v27 = vpop.permute.xlu0 %4606 }
 0xd21   : > { %v12381_v62 = vpop.permute.xlu0 %4535 }
 0xd24   : > { %9023 = vmatpush3.bf16.xpose.msra.mxu0 %v4477_v8 }
 0xd25   : > { %9288 = vmatprep.subr.msk.bf16.mxu0 %vm972_vm0, %v4607_v27  ;;  %v4601_v0 = vpop.permute.xlu0 %4600 }
 0xd29   : > { %v4603_v17 = vpop.permute.xlu0 %4602 }
 0xd2d   : > { %v4534_v28 = vpop.permute.xlu0 %4533 }
 0xd40   : > { %v4153_v10 = vpop.xlane.xlu1 %4152 }
 0xd41   : > { %10075 = vrcp.f32 %v4153_v10 }
 0xd42   : > { %10077 = vrcp.f32 %v4144_v7 }
 0xd43   : > { %10079 = vrcp.f32 %v4150_v13 }
 0xd44   : > { %v4147_v25 = vpop.xlane.xlu1 %4146 }
 0xd45   : > { %10081 = vrcp.f32 %v4147_v25 }
 0xd48   : > { %v4174_v43 = vpop.xlane.xlu1 %4173 }
 0xd4c   : > { %v4168_v2 = vpop.xlane.xlu1 %4167 }
 0xd4e   : > { %v10076_v20 = vpop.eup %10075 }
 0xd4f   : > { %v10078_v45 = vpop.eup %10077  ;;  %v4193_v32 = vmul.f32 %v10076_v20, %v12311_v59 }
 0xd50   : > { %v4177_v36 = vpop.xlane.xlu1 %4176  ;;  %v10080_v52 = vpop.eup %10079  ;;  %v4187_v7 = vmul.f32 %v10078_v45, %v12279_v6  ;;  %v4618_v6 = vsel %vm972_vm0, %v4607_v27, 0 }
 0xd51   : > { %10083 = vrcp.f32 %v4177_v36  ;;  %v4191_v31 = vmul.f32 %v10080_v52, %v12275_v23  ;;  %v4670_v23 = vpop.permute.xlu0 %4669  ;;  %v4549_v52 = vsel %vm972_vm0, %v4538_v50, 0 }
 0xd52   : > { %v10082_v30 = vpop.eup %10081  ;;  %10085 = vrcp.f32 %v4168_v2 }
 0xd53   : > { %v4189_v13 = vmul.f32 %v10082_v30, %v12318_v18  ;;  %10087 = vrcp.f32 %v4174_v43  ;;  %v4213_v58 = vpack.c.bf16 %v4193_v32, %v4191_v31 }
 0xd54   : > { %v4171_v19 = vpop.xlane.xlu1 %4170 }
 0xd55   : > { %10089 = vrcp.f32 %v4171_v19  ;;  %v4212_v54 = vpack.c.bf16 %v4189_v13, %v4187_v7  ;;  %v4925_v43 = vpop.permute.xlu0 %4924 }
 0xd57   : > { %9000 = vmatprep.mubr.msk.bf16.mxu1 %vm1217_vm1, %v4212_v54 }
 0xd58   : > { %9001 = vmatmul.mubr.msk.bf16.vlgmr.msra.gmra.mxu1 %vm1217_vm1, %v4213_v58  ;;  %v4465_v61 = vpop.permute.xlu1 %4464 }
 0xd59   : > { %9013 = vmatpush3.bf16.msra.mxu1 %v12289_v56  ;;  %9025 = vmatmul.mubr.msk.bf16.vlgmr.msra.gmra.mxu0 %vm972_vm0, %v4465_v61 }
 0xd5a   : > { %9014 = vmatprep.subr.bf16.mxu1 %v4402_v53  ;;  %9037 = vmatpush3.bf16.xpose.msra.mxu0 %v4618_v6 }
 0xd5b   : > { %9040 = vmatprep.mubr.msk.bf16.mxu0 %vm972_vm0, %v4601_v0 }
 0xd5c   : > { %v4605_v59 = vpop.permute.xlu1 %4604 }
 0xd5d   : > { %9015 = vmatpush3.bf16.msra.mxu1 %v4402_v53  ;;  %9289 = vmatprep.subr.msk.bf16.mxu0 %vm972_vm0, %v4605_v59  ;;  %v4615_v56 = vsel %vm972_vm0, %v4605_v59, 0 }
 0xd5e   : > { %9286 = vmatprep.subr.msk.bf16.mxu1 %vm972_vm0, %v4538_v50  ;;  %v10084_v18 = vpop.eup %10083 }
 0xd5f   : > { %v10086_v22 = vpop.eup %10085  ;;  %v4209_v27 = vmul.f32 %v10084_v18, %v12336_v41 }
 0xd60   : > { %v4532_v8 = vpop.permute.xlu1 %4531  ;;  %v10088_v10 = vpop.eup %10087  ;;  %v4203_v0 = vmul.f32 %v10086_v22, %v12330_v16 }
 0xd61   : > { %v4207_v20 = vmul.f32 %v10088_v10, %v12324_v60  ;;  %v4546_v60 = vsel %vm972_vm0, %v12381_v62, 0 }
 0xd62   : > { %v10090_v25 = vpop.eup %10089  ;;  %9039 = vmatpush3.bf16.xpose.msra.mxu0 %v4615_v56 }
 0xd63   : > { %9052 = vmatprep.subr.bf16.mxu0 %v4925_v43  ;;  %v4205_v53 = vmul.f32 %v10090_v25, %v12340_v63  ;;  %v4217_v36 = vpack.c.bf16 %v4209_v27, %v4207_v20  ;;  %v12409_v63 = vpop.permute.xlu0 %5046 }
 0xd64   : > { %v4676_v2 = vpop.permute.xlu1 %4675 }
 0xd65   : > { %v4216_v45 = vpack.c.bf16 %v4205_v53, %v4203_v0  ;;  %v4687_v50 = vsel %vm972_vm0, %v4676_v2, 0 }
 0xd67   : > { %9016 = vmatprep.mubr.msk.bf16.mxu1 %vm1217_vm1, %v4216_v45 }
 0xd68   : > { %9017 = vmatmul.mubr.msk.bf16.vlgmr.msra.gmra.mxu1 %vm1217_vm1, %v4217_v36  ;;  %v4674_v30 = vpop.permute.xlu1 %4673 }
 0xd69   : > { %9029 = vmatpush3.bf16.xpose.msra.mxu1 %v4549_v52  ;;  %9041 = vmatmul.mubr.msk.bf16.vlgmr.msra.gmra.mxu0 %vm972_vm0, %v4603_v17 }
 0xd6a   : > { %9287 = vmatprep.subr.msk.bf16.mxu1 %vm972_vm0, %v12381_v62  ;;  %9032 = vmatprep.mubr.msk.bf16.mxu1 %vm972_vm0, %v4532_v8  ;;  %v4684_v62 = vsel %vm972_vm0, %v4674_v30, 0 }
 0xd6b   : > { %9053 = vmatpush3.bf16.msra.mxu0 %v4925_v43 }
 0xd6c   : > { %v4672_v16 = vpop.permute.xlu1 %4671 }
 0xd70   : > { %v4923_v41 = vpop.permute.xlu1 %4922 }
 0xd71   : > { %9031 = vmatpush3.bf16.xpose.msra.mxu1 %v4546_v60  ;;  %9054 = vmatprep.subr.bf16.mxu0 %v4923_v41 }
 0xd72   : > { %9290 = vmatprep.subr.msk.bf16.mxu1 %vm972_vm0, %v4676_v2  ;;  %9055 = vmatpush3.bf16.msra.mxu0 %v4923_v41 }
 0xd73   : > { %9068 = vmatprep.subr.bf16.mxu0 %v12409_v63 }
 0xd78   : > { %9033 = vmatmul.mubr.msk.bf16.vlgmr.msra.gmra.mxu1 %vm972_vm0, %v4534_v28 }
 0xd79   : > { %9045 = vmatpush3.bf16.xpose.msra.mxu1 %v4687_v50  ;;  %9048 = vmatprep.mubr.msk.bf16.mxu1 %vm972_vm0, %v4670_v23 }
 0xd7a   : > { %9291 = vmatprep.subr.msk.bf16.mxu1 %vm972_vm0, %v4674_v30 }
 0xd81   : > { %9047 = vmatpush3.bf16.xpose.msra.mxu1 %v4684_v62 }
 0xd88   : > { %9049 = vmatmul.mubr.msk.bf16.vlgmr.msra.gmra.mxu1 %vm972_vm0, %v4672_v16 }
 0xdce   : > { %v12419_v17 = vpop.f32.mrf.mxu0 }
 0xdcf   : > { %14206 = vst [vmem:[#allocation79_spill] sm:$0xff] %v12419_v17 }
 0xdd0   : > { %v12421_v32 = vpop.f32.mrf.mxu0 }
 0xdd1   : > { %14207 = vst [vmem:[#allocation80_spill] sm:$0xff] %v12421_v32 }
 0xdd2   : > { %v12423_v7 = vpop.f32.mrf.mxu0 }
 0xdd3   : > { %14208 = vst [vmem:[#allocation81_spill] sm:$0xff] %v12423_v7 }
 0xdd4   : > { %v12427_v19 = vpop.f32.mrf.mxu0 }
 0xdd5   : > { %14209 = vst [vmem:[#allocation82_spill] sm:$0xff] %v12427_v19 }
 0xddb   : > { %v12431_v54 = vpop.f32.mrf.mxu0 }
 0xddc   : > { %14210 = vst [vmem:[#allocation83_spill] sm:$0xff] %v12431_v54 }
 0xddd   : > { %v12433_v28 = vpop.f32.mrf.mxu0 }
 0xdde   : > { %14211 = vst [vmem:[#allocation84_spill] sm:$0xff] %v12433_v28 }
 0xddf   : > { %v12435_v58 = vpop.f32.mrf.mxu0 }
 0xde0   : > { %14212 = vst [vmem:[#allocation85_spill] sm:$0xff] %v12435_v58 }
 0xde1   : > { %v12439_v6 = vpop.f32.mrf.mxu0 }
 0xde2   : > { %14213 = vst [vmem:[#allocation86_spill] sm:$0xff] %v12439_v6 }
 0xe18   : > { %v12443_v59 = vpop.f32.mrf.mxu1 }
 0xe19   : > { %14214 = vst [vmem:[#allocation87_spill] sm:$0xff] %v12443_v59  ;;  %v12445_v18 = vpop.f32.mrf.mxu0 }
 0xe1a   : > { %v12447_v22 = vpop.f32.mrf.mxu1  ;;  %v4744_v8 = vsel %vm1217_vm1, %v12445_v18, -inf }
 0xe1b   : > { %14215 = vst [vmem:[#allocation88_spill] sm:$0xff] %v12447_v22  ;;  %4745 = vmax.xlane.f32.xlu0 %v4744_v8  ;;  %v12451_v10 = vpop.f32.mrf.mxu0 }
 0xe1c   : > { %v12453_v56 = vpop.f32.mrf.mxu1  ;;  %v4738_v0 = vsel %vm1217_vm1, %v12451_v10, -inf }
 0xe1d   : > { %14216 = vst [vmem:[#allocation89_spill] sm:$0xff] %v12453_v56  ;;  %v12457_v43 = vpop.f32.mrf.mxu0 }
 0xe1e   : > { %v12459_v27 = vpop.f32.mrf.mxu1  ;;  %v4747_v45 = vsel %vm1217_vm1, %v12457_v43, -inf }
 0xe1f   : > { %14217 = vst [vmem:[#allocation90_spill] sm:$0xff] %v12459_v27  ;;  %4739 = vmax.xlane.f32.xlu0 %v4738_v0  ;;  %v12465_v2 = vpop.f32.mrf.mxu0 }
 0xe20   : > { %v4741_v20 = vsel %vm1217_vm1, %v12465_v2, -inf }
 0xe21   : > { %4742 = vmax.xlane.f32.xlu1 %v4741_v20 }
 0xe23   : > { %4748 = vmax.xlane.f32.xlu0 %v4747_v45 }
 0xe28   : > { %v12471_v36 = vpop.f32.mrf.mxu1 }
 0xe29   : > { %14218 = vst [vmem:[#allocation91_spill] sm:$0xff] %v12471_v36  ;;  %v12473_v52 = vpop.f32.mrf.mxu0 }
 0xe2a   : > { %v12475_v30 = vpop.f32.mrf.mxu1  ;;  %v4768_v16 = vsel %vm1217_vm1, %v12473_v52, -inf }
 0xe2b   : > { %14219 = vst [vmem:[#allocation92_spill] sm:$0xff] %v12475_v30  ;;  %4769 = vmax.xlane.f32.xlu0 %v4768_v16  ;;  %v12479_v60 = vpop.f32.mrf.mxu0 }
 0xe2c   : > { %v12481_v41 = vpop.f32.mrf.mxu1  ;;  %v4762_v0 = vsel %vm1217_vm1, %v12479_v60, -inf }
 0xe2d   : > { %14220 = vst [vmem:[#allocation93_spill] sm:$0xff] %v12481_v41  ;;  %v12485_v62 = vpop.f32.mrf.mxu0 }
 0xe2e   : > { %v12487_v8 = vpop.f32.mrf.mxu1  ;;  %v4771_v20 = vsel %vm1217_vm1, %v12485_v62, -inf }
 0xe2f   : > { %14221 = vst [vmem:[#allocation94_spill] sm:$0xff] %v12487_v8  ;;  %4763 = vmax.xlane.f32.xlu0 %v4762_v0  ;;  %4772 = vmax.xlane.f32.xlu1 %v4771_v20  ;;  %v12495_v16 = vpop.f32.mrf.mxu0 }
 0xe30   : > { %v4765_v50 = vsel %vm1217_vm1, %v12495_v16, -inf }
 0xe33   : > { %4766 = vmax.xlane.f32.xlu1 %v4765_v50 }
 0xe38   : > { %v12499_v23 = vpop.f32.mrf.mxu1 }
 0xe39   : > { %v4756_v61 = vsel %vm1217_vm1, %v12499_v23, -inf }
 0xe3a   : > { %4757 = vmax.xlane.f32.xlu0 %v4756_v61  ;;  %v12503_v25 = vpop.f32.mrf.mxu1 }
 0xe3b   : > { %v4750_v0 = vsel %vm1217_vm1, %v12503_v25, -inf }
 0xe3c   : > { %v12505_v53 = vpop.f32.mrf.mxu1 }
 0xe3d   : > { %v4759_v20 = vsel %vm1217_vm1, %v12505_v53, -inf }
 0xe3e   : > { %4751 = vmax.xlane.f32.xlu0 %v4750_v0  ;;  %4760 = vmax.xlane.f32.xlu1 %v4759_v20  ;;  %v12511_v45 = vpop.f32.mrf.mxu1 }
 0xe3f   : > { %v4753_v50 = vsel %vm1217_vm1, %v12511_v45, -inf }
 0xe42   : > { %4754 = vmax.xlane.f32.xlu1 %v4753_v50 }
 0xe48   : > { %v12515_v13 = vpop.f32.mrf.mxu1 }
 0xe49   : > { %v4780_v61 = vsel %vm1217_vm1, %v12515_v13, -inf }
 0xe4a   : > { %4781 = vmax.xlane.f32.xlu0 %v4780_v61  ;;  %v12519_v31 = vpop.f32.mrf.mxu1 }
 0xe4b   : > { %v4774_v30 = vsel %vm1217_vm1, %v12519_v31, -inf }
 0xe4c   : > { %v12533_v0 = vpop.f32.mrf.mxu1 }
 0xe4e   : > { %4775 = vmax.xlane.f32.xlu0 %v4774_v30  ;;  %v4783_v30 = vsel %vm1217_vm1, %v12533_v0, -inf  ;;  %v12537_v20 = vpop.f32.mrf.mxu1 }
 0xe4f   : > { %v4777_v50 = vsel %vm1217_vm1, %v12537_v20, -inf }
 0xe53   : > { %5172 = vrot.lane.b32.xlu1 %v10820_v12, %s10522_s18 }
 0xe57   : > { %5107 = vrot.lane.b32.xlu1 %v10997_v26, %s10521_s19 }
 0xe64   : > { %5044 = vrot.lane.b32.xlu0 %v10889_v11, %s10521_s19 }
 0xe68   : > { %4985 = vrot.lane.b32.xlu0 %v10975_v38, %s10521_s19 }
 0xe6c   : > { %4983 = vrot.lane.b32.xlu0 %v10988_v57, %s10521_s19 }
 0xe7b   : > { %4784 = vmax.xlane.f32.xlu1 %v4783_v30 }
 0xe7f   : > { %4778 = vmax.xlane.f32.xlu1 %v4777_v50 }
 0xea4   : > { %v4746_v61 = vpop.xlane.xlu0 %4745 }
 0xea5   : > { %v4788_v8 = vsub.f32 %v12445_v18, %v4746_v61 }
 0xea7   : > { %v4806_v36 = vmul.f32 1.442695, %v4788_v8 }
 0xea8   : > { %v4740_v41 = vpop.xlane.xlu0 %4739 }
 0xea9   : > { %10091 = vpow2.f32 %v4806_v36  ;;  %v4786_v28 = vsub.f32 %v12451_v10, %v4740_v41 }
 0xeaa   : > { %v4743_v6 = vpop.xlane.xlu1 %4742 }
 0xeab   : > { %v4802_v54 = vmul.f32 1.442695, %v4786_v28  ;;  %v4787_v58 = vsub.f32 %v12465_v2, %v4743_v6 }
 0xeac   : > { %v4749_v59 = vpop.xlane.xlu0 %4748 }
 0xead   : > { %10093 = vpow2.f32 %v4802_v54  ;;  %v4789_v30 = vsub.f32 %v12457_v43, %v4749_v59  ;;  %v4804_v56 = vmul.f32 1.442695, %v4787_v58 }
 0xeaf   : > { %v4808_v22 = vmul.f32 1.442695, %v4789_v30 }
 0xeb1   : > { %10095 = vpow2.f32 %v4808_v22 }
 0xeb2   : > { %10097 = vpow2.f32 %v4804_v56 }
 0xeb4   : > { %v4770_v50 = vpop.xlane.xlu0 %4769 }
 0xeb5   : > { %v4796_v18 = vsub.f32 %v12473_v52, %v4770_v50 }
 0xeb6   : > { %v12546_v8 = vpop.eup %10091 }
 0xeb7   : > { %v4822_v36 = vmul.f32 1.442695, %v4796_v18  ;;  %v4840_v10 = vsel %vm1217_vm1, %v12546_v8, 0.0 }
 0xeb8   : > { %v4764_v28 = vpop.xlane.xlu0 %4763  ;;  %v4773_v41 = vpop.xlane.xlu1 %4772  ;;  %4841 = vadd.xlane.f32.xlu0 %v4840_v10 }
 0xeb9   : > { %10099 = vpow2.f32 %v4822_v36  ;;  %v4794_v54 = vsub.f32 %v12479_v60, %v4764_v28  ;;  %v4797_v58 = vsub.f32 %v12485_v62, %v4773_v41 }
 0xeba   : > { %v12552_v6 = vpop.eup %10093 }
 0xebb   : > { %v4818_v59 = vmul.f32 1.442695, %v4794_v54  ;;  %v4824_v22 = vmul.f32 1.442695, %v4797_v58  ;;  %v4834_v56 = vsel %vm1217_vm1, %v12552_v6, 0.0 }
 0xebc   : > { %v4767_v43 = vpop.xlane.xlu1 %4766  ;;  %4835 = vadd.xlane.f32.xlu0 %v4834_v56 }
 0xebd   : > { %10101 = vpow2.f32 %v4818_v59  ;;  %v4795_v2 = vsub.f32 %v12495_v16, %v4767_v43 }
 0xebe   : > { %v12557_v52 = vpop.eup %10095  ;;  %10103 = vpow2.f32 %v4824_v22 }
 0xebf   : > { %v4820_v61 = vmul.f32 1.442695, %v4795_v2  ;;  %v4843_v60 = vsel %vm1217_vm1, %v12557_v52, 0.0  ;;  %v12561_v62 = vpop.eup %10097 }
 0xec0   : > { %4844 = vadd.xlane.f32.xlu1 %v4843_v60  ;;  %v4837_v50 = vsel %vm1217_vm1, %v12561_v62, 0.0 }
 0xec1   : > { %10105 = vpow2.f32 %v4820_v61 }
 0xec3   : > { %v4758_v30 = vpop.xlane.xlu0 %4757 }
 0xec4   : > { %v4792_v18 = vsub.f32 %v12499_v23, %v4758_v30  ;;  %4838 = vadd.xlane.f32.xlu1 %v4837_v50 }
 0xec6   : > { %v12566_v36 = vpop.eup %10099  ;;  %v4814_v16 = vmul.f32 1.442695, %v4792_v18 }
 0xec7   : > { %v4752_v10 = vpop.xlane.xlu0 %4751  ;;  %v4864_v28 = vsel %vm1217_vm1, %v12566_v36, 0.0  ;;  %v4761_v43 = vpop.xlane.xlu1 %4760 }
 0xec8   : > { %10107 = vpow2.f32 %v4814_v16  ;;  %v4790_v41 = vsub.f32 %v12503_v25, %v4752_v10  ;;  %4865 = vadd.xlane.f32.xlu0 %v4864_v28 }
 0xeca   : > { %v12571_v54 = vpop.eup %10101  ;;  %v4810_v58 = vmul.f32 1.442695, %v4790_v41 }
 0xecb   : > { %v12573_v59 = vpop.eup %10103  ;;  %v4858_v23 = vsel %vm1217_vm1, %v12571_v54, 0.0  ;;  %v4755_v18 = vpop.xlane.xlu1 %4754 }
 0xecc   : > { %10109 = vpow2.f32 %v4810_v58  ;;  %4859 = vadd.xlane.f32.xlu0 %v4858_v23  ;;  %v4867_v22 = vsel %vm1217_vm1, %v12573_v59, 0.0 }
 0xecd   : > { %4868 = vadd.xlane.f32.xlu1 %v4867_v22  ;;  %v4793_v22 = vsub.f32 %v12505_v53, %v4761_v43 }
 0xece   : > { %v12579_v56 = vpop.eup %10105 }
 0xecf   : > { %v4861_v25 = vsel %vm1217_vm1, %v12579_v56, 0.0  ;;  %v12593_v28 = vpop.permute.xlu1 %5172 }
 0xed1   : > { %4862 = vadd.xlane.f32.xlu1 %v4861_v25  ;;  %v4816_v25 = vmul.f32 1.442695, %v4793_v22 }
 0xed3   : > { %v4782_v2 = vpop.xlane.xlu0 %4781  ;;  %v12597_v23 = vpop.permute.xlu1 %5107  ;;  %10111 = vpow2.f32 %v4816_v25 }
 0xed5   : > { %v12583_v61 = vpop.eup %10107 }
 0xed6   : > { %v4852_v60 = vsel %vm1217_vm1, %v12583_v61, 0.0 }
 0xed7   : > { %4853 = vadd.xlane.f32.xlu0 %v4852_v60  ;;  %v4776_v30 = vpop.xlane.xlu0 %4775  ;;  %v4791_v60 = vsub.f32 %v12511_v45, %v4755_v18 }
 0xed8   : > { %v4798_v53 = vsub.f32 %v12519_v31, %v4776_v30 }
 0xed9   : > { %v12587_v50 = vpop.eup %10109 }
 0xeda   : > { %v4846_v16 = vsel %vm1217_vm1, %v12587_v50, 0.0  ;;  %v4826_v43 = vmul.f32 1.442695, %v4798_v53 }
 0xedb   : > { %4847 = vadd.xlane.f32.xlu0 %v4846_v16  ;;  %v12591_v10 = vpop.permute.xlu0 %5044  ;;  %v4812_v16 = vmul.f32 1.442695, %v4791_v60 }
 0xedd   : > { %10113 = vpow2.f32 %v4812_v16 }
 0xedf   : > { %v4986_v41 = vpop.permute.xlu0 %4985 }
 0xee0   : > { %9060 = vmatprep.subr.bf16.mxu1 %v4986_v41 }
 0xee1   : > { %9061 = vmatpush3.bf16.msra.mxu1 %v4986_v41  ;;  %v4800_v41 = vsub.f32 %v12515_v13, %v4782_v2  ;;  %v12619_v13 = vpop.eup %10111 }
 0xee2   : > { %5105 = vrot.lane.b32.xlu1 %v10908_v40, %s10521_s19  ;;  %v4855_v30 = vsel %vm1217_vm1, %v12619_v13, 0.0 }
 0xee3   : > { %v4984_v58 = vpop.permute.xlu0 %4983 }
 0xee4   : > { %9062 = vmatprep.subr.bf16.mxu1 %v4984_v58 }
 0xee5   : > { %9063 = vmatpush3.bf16.msra.mxu1 %v4984_v58  ;;  %v4830_v58 = vmul.f32 1.442695, %v4800_v41 }
 0xee6   : > { %5241 = vrot.lane.b32.xlu1 %v10859_v46, %s10522_s18  ;;  %9076 = vmatprep.subr.bf16.mxu1 %v12597_v23 }
 0xee7   : > { %10115 = vpow2.f32 %v4830_v58 }
 0xee8   : > { %10117 = vpow2.f32 %v4826_v43 }
 0xeea   : > { %v12626_v25 = vpop.eup %10113 }
 0xeeb   : > { %v4849_v60 = vsel %vm1217_vm1, %v12626_v25, 0.0 }
 0xef1   : > { %5170 = vrot.lane.b32.xlu0 %v10824_v15, %s10522_s18 }
 0xef4   : > { %v12632_v16 = vpop.eup %10115 }
 0xef5   : > { %5166 = vrot.lane.b32.xlu0 %v10805_v1, %s10522_s18  ;;  %v12638_v41 = vpop.eup %10117 }
 0xef6   : > { %v4870_v58 = vsel %vm1217_vm1, %v12638_v41, 0.0 }
 0xef9   : > { %5310 = vrot.lane.b32.xlu0 %v10906_v39, %s10522_s18 }
 0xefd   : > { %5239 = vrot.lane.b32.xlu0 %v10866_v55, %s10522_s18 }
 0xf01   : > { %5304 = vrot.lane.b32.xlu0 %v10887_v9, %s10522_s18 }
 0xf04   : > { %v4785_v45 = vpop.xlane.xlu1 %4784 }
 0xf05   : > { %v4801_v18 = vsub.f32 %v12533_v0, %v4785_v45  ;;  %5306 = vrot.lane.b32.xlu0 %v10948_v14, %s10522_s18 }
 0xf07   : > { %v4832_v2 = vmul.f32 1.442695, %v4801_v18 }
 0xf08   : > { %v4779_v22 = vpop.xlane.xlu1 %4778 }
 0xf09   : > { %10119 = vpow2.f32 %v4832_v2  ;;  %v4799_v31 = vsub.f32 %v12537_v20, %v4779_v22  ;;  %5237 = vrot.lane.b32.xlu0 %v10903_v37, %s10522_s18  ;;  %v4876_v20 = vsel %vm1217_vm1, %v12632_v16, 0.0 }
 0xf0a   : > { %4856 = vadd.xlane.f32.xlu1 %v4855_v30 }
 0xf0b   : > { %v4828_v0 = vmul.f32 1.442695, %v4799_v31 }
 0xf0d   : > { %10121 = vpow2.f32 %v4828_v0  ;;  %5373 = vrot.lane.b32.xlu0 %v10927_v3, %s10522_s18 }
 0xf0e   : > { %4850 = vadd.xlane.f32.xlu1 %v4849_v60 }
 0xf11   : > { %5628 = vrot.lane.b32.xlu0 %v10929_v5, %s10522_s18 }
 0xf12   : > { %4877 = vadd.xlane.f32.xlu1 %v4876_v20 }
 0xf15   : > { %5750 = vrot.lane.b32.xlu0 %v10970_v34, %s10522_s18 }
 0xf16   : > { %v12644_v53 = vpop.eup %10119  ;;  %4871 = vadd.xlane.f32.xlu1 %v4870_v58 }
 0xf17   : > { %v4879_v43 = vsel %vm1217_vm1, %v12644_v53, 0.0 }
 0xf1a   : > { %v12648_v45 = vpop.eup %10121  ;;  %4880 = vadd.xlane.f32.xlu1 %v4879_v43 }
 0xf1b   : > { %v4873_v18 = vsel %vm1217_vm1, %v12648_v45, 0.0 }
 0xf1e   : > { %4874 = vadd.xlane.f32.xlu1 %v4873_v18 }
 0xf2f   : > { %5168 = vrot.lane.b32.xlu1 %v10856_v44, %s10522_s18 }
 0xf33   : > { %5308 = vrot.lane.b32.xlu1 %v10910_v42, %s10522_s18 }
 0xf37   : > { %5235 = vrot.lane.b32.xlu1 %v10864_v48, %s10522_s18 }
 0xf3b   : > { %5379 = vrot.lane.b32.xlu1 %v10951_v21, %s10522_s18 }
 0xf3f   : > { %5377 = vrot.lane.b32.xlu1 %v10955_v33, %s10522_s18 }
 0xf41   : > { %v4842_v2 = vpop.xlane.xlu0 %4841 }
 0xf43   : > { %5375 = vrot.lane.b32.xlu1 %v10986_v49, %s10522_s18 }
 0xf45   : > { %v4836_v22 = vpop.xlane.xlu0 %4835 }
 0xf47   : > { %5626 = vrot.lane.b32.xlu1 %v10944_v29, %s10522_s18 }
 0xf49   : > { %v4845_v31 = vpop.xlane.xlu1 %4844 }
 0xf4a   : > { %10123 = vrcp.f32 %v4845_v31 }
 0xf4b   : > { %10125 = vrcp.f32 %v4836_v22 }
 0xf4c   : > { %10127 = vrcp.f32 %v4842_v2 }
 0xf4d   : > { %v4839_v30 = vpop.xlane.xlu1 %4838 }
 0xf4e   : > { %10129 = vrcp.f32 %v4839_v30 }
 0xf51   : > { %v4866_v0 = vpop.xlane.xlu0 %4865 }
 0xf55   : > { %v4860_v60 = vpop.xlane.xlu0 %4859 }
 0xf56   : > { %v4869_v20 = vpop.xlane.xlu1 %4868 }
 0xf57   : > { %v10124_v58 = vpop.eup %10123  ;;  %10131 = vrcp.f32 %v4869_v20 }
 0xf58   : > { %v10126_v43 = vpop.eup %10125  ;;  %10133 = vrcp.f32 %v4860_v60  ;;  %v4889_v7 = vmul.f32 %v10124_v58, %v12557_v52 }
 0xf59   : > { %v10128_v18 = vpop.eup %10127  ;;  %10135 = vrcp.f32 %v4866_v0  ;;  %v4883_v31 = vmul.f32 %v10126_v43, %v12552_v6 }
 0xf5a   : > { %v4863_v27 = vpop.xlane.xlu1 %4862  ;;  %v4887_v22 = vmul.f32 %v10128_v18, %v12546_v8 }
 0xf5b   : > { %v10130_v17 = vpop.eup %10129  ;;  %10137 = vrcp.f32 %v4863_v27 }
 0xf5c   : > { %v4885_v2 = vmul.f32 %v10130_v17, %v12561_v62  ;;  %v4915_v32 = vpack.c.bf16 %v4889_v7, %v4887_v22 }
 0xf5e   : > { %v4914_v30 = vpack.c.bf16 %v4885_v2, %v4883_v31 }
 0xf60   : > { %v4854_v19 = vpop.xlane.xlu0 %4853  ;;  %9056 = vmatprep.mubr.msk.bf16.mxu0 %vm1217_vm1, %v4914_v30 }
 0xf61   : > { %9057 = vmatmul.mubr.msk.bf16.vlgmr.msra.gmra.mxu0 %vm1217_vm1, %v4915_v32 }
 0xf62   : > { %9069 = vmatpush3.bf16.msra.mxu0 %v12409_v63 }
 0xf63   : > { %9070 = vmatprep.subr.bf16.mxu0 %v12591_v10 }
 0xf64   : > { %v4848_v0 = vpop.xlane.xlu0 %4847  ;;  %v10132_v52 = vpop.eup %10131 }
 0xf65   : > { %v10134_v27 = vpop.eup %10133  ;;  %v4905_v7 = vmul.f32 %v10132_v52, %v12573_v59 }
 0xf66   : > { %9071 = vmatpush3.bf16.msra.mxu0 %v12591_v10  ;;  %v10136_v6 = vpop.eup %10135  ;;  %v4899_v62 = vmul.f32 %v10134_v27, %v12571_v54  ;;  %v5184_v10 = vsel %vm972_vm0, %v12593_v28, 0 }
 0xf67   : > { %9292 = vmatprep.subr.msk.bf16.mxu0 %vm972_vm0, %v12593_v28  ;;  %v4903_v63 = vmul.f32 %v10136_v6, %v12566_v36  ;;  %v5106_v36 = vpop.permute.xlu1 %5105 }
 0xf68   : > { %v10138_v17 = vpop.eup %10137  ;;  %v5171_v8 = vpop.permute.xlu0 %5170 }
 0xf69   : > { %v4901_v32 = vmul.f32 %v10138_v17, %v12579_v56  ;;  %v4919_v58 = vpack.c.bf16 %v4905_v7, %v4903_v63  ;;  %v5181_v54 = vsel %vm972_vm0, %v5171_v8, 0 }
 0xf6b   : > { %v4918_v60 = vpack.c.bf16 %v4901_v32, %v4899_v62  ;;  %v5242_v56 = vpop.permute.xlu1 %5241 }
 0xf6c   : > { %v5167_v20 = vpop.permute.xlu0 %5166 }
 0xf6d   : > { %9072 = vmatprep.mubr.msk.bf16.mxu0 %vm1217_vm1, %v4918_v60 }
 0xf6e   : > { %9073 = vmatmul.mubr.msk.bf16.vlgmr.msra.gmra.mxu0 %vm1217_vm1, %v4919_v58 }
 0xf6f   : > { %9085 = vmatpush3.bf16.xpose.msra.mxu0 %v5184_v10  ;;  %9088 = vmatprep.mubr.msk.bf16.mxu0 %vm972_vm0, %v5167_v20 }
 0xf70   : > { %9293 = vmatprep.subr.msk.bf16.mxu0 %vm972_vm0, %v5171_v8  ;;  %v5311_v59 = vpop.permute.xlu0 %5310 }
 0xf74   : > { %v12689_v18 = vpop.permute.xlu0 %5239 }
 0xf77   : > { %9087 = vmatpush3.bf16.xpose.msra.mxu0 %v5181_v54 }
 0xf78   : > { %9296 = vmatprep.subr.msk.bf16.mxu0 %vm972_vm0, %v5311_v59  ;;  %v5305_v2 = vpop.permute.xlu0 %5304 }
 0xf7c   : > { %v5307_v27 = vpop.permute.xlu0 %5306 }
 0xf80   : > { %v5238_v60 = vpop.permute.xlu0 %5237 }
 0xf93   : > { %v4857_v43 = vpop.xlane.xlu1 %4856 }
 0xf94   : > { %10139 = vrcp.f32 %v4857_v43 }
 0xf95   : > { %10141 = vrcp.f32 %v4848_v0 }
 0xf96   : > { %10143 = vrcp.f32 %v4854_v19 }
 0xf97   : > { %v4851_v28 = vpop.xlane.xlu1 %4850 }
 0xf98   : > { %10145 = vrcp.f32 %v4851_v28 }
 0xf9b   : > { %v4878_v31 = vpop.xlane.xlu1 %4877 }
 0xf9f   : > { %v4872_v22 = vpop.xlane.xlu1 %4871 }
 0xfa1   : > { %v10140_v30 = vpop.eup %10139 }
 0xfa2   : > { %v10142_v52 = vpop.eup %10141  ;;  %v4897_v8 = vmul.f32 %v10140_v30, %v12619_v13 }
 0xfa3   : > { %v4881_v6 = vpop.xlane.xlu1 %4880  ;;  %v10144_v17 = vpop.eup %10143  ;;  %v4891_v0 = vmul.f32 %v10142_v52, %v12587_v50  ;;  %v5322_v50 = vsel %vm972_vm0, %v5311_v59, 0 }
 0xfa4   : > { %10147 = vrcp.f32 %v4881_v6  ;;  %v4895_v62 = vmul.f32 %v10144_v17, %v12583_v61  ;;  %v5374_v61 = vpop.permute.xlu0 %5373  ;;  %v5253_v17 = vsel %vm972_vm0, %v5242_v56, 0 }
 0xfa5   : > { %v10146_v7 = vpop.eup %10145  ;;  %10149 = vrcp.f32 %v4872_v22 }
 0xfa6   : > { %v4893_v19 = vmul.f32 %v10146_v7, %v12626_v25  ;;  %10151 = vrcp.f32 %v4878_v31  ;;  %v4917_v20 = vpack.c.bf16 %v4897_v8, %v4895_v62 }
 0xfa7   : > { %v4875_v32 = vpop.xlane.xlu1 %4874 }
 0xfa8   : > { %10153 = vrcp.f32 %v4875_v32  ;;  %v4916_v63 = vpack.c.bf16 %v4893_v19, %v4891_v0  ;;  %v5629_v31 = vpop.permute.xlu0 %5628 }
 0xfaa   : > { %9064 = vmatprep.mubr.msk.bf16.mxu1 %vm1217_vm1, %v4916_v63 }
 0xfab   : > { %9065 = vmatmul.mubr.msk.bf16.vlgmr.msra.gmra.mxu1 %vm1217_vm1, %v4917_v20  ;;  %v5169_v58 = vpop.permute.xlu1 %5168 }
 0xfac   : > { %9077 = vmatpush3.bf16.msra.mxu1 %v12597_v23  ;;  %9089 = vmatmul.mubr.msk.bf16.vlgmr.msra.gmra.mxu0 %vm972_vm0, %v5169_v58 }
 0xfad   : > { %9078 = vmatprep.subr.bf16.mxu1 %v5106_v36  ;;  %9101 = vmatpush3.bf16.xpose.msra.mxu0 %v5322_v50 }
 0xfae   : > { %9104 = vmatprep.mubr.msk.bf16.mxu0 %vm972_vm0, %v5305_v2 }
 0xfaf   : > { %v5309_v13 = vpop.permute.xlu1 %5308 }
 0xfb0   : > { %9079 = vmatpush3.bf16.msra.mxu1 %v5106_v36  ;;  %9297 = vmatprep.subr.msk.bf16.mxu0 %vm972_vm0, %v5309_v13  ;;  %v5319_v23 = vsel %vm972_vm0, %v5309_v13, 0 }
 0xfb1   : > { %9294 = vmatprep.subr.msk.bf16.mxu1 %vm972_vm0, %v5242_v56  ;;  %v10148_v25 = vpop.eup %10147 }
 0xfb2   : > { %v10150_v10 = vpop.eup %10149  ;;  %v4913_v59 = vmul.f32 %v10148_v25, %v12644_v53 }
 0xfb3   : > { %v5236_v54 = vpop.permute.xlu1 %5235  ;;  %v10152_v43 = vpop.eup %10151  ;;  %v4907_v2 = vmul.f32 %v10150_v10, %v12638_v41  ;;  %v5250_v41 = vsel %vm972_vm0, %v12689_v18, 0 }
 0xfb4   : > { %v4911_v22 = vmul.f32 %v10152_v43, %v12632_v16 }
 0xfb5   : > { %v10154_v28 = vpop.eup %10153  ;;  %9103 = vmatpush3.bf16.xpose.msra.mxu0 %v5319_v23 }
 0xfb6   : > { %9116 = vmatprep.subr.bf16.mxu0 %v5629_v31  ;;  %v4909_v36 = vmul.f32 %v10154_v28, %v12648_v45  ;;  %v4921_v6 = vpack.c.bf16 %v4913_v59, %v4911_v22  ;;  %v12717_v45 = vpop.permute.xlu0 %5750 }
 0xfb7   : > { %v5380_v30 = vpop.permute.xlu1 %5379 }
 0xfb8   : > { %v4920_v52 = vpack.c.bf16 %v4909_v36, %v4907_v2  ;;  %v5391_v56 = vsel %vm972_vm0, %v5380_v30, 0 }
 0xfba   : > { %9080 = vmatprep.mubr.msk.bf16.mxu1 %vm1217_vm1, %v4920_v52 }
 0xfbb   : > { %9081 = vmatmul.mubr.msk.bf16.vlgmr.msra.gmra.mxu1 %vm1217_vm1, %v4921_v6  ;;  %v5378_v7 = vpop.permute.xlu1 %5377 }
 0xfbc   : > { %9093 = vmatpush3.bf16.xpose.msra.mxu1 %v5253_v17  ;;  %9105 = vmatmul.mubr.msk.bf16.vlgmr.msra.gmra.mxu0 %vm972_vm0, %v5307_v27 }
 0xfbd   : > { %9295 = vmatprep.subr.msk.bf16.mxu1 %vm972_vm0, %v12689_v18  ;;  %9096 = vmatprep.mubr.msk.bf16.mxu1 %vm972_vm0, %v5236_v54  ;;  %v5388_v18 = vsel %vm972_vm0, %v5378_v7, 0 }
 0xfbe   : > { %9117 = vmatpush3.bf16.msra.mxu0 %v5629_v31 }
 0xfbf   : > { %v5376_v16 = vpop.permute.xlu1 %5375 }
 0xfc3   : > { %v5627_v53 = vpop.permute.xlu1 %5626 }
 0xfc4   : > { %9095 = vmatpush3.bf16.xpose.msra.mxu1 %v5250_v41  ;;  %9118 = vmatprep.subr.bf16.mxu0 %v5627_v53 }
 0xfc5   : > { %9298 = vmatprep.subr.msk.bf16.mxu1 %vm972_vm0, %v5380_v30  ;;  %9119 = vmatpush3.bf16.msra.mxu0 %v5627_v53 }
 0xfc6   : > { %9132 = vmatprep.subr.bf16.mxu0 %v12717_v45 }
 0xfcb   : > { %9097 = vmatmul.mubr.msk.bf16.vlgmr.msra.gmra.mxu1 %vm972_vm0, %v5238_v60 }
 0xfcc   : > { %9109 = vmatpush3.bf16.xpose.msra.mxu1 %v5391_v56  ;;  %9112 = vmatprep.mubr.msk.bf16.mxu1 %vm972_vm0, %v5374_v61 }
 0xfcd   : > { %9299 = vmatprep.subr.msk.bf16.mxu1 %vm972_vm0, %v5378_v7 }
 0xfd4   : > { %9111 = vmatpush3.bf16.xpose.msra.mxu1 %v5388_v18 }
 0xfdb   : > { %9113 = vmatmul.mubr.msk.bf16.vlgmr.msra.gmra.mxu1 %vm972_vm0, %v5376_v16 }
0x1021   : > { %v12727_v27 = vpop.f32.mrf.mxu0 }
0x1023   : > { %v12729_v8 = vpop.f32.mrf.mxu0 }
0x1025   : > { %v12731_v0 = vpop.f32.mrf.mxu0 }
0x1027   : > { %v12735_v62 = vpop.f32.mrf.mxu0 }
0x102e   : > { %v12739_v63 = vpop.f32.mrf.mxu0 }
0x102f   : > { %14222 = vst [vmem:[#allocation95_spill] sm:$0xff] %v12739_v63 }
0x1030   : > { %v12741_v60 = vpop.f32.mrf.mxu0 }
0x1031   : > { %14223 = vst [vmem:[#allocation96_spill] sm:$0xff] %v12741_v60 }
0x1032   : > { %v12743_v20 = vpop.f32.mrf.mxu0 }
0x1033   : > { %14224 = vst [vmem:[#allocation97_spill] sm:$0xff] %v12743_v20 }
0x1034   : > { %v12747_v50 = vpop.f32.mrf.mxu0 }
0x1035   : > { %14225 = vst [vmem:[#allocation98_spill] sm:$0xff] %v12747_v50 }
0x106b   : > { %v12751_v13 = vpop.f32.mrf.mxu1 }
0x106c   : > { %14226 = vst [vmem:[#allocation99_spill] sm:$0xff] %v12751_v13  ;;  %v12753_v25 = vpop.f32.mrf.mxu0 }
0x106d   : > { %v12755_v10 = vpop.f32.mrf.mxu1  ;;  %v5448_v54 = vsel %vm1217_vm1, %v12753_v25, -inf }
0x106e   : > { %14227 = vst [vmem:[#allocation100_spill] sm:$0xff] %v12755_v10  ;;  %5449 = vmax.xlane.f32.xlu0 %v5448_v54  ;;  %v12759_v43 = vpop.f32.mrf.mxu0 }
0x106f   : > { %v12761_v23 = vpop.f32.mrf.mxu1  ;;  %v5442_v2 = vsel %vm1217_vm1, %v12759_v43, -inf }
0x1070   : > { %14228 = vst [vmem:[#allocation101_spill] sm:$0xff] %v12761_v23  ;;  %v12765_v31 = vpop.f32.mrf.mxu0 }
0x1071   : > { %v12767_v59 = vpop.f32.mrf.mxu1  ;;  %v5451_v52 = vsel %vm1217_vm1, %v12765_v31, -inf }
0x1072   : > { %5443 = vmax.xlane.f32.xlu0 %v5442_v2  ;;  %v12773_v22 = vpop.f32.mrf.mxu0 }
0x1073   : > { %v5445_v30 = vsel %vm1217_vm1, %v12773_v22, -inf }
0x1074   : > { %5446 = vmax.xlane.f32.xlu1 %v5445_v30 }
0x1076   : > { %5452 = vmax.xlane.f32.xlu0 %v5451_v52 }
0x107b   : > { %v12779_v6 = vpop.f32.mrf.mxu1 }
0x107c   : > { %14229 = vst [vmem:[#allocation102_spill] sm:$0xff] %v12779_v6  ;;  %v12781_v17 = vpop.f32.mrf.mxu0 }
0x107d   : > { %v12783_v7 = vpop.f32.mrf.mxu1  ;;  %v5472_v16 = vsel %vm1217_vm1, %v12781_v17, -inf }
0x107e   : > { %14230 = vst [vmem:[#allocation103_spill] sm:$0xff] %v12783_v7  ;;  %5473 = vmax.xlane.f32.xlu0 %v5472_v16  ;;  %v12787_v41 = vpop.f32.mrf.mxu0 }
0x107f   : > { %v12789_v53 = vpop.f32.mrf.mxu1  ;;  %v5466_v2 = vsel %vm1217_vm1, %v12787_v41, -inf }
0x1080   : > { %14231 = vst [vmem:[#allocation104_spill] sm:$0xff] %v12789_v53  ;;  %v12793_v18 = vpop.f32.mrf.mxu0 }
0x1081   : > { %v12795_v54 = vpop.f32.mrf.mxu1  ;;  %v5475_v30 = vsel %vm1217_vm1, %v12793_v18, -inf }
0x1082   : > { %14232 = vst [vmem:[#allocation105_spill] sm:$0xff] %v12795_v54  ;;  %5467 = vmax.xlane.f32.xlu0 %v5466_v2  ;;  %5476 = vmax.xlane.f32.xlu1 %v5475_v30  ;;  %v12803_v16 = vpop.f32.mrf.mxu0 }
0x1083   : > { %v5469_v56 = vsel %vm1217_vm1, %v12803_v16, -inf }
0x1086   : > { %5470 = vmax.xlane.f32.xlu1 %v5469_v56 }
0x108b   : > { %v12807_v61 = vpop.f32.mrf.mxu1 }
0x108c   : > { %v5460_v58 = vsel %vm1217_vm1, %v12807_v61, -inf }
0x108d   : > { %5461 = vmax.xlane.f32.xlu0 %v5460_v58  ;;  %v12811_v28 = vpop.f32.mrf.mxu1 }
0x108e   : > { %v5454_v2 = vsel %vm1217_vm1, %v12811_v28, -inf }
0x108f   : > { %v12813_v36 = vpop.f32.mrf.mxu1 }
0x1090   : > { %v5463_v30 = vsel %vm1217_vm1, %v12813_v36, -inf }
0x1091   : > { %5455 = vmax.xlane.f32.xlu0 %v5454_v2  ;;  %5464 = vmax.xlane.f32.xlu1 %v5463_v30  ;;  %v12819_v52 = vpop.f32.mrf.mxu1 }
0x1092   : > { %v5457_v56 = vsel %vm1217_vm1, %v12819_v52, -inf }
0x1095   : > { %5458 = vmax.xlane.f32.xlu1 %v5457_v56 }
0x109b   : > { %v12823_v19 = vpop.f32.mrf.mxu1 }
0x109c   : > { %v5484_v58 = vsel %vm1217_vm1, %v12823_v19, -inf }
0x109d   : > { %5485 = vmax.xlane.f32.xlu0 %v5484_v58  ;;  %v12827_v32 = vpop.f32.mrf.mxu1 }
0x109e   : > { %v5478_v7 = vsel %vm1217_vm1, %v12827_v32, -inf }
0x109f   : > { %v12841_v2 = vpop.f32.mrf.mxu1 }
0x10a1   : > { %5479 = vmax.xlane.f32.xlu0 %v5478_v7  ;;  %v5487_v7 = vsel %vm1217_vm1, %v12841_v2, -inf  ;;  %v12845_v30 = vpop.f32.mrf.mxu1 }
0x10a6   : > { %5876 = vrot.lane.b32.xlu1 %v10820_v12, %s10523_s1  ;;  %v5481_v12 = vsel %vm1217_vm1, %v12845_v30, -inf }
0x10aa   : > { %5811 = vrot.lane.b32.xlu1 %v10997_v26, %s10522_s18 }
0x10b7   : > { %5748 = vrot.lane.b32.xlu0 %v10889_v11, %s10522_s18 }
0x10bb   : > { %5689 = vrot.lane.b32.xlu0 %v10975_v38, %s10522_s18 }
0x10bf   : > { %5687 = vrot.lane.b32.xlu0 %v10988_v57, %s10522_s18 }
0x10ce   : > { %5488 = vmax.xlane.f32.xlu1 %v5487_v7 }
0x10d2   : > { %5482 = vmax.xlane.f32.xlu1 %v5481_v12 }
0x10f7   : > { %v5450_v56 = vpop.xlane.xlu0 %5449 }
0x10f8   : > { %v5492_v58 = vsub.f32 %v12753_v25, %v5450_v56 }
0x10fa   : > { %v5510_v54 = vmul.f32 1.442695, %v5492_v58 }
0x10fb   : > { %v5444_v6 = vpop.xlane.xlu0 %5443 }
0x10fc   : > { %10155 = vpow2.f32 %v5510_v54  ;;  %v5490_v53 = vsub.f32 %v12759_v43, %v5444_v6 }
0x10fd   : > { %v5447_v60 = vpop.xlane.xlu1 %5446 }
0x10fe   : > { %v5506_v50 = vmul.f32 1.442695, %v5490_v53  ;;  %v5491_v63 = vsub.f32 %v12773_v22, %v5447_v60 }
0x10ff   : > { %v5453_v20 = vpop.xlane.xlu0 %5452 }
0x1100   : > { %10157 = vpow2.f32 %v5506_v50  ;;  %v5493_v7 = vsub.f32 %v12765_v31, %v5453_v20  ;;  %v5508_v13 = vmul.f32 1.442695, %v5491_v63 }
0x1102   : > { %v5512_v23 = vmul.f32 1.442695, %v5493_v7 }
0x1104   : > { %10159 = vpow2.f32 %v5512_v23 }
0x1105   : > { %10161 = vpow2.f32 %v5508_v13 }
0x1107   : > { %v5474_v12 = vpop.xlane.xlu0 %5473 }
0x1108   : > { %v5500_v25 = vsub.f32 %v12781_v17, %v5474_v12 }
0x1109   : > { %v12854_v56 = vpop.eup %10155 }
0x110a   : > { %v5526_v54 = vmul.f32 1.442695, %v5500_v25  ;;  %v5544_v43 = vsel %vm1217_vm1, %v12854_v56, 0.0 }
0x110b   : > { %v5468_v6 = vpop.xlane.xlu0 %5467  ;;  %v5477_v53 = vpop.xlane.xlu1 %5476  ;;  %5545 = vadd.xlane.f32.xlu0 %v5544_v43 }
0x110c   : > { %10163 = vpow2.f32 %v5526_v54  ;;  %v5498_v60 = vsub.f32 %v12787_v41, %v5468_v6  ;;  %v5501_v63 = vsub.f32 %v12793_v18, %v5477_v53 }
0x110d   : > { %v12860_v20 = vpop.eup %10157 }
0x110e   : > { %v5522_v50 = vmul.f32 1.442695, %v5498_v60  ;;  %v5528_v13 = vmul.f32 1.442695, %v5501_v63  ;;  %v5538_v23 = vsel %vm1217_vm1, %v12860_v20, 0.0 }
0x110f   : > { %v5471_v31 = vpop.xlane.xlu1 %5470  ;;  %5539 = vadd.xlane.f32.xlu0 %v5538_v23 }
0x1110   : > { %10165 = vpow2.f32 %v5522_v50  ;;  %v5499_v22 = vsub.f32 %v12803_v16, %v5471_v31 }
0x1111   : > { %v12865_v17 = vpop.eup %10159  ;;  %10167 = vpow2.f32 %v5528_v13 }
0x1112   : > { %v5524_v58 = vmul.f32 1.442695, %v5499_v22  ;;  %v5547_v41 = vsel %vm1217_vm1, %v12865_v17, 0.0  ;;  %v12869_v18 = vpop.eup %10161 }
0x1113   : > { %5548 = vadd.xlane.f32.xlu1 %v5547_v41  ;;  %v5541_v12 = vsel %vm1217_vm1, %v12869_v18, 0.0 }
0x1114   : > { %10169 = vpow2.f32 %v5524_v58 }
0x1116   : > { %v5462_v7 = vpop.xlane.xlu0 %5461 }
0x1117   : > { %v5496_v25 = vsub.f32 %v12807_v61, %v5462_v7  ;;  %5542 = vadd.xlane.f32.xlu1 %v5541_v12 }
0x1119   : > { %v12874_v54 = vpop.eup %10163  ;;  %v5518_v16 = vmul.f32 1.442695, %v5496_v25 }
0x111a   : > { %v5456_v43 = vpop.xlane.xlu0 %5455  ;;  %v5568_v6 = vsel %vm1217_vm1, %v12874_v54, 0.0  ;;  %v5465_v31 = vpop.xlane.xlu1 %5464 }
0x111b   : > { %10171 = vpow2.f32 %v5518_v16  ;;  %v5494_v53 = vsub.f32 %v12811_v28, %v5456_v43  ;;  %5569 = vadd.xlane.f32.xlu0 %v5568_v6 }
0x111d   : > { %v12879_v60 = vpop.eup %10165  ;;  %v5514_v63 = vmul.f32 1.442695, %v5494_v53 }
0x111e   : > { %v12881_v50 = vpop.eup %10167  ;;  %v5562_v61 = vsel %vm1217_vm1, %v12879_v60, 0.0  ;;  %v5459_v25 = vpop.xlane.xlu1 %5458 }
0x111f   : > { %10173 = vpow2.f32 %v5514_v63  ;;  %5563 = vadd.xlane.f32.xlu0 %v5562_v61  ;;  %v5571_v13 = vsel %vm1217_vm1, %v12881_v50, 0.0 }
0x1120   : > { %5572 = vadd.xlane.f32.xlu1 %v5571_v13  ;;  %v5497_v13 = vsub.f32 %v12813_v36, %v5465_v31 }
0x1121   : > { %v12887_v23 = vpop.eup %10169 }
0x1122   : > { %v5565_v28 = vsel %vm1217_vm1, %v12887_v23, 0.0  ;;  %v12901_v6 = vpop.permute.xlu1 %5876 }
0x1124   : > { %5566 = vadd.xlane.f32.xlu1 %v5565_v28  ;;  %v5520_v28 = vmul.f32 1.442695, %v5497_v13 }
0x1126   : > { %v5486_v22 = vpop.xlane.xlu0 %5485  ;;  %v12905_v61 = vpop.permute.xlu1 %5811  ;;  %10175 = vpow2.f32 %v5520_v28 }
0x1128   : > { %v12891_v58 = vpop.eup %10171 }
0x1129   : > { %v5556_v41 = vsel %vm1217_vm1, %v12891_v58, 0.0 }
0x112a   : > { %5557 = vadd.xlane.f32.xlu0 %v5556_v41  ;;  %v5480_v7 = vpop.xlane.xlu0 %5479  ;;  %v5495_v41 = vsub.f32 %v12819_v52, %v5459_v25 }
0x112c   : > { %v12895_v12 = vpop.eup %10173 }
0x112d   : > { %v5550_v16 = vsel %vm1217_vm1, %v12895_v12, 0.0 }
0x112e   : > { %5551 = vadd.xlane.f32.xlu0 %v5550_v16  ;;  %v12899_v43 = vpop.permute.xlu0 %5748  ;;  %v5516_v16 = vmul.f32 1.442695, %v5495_v41 }
0x1130   : > { %10177 = vpow2.f32 %v5516_v16 }
0x1132   : > { %v5690_v53 = vpop.permute.xlu0 %5689 }
0x1133   : > { %9124 = vmatprep.subr.bf16.mxu1 %v5690_v53 }
0x1134   : > { %9125 = vmatpush3.bf16.msra.mxu1 %v5690_v53  ;;  %v5504_v53 = vsub.f32 %v12823_v19, %v5486_v22 }
0x1135   : > { %5809 = vrot.lane.b32.xlu1 %v10908_v40, %s10522_s18 }
0x1136   : > { %v5688_v63 = vpop.permute.xlu0 %5687  ;;  %v5534_v10 = vmul.f32 1.442695, %v5504_v53 }
0x1137   : > { %9126 = vmatprep.subr.bf16.mxu1 %v5688_v63 }
0x1138   : > { %9127 = vmatpush3.bf16.msra.mxu1 %v5688_v63  ;;  %v5502_v63 = vsub.f32 %v12827_v32, %v5480_v7  ;;  %10179 = vpow2.f32 %v5534_v10 }
0x1139   : > { %9140 = vmatprep.subr.bf16.mxu1 %v12905_v61 }
0x113a   : > { %v5530_v36 = vmul.f32 1.442695, %v5502_v63 }
0x113c   : > { %10181 = vpow2.f32 %v5530_v36 }
0x1144   : > { %5874 = vrot.lane.b32.xlu0 %v10824_v15, %s10523_s1  ;;  %v12922_v15 = vpop.eup %10175 }
0x1145   : > { %v12929_v32 = vpop.eup %10177 }
0x1148   : > { %5870 = vrot.lane.b32.xlu0 %v10805_v1, %s10523_s1 }
0x114c   : > { %5945 = vrot.lane.b32.xlu0 %v10859_v46, %s10523_s1  ;;  %v5559_v46 = vsel %vm1217_vm1, %v12922_v15, 0.0 }
0x1150   : > { %5939 = vrot.lane.b32.xlu0 %v10864_v48, %s10523_s1 }
0x1154   : > { %6014 = vrot.lane.b32.xlu0 %v10906_v39, %s10523_s1  ;;  %v5553_v39 = vsel %vm1217_vm1, %v12929_v32, 0.0 }
0x1157   : > { %v5489_v19 = vpop.xlane.xlu1 %5488 }
0x1158   : > { %v5505_v1 = vsub.f32 %v12841_v2, %v5489_v19  ;;  %6008 = vrot.lane.b32.xlu0 %v10887_v9, %s10523_s1  ;;  %v12936_v2 = vpop.eup %10179 }
0x1159   : > { %5560 = vadd.xlane.f32.xlu1 %v5559_v46  ;;  %v5580_v31 = vsel %vm1217_vm1, %v12936_v2, 0.0  ;;  %v12942_v22 = vpop.eup %10181 }
0x115a   : > { %v5536_v10 = vmul.f32 1.442695, %v5505_v1 }
0x115b   : > { %v5483_v48 = vpop.xlane.xlu1 %5482 }
0x115c   : > { %10183 = vpow2.f32 %v5536_v10  ;;  %v5503_v52 = vsub.f32 %v12845_v30, %v5483_v48  ;;  %6083 = vrot.lane.b32.xlu0 %v10951_v21, %s10523_s1  ;;  %v5574_v21 = vsel %vm1217_vm1, %v12942_v22, 0.0 }
0x115d   : > { %5554 = vadd.xlane.f32.xlu1 %v5553_v39 }
0x115e   : > { %v5532_v9 = vmul.f32 1.442695, %v5503_v52 }
0x1160   : > { %10185 = vpow2.f32 %v5532_v9  ;;  %6077 = vrot.lane.b32.xlu0 %v10927_v3, %s10523_s1 }
0x1161   : > { %5581 = vadd.xlane.f32.xlu1 %v5580_v31 }
0x1165   : > { %5575 = vadd.xlane.f32.xlu1 %v5574_v21 }
0x1169   : > { %v12946_v30 = vpop.eup %10183 }
0x116a   : > { %v5583_v7 = vsel %vm1217_vm1, %v12946_v30, 0.0 }
0x116b   : > { %5584 = vadd.xlane.f32.xlu1 %v5583_v7 }
0x116d   : > { %v12950_v25 = vpop.eup %10185 }
0x116e   : > { %v5577_v3 = vsel %vm1217_vm1, %v12950_v25, 0.0 }
0x116f   : > { %5578 = vadd.xlane.f32.xlu1 %v5577_v3 }
0x1180   : > { %5872 = vrot.lane.b32.xlu1 %v10856_v44, %s10523_s1 }
0x1184   : > { %5943 = vrot.lane.b32.xlu1 %v10866_v55, %s10523_s1 }
0x1188   : > { %5941 = vrot.lane.b32.xlu1 %v10903_v37, %s10523_s1 }
0x118c   : > { %6012 = vrot.lane.b32.xlu1 %v10910_v42, %s10523_s1 }
0x1190   : > { %6010 = vrot.lane.b32.xlu1 %v10948_v14, %s10523_s1 }
0x1194   : > { %6081 = vrot.lane.b32.xlu1 %v10955_v33, %s10523_s1  ;;  %v5546_v13 = vpop.xlane.xlu0 %5545 }
0x1198   : > { %6079 = vrot.lane.b32.xlu1 %v10986_v49, %s10523_s1  ;;  %v5540_v44 = vpop.xlane.xlu0 %5539 }
0x119c   : > { %v5549_v28 = vpop.xlane.xlu1 %5548 }
0x119d   : > { %10187 = vrcp.f32 %v5549_v28 }
0x119e   : > { %10189 = vrcp.f32 %v5540_v44 }
0x119f   : > { %10191 = vrcp.f32 %v5546_v13 }
0x11a0   : > { %v5543_v55 = vpop.xlane.xlu1 %5542 }
0x11a1   : > { %10193 = vrcp.f32 %v5543_v55 }
0x11a4   : > { %v5570_v37 = vpop.xlane.xlu0 %5569 }
0x11a8   : > { %v5564_v41 = vpop.xlane.xlu0 %5563 }
0x11a9   : > { %v5573_v42 = vpop.xlane.xlu1 %5572 }
0x11aa   : > { %v10188_v16 = vpop.eup %10187  ;;  %10195 = vrcp.f32 %v5573_v42 }
0x11ab   : > { %v10190_v14 = vpop.eup %10189  ;;  %10197 = vrcp.f32 %v5564_v41  ;;  %v5593_v49 = vmul.f32 %v10188_v16, %v12865_v17 }
0x11ac   : > { %v10192_v53 = vpop.eup %10191  ;;  %10199 = vrcp.f32 %v5570_v37  ;;  %v5587_v36 = vmul.f32 %v10190_v14, %v12860_v20 }
0x11ad   : > { %v5567_v33 = vpop.xlane.xlu1 %5566  ;;  %v5591_v1 = vmul.f32 %v10192_v53, %v12854_v56 }
0x11ae   : > { %v10194_v63 = vpop.eup %10193  ;;  %10201 = vrcp.f32 %v5567_v33 }
0x11af   : > { %v5589_v19 = vmul.f32 %v10194_v63, %v12869_v18  ;;  %v5619_v10 = vpack.c.bf16 %v5593_v49, %v5591_v1 }
0x11b1   : > { %v5618_v46 = vpack.c.bf16 %v5589_v19, %v5587_v36  ;;  %v5810_v44 = vpop.permute.xlu1 %5809 }
0x11b3   : > { %v5558_v48 = vpop.xlane.xlu0 %5557  ;;  %9120 = vmatprep.mubr.msk.bf16.mxu0 %vm1217_vm1, %v5618_v46 }
0x11b4   : > { %9121 = vmatmul.mubr.msk.bf16.vlgmr.msra.gmra.mxu0 %vm1217_vm1, %v5619_v10 }
0x11b5   : > { %9133 = vmatpush3.bf16.msra.mxu0 %v12717_v45 }
0x11b6   : > { %9134 = vmatprep.subr.bf16.mxu0 %v12899_v43 }
0x11b7   : > { %v5552_v52 = vpop.xlane.xlu0 %5551  ;;  %v10196_v17 = vpop.eup %10195 }
0x11b8   : > { %v10198_v39 = vpop.eup %10197  ;;  %v5609_v18 = vmul.f32 %v10196_v17, %v12881_v50 }
0x11b9   : > { %9135 = vmatpush3.bf16.msra.mxu0 %v12899_v43  ;;  %v10200_v20 = vpop.eup %10199  ;;  %v5603_v31 = vmul.f32 %v10198_v39, %v12879_v60  ;;  %v5888_v43 = vsel %vm972_vm0, %v12901_v6, 0 }
0x11ba   : > { %9300 = vmatprep.subr.msk.bf16.mxu0 %vm972_vm0, %v12901_v6  ;;  %v5607_v45 = vmul.f32 %v10200_v20, %v12874_v54 }
0x11bb   : > { %v10202_v56 = vpop.eup %10201  ;;  %v5875_v9 = vpop.permute.xlu0 %5874 }
0x11bc   : > { %v5605_v21 = vmul.f32 %v10202_v56, %v12887_v23  ;;  %v5623_v13 = vpack.c.bf16 %v5609_v18, %v5607_v45  ;;  %v5885_v23 = vsel %vm972_vm0, %v5875_v9, 0 }
0x11be   : > { %v5622_v7 = vpack.c.bf16 %v5605_v21, %v5603_v31 }
0x11bf   : > { %v5871_v3 = vpop.permute.xlu0 %5870 }
0x11c0   : > { %9136 = vmatprep.mubr.msk.bf16.mxu0 %vm1217_vm1, %v5622_v7 }
0x11c1   : > { %9137 = vmatmul.mubr.msk.bf16.vlgmr.msra.gmra.mxu0 %vm1217_vm1, %v5623_v13 }
0x11c2   : > { %9149 = vmatpush3.bf16.xpose.msra.mxu0 %v5888_v43  ;;  %9152 = vmatprep.mubr.msk.bf16.mxu0 %vm972_vm0, %v5871_v3 }
0x11c3   : > { %9301 = vmatprep.subr.msk.bf16.mxu0 %vm972_vm0, %v5875_v9  ;;  %v5946_v60 = vpop.permute.xlu0 %5945 }
0x11c7   : > { %v5940_v50 = vpop.permute.xlu0 %5939 }
0x11ca   : > { %9151 = vmatpush3.bf16.xpose.msra.mxu0 %v5885_v23 }
0x11cb   : > { %v6015_v54 = vpop.permute.xlu0 %6014 }
0x11cc   : > { %9304 = vmatprep.subr.msk.bf16.mxu0 %vm972_vm0, %v6015_v54 }
0x11e2   : > { %v5561_v28 = vpop.xlane.xlu1 %5560 }
0x11e3   : > { %10203 = vrcp.f32 %v5561_v28 }
0x11e4   : > { %10205 = vrcp.f32 %v5552_v52 }
0x11e5   : > { %10207 = vrcp.f32 %v5558_v48 }
0x11e6   : > { %v5555_v55 = vpop.xlane.xlu1 %5554 }
0x11e7   : > { %10209 = vrcp.f32 %v5555_v55 }
0x11ea   : > { %v5582_v6 = vpop.xlane.xlu1 %5581 }
0x11ee   : > { %v5576_v37 = vpop.xlane.xlu1 %5575 }
0x11f0   : > { %v10204_v41 = vpop.eup %10203 }
0x11f1   : > { %v10206_v42 = vpop.eup %10205  ;;  %v5601_v53 = vmul.f32 %v10204_v41, %v12922_v15 }
0x11f2   : > { %v10208_v16 = vpop.eup %10207  ;;  %v5595_v63 = vmul.f32 %v10206_v42, %v12895_v12  ;;  %v6009_v12 = vpop.permute.xlu0 %6008 }
0x11f3   : > { %v5599_v36 = vmul.f32 %v10208_v16, %v12891_v58  ;;  %v6026_v58 = vsel %vm972_vm0, %v6015_v54, 0 }
0x11f4   : > { %v10210_v14 = vpop.eup %10209  ;;  %v5585_v33 = vpop.xlane.xlu1 %5584 }
0x11f5   : > { %v5597_v49 = vmul.f32 %v10210_v14, %v12929_v32  ;;  %10211 = vrcp.f32 %v5585_v33  ;;  %v5621_v46 = vpack.c.bf16 %v5601_v53, %v5599_v36 }
0x11f6   : > { %10213 = vrcp.f32 %v5576_v37 }
0x11f7   : > { %v5620_v19 = vpack.c.bf16 %v5597_v49, %v5595_v63  ;;  %10215 = vrcp.f32 %v5582_v6 }
0x11f8   : > { %v5579_v1 = vpop.xlane.xlu1 %5578 }
0x11f9   : > { %9128 = vmatprep.mubr.msk.bf16.mxu1 %vm1217_vm1, %v5620_v19  ;;  %10217 = vrcp.f32 %v5579_v1 }
0x11fa   : > { %9129 = vmatmul.mubr.msk.bf16.vlgmr.msra.gmra.mxu1 %vm1217_vm1, %v5621_v46 }
0x11fb   : > { %9141 = vmatpush3.bf16.msra.mxu1 %v12905_v61 }
0x11fc   : > { %9142 = vmatprep.subr.bf16.mxu1 %v5810_v44  ;;  %v5873_v15 = vpop.permute.xlu1 %5872 }
0x11fd   : > { %9153 = vmatmul.mubr.msk.bf16.vlgmr.msra.gmra.mxu0 %vm972_vm0, %v5873_v15 }
0x11fe   : > { %9165 = vmatpush3.bf16.xpose.msra.mxu0 %v6026_v58  ;;  %9168 = vmatprep.mubr.msk.bf16.mxu0 %vm972_vm0, %v6009_v12 }
0x11ff   : > { %9143 = vmatpush3.bf16.msra.mxu1 %v5810_v44 }
0x1200   : > { %9302 = vmatprep.subr.msk.bf16.mxu1 %vm972_vm0, %v5946_v60  ;;  %v5944_v32 = vpop.permute.xlu1 %5943 }
0x1202   : > { %v10212_v10 = vpop.eup %10211 }
0x1203   : > { %v10214_v48 = vpop.eup %10213  ;;  %v5617_v61 = vmul.f32 %v10212_v10, %v12946_v30  ;;  %v5957_v30 = vsel %vm972_vm0, %v5946_v60, 0 }
0x1204   : > { %v5942_v52 = vpop.permute.xlu1 %5941  ;;  %v10216_v17 = vpop.eup %10215  ;;  %v5611_v20 = vmul.f32 %v10214_v48, %v12942_v22  ;;  %v5954_v22 = vsel %vm972_vm0, %v5944_v32, 0 }
0x1205   : > { %v5615_v18 = vmul.f32 %v10216_v17, %v12936_v2 }
0x1206   : > { %v10218_v39 = vpop.eup %10217 }
0x1207   : > { %v5613_v56 = vmul.f32 %v10218_v39, %v12950_v25  ;;  %v5625_v45 = vpack.c.bf16 %v5617_v61, %v5615_v18  ;;  %v6084_v25 = vpop.permute.xlu0 %6083 }
0x1208   : > { %v6013_v9 = vpop.permute.xlu1 %6012  ;;  %v6095_v3 = vsel %vm972_vm0, %v6084_v25, 0 }
0x1209   : > { %9305 = vmatprep.subr.msk.bf16.mxu0 %vm972_vm0, %v6013_v9  ;;  %v6023_v31 = vsel %vm972_vm0, %v6013_v9, 0  ;;  %v5624_v21 = vpack.c.bf16 %v5613_v56, %v5611_v20 }
0x120a   : > { %9167 = vmatpush3.bf16.xpose.msra.mxu0 %v6023_v31 }
0x120b   : > { %9144 = vmatprep.mubr.msk.bf16.mxu1 %vm1217_vm1, %v5624_v21  ;;  %v6078_v7 = vpop.permute.xlu0 %6077 }
0x120c   : > { %9145 = vmatmul.mubr.msk.bf16.vlgmr.msra.gmra.mxu1 %vm1217_vm1, %v5625_v45  ;;  %v6011_v2 = vpop.permute.xlu1 %6010 }
0x120d   : > { %9157 = vmatpush3.bf16.xpose.msra.mxu1 %v5957_v30  ;;  %9160 = vmatprep.mubr.msk.bf16.mxu1 %vm972_vm0, %v5940_v50 }
0x120e   : > { %9303 = vmatprep.subr.msk.bf16.mxu1 %vm972_vm0, %v5944_v32 }
0x1210   : > { %v6082_v13 = vpop.permute.xlu1 %6081 }
0x1211   : > { %9169 = vmatmul.mubr.msk.bf16.vlgmr.msra.gmra.mxu0 %vm972_vm0, %v6011_v2  ;;  %v6092_v43 = vsel %vm972_vm0, %v6082_v13, 0 }
0x1214   : > { %v6080_v60 = vpop.permute.xlu1 %6079 }
0x1215   : > { %9159 = vmatpush3.bf16.xpose.msra.mxu1 %v5954_v22 }
0x1216   : > { %9306 = vmatprep.subr.msk.bf16.mxu1 %vm972_vm0, %v6084_v25 }
0x121c   : > { %9161 = vmatmul.mubr.msk.bf16.vlgmr.msra.gmra.mxu1 %vm972_vm0, %v5942_v52 }
0x121d   : > { %9173 = vmatpush3.bf16.xpose.msra.mxu1 %v6095_v3  ;;  %9176 = vmatprep.mubr.msk.bf16.mxu1 %vm972_vm0, %v6078_v7 }
0x121e   : > { %9307 = vmatprep.subr.msk.bf16.mxu1 %vm972_vm0, %v6082_v13 }
0x1225   : > { %9175 = vmatpush3.bf16.xpose.msra.mxu1 %v6092_v43 }
0x122c   : > { %9177 = vmatmul.mubr.msk.bf16.vlgmr.msra.gmra.mxu1 %vm972_vm0, %v6080_v60 }
0x1274   : > { %v13022_v50 = vpop.f32.mrf.mxu0 }
0x1276   : > { %v13024_v23 = vpop.f32.mrf.mxu0 }
0x1278   : > { %v13026_v54 = vpop.f32.mrf.mxu0 }
0x1279   : > { %v9466_v44 = vpack.i.bf16 %v13026_v54, %v13022_v50  ;;  %v14258_v50 = vld [vmem:[#allocation57_spill] sm:$0xff]  ;;  %v14259_v54 = vld [vmem:[#allocation55_spill] sm:$0xff] }
0x127a   : > { %v13030_v28 = vpop.f32.mrf.mxu0 }
0x127b   : > { %v9461_v55 = vpack.i.bf16 %v13030_v28, %v13024_v23  ;;  %v14255_v23 = vld [vmem:[#allocation43_spill] sm:$0xff]  ;;  %v14256_v28 = vld [vmem:[#allocation41_spill] sm:$0xff] }
0x1281   : > { %v13034_v6 = vpop.f32.mrf.mxu0 }
0x1283   : > { %v13036_v37 = vpop.f32.mrf.mxu0 }
0x1285   : > { %v13038_v41 = vpop.f32.mrf.mxu0 }
0x1286   : > { %v9596_v42 = vpack.i.bf16 %v13038_v41, %v13034_v6 }
0x1287   : > { %v13042_v16 = vpop.f32.mrf.mxu0 }
0x12ba   : > { %v13046_v53 = vpop.f32.mrf.mxu1 }
0x12bc   : > { %v13048_v33 = vpop.f32.mrf.mxu1 }
0x12bd   : > { %v13050_v63 = vpop.f32.mrf.mxu0 }
0x12be   : > { %v13052_v49 = vpop.f32.mrf.mxu1  ;;  %v6152_v36 = vsel %vm1217_vm1, %v13050_v63, -inf }
0x12bf   : > { %v9526_v19 = vpack.i.bf16 %v13052_v49, %v13046_v53  ;;  %6153 = vmax.xlane.f32.xlu0 %v6152_v36  ;;  %v13058_v1 = vpop.f32.mrf.mxu0  ;;  %v14285_v53 = vld [vmem:[#allocation68_spill] sm:$0xff]  ;;  %v14286_v49 = vld [vmem:[#allocation70_spill] sm:$0xff] }
0x12c0   : > { %v13060_v46 = vpop.f32.mrf.mxu1  ;;  %v6146_v58 = vsel %vm1217_vm1, %v13058_v1, -inf }
0x12c1   : > { %v9521_v15 = vpack.i.bf16 %v13060_v46, %v13048_v33  ;;  %v13064_v12 = vpop.f32.mrf.mxu0  ;;  %v14280_v33 = vld [vmem:[#allocation52_spill] sm:$0xff]  ;;  %v14281_v46 = vld [vmem:[#allocation54_spill] sm:$0xff] }
0x12c2   : > { %v6155_v48 = vsel %vm1217_vm1, %v13064_v12, -inf }
0x12c3   : > { %6147 = vmax.xlane.f32.xlu0 %v6146_v58  ;;  %v13068_v32 = vpop.f32.mrf.mxu0 }
0x12c4   : > { %v6149_v10 = vsel %vm1217_vm1, %v13068_v32, -inf }
0x12c5   : > { %6150 = vmax.xlane.f32.xlu1 %v6149_v10 }
0x12c7   : > { %6156 = vmax.xlane.f32.xlu0 %v6155_v48 }
0x12cc   : > { %v13074_v52 = vpop.f32.mrf.mxu1 }
0x12ce   : > { %v13076_v17 = vpop.f32.mrf.mxu1 }
0x12d0   : > { %v13078_v39 = vpop.f32.mrf.mxu1 }
0x12d1   : > { %v13082_v20 = vpop.f32.mrf.mxu0 }
0x12d2   : > { %v13084_v56 = vpop.f32.mrf.mxu1  ;;  %v6176_v18 = vsel %vm1217_vm1, %v13082_v20, -inf }
0x12d3   : > { %6177 = vmax.xlane.f32.xlu0 %v6176_v18  ;;  %v13090_v31 = vpop.f32.mrf.mxu0 }
0x12d4   : > { %v6170_v45 = vsel %vm1217_vm1, %v13090_v31, -inf }
0x12d5   : > { %v13092_v21 = vpop.f32.mrf.mxu0 }
0x12d6   : > { %v6179_v30 = vsel %vm1217_vm1, %v13092_v21, -inf }
0x12d7   : > { %6171 = vmax.xlane.f32.xlu0 %v6170_v45  ;;  %6180 = vmax.xlane.f32.xlu1 %v6179_v30  ;;  %v13098_v2 = vpop.f32.mrf.mxu0 }
0x12d8   : > { %v6173_v22 = vsel %vm1217_vm1, %v13098_v2, -inf }
0x12db   : > { %6174 = vmax.xlane.f32.xlu1 %v6173_v22 }
0x12dc   : > { %v13102_v25 = vpop.f32.mrf.mxu1 }
0x12dd   : > { %v6164_v7 = vsel %vm1217_vm1, %v13102_v25, -inf }
0x12de   : > { %v13106_v3 = vpop.f32.mrf.mxu1  ;;  %6165 = vmax.xlane.f32.xlu0 %v6164_v7 }
0x12df   : > { %v6158_v43 = vsel %vm1217_vm1, %v13106_v3, -inf }
0x12e0   : > { %v13108_v13 = vpop.f32.mrf.mxu1 }
0x12e1   : > { %v6167_v60 = vsel %vm1217_vm1, %v13108_v13, -inf }
0x12e2   : > { %v13114_v36 = vpop.f32.mrf.mxu1  ;;  %6159 = vmax.xlane.f32.xlu0 %v6158_v43  ;;  %6168 = vmax.xlane.f32.xlu1 %v6167_v60 }
0x12e3   : > { %v6161_v58 = vsel %vm1217_vm1, %v13114_v36, -inf }
0x12e6   : > { %6162 = vmax.xlane.f32.xlu1 %v6161_v58 }
0x12ec   : > { %v13122_v10 = vpop.f32.mrf.mxu1 }
0x12ed   : > { %v6188_v18 = vsel %vm1217_vm1, %v13122_v10, -inf }
0x12ee   : > { %v13124_v48 = vpop.f32.mrf.mxu1 }
0x12ef   : > { %v6182_v30 = vsel %vm1217_vm1, %v13124_v48, -inf }
0x12f0   : > { %v13128_v45 = vpop.f32.mrf.mxu1 }
0x12f1   : > { %v6191_v22 = vsel %vm1217_vm1, %v13128_v45, -inf }
0x12f7   : > { %6330 = vrot.lane.b32.xlu1 %v10944_v29, %s10523_s1  ;;  %v13134_v29 = vpop.f32.mrf.mxu1 }
0x12f8   : > { %6332 = vrot.lane.b32.xlu0 %v10929_v5, %s10523_s1  ;;  %v6185_v5 = vsel %vm1217_vm1, %v13134_v29, -inf }
0x1317   : > { %6189 = vmax.xlane.f32.xlu0 %v6188_v18 }
0x131b   : > { %6183 = vmax.xlane.f32.xlu0 %v6182_v30  ;;  %6192 = vmax.xlane.f32.xlu1 %v6191_v22 }
0x131f   : > { %6186 = vmax.xlane.f32.xlu1 %v6185_v5 }
0x1330   : > { %6391 = vrot.lane.b32.xlu1 %v10988_v57, %s10523_s1 }
0x1331   : > { %6393 = vrot.lane.b32.xlu0 %v10975_v38, %s10523_s1 }
0x1348   : > { %v6154_v7 = vpop.xlane.xlu0 %6153 }
0x1349   : > { %v6196_v43 = vsub.f32 %v13050_v63, %v6154_v7 }
0x134b   : > { %v6214_v60 = vmul.f32 1.442695, %v6196_v43 }
0x134c   : > { %v6148_v58 = vpop.xlane.xlu0 %6147 }
0x134d   : > { %10219 = vpow2.f32 %v6214_v60  ;;  %v6194_v18 = vsub.f32 %v13058_v1, %v6148_v58 }
0x134e   : > { %v6151_v30 = vpop.xlane.xlu1 %6150 }
0x134f   : > { %v6210_v22 = vmul.f32 1.442695, %v6194_v18  ;;  %v6195_v9 = vsub.f32 %v13068_v32, %v6151_v30 }
0x1350   : > { %v6157_v61 = vpop.xlane.xlu0 %6156 }
0x1351   : > { %10221 = vpow2.f32 %v6210_v22  ;;  %v6197_v5 = vsub.f32 %v13064_v12, %v6157_v61  ;;  %v6212_v57 = vmul.f32 1.442695, %v6195_v9 }
0x1353   : > { %v6216_v14 = vmul.f32 1.442695, %v6197_v5 }
0x1355   : > { %10223 = vpow2.f32 %v6216_v14 }
0x1356   : > { %10225 = vpow2.f32 %v6212_v57 }
0x135a   : > { %v13146_v38 = vpop.eup %10219 }
0x135b   : > { %v6248_v63 = vsel %vm1217_vm1, %v13146_v38, 0.0 }
0x135c   : > { %v6178_v7 = vpop.xlane.xlu0 %6177  ;;  %6249 = vadd.xlane.f32.xlu0 %v6248_v63 }
0x135d   : > { %v6204_v1 = vsub.f32 %v13082_v20, %v6178_v7 }
0x135e   : > { %v13151_v43 = vpop.eup %10221 }
0x135f   : > { %v6230_v32 = vmul.f32 1.442695, %v6204_v1  ;;  %v6242_v60 = vsel %vm1217_vm1, %v13151_v43, 0.0 }
0x1360   : > { %v6172_v12 = vpop.xlane.xlu0 %6171  ;;  %6243 = vadd.xlane.f32.xlu0 %v6242_v60  ;;  %v6181_v61 = vpop.xlane.xlu1 %6180 }
0x1361   : > { %10227 = vpow2.f32 %v6230_v32  ;;  %v6202_v14 = vsub.f32 %v13090_v31, %v6172_v12  ;;  %v6205_v9 = vsub.f32 %v13092_v21, %v6181_v61 }
0x1362   : > { %v13157_v58 = vpop.eup %10223 }
0x1363   : > { %v6226_v18 = vmul.f32 1.442695, %v6202_v14  ;;  %v6232_v30 = vmul.f32 1.442695, %v6205_v9  ;;  %v6251_v20 = vsel %vm1217_vm1, %v13157_v58, 0.0  ;;  %v13161_v22 = vpop.eup %10225 }
0x1364   : > { %6252 = vadd.xlane.f32.xlu1 %v6251_v20  ;;  %v6175_v5 = vpop.xlane.xlu1 %6174  ;;  %v6245_v31 = vsel %vm1217_vm1, %v13161_v22, 0.0 }
0x1365   : > { %10229 = vpow2.f32 %v6226_v18  ;;  %v6203_v57 = vsub.f32 %v13098_v2, %v6175_v5 }
0x1366   : > { %10231 = vpow2.f32 %v6232_v30 }
0x1367   : > { %v6228_v63 = vmul.f32 1.442695, %v6203_v57  ;;  %v6166_v7 = vpop.xlane.xlu0 %6165 }
0x1368   : > { %v6200_v21 = vsub.f32 %v13102_v25, %v6166_v7  ;;  %6246 = vadd.xlane.f32.xlu1 %v6245_v31 }
0x1369   : > { %10233 = vpow2.f32 %v6228_v63 }
0x136a   : > { %v6222_v1 = vmul.f32 1.442695, %v6200_v21 }
0x136b   : > { %v6160_v32 = vpop.xlane.xlu0 %6159  ;;  %v6169_v60 = vpop.xlane.xlu1 %6168 }
0x136c   : > { %10235 = vpow2.f32 %v6222_v1  ;;  %v6198_v12 = vsub.f32 %v13106_v3, %v6160_v32  ;;  %v6201_v61 = vsub.f32 %v13108_v13, %v6169_v60 }
0x136e   : > { %v13169_v14 = vpop.eup %10227  ;;  %v6218_v2 = vmul.f32 1.442695, %v6198_v12  ;;  %v6224_v9 = vmul.f32 1.442695, %v6201_v61 }
0x136f   : > { %v6333_v18 = vpop.permute.xlu0 %6332  ;;  %v6163_v30 = vpop.xlane.xlu1 %6162  ;;  %v6272_v20 = vsel %vm1217_vm1, %v13169_v14, 0.0 }
0x1370   : > { %10237 = vpow2.f32 %v6218_v2  ;;  %v6199_v25 = vsub.f32 %v13114_v36, %v6163_v30  ;;  %9180 = vmatprep.subr.bf16.mxu0 %v6333_v18  ;;  %6273 = vadd.xlane.f32.xlu0 %v6272_v20 }
0x1371   : > { %10239 = vpow2.f32 %v6224_v9  ;;  %9181 = vmatpush3.bf16.msra.mxu0 %v6333_v18 }
0x1372   : > { %v13174_v5 = vpop.eup %10229  ;;  %v6220_v3 = vmul.f32 1.442695, %v6199_v25 }
0x1373   : > { %v6331_v13 = vpop.permute.xlu1 %6330  ;;  %v6266_v57 = vsel %vm1217_vm1, %v13174_v5, 0.0  ;;  %v13178_v63 = vpop.eup %10231 }
0x1374   : > { %10241 = vpow2.f32 %v6220_v3  ;;  %9182 = vmatprep.subr.bf16.mxu0 %v6331_v13  ;;  %6267 = vadd.xlane.f32.xlu1 %v6266_v57  ;;  %v6275_v36 = vsel %vm1217_vm1, %v13178_v63, 0.0 }
0x1375   : > { %9183 = vmatpush3.bf16.msra.mxu0 %v6331_v13 }
0x1376   : > { %v13180_v7 = vpop.eup %10233 }
0x1377   : > { %v6269_v31 = vsel %vm1217_vm1, %v13180_v7, 0.0 }
0x1378   : > { %6276 = vadd.xlane.f32.xlu1 %v6275_v36  ;;  %6270 = vadd.xlane.f32.xlu0 %v6269_v31 }
0x1379   : > { %v13186_v21 = vpop.eup %10235 }
0x137a   : > { %v6260_v1 = vsel %vm1217_vm1, %v13186_v21, 0.0 }
0x137c   : > { %6261 = vadd.xlane.f32.xlu0 %v6260_v1 }
0x137d   : > { %v13190_v32 = vpop.eup %10237 }
0x137e   : > { %v13192_v60 = vpop.eup %10239  ;;  %v6254_v61 = vsel %vm1217_vm1, %v13190_v32, 0.0 }
0x137f   : > { %v6263_v12 = vsel %vm1217_vm1, %v13192_v60, 0.0 }
0x1380   : > { %6264 = vadd.xlane.f32.xlu1 %v6263_v12  ;;  %6255 = vadd.xlane.f32.xlu0 %v6254_v61 }
0x1381   : > { %v13198_v2 = vpop.eup %10241 }
0x1382   : > { %v6257_v9 = vsel %vm1217_vm1, %v13198_v2, 0.0 }
0x1384   : > { %6258 = vadd.xlane.f32.xlu1 %v6257_v9 }
0x13a0   : > { %v6190_v18 = vpop.xlane.xlu0 %6189 }
0x13a1   : > { %v6208_v30 = vsub.f32 %v13122_v10, %v6190_v18 }
0x13a3   : > { %v6238_v20 = vmul.f32 1.442695, %v6208_v30 }
0x13a4   : > { %v6184_v25 = vpop.xlane.xlu0 %6183  ;;  %v6193_v3 = vpop.xlane.xlu1 %6192 }
0x13a5   : > { %10243 = vpow2.f32 %v6238_v20  ;;  %v6206_v13 = vsub.f32 %v13124_v48, %v6184_v25  ;;  %v6209_v57 = vsub.f32 %v13128_v45, %v6193_v3 }
0x13a7   : > { %v6234_v36 = vmul.f32 1.442695, %v6206_v13  ;;  %v6240_v31 = vmul.f32 1.442695, %v6209_v57  ;;  %v9411_v13 = vpack.i.bf16 %v11523_v24, %v11517_v35  ;;  %v9421_v57 = vpack.i.bf16 %v11823_v47, %v11817_v4  ;;  %v14237_v35 = vld [vmem:[#allocation50_spill] sm:$0xff]  ;;  %v14238_v24 = vld [vmem:[#allocation49_spill] sm:$0xff] }
0x13a8   : > { %v6394_v1 = vpop.permute.xlu0 %6393  ;;  %v6187_v12 = vpop.xlane.xlu1 %6186  ;;  %v14241_v4 = vld [vmem:[#allocation63_spill] sm:$0xff] }
0x13a9   : > { %10245 = vpow2.f32 %v6234_v36  ;;  %v6207_v61 = vsub.f32 %v13134_v29, %v6187_v12  ;;  %9188 = vmatprep.subr.bf16.mxu1 %v6394_v1  ;;  %v14244_v12 = vld [vmem:[#allocation80_spill] sm:$0xff] }
0x13aa   : > { %9189 = vmatpush3.bf16.msra.mxu1 %v6394_v1  ;;  %10247 = vpow2.f32 %v6240_v31  ;;  %v14239_v1 = vpack.i.bf16 %v14237_v35, %v14238_v24  ;;  %v14264_v24 = vld [vmem:[#allocation73_spill] sm:$0xff] }
0x13ab   : > { %v6236_v9 = vmul.f32 1.442695, %v6207_v61 }
0x13ac   : > { %v6392_v10 = vpop.permute.xlu1 %6391 }
0x13ad   : > { %10249 = vpow2.f32 %v6236_v9  ;;  %9190 = vmatprep.subr.bf16.mxu1 %v6392_v10  ;;  %v14246_v9 = vld [vmem:[#allocation81_spill] sm:$0xff] }
0x13ae   : > { %9191 = vmatpush3.bf16.msra.mxu1 %v6392_v10  ;;  %v14247_v10 = vld [vmem:[#allocation79_spill] sm:$0xff] }
0x13b2   : > { %v13206_v18 = vpop.eup %10243 }
0x13b3   : > { %v6284_v48 = vsel %vm1217_vm1, %v13206_v18, 0.0 }
0x13b4   : > { %6285 = vadd.xlane.f32.xlu0 %v6284_v48  ;;  %v14248_v48 = vpack.i.bf16 %v14246_v9, %v14247_v10  ;;  %v14270_v10 = vld [vmem:[#allocation89_spill] sm:$0xff] }
0x13b6   : > { %v13210_v45 = vpop.eup %10245 }
0x13b7   : > { %v6278_v30 = vsel %vm1217_vm1, %v13210_v45, 0.0  ;;  %v13214_v29 = vpop.eup %10247 }
0x13b8   : > { %6279 = vadd.xlane.f32.xlu1 %v6278_v30  ;;  %v6287_v25 = vsel %vm1217_vm1, %v13214_v29, 0.0  ;;  %v14249_v30 = vpack.i.bf16 %v12735_v62, %v12729_v8 }
0x13ba   : > { %v13216_v20 = vpop.eup %10249 }
0x13bb   : > { %v6281_v3 = vsel %vm1217_vm1, %v13216_v20, 0.0 }
0x13bc   : > { %6288 = vadd.xlane.f32.xlu1 %v6287_v25  ;;  %6282 = vadd.xlane.f32.xlu0 %v6281_v3  ;;  %v14250_v3 = vpack.i.bf16 %v12731_v0, %v12727_v27  ;;  %v14253_v27 = vld [vmem:[#allocation56_spill] sm:$0xff]  ;;  %v14254_v0 = vld [vmem:[#allocation58_spill] sm:$0xff] }
0x13bd   : > { %v9481_v62 = vpack.i.bf16 %v14254_v0, %v14253_v27 }
0x13cd   : > { %6452 = vrot.lane.b32.xlu1 %v10889_v11, %s10523_s1  ;;  %v14233_v11 = vld [vmem:[#allocation36_spill] sm:$0xff] }
0x13ce   : > { %v14234_v36 = vpack.i.bf16 %v11519_v51, %v14233_v11  ;;  %v14243_v51 = vld [vmem:[#allocation82_spill] sm:$0xff] }
0x13cf   : > { %v14245_v61 = vpack.i.bf16 %v14243_v51, %v14244_v12 }
0x13d1   : > { %6515 = vrot.lane.b32.xlu1 %v10997_v26, %s10523_s1  ;;  %v14235_v26 = vld [vmem:[#allocation64_spill] sm:$0xff] }
0x13d2   : > { %6454 = vrot.lane.b32.xlu0 %v10970_v34, %s10523_s1  ;;  %v14236_v34 = vld [vmem:[#allocation66_spill] sm:$0xff] }
0x13d3   : > { %v9431_v31 = vpack.i.bf16 %v14236_v34, %v14235_v26  ;;  %v14261_v34 = vld [vmem:[#allocation74_spill] sm:$0xff] }
0x13d5   : > { %6513 = vrot.lane.b32.xlu1 %v10908_v40, %s10523_s1  ;;  %v14240_v40 = vld [vmem:[#allocation65_spill] sm:$0xff] }
0x13d6   : > { %9412 = vrot.lane.b32.xlu0 %v9411_v13, %s10523_s1  ;;  %v14242_v47 = vpack.i.bf16 %v14240_v40, %v14241_v4  ;;  %v14251_v13 = vld [vmem:[#allocation42_spill] sm:$0xff] }
0x13d7   : > { %v14267_v4 = vld [vmem:[#allocation90_spill] sm:$0xff] }
0x13d9   : > { %9417 = vrot.lane.b32.xlu1 %v14234_v36, %s10523_s1 }
0x13da   : > { %9422 = vrot.lane.b32.xlu0 %v9421_v57, %s10522_s18  ;;  %v14252_v57 = vld [vmem:[#allocation44_spill] sm:$0xff] }
0x13db   : > { %v9471_v11 = vpack.i.bf16 %v14252_v57, %v14251_v13  ;;  %v14273_v13 = vld [vmem:[#allocation100_spill] sm:$0xff] }
0x13dc   : > { %v14274_v57 = vpack.i.bf16 %v12767_v59, %v14273_v13 }
0x13dd   : > { %9427 = vrot.lane.b32.xlu1 %v14239_v1, %s10522_s18  ;;  %v14265_v1 = vld [vmem:[#allocation71_spill] sm:$0xff] }
0x13de   : > { %9432 = vrot.lane.b32.xlu0 %v9431_v31, %s10521_s19  ;;  %v14262_v31 = vld [vmem:[#allocation72_spill] sm:$0xff]  ;;  %v14266_v40 = vpack.i.bf16 %v14264_v24, %v14265_v1 }
0x13df   : > { %v14263_v35 = vpack.i.bf16 %v14261_v34, %v14262_v31  ;;  %v14283_v34 = vld [vmem:[#allocation37_spill] sm:$0xff] }
0x13e1   : > { %9437 = vrot.lane.b32.xlu1 %v14242_v47, %s10521_s19  ;;  %v14268_v47 = vld [vmem:[#allocation88_spill] sm:$0xff] }
0x13e2   : > { %9442 = vrot.lane.b32.xlu0 %v14245_v61, %s10520_s24  ;;  %v14269_v51 = vpack.i.bf16 %v14267_v4, %v14268_v47  ;;  %v14288_v4 = vld [vmem:[#allocation51_spill] sm:$0xff] }
0x13e5   : > { %9447 = vrot.lane.b32.xlu1 %v14248_v48, %s10520_s24  ;;  %v6250_v25 = vpop.xlane.xlu0 %6249  ;;  %v14271_v48 = vld [vmem:[#allocation87_spill] sm:$0xff] }
0x13e6   : > { %9452 = vrot.lane.b32.xlu0 %v14249_v30, %s10519_s30  ;;  %v14272_v30 = vpack.i.bf16 %v14270_v10, %v14271_v48  ;;  %v14290_v10 = vld [vmem:[#allocation69_spill] sm:$0xff]  ;;  %v14291_v48 = vld [vmem:[#allocation67_spill] sm:$0xff] }
0x13e9   : > { %9457 = vrot.lane.b32.xlu1 %v14250_v3, %s10519_s30  ;;  %v6244_v36 = vpop.xlane.xlu0 %6243 }
0x13ea   : > { %9462 = vrot.lane.b32.xlu0 %v9461_v55, %s10518_s17  ;;  %v14257_v55 = vpack.i.bf16 %v14255_v23, %v14256_v28  ;;  %v14276_v23 = vld [vmem:[#allocation99_spill] sm:$0xff] }
0x13ed   : > { %9467 = vrot.lane.b32.xlu1 %v9466_v44, %s10518_s17  ;;  %v6253_v8 = vpop.xlane.xlu1 %6252  ;;  %v14260_v44 = vpack.i.bf16 %v14258_v50, %v14259_v54 }
0x13ee   : > { %9472 = vrot.lane.b32.xlu0 %v9471_v11, %s10523_s1  ;;  %10251 = vrcp.f32 %v6253_v8 }
0x13ef   : > { %10253 = vrcp.f32 %v6244_v36 }
0x13f0   : > { %10255 = vrcp.f32 %v6250_v25 }
0x13f1   : > { %9477 = vrot.lane.b32.xlu1 %v14257_v55, %s10523_s1  ;;  %v6247_v26 = vpop.xlane.xlu1 %6246 }
0x13f2   : > { %9482 = vrot.lane.b32.xlu0 %v9481_v62, %s10522_s18  ;;  %10257 = vrcp.f32 %v6247_v26  ;;  %v14275_v62 = vld [vmem:[#allocation101_spill] sm:$0xff]  ;;  %v14278_v26 = vld [vmem:[#allocation38_spill] sm:$0xff] }
0x13f3   : > { %v14277_v28 = vpack.i.bf16 %v14275_v62, %v14276_v23 }
0x13f5   : > { %9487 = vrot.lane.b32.xlu1 %v14260_v44, %s10522_s18  ;;  %v14282_v44 = vld [vmem:[#allocation39_spill] sm:$0xff] }
0x13f6   : > { %9492 = vrot.lane.b32.xlu0 %v14263_v35, %s10521_s19  ;;  %v14284_v31 = vpack.i.bf16 %v14282_v44, %v14283_v34 }
0x13f9   : > { %9497 = vrot.lane.b32.xlu1 %v14266_v40, %s10521_s19  ;;  %v6274_v9 = vpop.xlane.xlu0 %6273  ;;  %v14287_v40 = vld [vmem:[#allocation53_spill] sm:$0xff] }
0x13fa   : > { %9502 = vrot.lane.b32.xlu0 %v14269_v51, %s10520_s24  ;;  %v14289_v47 = vpack.i.bf16 %v14287_v40, %v14288_v4 }
0x13fb   : > { %v10252_v12 = vpop.eup %10251 }
0x13fc   : > { %v10254_v61 = vpop.eup %10253  ;;  %v6297_v36 = vmul.f32 %v10252_v12, %v13157_v58 }
0x13fd   : > { %9507 = vrot.lane.b32.xlu1 %v14272_v30, %s10520_s24  ;;  %v6268_v25 = vpop.xlane.xlu1 %6267  ;;  %v10256_v3 = vpop.eup %10255  ;;  %v6291_v8 = vmul.f32 %v10254_v61, %v13151_v43  ;;  %v14279_v43 = vld [vmem:[#allocation40_spill] sm:$0xff]  ;;  %v14292_v30 = vpack.i.bf16 %v14290_v10, %v14291_v48 }
0x13fe   : > { %9512 = vrot.lane.b32.xlu0 %v14274_v57, %s10519_s30  ;;  %10259 = vrcp.f32 %v6268_v25  ;;  %v6295_v0 = vmul.f32 %v10256_v3, %v13146_v38  ;;  %v9531_v50 = vpack.i.bf16 %v14279_v43, %v14278_v26 }
0x13ff   : > { %v10258_v11 = vpop.eup %10257 }
0x1400   : > { %v6293_v27 = vmul.f32 %v10258_v11, %v13161_v22  ;;  %v6323_v58 = vpack.c.bf16 %v6297_v36, %v6295_v0 }
0x1401   : > { %9517 = vrot.lane.b32.xlu1 %v14277_v28, %s10519_s30  ;;  %v6271_v55 = vpop.xlane.xlu0 %6270  ;;  %v6277_v38 = vpop.xlane.xlu1 %6276 }
0x1402   : > { %10261 = vrcp.f32 %v6271_v55  ;;  %9522 = vrot.lane.b32.xlu0 %v9521_v15, %s10518_s17  ;;  %v6322_v59 = vpack.c.bf16 %v6293_v27, %v6291_v8  ;;  %v9541_v15 = vpack.i.bf16 %v14281_v46, %v14280_v33 }
0x1404   : > { %9184 = vmatprep.mubr.msk.bf16.mxu0 %vm1217_vm1, %v6322_v59 }
0x1405   : > { %9527 = vrot.lane.b32.xlu1 %v9526_v19, %s10518_s17  ;;  %v6262_v22 = vpop.xlane.xlu0 %6261  ;;  %9185 = vmatmul.mubr.msk.bf16.vlgmr.msra.gmra.mxu0 %vm1217_vm1, %v6323_v58  ;;  %v9551_v19 = vpack.i.bf16 %v14286_v49, %v14285_v53 }
0x1406   : > { %9532 = vrot.lane.b32.xlu0 %v9531_v50, %s10523_s1 }
0x1409   : > { %v6265_v54 = vpop.xlane.xlu1 %6264  ;;  %9537 = vrot.lane.b32.xlu1 %v14284_v31, %s10523_s1  ;;  %v6256_v35 = vpop.xlane.xlu0 %6255 }
0x140a   : > { %9542 = vrot.lane.b32.xlu0 %v9541_v15, %s10522_s18  ;;  %10263 = vrcp.f32 %v6265_v54 }
0x140b   : > { %10265 = vrcp.f32 %v6256_v35  ;;  %v10260_v24 = vpop.eup %10259 }
0x140c   : > { %10267 = vrcp.f32 %v6262_v22  ;;  %v6307_v12 = vmul.f32 %v10260_v24, %v13174_v5 }
0x140d   : > { %v6259_v1 = vpop.xlane.xlu1 %6258  ;;  %9547 = vrot.lane.b32.xlu1 %v14289_v47, %s10522_s18 }
0x140e   : > { %10269 = vrcp.f32 %v6259_v1  ;;  %9552 = vrot.lane.b32.xlu0 %v9551_v19, %s10521_s19 }
0x140f   : > { %v10262_v51 = vpop.eup %10261  ;;  %10271 = vrcp.f32 %v6277_v38 }
0x1410   : > { %v6309_v61 = vmul.f32 %v10262_v51, %v13180_v7  ;;  %10273 = vrcp.f32 %v6274_v9 }
0x1411   : > { %9557 = vrot.lane.b32.xlu1 %v14292_v30, %s10521_s19 }
0x1412   : > { %v6326_v25 = vpack.c.bf16 %v6309_v61, %v6307_v12 }
0x1414   : > { %9200 = vmatprep.mubr.msk.bf16.mxu0 %vm1217_vm1, %v6326_v25 }
0x1417   : > { %v10264_v3 = vpop.eup %10263 }
0x1418   : > { %v10266_v13 = vpop.eup %10265  ;;  %v6305_v36 = vmul.f32 %v10264_v3, %v13192_v60 }
0x1419   : > { %v10268_v57 = vpop.eup %10267  ;;  %v6299_v8 = vmul.f32 %v10266_v13, %v13190_v32 }
0x141a   : > { %v6303_v7 = vmul.f32 %v10268_v57, %v13186_v21 }
0x141b   : > { %v10270_v11 = vpop.eup %10269 }
0x141c   : > { %v6301_v5 = vmul.f32 %v10270_v11, %v13198_v2  ;;  %v6325_v0 = vpack.c.bf16 %v6305_v36, %v6303_v7  ;;  %v10272_v32 = vpop.eup %10271 }
0x141d   : > { %v10274_v21 = vpop.eup %10273  ;;  %v6313_v59 = vmul.f32 %v10272_v32, %v13178_v63 }
0x141e   : > { %v6324_v27 = vpack.c.bf16 %v6301_v5, %v6299_v8  ;;  %v6311_v26 = vmul.f32 %v10274_v21, %v13169_v14 }
0x1420   : > { %9192 = vmatprep.mubr.msk.bf16.mxu1 %vm1217_vm1, %v6324_v27  ;;  %v6327_v43 = vpack.c.bf16 %v6313_v59, %v6311_v26 }
0x1421   : > { %9193 = vmatmul.mubr.msk.bf16.vlgmr.msra.gmra.mxu1 %vm1217_vm1, %v6325_v0  ;;  %v14294_v0 = vld [vmem:[#allocation33_spill] sm:$0xff] }
0x143d   : > { %v6286_v62 = vpop.xlane.xlu0 %6285 }
0x143e   : > { %10275 = vrcp.f32 %v6286_v62 }
0x1441   : > { %v6280_v23 = vpop.xlane.xlu1 %6279 }
0x1442   : > { %10277 = vrcp.f32 %v6280_v23  ;;  %v14295_v23 = vld [vmem:[#allocation29_spill] sm:$0xff] }
0x1445   : > { %v6283_v28 = vpop.xlane.xlu0 %6282  ;;  %v6289_v60 = vpop.xlane.xlu1 %6288 }
0x1446   : > { %10279 = vrcp.f32 %v6283_v28 }
0x1447   : > { %10281 = vrcp.f32 %v6289_v60 }
0x1449   : > { %v6455_v2 = vpop.permute.xlu0 %6454  ;;  %v6453_v55 = vpop.permute.xlu1 %6452 }
0x144a   : > { %9196 = vmatprep.subr.bf16.mxu0 %v6455_v2 }
0x144b   : > { %9197 = vmatpush3.bf16.msra.mxu0 %v6455_v2  ;;  %v10276_v50 = vpop.eup %10275 }
0x144c   : > { %9198 = vmatprep.subr.bf16.mxu0 %v6453_v55  ;;  %v6319_v54 = vmul.f32 %v10276_v50, %v13206_v18 }
0x144d   : > { %v13358_v58 = vpop.permute.xlu0 %9412  ;;  %v6516_v9 = vpop.permute.xlu1 %6515 }
0x144e   : > { %9204 = vmatprep.subr.bf16.mxu1 %v6516_v9 }
0x144f   : > { %9199 = vmatpush3.bf16.msra.mxu0 %v6453_v55  ;;  %9205 = vmatpush3.bf16.msra.mxu1 %v6516_v9  ;;  %v10278_v33 = vpop.eup %10277 }
0x1450   : > { %v6315_v31 = vmul.f32 %v10278_v33, %v13210_v45 }
0x1451   : > { %v13361_v38 = vpop.permute.xlu0 %9422  ;;  %v6514_v22 = vpop.permute.xlu1 %6513 }
0x1452   : > { %9201 = vmatmul.mubr.msk.bf16.vlgmr.msra.gmra.mxu0 %vm1217_vm1, %v6327_v43  ;;  %9206 = vmatprep.subr.bf16.mxu1 %v6514_v22  ;;  %v14296_v43 = vld [vmem:[#allocation31_spill] sm:$0xff] }
0x1453   : > { %v10280_v46 = vpop.eup %10279  ;;  %9207 = vmatpush3.bf16.msra.mxu1 %v6514_v22  ;;  %v14297_v22 = vld [vmem:[#allocation27_spill] sm:$0xff] }
0x1454   : > { %v10282_v63 = vpop.eup %10281  ;;  %v6317_v15 = vmul.f32 %v10280_v46, %v13216_v20  ;;  %v14293_v20 = vmov 0  }
0x1455   : > { %v6321_v14 = vmul.f32 %v10282_v63, %v13214_v29  ;;  %v13367_v44 = vpop.permute.xlu0 %9432  ;;  %v13369_v34 = vpop.permute.xlu1 %9417 }
0x1456   : > { %v6328_v53 = vpack.c.bf16 %v6317_v15, %v6315_v31  ;;  %v9723_v15 = vld [vmem:[#allocation7 + $0x38] sm:$0xff]   ;;  %v9726_v31 = vld [vmem:[#allocation7 + $0x20] sm:$0xff]  }
0x1457   : > { %v6329_v35 = vpack.c.bf16 %v6321_v14, %v6319_v54  ;;  %9212 = vmatprep.subr.bf16.mxu0 %v9723_v15  ;;  %v9724_v54 = vld [vmem:[#allocation7 + $0x30] sm:$0xff]   ;;  %v9725_v14 = vld [vmem:[#allocation7 + $0x28] sm:$0xff]  }
0x1458   : > { %9208 = vmatprep.mubr.msk.bf16.mxu1 %vm1217_vm1, %v6328_v53  ;;  %9213 = vmatpush3.bf16.msra.mxu0 %v9723_v15  ;;  %v9728_v53 = vld [vmem:[#allocation7 + $0x10] sm:$0xff]   ;;  %v14310_v15 = vpack.i.bf16 %v13042_v16, %v13036_v37  ;;  %v14311_v37 = vld [vmem:[#allocation46_spill] sm:$0xff]  ;;  %v14312_v16 = vld [vmem:[#allocation48_spill] sm:$0xff] }
0x1459   : > { %v13373_v49 = vpop.permute.xlu0 %9442  ;;  %v13375_v19 = vpop.permute.xlu1 %9427  ;;  %9209 = vmatmul.mubr.msk.bf16.vlgmr.msra.gmra.mxu1 %vm1217_vm1, %v6329_v35  ;;  %9214 = vmatprep.subr.bf16.mxu0 %v9724_v54  ;;  %v9727_v35 = vld [vmem:[#allocation7 + $0x18] sm:$0xff]  }
0x145a   : > { %7525 = vmatprep.mubr.bf16.mxu1 %v14293_v20 }
0x145c   : > { %9215 = vmatpush3.bf16.msra.mxu0 %v9724_v54 }
0x145d   : > { %v13379_v18 = vpop.permute.xlu0 %9452  ;;  %v13381_v29 = vpop.permute.xlu1 %9437  ;;  %9216 = vmatprep.subr.bf16.mxu0 %v9725_v14 }
0x1460   : > { %9217 = vmatpush3.bf16.msra.mxu0 %v9725_v14 }
0x1461   : > { %v13383_v24 = vpop.permute.xlu0 %9462  ;;  %v13385_v1 = vpop.permute.xlu1 %9447  ;;  %9218 = vmatprep.subr.bf16.mxu0 %v9726_v31 }
0x1464   : > { %9219 = vmatpush3.bf16.msra.mxu0 %v9726_v31 }
0x1465   : > { %v13387_v45 = vpop.permute.xlu0 %9472  ;;  %v13389_v40 = vpop.permute.xlu1 %9457  ;;  %9220 = vmatprep.subr.bf16.mxu0 %v9727_v35 }
0x1468   : > { %9221 = vmatpush3.bf16.msra.mxu0 %v9727_v35 }
0x1469   : > { %v13391_v4 = vpop.permute.xlu0 %9482  ;;  %v13393_v47 = vpop.permute.xlu1 %9467  ;;  %9222 = vmatprep.subr.bf16.mxu0 %v9728_v53 }
0x146c   : > { %9223 = vmatpush3.bf16.msra.mxu0 %v9728_v53 }
0x146d   : > { %v13395_v51 = vpop.permute.xlu0 %9492  ;;  %v13397_v12 = vpop.permute.xlu1 %9477 }
0x1471   : > { %v13399_v61 = vpop.permute.xlu0 %9502  ;;  %v13401_v10 = vpop.permute.xlu1 %9487 }
0x1475   : > { %v13403_v48 = vpop.permute.xlu0 %9512  ;;  %v13405_v30 = vpop.permute.xlu1 %9497 }
0x1479   : > { %v13407_v25 = vpop.permute.xlu0 %9522  ;;  %v13409_v3 = vpop.permute.xlu1 %9507 }
0x147d   : > { %v9533_v13 = vpop.permute.xlu0 %9532  ;;  %v13411_v57 = vpop.permute.xlu1 %9517 }
0x147e   : > { %v9535_v11 = vunpack.i.h.bf16 %v9533_v13  ;;  %v9534_v36 = vunpack.i.l.bf16 %v9533_v13  ;;  %v9729_v13 = vld [vmem:[#allocation7 + $0x8] sm:$0xff]  }
0x147f   : > { %9224 = vmatprep.subr.bf16.mxu0 %v9729_v13 }
0x1480   : > { %v7031_v62 = vsel %vm972_vm0, %v14294_v0, %v9535_v11  ;;  %v7030_v28 = vsel %vm972_vm0, %v14295_v23, %v9534_v36  ;;  %9225 = vmatpush3.bf16.msra.mxu0 %v9729_v13  ;;  %v9730_v11 = vld [vmem:[#allocation7] sm:$0xff]   ;;  %v14298_v23 = vld [vmem:[#allocation85_spill] sm:$0xff] }
0x1481   : > { %v9543_v8 = vpop.permute.xlu0 %9542  ;;  %v13413_v5 = vpop.permute.xlu1 %9527  ;;  %9226 = vmatprep.subr.bf16.mxu0 %v9730_v11 }
0x1482   : > { %v9545_v7 = vunpack.i.h.bf16 %v9543_v8  ;;  %v9544_v27 = vunpack.i.l.bf16 %v9543_v8 }
0x1484   : > { %v13420_v60 = vsel %vm1217_vm1, %v7030_v28, %v9544_v27  ;;  %v13423_v32 = vsel %vm1217_vm1, %v7031_v62, %v9545_v7  ;;  %9227 = vmatpush3.bf16.msra.mxu0 %v9730_v11  ;;  %v14299_v28 = vld [vmem:[#allocation83_spill] sm:$0xff] }
0x1485   : > { %v9538_v2 = vpop.permute.xlu1 %9537 }
0x1486   : > { %v9540_v55 = vunpack.i.h.bf16 %v9538_v2  ;;  %v9539_v21 = vunpack.i.l.bf16 %v9538_v2  ;;  %v14300_v2 = vpack.i.bf16 %v14298_v23, %v14299_v28  ;;  %v14316_v23 = vld [vmem:[#allocation60_spill] sm:$0xff]  ;;  %v14317_v28 = vld [vmem:[#allocation62_spill] sm:$0xff] }
0x1488   : > { %v7033_v50 = vsel %vm972_vm0, %v14296_v43, %v9540_v55  ;;  %v7032_v33 = vsel %vm972_vm0, %v14297_v22, %v9539_v21  ;;  %v14301_v55 = vld [vmem:[#allocation86_spill] sm:$0xff]  ;;  %v14302_v21 = vld [vmem:[#allocation84_spill] sm:$0xff] }
0x1489   : > { %v9548_v59 = vpop.permute.xlu1 %9547  ;;  %v14308_v22 = vld [vmem:[#allocation96_spill] sm:$0xff] }
0x148a   : > { %v9550_v9 = vunpack.i.h.bf16 %v9548_v59  ;;  %v9549_v26 = vunpack.i.l.bf16 %v9548_v59  ;;  %v14303_v59 = vpack.i.bf16 %v14301_v55, %v14302_v21  ;;  %v14318_v55 = vld [vmem:[#allocation61_spill] sm:$0xff]  ;;  %v14319_v21 = vld [vmem:[#allocation59_spill] sm:$0xff] }
0x148c   : > { %v13430_v46 = vsel %vm1217_vm1, %v7032_v33, %v9549_v26  ;;  %v13433_v63 = vsel %vm1217_vm1, %v7033_v50, %v9550_v9  ;;  %v14304_v9 = vld [vmem:[#allocation97_spill] sm:$0xff]  ;;  %v14305_v26 = vld [vmem:[#allocation95_spill] sm:$0xff]  ;;  %v14307_v50 = vld [vmem:[#allocation98_spill] sm:$0xff] }
0x148d   : > { %v14306_v43 = vpack.i.bf16 %v14304_v9, %v14305_v26  ;;  %v14309_v33 = vpack.i.bf16 %v14307_v50, %v14308_v22  ;;  %v14321_v9 = vld [vmem:[#allocation77_spill] sm:$0xff]  ;;  %v14322_v26 = vld [vmem:[#allocation75_spill] sm:$0xff]  ;;  %v14324_v22 = vld [vmem:[#allocation78_spill] sm:$0xff] }
0x14c5   : > { %v9186_v36 = vpop.f32.mrf.mxu0 }
0x14c7   : > { %v6376_v8 = vpop.f32.mrf.mxu0 }
0x14c9   : > { %v9187_v7 = vpop.f32.mrf.mxu0 }
0x14ca   : > { %v9561_v27 = vpack.i.bf16 %v9187_v7, %v9186_v36  ;;  %v9621_v7 = vpack.i.bf16 %v14312_v16, %v14311_v37  ;;  %v14337_v37 = vld [vmem:[#allocation103_spill] sm:$0xff] }
0x14cb   : > { %v6379_v0 = vpop.f32.mrf.mxu0 }
0x14cc   : > { %v9566_v62 = vpack.i.bf16 %v6379_v0, %v6376_v8  ;;  %9562 = vrot.lane.b32.xlu1 %v9561_v27, %s10517_s16  ;;  %v14313_v27 = vld [vmem:[#allocation47_spill] sm:$0xff]  ;;  %v14314_v0 = vld [vmem:[#allocation45_spill] sm:$0xff] }
0x14ce   : > { %9567 = vrot.lane.b32.xlu0 %v9566_v62, %s10517_s16  ;;  %v14315_v62 = vpack.i.bf16 %v14313_v27, %v14314_v0  ;;  %v9733_v27 = vld [vmem:[#allocation8 + $0x74] ss:$8 sps:$4 sm:$0xff]   ;;  %v14339_v0 = vpack.i.bf16 %v13078_v39, %v13074_v52  ;;  %v9424_v52 = vunpack.i.l.bf16 %v13361_v38 }
0x14cf   : > { %7493 = vmatprep.subr.bf16.mxu1 %v9733_v27  ;;  %v9739_v39 = vld [vmem:[#allocation8 + $0x54] ss:$8 sps:$4 sm:$0xff]  }
0x14d0   : > { %9577 = vrot.lane.b32.xlu1 %v14300_v2, %s10520_s24  ;;  %v9631_v2 = vpack.i.bf16 %v14317_v28, %v14316_v23  ;;  %v9415_v23 = vunpack.i.h.bf16 %v13358_v58 }
0x14d2   : > { %9572 = vrot.lane.b32.xlu0 %v14303_v59, %s10520_s24  ;;  %v14320_v59 = vpack.i.bf16 %v14318_v55, %v14319_v21  ;;  %v14340_v21 = vpack.i.bf16 %v13084_v56, %v13076_v17  ;;  %v9420_v56 = vunpack.i.h.bf16 %v13369_v34 }
0x14d4   : > { %9587 = vrot.lane.b32.xlu1 %v14306_v43, %s10519_s30  ;;  %v14323_v43 = vpack.i.bf16 %v14321_v9, %v14322_v26  ;;  %v9425_v9 = vunpack.i.h.bf16 %v13361_v38  ;;  %v9435_v26 = vunpack.i.h.bf16 %v13367_v44 }
0x14d6   : > { %9582 = vrot.lane.b32.xlu0 %v14309_v33, %s10519_s30  ;;  %v14325_v33 = vld [vmem:[#allocation76_spill] sm:$0xff] }
0x14d8   : > { %9597 = vrot.lane.b32.xlu1 %v9596_v42, %s10518_s17 }
0x14da   : > { %9592 = vrot.lane.b32.xlu0 %v14310_v15, %s10518_s17  ;;  %v14326_v15 = vpack.i.bf16 %v14324_v22, %v14325_v33  ;;  %v9419_v22 = vunpack.i.l.bf16 %v13369_v34  ;;  %v14342_v33 = vld [vmem:[#allocation21_spill] sm:$0xff]  ;;  %v9742_v34 = vld [vmem:[#allocation8 + $0x44] ss:$8 sps:$4 sm:$0xff]  }
0x14e1   : > { %v9194_v54 = vpop.f32.mrf.mxu1 }
0x14e3   : > { %v6437_v14 = vpop.f32.mrf.mxu1 }
0x14e5   : > { %v9195_v31 = vpop.f32.mrf.mxu1 }
0x14e6   : > { %v9601_v35 = vpack.i.bf16 %v9195_v31, %v9194_v54  ;;  %v14327_v54 = vld [vmem:[#allocation93_spill] sm:$0xff] }
0x14e7   : > { %v6440_v53 = vpop.f32.mrf.mxu1 }
0x14e8   : > { %v9606_v13 = vpack.i.bf16 %v6440_v53, %v6437_v14  ;;  %9602 = vrot.lane.b32.xlu1 %v9601_v35, %s10517_s16  ;;  %v14328_v14 = vld [vmem:[#allocation91_spill] sm:$0xff]  ;;  %v14330_v53 = vld [vmem:[#allocation94_spill] sm:$0xff] }
0x14e9   : > { %v14329_v31 = vpack.i.bf16 %v14327_v54, %v14328_v14  ;;  %v9444_v54 = vunpack.i.l.bf16 %v13373_v49  ;;  %v9737_v14 = vld [vmem:[#allocation8 + $0x50] ss:$8 sps:$4 sm:$0xff]  }
0x14ea   : > { %9607 = vrot.lane.b32.xlu0 %v9606_v13, %s10517_s16  ;;  %v14331_v13 = vld [vmem:[#allocation92_spill] sm:$0xff] }
0x1512   : > { %v9202_v11 = vpop.f32.mrf.mxu0 }
0x1514   : > { %v6498_v36 = vpop.f32.mrf.mxu0 }
0x1516   : > { %v9203_v8 = vpop.f32.mrf.mxu0 }
0x1517   : > { %v9616_v6 = vpack.i.bf16 %v9203_v8, %v9202_v11  ;;  %v14332_v11 = vpack.i.bf16 %v14330_v53, %v14331_v13  ;;  %v14334_v8 = vld [vmem:[#allocation102_spill] sm:$0xff] }
0x1518   : > { %v6501_v41 = vpop.f32.mrf.mxu0 }
0x1519   : > { %v9611_v42 = vpack.i.bf16 %v6501_v41, %v6498_v36  ;;  %9617 = vrot.lane.b32.xlu1 %v9616_v6, %s10517_s16  ;;  %v9210_v50 = vpop.f32.mrf.mxu1  ;;  %v14333_v36 = vld [vmem:[#allocation104_spill] sm:$0xff] }
0x151a   : > { %v14335_v6 = vpack.i.bf16 %v14333_v36, %v14334_v8  ;;  %v14343_v36 = vld [vmem:[#allocation23_spill] sm:$0xff] }
0x151b   : > { %9612 = vrot.lane.b32.xlu0 %v9611_v42, %s10517_s16  ;;  %v6559_v35 = vpop.f32.mrf.mxu1  ;;  %v14336_v42 = vld [vmem:[#allocation105_spill] sm:$0xff]  ;;  %v7025_v8 = vsel %vm972_vm0, %v14343_v36, %v9420_v56 }
0x151c   : > { %v14338_v16 = vpack.i.bf16 %v14336_v42, %v14337_v37  ;;  %v9440_v42 = vunpack.i.h.bf16 %v13381_v29  ;;  %v9449_v37 = vunpack.i.l.bf16 %v13385_v1 }
0x151d   : > { %9627 = vrot.lane.b32.xlu1 %v14315_v62, %s10523_s1  ;;  %v9211_v41 = vpop.f32.mrf.mxu1  ;;  %v9736_v62 = vld [vmem:[#allocation8 + $0x64] ss:$8 sps:$4 sm:$0xff]  }
0x151e   : > { %v9686_v55 = vpack.i.bf16 %v9211_v41, %v9210_v50  ;;  %v14341_v50 = vld [vmem:[#allocation25_spill] sm:$0xff] }
0x151f   : > { %9622 = vrot.lane.b32.xlu0 %v9621_v7, %s10523_s1  ;;  %v9731_v7 = vld [vmem:[#allocation8 + $0x70] ss:$8 sps:$4 sm:$0xff]   ;;  %v6562_v28 = vpop.f32.mrf.mxu1  ;;  %v7023_v17 = vsel %vm972_vm0, %v14341_v50, %v9415_v23  ;;  %v9455_v23 = vunpack.i.h.bf16 %v13379_v18 }
0x1520   : > { %7494 = vmatpush1.bf16.msra.mxu1 %v9731_v7 }
0x1521   : > { %9637 = vrot.lane.b32.xlu1 %v14320_v59, %s10522_s18  ;;  %v9734_v59 = vld [vmem:[#allocation8 + $0x60] ss:$8 sps:$4 sm:$0xff]   ;;  %7495 = vmatprep.subr.bf16.mxu1 %v9736_v62 }
0x1522   : > { %v9740_v62 = vld [vmem:[#allocation8 + $0x40] ss:$8 sps:$4 sm:$0xff]  }
0x1523   : > { %9632 = vrot.lane.b32.xlu0 %v9631_v2, %s10522_s18  ;;  %v9414_v2 = vunpack.i.l.bf16 %v13358_v58  ;;  %v9681_v58 = vpack.i.bf16 %v6562_v28, %v6559_v35  ;;  %v7039_v35 = vsel %vm1217_vm1, %v7023_v17, %v9425_v9  ;;  %v9454_v28 = vunpack.i.l.bf16 %v13379_v18 }
0x1524   : > { %7496 = vmatpush1.bf16.msra.mxu1 %v9734_v59  ;;  %v7056_v13 = vsel %vm7054_vm2, %v7039_v35, %v9435_v26  ;;  %v9470_v9 = vunpack.i.h.bf16 %v13393_v47  ;;  %v9464_v18 = vunpack.i.l.bf16 %v13383_v24 }
0x1525   : > { %9647 = vrot.lane.b32.xlu1 %v14323_v43, %s10521_s19  ;;  %v9434_v43 = vunpack.i.l.bf16 %v13367_v44  ;;  %v7022_v38 = vsel %vm972_vm0, %v14342_v33, %v9414_v2  ;;  %v9429_v44 = vunpack.i.l.bf16 %v13375_v19  ;;  %7497 = vmatprep.subr.bf16.mxu1 %v9739_v39  ;;  %v9459_v2 = vunpack.i.l.bf16 %v13389_v40 }
0x1526   : > { %v9465_v39 = vunpack.i.h.bf16 %v13383_v24 }
0x1527   : > { %9642 = vrot.lane.b32.xlu0 %v14326_v15, %s10521_s19  ;;  %v9445_v15 = vunpack.i.h.bf16 %v13373_v49  ;;  %v9430_v49 = vunpack.i.h.bf16 %v13375_v19 }
0x1528   : > { %7498 = vmatpush1.bf16.msra.mxu1 %v9737_v14 }
0x1529   : > { %9657 = vrot.lane.b32.xlu1 %v14329_v31, %s10520_s24  ;;  %v7038_v31 = vsel %vm1217_vm1, %v7022_v38, %v9424_v52  ;;  %v7073_v27 = vsel %vm7071_vm3, %v7056_v13, %v9445_v15  ;;  %7499 = vmatprep.subr.bf16.mxu1 %v9742_v34 }
0x152a   : > { %v7055_v53 = vsel %vm7054_vm2, %v7038_v31, %v9434_v43  ;;  %v7090_v56 = vsel %vm7088_vm4, %v7073_v27, %v9455_v23  ;;  %v9494_v27 = vunpack.i.l.bf16 %v13395_v51  ;;  %v14345_v23 = vld [vmem:[#allocation28_spill] sm:$0xff] }
0x152b   : > { %9652 = vrot.lane.b32.xlu0 %v14332_v11, %s10520_s24  ;;  %v9439_v11 = vunpack.i.l.bf16 %v13381_v29  ;;  %v7072_v7 = vsel %vm7071_vm3, %v7055_v53, %v9444_v54  ;;  %v9460_v29 = vunpack.i.h.bf16 %v13389_v40  ;;  %v7107_v14 = vsel %vm7105_vm5, %v7090_v56, %v9465_v39 }
0x152c   : > { %7500 = vmatpush1.bf16.msra.mxu1 %v9740_v62  ;;  %v7089_v17 = vsel %vm7088_vm4, %v7072_v7, %v9454_v28  ;;  %v9495_v7 = vunpack.i.h.bf16 %v13395_v51  ;;  %v9515_v56 = vunpack.i.h.bf16 %v13403_v48 }
0x152d   : > { %9667 = vrot.lane.b32.xlu1 %v14335_v6, %s10519_s30  ;;  %v14344_v6 = vld [vmem:[#allocation20_spill] sm:$0xff] }
0x152e   : > { %v7024_v41 = vsel %vm972_vm0, %v14344_v6, %v9419_v22  ;;  %v9474_v6 = vunpack.i.l.bf16 %v13387_v45 }
0x152f   : > { %9662 = vrot.lane.b32.xlu0 %v14338_v16, %s10519_s30  ;;  %v13540_v16 = vpop.permute.xlu1 %9557  ;;  %v7040_v19 = vsel %vm1217_vm1, %v7024_v41, %v9429_v44  ;;  %v7106_v44 = vsel %vm7105_vm5, %v7089_v17, %v9464_v18  ;;  %v9485_v41 = vunpack.i.h.bf16 %v13391_v4  ;;  %v14348_v18 = vld [vmem:[#allocation22_spill] sm:$0xff]  ;;  %v9510_v17 = vunpack.i.h.bf16 %v13409_v3  ;;  %s10435_s30 = sshll.u32 %s10524_s29, 4  ;;  %s10436_s30 = int_to_ptr.vmem [resolvable:$false] %s10435_s30 }
0x1530   : > { %v7057_v59 = vsel %vm7054_vm2, %v7040_v19, %v9439_v11  ;;  %v9480_v19 = vunpack.i.h.bf16 %v13397_v12  ;;  %s10437_s24 = scalar_lea.vmem %s10436_s30, 4096  ;;  %p10438_p3 = scmp.lt.s32.totalorder %s13994_s23, %s10436_s30 }
0x1531   : > { %9677 = vrot.lane.b32.xlu1 %v14339_v0, %s10518_s17  ;;  %v9450_v0 = vunpack.i.h.bf16 %v13385_v1  ;;  %v9469_v1 = vunpack.i.l.bf16 %v13393_v47  ;;  %v7074_v26 = vsel %vm7071_vm3, %v7057_v59, %v9449_v37 }
0x1532   : > { %v7091_v47 = vsel %vm7088_vm4, %v7074_v26, %v9459_v2  ;;  %v9504_v2 = vunpack.i.l.bf16 %v13399_v61 }
0x1533   : > { %9672 = vrot.lane.b32.xlu0 %v14340_v21, %s10518_s17  ;;  %v7041_v21 = vsel %vm1217_vm1, %v7025_v8, %v9430_v49  ;;  %v7108_v24 = vsel %vm7105_vm5, %v7091_v47, %v9469_v1  ;;  %v9475_v8 = vunpack.i.h.bf16 %v13387_v45  ;;  %v14346_v45 = vld [vmem:[#allocation24_spill] sm:$0xff]  ;;  %v9489_v1 = vunpack.i.l.bf16 %v13401_v10  ;;  %s10431_s17 = scalar_lea.vmem %s13994_s23, 2048 }
0x1534   : > { %v7058_v52 = vsel %vm7054_vm2, %v7041_v21, %v9440_v42  ;;  %v9484_v42 = vunpack.i.l.bf16 %v13391_v4  ;;  %v9505_v4 = vunpack.i.h.bf16 %v13399_v61  ;;  %v9500_v61 = vunpack.i.h.bf16 %v13405_v30  ;;  %p10432_p11 = scmp.ne.s32.totalorder %s13994_s23, %s10431_s17  ;;  %p10439_p0 = scmp.lt.s32.totalorder %s10437_s24, %s10431_s17 }
0x1535   : > { %9687 = vrot.lane.b32.xlu1 %v9686_v55, %s10517_s16  ;;  %v13550_v55 = vpop.permute.xlu0 %9552  ;;  %v7075_v43 = vsel %vm7071_vm3, %v7058_v52, %v9450_v0  ;;  %v9479_v0 = vunpack.i.l.bf16 %v13397_v12  ;;  %v7027_v28 = vsel %vm972_vm0, %v14345_v23, %v9475_v8  ;;  %v14347_v52 = vld [vmem:[#allocation26_spill] sm:$0xff]  ;;  %v9514_v47 = vunpack.i.l.bf16 %v13403_v48 }
0x1536   : > { %v7092_v22 = vsel %vm7088_vm4, %v7075_v43, %v9460_v29  ;;  %v7026_v29 = vsel %vm972_vm0, %v14346_v45, %v9474_v6  ;;  %v7043_v51 = vsel %vm1217_vm1, %v7027_v28, %v9485_v41  ;;  %v7029_v39 = vsel %vm972_vm0, %v14347_v52, %v9480_v19  ;;  %p10433_p9 = pnand %p10432_p11, %p14356_p7  ;;  %p10440_p1 = por %p10439_p0, %p10438_p3 }
0x1537   : > { %9682 = vrot.lane.b32.xlu0 %v9681_v58, %s10517_s16  ;;  %v7109_v38 = vsel %vm7105_vm5, %v7092_v22, %v9470_v9  ;;  %v7042_v21 = vsel %vm1217_vm1, %v7026_v29, %v9484_v42  ;;  %v7060_v12 = vsel %vm7054_vm2, %v7043_v51, %v9495_v7  ;;  %v9490_v9 = vunpack.i.h.bf16 %v13401_v10  ;;  %s13992_s16 = scalar_lea.hbm %s14051_s13, %s8315_s27 }
0x1538   : > { %v7059_v59 = vsel %vm7054_vm2, %v7042_v21, %v9494_v27  ;;  %v7028_v26 = vsel %vm972_vm0, %v14348_v18, %v9479_v0  ;;  %v9509_v10 = vunpack.i.l.bf16 %v13409_v3  ;;  %v9520_v22 = vunpack.i.h.bf16 %v13411_v57  ;;  %p10434_p12 = pneg %p10433_p9 }
0x1539   : > { %v9525_v48 = vunpack.i.h.bf16 %v13407_v25  ;;  %v9559_v21 = vunpack.i.l.bf16 %v13540_v16  ;;  %v9555_v51 = vunpack.i.h.bf16 %v13550_v55 }
0x153a   : > { %p10441_p6 = pnand %p10440_p1, %p10434_p12 }
0x153e   : > { %v9563_v40 = vpop.permute.xlu1 %9562 }
0x153f   : > { %v9565_v58 = vunpack.i.h.bf16 %v9563_v40  ;;  %v9564_v50 = vunpack.i.l.bf16 %v9563_v40  ;;  %v9499_v40 = vunpack.i.l.bf16 %v13405_v30  ;;  %v7044_v30 = vsel %vm1217_vm1, %v7028_v26, %v9489_v1 }
0x1540   : > { %v9568_v33 = vpop.permute.xlu0 %9567 }
0x1541   : > { %v9570_v15 = vunpack.i.h.bf16 %v9568_v33  ;;  %v9569_v54 = vunpack.i.l.bf16 %v9568_v33  ;;  %v7125_v31 = vsel %vm7122_vm6, %v7108_v24, %v9564_v50  ;;  %v7126_v35 = vsel %vm7122_vm6, %v7109_v38, %v9565_v58 }
0x1542   : > { %v7140_v49 = vpack.c.bf16 %v7126_v35, %v7125_v31  ;;  %v13573_v11 = vpop.permute.xlu1 %9577  ;;  %v7076_v58 = vsel %vm7071_vm3, %v7059_v59, %v9504_v2  ;;  %v7077_v50 = vsel %vm7071_vm3, %v7060_v12, %v9505_v4  ;;  %v9519_v33 = vunpack.i.l.bf16 %v13411_v57 }
0x1543   : > { %v7123_v34 = vsel %vm7122_vm6, %v7106_v44, %v9569_v54  ;;  %v7124_v53 = vsel %vm7122_vm6, %v7107_v14, %v9570_v15  ;;  %v7045_v38 = vsel %vm1217_vm1, %v7029_v39, %v9490_v9  ;;  %v9530_v15 = vunpack.i.h.bf16 %v13413_v5 }
0x1544   : > { %v7139_v13 = vpack.c.bf16 %v7124_v53, %v7123_v34  ;;  %v13575_v36 = vpop.permute.xlu0 %9572  ;;  %v9529_v54 = vunpack.i.l.bf16 %v13413_v5  ;;  %v7061_v3 = vsel %vm7054_vm2, %v7044_v30, %v9499_v40  ;;  %v7062_v44 = vsel %vm7054_vm2, %v7045_v38, %v9500_v61  ;;  %v9745_v61 = vld [vmem:[#allocation8 + $0x34] ss:$8 sps:$4 sm:$0xff]  }
0x1545   : > { %v9524_v14 = vunpack.i.l.bf16 %v13407_v25  ;;  %v7078_v57 = vsel %vm7071_vm3, %v7061_v3, %v9509_v10  ;;  %v7079_v35 = vsel %vm7071_vm3, %v7062_v44, %v9510_v17  ;;  %v9560_v2 = vunpack.i.h.bf16 %v13540_v16  ;;  %7501 = vmatprep.subr.bf16.mxu1 %v9745_v61  ;;  %v9746_v44 = vld [vmem:[#allocation8 + $0x20] ss:$8 sps:$4 sm:$0xff]  }
0x1546   : > { %9228 = vmatprep.mubr.bf16.mxu0 %v7139_v13  ;;  %v13581_v37 = vpop.permute.xlu1 %9587  ;;  %v7093_v13 = vsel %vm7088_vm4, %v7076_v58, %v9514_v47  ;;  %v7095_v5 = vsel %vm7088_vm4, %v7078_v57, %v9519_v33  ;;  %v7096_v8 = vsel %vm7088_vm4, %v7079_v35, %v9520_v22  ;;  %v9554_v59 = vunpack.i.l.bf16 %v13550_v55  ;;  %v9748_v33 = vld [vmem:[#allocation8 + $0x24] ss:$8 sps:$4 sm:$0xff]  }
0x1547   : > { %9229 = vmatmul.mubr.bf16.vlgmr.msra.gmra.mxu0 %v7140_v49  ;;  %v7094_v49 = vsel %vm7088_vm4, %v7077_v50, %v9515_v56  ;;  %v7112_v41 = vsel %vm7105_vm5, %v7095_v5, %v9529_v54  ;;  %v7113_v25 = vsel %vm7105_vm5, %v7096_v8, %v9530_v15  ;;  %v7110_v27 = vsel %vm7105_vm5, %v7093_v13, %v9524_v14  ;;  %v9751_v5 = vld [vmem:[#allocation8 + $0x14] ss:$8 sps:$4 sm:$0xff]   ;;  %v14351_v61 = vld [vmem:[#allocation35_spill] sm:$0xff] }
0x1548   : > { %v13587_v62 = vpop.permute.xlu0 %9582  ;;  %v7111_v19 = vsel %vm7105_vm5, %v7094_v49, %v9525_v48  ;;  %v9580_v12 = vunpack.i.h.bf16 %v13573_v11  ;;  %v9579_v9 = vunpack.i.l.bf16 %v13573_v11  ;;  %v9575_v1 = vunpack.i.h.bf16 %v13575_v36 }
0x1549   : > { %v9574_v52 = vunpack.i.l.bf16 %v13575_v36  ;;  %v7065_v39 = vsel %vm7054_vm2, %v13430_v46, %v9559_v21  ;;  %v7066_v18 = vsel %vm7054_vm2, %v13433_v63, %v9560_v2  ;;  %v9590_v16 = vunpack.i.h.bf16 %v13581_v37  ;;  %v9743_v36 = vld [vmem:[#allocation8 + $0x30] ss:$8 sps:$4 sm:$0xff]  }
0x154a   : > { %v13607_v43 = vpop.permute.xlu1 %9597  ;;  %v9589_v26 = vunpack.i.l.bf16 %v13581_v37  ;;  %v9585_v55 = vunpack.i.h.bf16 %v13587_v62  ;;  %v9584_v40 = vunpack.i.l.bf16 %v13587_v62  ;;  %v7063_v46 = vsel %vm7054_vm2, %v13420_v60, %v9554_v59  ;;  %7502 = vmatpush1.bf16.msra.mxu1 %v9743_v36 }
0x154b   : > { %v9600_v11 = vunpack.i.h.bf16 %v13607_v43  ;;  %v9599_v58 = vunpack.i.l.bf16 %v13607_v43  ;;  %v7064_v63 = vsel %vm7054_vm2, %v13423_v32, %v9555_v51  ;;  %v7082_v50 = vsel %vm7071_vm3, %v7065_v39, %v9579_v9  ;;  %7503 = vmatprep.subr.bf16.mxu1 %v9748_v33  ;;  %v14349_v39 = vld [vmem:[#allocation34_spill] sm:$0xff] }
0x154c   : > { %v13617_v24 = vpop.permute.xlu0 %9592  ;;  %v7083_v37 = vsel %vm7071_vm3, %v7066_v18, %v9580_v12  ;;  %v7081_v17 = vsel %vm7071_vm3, %v7064_v63, %v9575_v1  ;;  %v7080_v62 = vsel %vm7071_vm3, %v7063_v46, %v9574_v52  ;;  %v7099_v60 = vsel %vm7088_vm4, %v7082_v50, %v9589_v26 }
0x154d   : > { %v9595_v10 = vunpack.i.h.bf16 %v13617_v24  ;;  %v9594_v43 = vunpack.i.l.bf16 %v13617_v24  ;;  %v7100_v47 = vsel %vm7088_vm4, %v7083_v37, %v9590_v16  ;;  %v7097_v30 = vsel %vm7088_vm4, %v7080_v62, %v9584_v40  ;;  %v14350_v16 = vld [vmem:[#allocation30_spill] sm:$0xff]  ;;  %v14352_v40 = vld [vmem:[#allocation32_spill] sm:$0xff] }
0x154e   : > { %v7098_v38 = vsel %vm7088_vm4, %v7081_v17, %v9585_v55  ;;  %v7116_v15 = vsel %vm7105_vm5, %v7099_v60, %v9599_v58  ;;  %v7117_v54 = vsel %vm7105_vm5, %v7100_v47, %v9600_v11  ;;  %7504 = vmatpush1.bf16.msra.mxu1 %v9746_v44 }
0x154f   : > { %v7114_v57 = vsel %vm7105_vm5, %v7097_v30, %v9594_v43  ;;  %v7115_v35 = vsel %vm7105_vm5, %v7098_v38, %v9595_v10  ;;  %7505 = vmatprep.subr.bf16.mxu1 %v9751_v5 }
0x155a   : > { %v9603_v31 = vpop.permute.xlu1 %9602 }
0x155b   : > { %v9605_v34 = vunpack.i.h.bf16 %v9603_v31  ;;  %v9604_v53 = vunpack.i.l.bf16 %v9603_v31 }
0x155c   : > { %v9608_v6 = vpop.permute.xlu0 %9607 }
0x155d   : > { %v9610_v42 = vunpack.i.h.bf16 %v9608_v6  ;;  %v9609_v7 = vunpack.i.l.bf16 %v9608_v6  ;;  %v7129_v0 = vsel %vm7122_vm6, %v7112_v41, %v9604_v53  ;;  %v7130_v23 = vsel %vm7122_vm6, %v7113_v25, %v9605_v34  ;;  %v9749_v41 = vld [vmem:[#allocation8 + $0x10] ss:$8 sps:$4 sm:$0xff]  }
0x155e   : > { %v7142_v4 = vpack.c.bf16 %v7130_v23, %v7129_v0  ;;  %7506 = vmatpush1.bf16.msra.mxu1 %v9749_v41 }
0x155f   : > { %v7127_v28 = vsel %vm7122_vm6, %v7110_v27, %v9609_v7  ;;  %v7128_v45 = vsel %vm7122_vm6, %v7111_v19, %v9610_v42  ;;  %v9754_v42 = vld [vmem:[#allocation8 + $0x4] ss:$8 sps:$4 sm:$0xff]   ;;  %v9752_v27 = vld [vmem:[#allocation8] ss:$8 sps:$4 sm:$0xff]  }
0x1560   : > { %v7141_v29 = vpack.c.bf16 %v7128_v45, %v7127_v28  ;;  %7507 = vmatprep.subr.bf16.mxu1 %v9754_v42 }
0x1562   : > { %9232 = vmatprep.mubr.bf16.mxu0 %v7141_v29  ;;  %7508 = vmatpush1.bf16.msra.mxu1 %v9752_v27 }
0x1563   : > { %9233 = vmatmul.mubr.bf16.gmra.mxu0 %v7142_v4 }
0x158b   : > { %v9618_v56 = vpop.permute.xlu1 %9617 }
0x158c   : > { %v9620_v32 = vunpack.i.h.bf16 %v9618_v56  ;;  %v9619_v22 = vunpack.i.l.bf16 %v9618_v56 }
0x158d   : > { %v9613_v3 = vpop.permute.xlu0 %9612 }
0x158e   : > { %v7133_v24 = vsel %vm7122_vm6, %v7116_v15, %v9619_v22  ;;  %v7134_v48 = vsel %vm7122_vm6, %v7117_v54, %v9620_v32  ;;  %v9615_v14 = vunpack.i.h.bf16 %v9613_v3  ;;  %v9614_v31 = vunpack.i.l.bf16 %v9613_v3 }
0x158f   : > { %v7144_v34 = vpack.c.bf16 %v7134_v48, %v7133_v24  ;;  %v9628_v53 = vpop.permute.xlu1 %9627 }
0x1590   : > { %v7131_v13 = vsel %vm7122_vm6, %v7114_v57, %v9614_v31  ;;  %v7132_v49 = vsel %vm7122_vm6, %v7115_v35, %v9615_v14  ;;  %v9630_v28 = vunpack.i.h.bf16 %v9628_v53  ;;  %v9629_v45 = vunpack.i.l.bf16 %v9628_v53 }
0x1591   : > { %v9623_v8 = vpop.permute.xlu0 %9622  ;;  %v7143_v6 = vpack.c.bf16 %v7132_v49, %v7131_v13 }
0x1592   : > { %v9625_v29 = vunpack.i.h.bf16 %v9623_v8  ;;  %v9624_v4 = vunpack.i.l.bf16 %v9623_v8  ;;  %v7037_v18 = vsel %vm972_vm0, %v14349_v39, %v9630_v28  ;;  %v7036_v26 = vsel %vm972_vm0, %v14350_v16, %v9629_v45  ;;  %v10283_v16 = vld [vmem:[%s10751_s7] sm:$0xff] }
0x1593   : > { %v9638_v25 = vpop.permute.xlu1 %9637  ;;  %9236 = vmatprep.mubr.bf16.mxu0 %v7143_v6 }
0x1594   : > { %9237 = vmatmul.mubr.bf16.gmra.mxu0 %v7144_v34  ;;  %v9640_v21 = vunpack.i.h.bf16 %v9638_v25  ;;  %v9639_v51 = vunpack.i.l.bf16 %v9638_v25  ;;  %v7035_v55 = vsel %vm972_vm0, %v14351_v61, %v9625_v29  ;;  %v7034_v11 = vsel %vm972_vm0, %v14352_v40, %v9624_v4  ;;  %v9758_v61 = vld [vmem:[#allocation10 + $0x30] sm:$0xff]   ;;  %v9759_v40 = vld [vmem:[#allocation10 + $0x68] sm:$0xff]  }
0x1595   : > { %v9633_v7 = vpop.permute.xlu0 %9632 }
0x1596   : > { %v9635_v59 = vunpack.i.h.bf16 %v9633_v7  ;;  %v9634_v12 = vunpack.i.l.bf16 %v9633_v7  ;;  %v7052_v36 = vsel %vm1217_vm1, %v7036_v26, %v9639_v51  ;;  %v7053_v46 = vsel %vm1217_vm1, %v7037_v18, %v9640_v21 }
0x1597   : > { %v9648_v19 = vpop.permute.xlu1 %9647 }
0x1598   : > { %v9650_v1 = vunpack.i.h.bf16 %v9648_v19  ;;  %v9649_v52 = vunpack.i.l.bf16 %v9648_v19  ;;  %v7050_v37 = vsel %vm1217_vm1, %v7034_v11, %v9634_v12  ;;  %v7051_v17 = vsel %vm1217_vm1, %v7035_v55, %v9635_v59  ;;  %v13716_v59 = vld [vmem:[%s14042_s4] ss:$0 sm:$0xff] }
0x1599   : > { %v9643_v0 = vpop.permute.xlu0 %9642 }
0x159a   : > { %v9645_v63 = vunpack.i.h.bf16 %v9643_v0  ;;  %v9644_v50 = vunpack.i.l.bf16 %v9643_v0  ;;  %v7069_v56 = vsel %vm7054_vm2, %v7052_v36, %v9649_v52  ;;  %v7070_v60 = vsel %vm7054_vm2, %v7053_v46, %v9650_v1  ;;  %v9756_v1 = vld [vmem:[#allocation10 + $0x38] sm:$0xff]   ;;  %v9757_v52 = vld [vmem:[#allocation10 + $0x70] sm:$0xff]   ;;  %v13725_v36 = vld [vmem:[%s14043_s5] ss:$0 sm:$0xff] }
0x159b   : > { %v9658_v23 = vpop.permute.xlu1 %9657 }
0x159c   : > { %v9660_v62 = vunpack.i.h.bf16 %v9658_v23  ;;  %v9659_v10 = vunpack.i.l.bf16 %v9658_v23  ;;  %v7067_v54 = vsel %vm7054_vm2, %v7050_v37, %v9644_v50  ;;  %v7068_v3 = vsel %vm7054_vm2, %v7051_v17, %v9645_v63  ;;  %v10284_v50 = vld [vmem:[%s10751_s7 + $0x8] sm:$0xff] }
0x159d   : > { %v9653_v2 = vpop.permute.xlu0 %9652  ;;  %v9760_v17 = vld [vmem:[#allocation10 + $0x28] sm:$0xff]  }
0x159e   : > { %v9655_v47 = vunpack.i.h.bf16 %v9653_v2  ;;  %v9654_v32 = vunpack.i.l.bf16 %v9653_v2  ;;  %v7086_v48 = vsel %vm7071_vm3, %v7069_v56, %v9659_v10  ;;  %v7087_v14 = vsel %vm7071_vm3, %v7070_v60, %v9660_v62  ;;  %v9761_v62 = vld [vmem:[#allocation10 + $0x60] sm:$0xff]   ;;  %v10285_v10 = vld [vmem:[%s10751_s7 + $0x18] sm:$0xff] }
0x159f   : > { %v9668_v9 = vpop.permute.xlu1 %9667  ;;  %v13735_v60 = vld [vmem:[%s14044_s6] ss:$0 sm:$0xff] }
0x15a0   : > { %v9670_v22 = vunpack.i.h.bf16 %v9668_v9  ;;  %v9669_v33 = vunpack.i.l.bf16 %v9668_v9  ;;  %v7084_v34 = vsel %vm7071_vm3, %v7067_v54, %v9654_v32  ;;  %v7085_v53 = vsel %vm7071_vm3, %v7068_v3, %v9655_v47  ;;  %v9755_v9 = vld [vmem:[#allocation10 + $0x78] sm:$0xff]   ;;  %v10286_v47 = vld [vmem:[%s10751_s7 + $0x10] sm:$0xff] }
0x15a1   : > { %v9663_v58 = vpop.permute.xlu0 %9662  ;;  %8604 = vmatprep.subr.bf16.mxu0 %v9755_v9 }
0x15a2   : > { %v9665_v30 = vunpack.i.h.bf16 %v9663_v58  ;;  %v9664_v38 = vunpack.i.l.bf16 %v9663_v58  ;;  %v7103_v5 = vsel %vm7088_vm4, %v7086_v48, %v9669_v33  ;;  %v7104_v8 = vsel %vm7088_vm4, %v7087_v14, %v9670_v22  ;;  %8605 = vmatpush3.bf16.msra.mxu0 %v9756_v1 }
0x15a3   : > { %v9678_v43 = vpop.permute.xlu1 %9677  ;;  %8606 = vmatprep.subr.bf16.mxu0 %v9757_v52 }
0x15a4   : > { %v9680_v44 = vunpack.i.h.bf16 %v9678_v43  ;;  %v9679_v24 = vunpack.i.l.bf16 %v9678_v43  ;;  %v7101_v6 = vsel %vm7088_vm4, %v7084_v34, %v9664_v38  ;;  %v7102_v41 = vsel %vm7088_vm4, %v7085_v53, %v9665_v30  ;;  %v9762_v30 = vld [vmem:[#allocation10 + $0x20] sm:$0xff]   ;;  %v9763_v38 = vld [vmem:[#allocation10 + $0x58] sm:$0xff]  }
0x15a5   : > { %v9673_v15 = vpop.permute.xlu0 %9672  ;;  %v10287_v53 = vld [vmem:[%s10751_s7 + $0x20] sm:$0xff] }
0x15a6   : > { %v9675_v31 = vunpack.i.h.bf16 %v9673_v15  ;;  %v9674_v57 = vunpack.i.l.bf16 %v9673_v15  ;;  %v7120_v42 = vsel %vm7105_vm5, %v7103_v5, %v9679_v24  ;;  %v7121_v7 = vsel %vm7105_vm5, %v7104_v8, %v9680_v44  ;;  %8607 = vmatpush3.bf16.msra.mxu0 %v9758_v61  ;;  %v9764_v44 = vld [vmem:[#allocation10 + $0x18] sm:$0xff]   ;;  %v9765_v61 = vld [vmem:[#allocation10 + $0x50] sm:$0xff]  }
0x15a7   : > { %v9688_v35 = vpop.permute.xlu1 %9687  ;;  %8608 = vmatprep.subr.bf16.mxu0 %v9759_v40 }
0x15a8   : > { %v9690_v13 = vunpack.i.h.bf16 %v9688_v35  ;;  %v9689_v49 = vunpack.i.l.bf16 %v9688_v35  ;;  %v7118_v0 = vsel %vm7105_vm5, %v7101_v6, %v9674_v57  ;;  %v7119_v23 = vsel %vm7105_vm5, %v7102_v41, %v9675_v31 }
0x15a9   : > { %v9683_v25 = vpop.permute.xlu0 %9682 }
0x15aa   : > { %v9685_v27 = vunpack.i.h.bf16 %v9683_v25  ;;  %v9684_v19 = vunpack.i.l.bf16 %v9683_v25  ;;  %v7137_v28 = vsel %vm7122_vm6, %v7120_v42, %v9689_v49  ;;  %v7138_v45 = vsel %vm7122_vm6, %v7121_v7, %v9690_v13  ;;  %8609 = vmatpush3.bf16.msra.mxu0 %v9760_v17  ;;  %v10288_v25 = vld [vmem:[%s10751_s7 + $0x28] sm:$0xff]  ;;  %v10289_v7 = vld [vmem:[%s10751_s7 + $0x38] sm:$0xff] }
0x15ab   : > { %v7146_v21 = vpack.c.bf16 %v7138_v45, %v7137_v28  ;;  %8610 = vmatprep.subr.bf16.mxu0 %v9761_v62  ;;  %v10293_v17 = vld [vmem:[%s10751_s7 + $0x58] sm:$0xff] }
0x15ac   : > { %v7135_v29 = vsel %vm7122_vm6, %v7118_v0, %v9684_v19  ;;  %v7136_v4 = vsel %vm7122_vm6, %v7119_v23, %v9685_v27  ;;  %v10290_v0 = vld [vmem:[%s10751_s7 + $0x30] sm:$0xff] }
0x15ad   : > { %v7145_v2 = vpack.c.bf16 %v7136_v4, %v7135_v29 }
0x15ae   : > { %8611 = vmatpush3.bf16.msra.mxu0 %v9762_v30 }
0x15af   : > { %9240 = vmatprep.mubr.bf16.mxu0 %v7145_v2  ;;  %8612 = vmatprep.subr.bf16.mxu0 %v9763_v38  ;;  %v9769_v38 = vld [vmem:[#allocation10 + $0x40] sm:$0xff]  }
0x15b0   : > { %9241 = vmatmul.mubr.bf16.gmra.mxu0 %v7146_v21 }
0x15b2   : > { %8613 = vmatpush3.bf16.msra.mxu0 %v9764_v44 }
0x15b3   : > { %8614 = vmatprep.subr.bf16.mxu0 %v9765_v61  ;;  %v14353_v61 = vld [vmem:[#allocation19_spill] sm:$0xff] }
0x1607   : > { %v9230_v51 = vpop.f32.mrf.mxu0 }
0x1608   : > { %v7261_v46 = vadd.f32 %v9230_v51, %v13716_v59 }
0x1609   : > { %v7252_v12 = vpop.f32.mrf.mxu0 }
0x160a   : > { %v7253_v39 = vadd.f32 %v13716_v59, %v7252_v12  ;;  %v7317_v32 = vadd.f32 %v10286_v47, %v7261_v46 }
0x160b   : > { %v9231_v18 = vpop.f32.mrf.mxu0 }
0x160c   : > { %v7315_v26 = vadd.f32 %v10283_v16, %v7253_v39  ;;  %v7264_v11 = vadd.f32 %v9231_v18, %v13716_v59  ;;  %v7340_v3 = vmul.f32 %v13725_v36, %v7317_v32  ;;  %v10291_v18 = vld [vmem:[%s10751_s7 + $0x40] sm:$0xff] }
0x160d   : > { %v7255_v55 = vpop.f32.mrf.mxu0 }
0x160e   : > { %v7256_v58 = vadd.f32 %v13716_v59, %v7255_v55  ;;  %v7338_v63 = vmul.f32 %v13725_v36, %v7315_v26  ;;  %v7318_v43 = vadd.f32 %v10285_v10, %v7264_v11  ;;  %v13753_v48 = vadd.f32 %v13735_v60, %v7340_v3  ;;  %v9766_v11 = vld [vmem:[#allocation10 + $0x10] sm:$0xff]   ;;  %v9770_v3 = vld [vmem:[#allocation10] sm:$0xff]  }
0x160f   : > { %8615 = vmatpush3.bf16.msra.mxu0 %v9766_v11 }
0x1610   : > { %v7316_v37 = vadd.f32 %v10284_v50, %v7256_v58  ;;  %v13739_v22 = vadd.f32 %v13735_v60, %v7338_v63  ;;  %v7341_v15 = vmul.f32 %v13725_v36, %v7318_v43  ;;  %v10292_v63 = vld [vmem:[%s10751_s7 + $0x48] sm:$0xff] }
0x1611   : > { %v9768_v43 = vld [vmem:[#allocation10 + $0x8] sm:$0xff]  }
0x1612   : > { %v7339_v56 = vmul.f32 %v13725_v36, %v7316_v37  ;;  %v13750_v24 = vadd.f32 %v13735_v60, %v7341_v15  ;;  %v9767_v37 = vld [vmem:[#allocation10 + $0x48] sm:$0xff]  }
0x1613   : > { %8616 = vmatprep.subr.bf16.mxu0 %v9767_v37 }
0x1614   : > { %v13742_v33 = vadd.f32 %v13735_v60, %v7339_v56  ;;  %v7378_v14 = vpack.c.bf16 %v13750_v24, %v13753_v48  ;;  %v10294_v56 = vld [vmem:[%s10751_s7 + $0x50] sm:$0xff]  ;;  %8617 = vmatpush3.bf16.msra.mxu0 %v9768_v43 }
0x1615   : > { %8618 = vmatprep.subr.bf16.mxu0 %v9769_v38 }
0x1616   : > { %v7377_v54 = vpack.c.bf16 %v13742_v33, %v13739_v22 }
0x1618   : > { %7526 = vmatmul.mubr.bf16.vlgmr.msra.gmra.mxu1 %v7377_v54  ;;  %8619 = vmatpush3.bf16.msra.mxu0 %v9770_v3 }
0x1619   : > { %7535 = vmatprep.mubr.bf16.mxu1 %v14293_v20 }
0x1620   : > { %7536 = vmatmul.mubr.bf16.gmra.mxu1 %v7378_v14 }
0x1621   : > { %7545 = vmatprep.mubr.bf16.mxu1 %v14293_v20 }
0x1623   : > { %v9234_v31 = vpop.f32.mrf.mxu0 }
0x1624   : > { %v7277_v6 = vadd.f32 %v9234_v31, %v13716_v59 }
0x1625   : > { %v7268_v57 = vpop.f32.mrf.mxu0 }
0x1626   : > { %v7269_v35 = vadd.f32 %v13716_v59, %v7268_v57  ;;  %v7321_v23 = vadd.f32 %v10290_v0, %v7277_v6 }
0x1627   : > { %v9235_v34 = vpop.f32.mrf.mxu0 }
0x1628   : > { %v7319_v13 = vadd.f32 %v10287_v53, %v7269_v35  ;;  %v7280_v5 = vadd.f32 %v9235_v34, %v13716_v59  ;;  %v7344_v2 = vmul.f32 %v13725_v36, %v7321_v23 }
0x1629   : > { %v7271_v49 = vpop.f32.mrf.mxu0 }
0x162a   : > { %v7272_v8 = vadd.f32 %v13716_v59, %v7271_v49  ;;  %v7342_v41 = vmul.f32 %v13725_v36, %v7319_v13  ;;  %v7322_v27 = vadd.f32 %v10289_v7, %v7280_v5  ;;  %v13783_v51 = vadd.f32 %v13735_v60, %v7344_v2  ;;  %v10295_v49 = vld [vmem:[%s10751_s7 + $0x60] sm:$0xff]  ;;  %v10296_v7 = vld [vmem:[%s10751_s7 + $0x68] sm:$0xff] }
0x162c   : > { %v7320_v42 = vadd.f32 %v10288_v25, %v7272_v8  ;;  %v13769_v28 = vadd.f32 %v13735_v60, %v7342_v41  ;;  %v7345_v29 = vmul.f32 %v13725_v36, %v7322_v27 }
0x162e   : > { %v7343_v19 = vmul.f32 %v13725_v36, %v7320_v42  ;;  %v13780_v21 = vadd.f32 %v13735_v60, %v7345_v29  ;;  %v10298_v29 = vld [vmem:[%s10751_s7 + $0x70] sm:$0xff] }
0x1630   : > { %v13772_v45 = vadd.f32 %v13735_v60, %v7343_v19  ;;  %v7380_v12 = vpack.c.bf16 %v13780_v21, %v13783_v51  ;;  %v10297_v19 = vld [vmem:[%s10751_s7 + $0x78] sm:$0xff]  ;;  %s7965_s7 = scalar_lea.sflag [#allocation4], %s10745_s21 }
0x1632   : > { %v7379_v4 = vpack.c.bf16 %v13772_v45, %v13769_v28 }
0x1634   : > { %7546 = vmatmul.mubr.bf16.gmra.mxu1 %v7379_v4 }
0x1635   : > { %7555 = vmatprep.mubr.bf16.mxu1 %v14293_v20 }
0x163c   : > { %7556 = vmatmul.mubr.bf16.gmra.mxu1 %v7380_v12 }
0x163d   : > { %7565 = vmatprep.mubr.bf16.mxu1 %v14293_v20 }
0x1654   : > { %v9238_v9 = vpop.f32.mrf.mxu0 }
0x1655   : > { %v7293_v58 = vadd.f32 %v9238_v9, %v13716_v59 }
0x1656   : > { %v7284_v1 = vpop.f32.mrf.mxu0 }
0x1657   : > { %v7285_v52 = vadd.f32 %v13716_v59, %v7284_v1  ;;  %v7325_v47 = vadd.f32 %v10294_v56, %v7293_v58 }
0x1658   : > { %v9239_v39 = vpop.f32.mrf.mxu0 }
0x1659   : > { %v7323_v16 = vadd.f32 %v10291_v18, %v7285_v52  ;;  %v7296_v55 = vadd.f32 %v9239_v39, %v13716_v59  ;;  %v7348_v44 = vmul.f32 %v13725_v36, %v7325_v47 }
0x165a   : > { %v7287_v26 = vpop.f32.mrf.mxu0 }
0x165b   : > { %v7288_v40 = vadd.f32 %v13716_v59, %v7287_v26  ;;  %v7346_v46 = vmul.f32 %v13725_v36, %v7323_v16  ;;  %v7326_v62 = vadd.f32 %v10293_v17, %v7296_v55  ;;  %v13813_v31 = vadd.f32 %v13735_v60, %v7348_v44  ;;  %v7401_v16 = vld [vmem:[%s14046_s8] sm:$0x3] }
0x165d   : > { %v7324_v50 = vadd.f32 %v10292_v63, %v7288_v40  ;;  %v13799_v32 = vadd.f32 %v13735_v60, %v7346_v46  ;;  %v7349_v15 = vmul.f32 %v13725_v36, %v7326_v62 }
0x165f   : > { %v7347_v10 = vmul.f32 %v13725_v36, %v7324_v50  ;;  %v13810_v14 = vadd.f32 %v13735_v60, %v7349_v15 }
0x1661   : > { %v13802_v30 = vadd.f32 %v13735_v60, %v7347_v10  ;;  %v7382_v57 = vpack.c.bf16 %v13810_v14, %v13813_v31 }
0x1663   : > { %v7381_v54 = vpack.c.bf16 %v13802_v30, %v13799_v32 }
0x1665   : > { %7566 = vmatmul.mubr.bf16.gmra.mxu1 %v7381_v54 }
0x1666   : > { %7575 = vmatprep.mubr.bf16.mxu1 %v14293_v20 }
0x166d   : > { %7576 = vmatmul.mubr.bf16.gmra.mxu1 %v7382_v57 }
0x166e   : > { %7585 = vmatprep.mubr.bf16.mxu1 %v14293_v20 }
0x1670   : > { %v9242_v35 = vpop.f32.mrf.mxu0 }
0x1671   : > { %v7309_v25 = vadd.f32 %v9242_v35, %v13716_v59 }
0x1672   : > { %v7300_v34 = vpop.f32.mrf.mxu0 }
0x1673   : > { %v7301_v53 = vadd.f32 %v13716_v59, %v7300_v34  ;;  %v7329_v4 = vadd.f32 %v10298_v29, %v7309_v25 }
0x1674   : > { %v9243_v13 = vpop.f32.mrf.mxu0 }
0x1675   : > { %v7327_v5 = vadd.f32 %v10295_v49, %v7301_v53  ;;  %v7312_v6 = vadd.f32 %v9243_v13, %v13716_v59  ;;  %v7352_v1 = vmul.f32 %v13725_v36, %v7329_v4 }
0x1676   : > { %v7303_v8 = vpop.f32.mrf.mxu0 }
0x1677   : > { %v7304_v41 = vadd.f32 %v13716_v59, %v7303_v8  ;;  %v7350_v42 = vmul.f32 %v13725_v36, %v7327_v5  ;;  %v7330_v0 = vadd.f32 %v10297_v19, %v7312_v6  ;;  %v13843_v39 = vadd.f32 %v13735_v60, %v7352_v1 }
0x1679   : > { %v7328_v27 = vadd.f32 %v10296_v7, %v7304_v41  ;;  %v13829_v2 = vadd.f32 %v13735_v60, %v7350_v42  ;;  %v7353_v9 = vmul.f32 %v13725_v36, %v7330_v0 }
0x167b   : > { %v7351_v23 = vmul.f32 %v13725_v36, %v7328_v27  ;;  %v13840_v52 = vadd.f32 %v13735_v60, %v7353_v9  ;;  %v14354_v36 = vsub.s32 1, %v14353_v61 }
0x167d   : > { %v13832_v12 = vadd.f32 %v13735_v60, %v7351_v23  ;;  %v7384_v18 = vpack.c.bf16 %v13840_v52, %v13843_v39  ;;  %v13852_v55 = vrot.slane %v7401_v16, %v14354_v36 }
0x167f   : > { %v7383_v59 = vpack.c.bf16 %v13832_v12, %v13829_v2 }
0x1681   : > { %7586 = vmatmul.mubr.bf16.gmra.mxu1 %v7383_v59 }
0x1682   : > { %7595 = vmatprep.mubr.bf16.mxu1 %v14293_v20  ;;  %v14355_v20 = vsub.s32 0, %v14353_v61 }
0x1684   : > { %v13856_v40 = vrot.slane %v7401_v16, %v14355_v20 }
0x1689   : > { %7596 = vmatmul.mubr.bf16.gmra.mxu1 %v7384_v18 }
0x16d8   : > { %v7527_v26 = vpop.f32.mrf.mxu1 }
0x16d9   : > { %v7528_v63 = vadd.f32 %v7527_v26, %v13856_v40 }
0x16da   : > { %v7529_v11 = vpop.f32.mrf.mxu1 }
0x16db   : > { %v7530_v58 = vadd.f32 %v7529_v11, %v13852_v55  ;;  %v7606_v56 = vmax.f32 %v7528_v63, 0.0 }
0x16dc   : > { %v7531_v60 = vpop.f32.mrf.mxu1 }
0x16dd   : > { %v7532_v46 = vadd.f32 %v7531_v60, %v13856_v40  ;;  %v7607_v10 = vmax.f32 %v7530_v58, 0.0 }
0x16de   : > { %v7533_v50 = vpop.f32.mrf.mxu1 }
0x16df   : > { %v7534_v37 = vadd.f32 %v7533_v50, %v13852_v55  ;;  %v7608_v17 = vmax.f32 %v7532_v46, 0.0 }
0x16e0   : > { %v7537_v62 = vpop.f32.mrf.mxu1 }
0x16e1   : > { %v7609_v43 = vmax.f32 %v7534_v37, 0.0  ;;  %v7638_v15 = vpack.c.bf16 %v7608_v17, %v7606_v56  ;;  %v7538_v57 = vadd.f32 %v7537_v62, %v13856_v40 }
0x16e2   : > { %v7539_v47 = vpop.f32.mrf.mxu1 }
0x16e3   : > { %v7639_v38 = vpack.c.bf16 %v7609_v43, %v7607_v10  ;;  %v7540_v3 = vadd.f32 %v7539_v47, %v13852_v55  ;;  %v7610_v5 = vmax.f32 %v7538_v57, 0.0 }
0x16e4   : > { %v7541_v54 = vpop.f32.mrf.mxu1 }
0x16e5   : > { %v7542_v44 = vadd.f32 %v7541_v54, %v13856_v40  ;;  %7821 = vmatprep.mubr.bf16.mxu0 %v7639_v38  ;;  %v7611_v13 = vmax.f32 %v7540_v3, 0.0 }
0x16e6   : > { %v7543_v35 = vpop.f32.mrf.mxu1  ;;  %7822 = vmatmul.mubr.bf16.vlgmr.msra.gmra.mxu0 %v7638_v15 }
0x16e7   : > { %v7544_v34 = vadd.f32 %v7543_v35, %v13852_v55  ;;  %v7612_v53 = vmax.f32 %v7542_v44, 0.0 }
0x16e9   : > { %v7613_v49 = vmax.f32 %v7544_v34, 0.0  ;;  %v7640_v6 = vpack.c.bf16 %v7612_v53, %v7610_v5 }
0x16eb   : > { %v7641_v8 = vpack.c.bf16 %v7613_v49, %v7611_v13 }
0x16ed   : > { %7829 = vmatprep.mubr.bf16.mxu0 %v7641_v8 }
0x16ee   : > { %7830 = vmatmul.mubr.bf16.gmra.mxu0 %v7640_v6 }
0x16f4   : > { %v7547_v41 = vpop.f32.mrf.mxu1 }
0x16f5   : > { %v7548_v19 = vadd.f32 %v7547_v41, %v13856_v40 }
0x16f6   : > { %v7549_v25 = vpop.f32.mrf.mxu1 }
0x16f7   : > { %v7550_v7 = vadd.f32 %v7549_v25, %v13852_v55  ;;  %v7614_v1 = vmax.f32 %v7548_v19, 0.0 }
0x16f8   : > { %v7551_v42 = vpop.f32.mrf.mxu1 }
0x16f9   : > { %v7552_v27 = vadd.f32 %v7551_v42, %v13856_v40  ;;  %v7615_v9 = vmax.f32 %v7550_v7, 0.0 }
0x16fa   : > { %v7553_v0 = vpop.f32.mrf.mxu1 }
0x16fb   : > { %v7554_v23 = vadd.f32 %v7553_v0, %v13852_v55  ;;  %v7616_v29 = vmax.f32 %v7552_v27, 0.0 }
0x16fc   : > { %v7557_v4 = vpop.f32.mrf.mxu1 }
0x16fd   : > { %v7617_v59 = vmax.f32 %v7554_v23, 0.0  ;;  %v7642_v26 = vpack.c.bf16 %v7616_v29, %v7614_v1  ;;  %v7558_v11 = vadd.f32 %v7557_v4, %v13856_v40 }
0x16fe   : > { %v7559_v18 = vpop.f32.mrf.mxu1 }
0x16ff   : > { %v7643_v16 = vpack.c.bf16 %v7617_v59, %v7615_v9  ;;  %v7560_v36 = vadd.f32 %v7559_v18, %v13852_v55  ;;  %v7618_v37 = vmax.f32 %v7558_v11, 0.0 }
0x1700   : > { %v7561_v61 = vpop.f32.mrf.mxu1 }
0x1701   : > { %v7562_v20 = vadd.f32 %v7561_v61, %v13856_v40  ;;  %7837 = vmatprep.mubr.bf16.mxu0 %v7643_v16  ;;  %v7619_v63 = vmax.f32 %v7560_v36, 0.0 }
0x1702   : > { %v7563_v60 = vpop.f32.mrf.mxu1  ;;  %7838 = vmatmul.mubr.bf16.gmra.mxu0 %v7642_v26 }
0x1703   : > { %v7564_v58 = vadd.f32 %v7563_v60, %v13852_v55  ;;  %v7620_v46 = vmax.f32 %v7562_v20, 0.0 }
0x1705   : > { %v7621_v50 = vmax.f32 %v7564_v58, 0.0  ;;  %v7644_v62 = vpack.c.bf16 %v7620_v46, %v7618_v37 }
0x1707   : > { %v7645_v17 = vpack.c.bf16 %v7621_v50, %v7619_v63 }
0x1709   : > { %7845 = vmatprep.mubr.bf16.mxu0 %v7645_v17 }
0x170a   : > { %7846 = vmatmul.mubr.bf16.gmra.mxu0 %v7644_v62 }
0x1725   : > { %v7567_v10 = vpop.f32.mrf.mxu1 }
0x1726   : > { %v7568_v15 = vadd.f32 %v7567_v10, %v13856_v40 }
0x1727   : > { %v7569_v43 = vpop.f32.mrf.mxu1 }
0x1728   : > { %v7570_v47 = vadd.f32 %v7569_v43, %v13852_v55  ;;  %v7622_v53 = vmax.f32 %v7568_v15, 0.0 }
0x1729   : > { %v7571_v56 = vpop.f32.mrf.mxu1 }
0x172a   : > { %v7572_v38 = vadd.f32 %v7571_v56, %v13856_v40  ;;  %v7623_v35 = vmax.f32 %v7570_v47, 0.0 }
0x172b   : > { %v7573_v54 = vpop.f32.mrf.mxu1 }
0x172c   : > { %v7574_v3 = vadd.f32 %v7573_v54, %v13852_v55  ;;  %v7624_v44 = vmax.f32 %v7572_v38, 0.0 }
0x172d   : > { %v7577_v57 = vpop.f32.mrf.mxu1 }
0x172e   : > { %v7625_v34 = vmax.f32 %v7574_v3, 0.0  ;;  %v7646_v5 = vpack.c.bf16 %v7624_v44, %v7622_v53  ;;  %v7578_v25 = vadd.f32 %v7577_v57, %v13856_v40 }
0x172f   : > { %v7579_v13 = vpop.f32.mrf.mxu1 }
0x1730   : > { %v7647_v49 = vpack.c.bf16 %v7625_v34, %v7623_v35  ;;  %v7580_v6 = vadd.f32 %v7579_v13, %v13852_v55  ;;  %v7626_v23 = vmax.f32 %v7578_v25, 0.0  ;;  %v13893_v34 = vld [vmem:[%s14048_s10] ss:$0 sm:$0xff] }
0x1731   : > { %v7581_v8 = vpop.f32.mrf.mxu1 }
0x1732   : > { %v7582_v41 = vadd.f32 %v7581_v8, %v13856_v40  ;;  %7853 = vmatprep.mubr.bf16.mxu0 %v7647_v49  ;;  %v7627_v19 = vmax.f32 %v7580_v6, 0.0  ;;  %v13899_v49 = vld [vmem:[%s14049_s11] ss:$0 sm:$0xff] }
0x1733   : > { %v7583_v42 = vpop.f32.mrf.mxu1  ;;  %7854 = vmatmul.mubr.bf16.gmra.mxu0 %v7646_v5 }
0x1734   : > { %v7584_v7 = vadd.f32 %v7583_v42, %v13852_v55  ;;  %v7628_v27 = vmax.f32 %v7582_v41, 0.0  ;;  %v13905_v41 = vld [vmem:[%s14050_s12] ss:$0 sm:$0xff] }
0x1736   : > { %v7629_v0 = vmax.f32 %v7584_v7, 0.0  ;;  %v7648_v4 = vpack.c.bf16 %v7628_v27, %v7626_v23 }
0x1738   : > { %v7649_v29 = vpack.c.bf16 %v7629_v0, %v7627_v19 }
0x173a   : > { %7861 = vmatprep.mubr.bf16.mxu0 %v7649_v29 }
0x173b   : > { %7862 = vmatmul.mubr.bf16.gmra.mxu0 %v7648_v4 }
0x1741   : > { %v7587_v9 = vpop.f32.mrf.mxu1 }
0x1742   : > { %v7588_v26 = vadd.f32 %v7587_v9, %v13856_v40 }
0x1743   : > { %v7589_v59 = vpop.f32.mrf.mxu1 }
0x1744   : > { %v7590_v18 = vadd.f32 %v7589_v59, %v13852_v55  ;;  %v7630_v46 = vmax.f32 %v7588_v26, 0.0 }
0x1745   : > { %v7591_v1 = vpop.f32.mrf.mxu1 }
0x1746   : > { %v7592_v16 = vadd.f32 %v7591_v1, %v13856_v40  ;;  %v7631_v60 = vmax.f32 %v7590_v18, 0.0 }
0x1747   : > { %v7593_v61 = vpop.f32.mrf.mxu1 }
0x1748   : > { %v7594_v36 = vadd.f32 %v7593_v61, %v13852_v55  ;;  %v7632_v20 = vmax.f32 %v7592_v16, 0.0 }
0x1749   : > { %v7597_v11 = vpop.f32.mrf.mxu1 }
0x174a   : > { %v7633_v58 = vmax.f32 %v7594_v36, 0.0  ;;  %v7650_v37 = vpack.c.bf16 %v7632_v20, %v7630_v46  ;;  %v7598_v43 = vadd.f32 %v7597_v11, %v13856_v40 }
0x174b   : > { %v7599_v63 = vpop.f32.mrf.mxu1 }
0x174c   : > { %v7651_v50 = vpack.c.bf16 %v7633_v58, %v7631_v60  ;;  %v7600_v62 = vadd.f32 %v7599_v63, %v13852_v55  ;;  %v7634_v3 = vmax.f32 %v7598_v43, 0.0 }
0x174d   : > { %v7601_v17 = vpop.f32.mrf.mxu1 }
0x174e   : > { %v7602_v10 = vadd.f32 %v7601_v17, %v13856_v40  ;;  %7869 = vmatprep.mubr.bf16.mxu0 %v7651_v50  ;;  %v7635_v15 = vmax.f32 %v7600_v62, 0.0 }
0x174f   : > { %v7603_v56 = vpop.f32.mrf.mxu1  ;;  %7870 = vmatmul.mubr.bf16.gmra.mxu0 %v7650_v37 }
0x1750   : > { %v7604_v47 = vadd.f32 %v7603_v56, %v13852_v55  ;;  %v7636_v38 = vmax.f32 %v7602_v10, 0.0 }
0x1752   : > { %v7637_v54 = vmax.f32 %v7604_v47, 0.0  ;;  %v7652_v57 = vpack.c.bf16 %v7636_v38, %v7634_v3 }
0x1754   : > { %v7653_v44 = vpack.c.bf16 %v7637_v54, %v7635_v15 }
0x1756   : > { %7877 = vmatprep.mubr.bf16.mxu0 %v7653_v44 }
0x1757   : > { %7878 = vmatmul.mubr.bf16.gmra.mxu0 %v7652_v57 }
0x17a6   : > { %v8620_v35 = vpop.f32.mrf.mxu0 }
0x17a8   : > { %v8621_v53 = vpop.f32.mrf.mxu0 }
0x17a9   : > { %v8622_v40 = vadd.f32 %v8621_v53, %v8620_v35 }
0x17aa   : > { %v8623_v13 = vpop.f32.mrf.mxu0 }
0x17ab   : > { %v7824_v55 = vadd.f32 %v8622_v40, %v13893_v34 }
0x17ac   : > { %v8624_v5 = vpop.f32.mrf.mxu0 }
0x17ad   : > { %v7886_v8 = vadd.f32 %v7824_v55, %v13739_v22  ;;  %v8625_v6 = vadd.f32 %v8624_v5, %v8623_v13 }
0x17ae   : > { %v8626_v25 = vpop.f32.mrf.mxu0 }
0x17af   : > { %v7909_v42 = vmul.f32 %v13899_v49, %v7886_v8  ;;  %v7827_v7 = vadd.f32 %v8625_v6, %v13893_v34 }
0x17b0   : > { %v8627_v27 = vpop.f32.mrf.mxu0 }
0x17b1   : > { %v7932_v19 = vadd.f32 %v13905_v41, %v7909_v42  ;;  %v7887_v0 = vadd.f32 %v7827_v7, %v13742_v33  ;;  %v8628_v23 = vadd.f32 %v8627_v27, %v8626_v25 }
0x17b2   : > { %v8629_v29 = vpop.f32.mrf.mxu0 }
0x17b3   : > { %7948 = vst [vmem:[%s13913_s20] sm:$0xff] %v7932_v19  ;;  %v7910_v22 = vmul.f32 %v13899_v49, %v7887_v0  ;;  %v7832_v4 = vadd.f32 %v8628_v23, %v13893_v34 }
0x17b4   : > { %v8630_v9 = vpop.f32.mrf.mxu0 }
0x17b5   : > { %v7933_v59 = vadd.f32 %v13905_v41, %v7910_v22  ;;  %v7888_v1 = vadd.f32 %v7832_v4, %v13753_v48  ;;  %v8631_v33 = vadd.f32 %v8630_v9, %v8629_v29 }
0x17b7   : > { %7949 = vst [vmem:[%s13913_s20 + $0x8] sm:$0xff] %v7933_v59  ;;  %v7911_v18 = vmul.f32 %v13899_v49, %v7888_v1  ;;  %v7835_v16 = vadd.f32 %v8631_v33, %v13893_v34 }
0x17b9   : > { %v7934_v26 = vadd.f32 %v13905_v41, %v7911_v18  ;;  %v7889_v61 = vadd.f32 %v7835_v16, %v13750_v24 }
0x17bb   : > { %7950 = vst [vmem:[%s13913_s20 + $0x10] sm:$0xff] %v7934_v26  ;;  %v7912_v36 = vmul.f32 %v13899_v49, %v7889_v61 }
0x17bd   : > { %v7935_v20 = vadd.f32 %v13905_v41, %v7912_v36 }
0x17bf   : > { %7951 = vst [vmem:[%s13913_s20 + $0x18] sm:$0xff] %v7935_v20 }
0x17c2   : > { %v8632_v11 = vpop.f32.mrf.mxu0 }
0x17c4   : > { %v8633_v60 = vpop.f32.mrf.mxu0 }
0x17c5   : > { %v8634_v48 = vadd.f32 %v8633_v60, %v8632_v11 }
0x17c6   : > { %v8635_v58 = vpop.f32.mrf.mxu0 }
0x17c7   : > { %v7840_v46 = vadd.f32 %v8634_v48, %v13893_v34 }
0x17c8   : > { %v8636_v63 = vpop.f32.mrf.mxu0 }
0x17c9   : > { %v7890_v50 = vadd.f32 %v7840_v46, %v13769_v28  ;;  %v8637_v37 = vadd.f32 %v8636_v63, %v8635_v58 }
0x17ca   : > { %v8638_v17 = vpop.f32.mrf.mxu0 }
0x17cb   : > { %v7913_v24 = vmul.f32 %v13899_v49, %v7890_v50  ;;  %v7843_v62 = vadd.f32 %v8637_v37, %v13893_v34 }
0x17cc   : > { %v8639_v10 = vpop.f32.mrf.mxu0 }
0x17cd   : > { %v7936_v43 = vadd.f32 %v13905_v41, %v7913_v24  ;;  %v7891_v56 = vadd.f32 %v7843_v62, %v13772_v45  ;;  %v8640_v47 = vadd.f32 %v8639_v10, %v8638_v17 }
0x17ce   : > { %v8641_v38 = vpop.f32.mrf.mxu0 }
0x17cf   : > { %7952 = vst [vmem:[%s13913_s20 + $0x20] sm:$0xff] %v7936_v43  ;;  %v7914_v15 = vmul.f32 %v13899_v49, %v7891_v56  ;;  %v7848_v28 = vadd.f32 %v8640_v47, %v13893_v34 }
0x17d0   : > { %v8642_v54 = vpop.f32.mrf.mxu0 }
0x17d1   : > { %v7937_v3 = vadd.f32 %v13905_v41, %v7914_v15  ;;  %v7892_v44 = vadd.f32 %v7848_v28, %v13783_v51  ;;  %v8643_v57 = vadd.f32 %v8642_v54, %v8641_v38 }
0x17d3   : > { %7953 = vst [vmem:[%s13913_s20 + $0x28] sm:$0xff] %v7937_v3  ;;  %v7915_v35 = vmul.f32 %v13899_v49, %v7892_v44  ;;  %v7851_v53 = vadd.f32 %v8643_v57, %v13893_v34 }
0x17d5   : > { %v7938_v45 = vadd.f32 %v13905_v41, %v7915_v35  ;;  %v7893_v40 = vadd.f32 %v7851_v53, %v13780_v21 }
0x17d7   : > { %7954 = vst [vmem:[%s13913_s20 + $0x30] sm:$0xff] %v7938_v45  ;;  %v7916_v13 = vmul.f32 %v13899_v49, %v7893_v40 }
0x17d9   : > { %v7939_v55 = vadd.f32 %v13905_v41, %v7916_v13 }
0x17db   : > { %7955 = vst [vmem:[%s13913_s20 + $0x38] sm:$0xff] %v7939_v55 }
0x17f3   : > { %v8644_v5 = vpop.f32.mrf.mxu0 }
0x17f5   : > { %v8645_v8 = vpop.f32.mrf.mxu0 }
0x17f6   : > { %v8646_v51 = vadd.f32 %v8645_v8, %v8644_v5 }
0x17f7   : > { %v8647_v6 = vpop.f32.mrf.mxu0 }
0x17f8   : > { %v7856_v25 = vadd.f32 %v8646_v51, %v13893_v34 }
0x17f9   : > { %v8648_v42 = vpop.f32.mrf.mxu0 }
0x17fa   : > { %v7894_v7 = vadd.f32 %v7856_v25, %v13799_v32  ;;  %v8649_v27 = vadd.f32 %v8648_v42, %v8647_v6 }
0x17fb   : > { %v8650_v19 = vpop.f32.mrf.mxu0 }
0x17fc   : > { %v7917_v21 = vmul.f32 %v13899_v49, %v7894_v7  ;;  %v7859_v0 = vadd.f32 %v8649_v27, %v13893_v34 }
0x17fd   : > { %v8651_v23 = vpop.f32.mrf.mxu0 }
0x17fe   : > { %v7940_v29 = vadd.f32 %v13905_v41, %v7917_v21  ;;  %v7895_v22 = vadd.f32 %v7859_v0, %v13802_v30  ;;  %v8652_v4 = vadd.f32 %v8651_v23, %v8650_v19 }
0x17ff   : > { %v8653_v9 = vpop.f32.mrf.mxu0 }
0x1800   : > { %7956 = vst [vmem:[%s13913_s20 + $0x40] sm:$0xff] %v7940_v29  ;;  %v7918_v59 = vmul.f32 %v13899_v49, %v7895_v22  ;;  %v7864_v32 = vadd.f32 %v8652_v4, %v13893_v34 }
0x1801   : > { %v8654_v1 = vpop.f32.mrf.mxu0 }
0x1802   : > { %v7941_v33 = vadd.f32 %v13905_v41, %v7918_v59  ;;  %v7896_v18 = vadd.f32 %v7864_v32, %v13813_v31  ;;  %v8655_v16 = vadd.f32 %v8654_v1, %v8653_v9 }
0x1804   : > { %7957 = vst [vmem:[%s13913_s20 + $0x48] sm:$0xff] %v7941_v33  ;;  %v7919_v26 = vmul.f32 %v13899_v49, %v7896_v18  ;;  %v7867_v61 = vadd.f32 %v8655_v16, %v13893_v34 }
0x1806   : > { %v7942_v30 = vadd.f32 %v13905_v41, %v7919_v26  ;;  %v7897_v36 = vadd.f32 %v7867_v61, %v13810_v14 }
0x1808   : > { %7958 = vst [vmem:[%s13913_s20 + $0x50] sm:$0xff] %v7942_v30  ;;  %v7920_v20 = vmul.f32 %v13899_v49, %v7897_v36 }
0x180a   : > { %v7943_v11 = vadd.f32 %v13905_v41, %v7920_v20 }
0x180c   : > { %7959 = vst [vmem:[%s13913_s20 + $0x58] sm:$0xff] %v7943_v11 }
0x180f   : > { %v8656_v60 = vpop.f32.mrf.mxu0 }
0x1811   : > { %v8657_v48 = vpop.f32.mrf.mxu0 }
0x1812   : > { %v8658_v31 = vadd.f32 %v8657_v48, %v8656_v60 }
0x1813   : > { %v8659_v58 = vpop.f32.mrf.mxu0 }
0x1814   : > { %v7872_v46 = vadd.f32 %v8658_v31, %v13893_v34 }
0x1815   : > { %v8660_v63 = vpop.f32.mrf.mxu0 }
0x1816   : > { %v7898_v50 = vadd.f32 %v7872_v46, %v13829_v2  ;;  %v8661_v37 = vadd.f32 %v8660_v63, %v8659_v58 }
0x1817   : > { %v8662_v17 = vpop.f32.mrf.mxu0 }
0x1818   : > { %v7921_v14 = vmul.f32 %v13899_v49, %v7898_v50  ;;  %v7875_v24 = vadd.f32 %v8661_v37, %v13893_v34 }
0x1819   : > { %v8663_v62 = vpop.f32.mrf.mxu0 }
0x181a   : > { %v7944_v10 = vadd.f32 %v13905_v41, %v7921_v14  ;;  %v7899_v43 = vadd.f32 %v7875_v24, %v13832_v12  ;;  %v8664_v56 = vadd.f32 %v8663_v62, %v8662_v17 }
0x181b   : > { %v8665_v47 = vpop.f32.mrf.mxu0 }
0x181c   : > { %7960 = vst [vmem:[%s13913_s20 + $0x60] sm:$0xff] %v7944_v10  ;;  %v7922_v2 = vmul.f32 %v13899_v49, %v7899_v43  ;;  %v7880_v38 = vadd.f32 %v8664_v56, %v13893_v34 }
0x181d   : > { %v8666_v15 = vpop.f32.mrf.mxu0 }
0x181e   : > { %v7945_v28 = vadd.f32 %v13905_v41, %v7922_v2  ;;  %v7900_v54 = vadd.f32 %v7880_v38, %v13843_v39  ;;  %v8667_v3 = vadd.f32 %v8666_v15, %v8665_v47 }
0x1820   : > { %7961 = vst [vmem:[%s13913_s20 + $0x68] sm:$0xff] %v7945_v28  ;;  %v7923_v12 = vmul.f32 %v13899_v49, %v7900_v54  ;;  %v7883_v44 = vadd.f32 %v8667_v3, %v13893_v34 }
0x1822   : > { %v7946_v57 = vadd.f32 %v13905_v41, %v7923_v12  ;;  %v7901_v35 = vadd.f32 %v7883_v44, %v13840_v52 }
0x1824   : > { %7962 = vst [vmem:[%s13913_s20 + $0x70] sm:$0xff] %v7946_v57  ;;  %v7924_v53 = vmul.f32 %v13899_v49, %v7901_v35 }
0x1826   : > { %v7947_v39 = vadd.f32 %v13905_v41, %v7924_v53 }
0x1828   : > { %7963 = vst [vmem:[%s13913_s20 + $0x78] sm:$0xff] %v7947_v39 }
0x1829   : > { %10444 = shalt.err (!%p10441_p6)
}
0x182a   : > { %s10445_s19 = scalar_lea.hbm %s13992_s16, 2048  ;;  %s10449_s9 = scalar_lea.hbm %s14051_s13, 8192 }
0x182b   : > { %p10446_p2 = scmp.ne.s32.totalorder %s13992_s16, %s10445_s19  ;;  %p10450_p13 = scmp.lt.s32.totalorder %s13992_s16, %s14051_s13 }
0x182c   : > { %p10451_p10 = scmp.lt.s32.totalorder %s10449_s9, %s10445_s19 }
0x182d   : > { %p10447_p4 = pnand %p10446_p2, %p14356_p7 }
0x182e   : > { %p10452_p5 = por %p10451_p10, %p10450_p13 }
0x182f   : > { %p10448_p8 = pneg %p10447_p4 }
0x1831   : > { %p10453_p11 = pnand %p10452_p5, %p10448_p8 }
0x1833   : > { %10456 = shalt.err (!%p10453_p11)
}
0x1834   : > { %s10525_s3 = smov 128   ;;  %s10526_s14 = smov 8  }
0x1835   : > { %9326 = dma.vmem_to_hbm [thread:$0]  (%p14356_p7), %s13994_s23, 2048, %s13992_s16, %s7965_s7, %s10525_s3, %s10525_s3, %s10526_s14  }
0x1836 PF: > { %s14357_s17 = sld [smem:[#allocation17_spill]]  ;;  %p9358_p9 = scmp.ge.s32.totalorder %s10503_s28, 2 }
0x1837   : > { %s7994_s29 = sand.u32 1, %s10491_s25  }
0x1838   : > { %s7995_s30 = scalar_lea.sflag [#allocation4], %s7994_s29 }
0x183c   : > { %p14358_p12 = scmp.ne.s32.totalorder %s14357_s17, 0 }
0x183e   : > { %p9346_p3 = pnand %p9358_p9, %p14358_p12 }
0x1840   : > { %p9347_p0 = pneg %p9346_p3 }
0x1842   : > { %10486 = dma.done.wait (%p9347_p0), %s7995_s30, 2048  }
0x1843   : > { %10488 = vsyncadd (%p9347_p0), %s7995_s30, 4294965248  ;;  %s14359_s24 = sld [smem:[#allocation16_spill]]  ;;  %p28_p1 = scmp.ge.s32.totalorder %s10687_s22, 6  }
0x1844   : > { %s14360_s27 = sld [smem:[#allocation18_spill]]  ;;  %s14361_s25 = smov %s10495_s26 }
0x1845   : > { %s14363_s28 = smov %s10687_s22  ;;  %30 = sbr.rel (!%p28_p1) target bundleno = 12 (0xc), region = 133 }
0x1849   : > { %s14362_s26 = smov %s14359_s24 }
0x184a   :  { %8000 = vsyncpa [#allocation3], 1 }
0x184b   :  { %8002 = vsyncpa [#allocation3 + $0x1], 1 }
0x184c   :  { %8003 = vsyncpa [#allocation6], 1 }
0x184d   :  { %8004 = vsyncpa [#allocation9], 1 }
0x184e   :  { %8005 = vsyncpa [#allocation4], 1 }
0x184f   :  { %8007 = vsyncpa [#allocation4 + $0x1], 1 }

</bundles_post_ra>
